<compile_context>
chip_gen: v7x
topology: tpu7x:2x2x1
jax: 0.10.0
libtpu: 0.0.40
codegen_flags: <defaults>
</compile_context>

<pallas_src>
import functools

import jax
import jax.numpy as jnp
import numpy as np
from jax import lax
from jax.experimental import pallas as pl
from jax.experimental.pallas import tpu as pltpu

LN_EPS = 1e-5


def _block_kernel(x_ref, g1_ref, bt1_ref, wqkv_ref, wp_ref, bp_ref,
                  g2_ref, bt2_ref, w1_ref, b1_ref, w2_ref, b2_ref,
                  o_ref, att_ref, *, num_heads, head_size, seq_len):
    """One grid step processes R = batch_block * T flattened rows.

    x_ref    : (R, C)      f32   rows of the flattened (B*T, C) input
    g1/bt1   : (1, C)      f32   LayerNorm1 gamma / beta
    wqkv_ref : (C, 3*H*D)  bf16  fused QKV weight, heads packed lane-dense,
                                 1/sqrt(D) pre-folded into the Q columns
    wp_ref   : (H*D, C)    bf16  output projection weight (pre-transposed)
    bp_ref   : (1, C)      f32   output projection bias
    g2/bt2   : (1, C)      f32   LayerNorm2 gamma / beta
    w1_ref   : (C, 4C) bf16, b1_ref : (1, 4C) f32   FFN first linear
    w2_ref   : (4C, C) bf16, b2_ref : (1, C)  f32   FFN second linear
    o_ref    : (R, C)            output rows
    att_ref  : (R, H*D)    f32   VMEM scratch: concatenated head outputs
    """
    H, D, T = num_heads, head_size, seq_len
    HD = H * D
    R = x_ref.shape[0]
    n_batch = R // T

    x = x_ref[...].astype(jnp.float32)                    # (R, C)

    def layer_norm(v, gamma_ref, beta_ref):               # f32 VPU/EUP math
        mu = jnp.mean(v, axis=-1, keepdims=True)
        d = v - mu
        var = jnp.mean(d * d, axis=-1, keepdims=True)
        inv = lax.rsqrt(var + LN_EPS)                     # EUP
        return d * inv * gamma_ref[...] + beta_ref[...]   # (1, C) broadcasts

    # ---- LayerNorm 1 + fused lane-dense QKV projection (bf16 MXU, f32 acc) ----
    h = layer_norm(x, g1_ref, bt1_ref)                    # (R, C) f32
    qkv = jnp.dot(h.astype(jnp.bfloat16), wqkv_ref[...],
                  preferred_element_type=jnp.float32)     # (R, 3*H*D) f32

    # Causal mask: computed once per kernel invocation (hoisted out of loops).
    row = lax.broadcasted_iota(jnp.int32, (T, T), 0)
    col = lax.broadcasted_iota(jnp.int32, (T, T), 1)
    causal = row >= col
    neg_big = jnp.float32(-1e30)                          # finite: no exp(-inf) NaN

    # ---- causal multi-head self-attention -------------------------------------
    for bb in range(n_batch):                             # static (1 or B)
        r0 = bb * T
        for hh in range(H):                               # static unrolled
            c0 = hh * D
            q = qkv[r0:r0 + T, c0:c0 + D].astype(jnp.bfloat16)                   # (T, D)
            k = qkv[r0:r0 + T, HD + c0:HD + c0 + D].astype(jnp.bfloat16)         # (T, D)
            v = qkv[r0:r0 + T, 2 * HD + c0:2 * HD + c0 + D].astype(jnp.bfloat16)

            # Contract on D of both operands: no explicit k.T / XLU transpose.
            s = lax.dot_general(q, k, (((1,), (1,)), ((), ())),
                                preferred_element_type=jnp.float32)              # (T, T)
            s = jnp.where(causal, s, neg_big)             # f32 mask / softmax math
            m = jnp.max(s, axis=-1, keepdims=True)
            e = jnp.exp(s - m)                            # f32 unnormalized probs
            denom = jnp.sum(e, axis=-1, keepdims=True)    # (T, 1)

            # P @ V on unnormalized exps; normalize the (T, D) result instead of
            # the (T, T) matrix (deferred softmax normalization).
            pv = jnp.dot(e.astype(jnp.bfloat16), v,
                         preferred_element_type=jnp.float32)                     # (T, D)
            # (attention-weight dropout: identity in eval mode)
            att_ref[r0:r0 + T, c0:c0 + D] = pv * pl.reciprocal(denom, approx=False)

    # ---- output projection + residual (single lane-dense matmul, no concat) ----
    y = jnp.dot(att_ref[...].astype(jnp.bfloat16), wp_ref[...],
                preferred_element_type=jnp.float32) + bp_ref[...]
    # (projection dropout: identity in eval mode)
    x1 = x + y

    # ---- LayerNorm 2 + FeedForward ---------------------------------------------
    h2 = layer_norm(x1, g2_ref, bt2_ref)
    f = jnp.dot(h2.astype(jnp.bfloat16), w1_ref[...],
                preferred_element_type=jnp.float32) + b1_ref[...]
    f = jnp.maximum(f, 0.0)                               # ReLU (f32)
    f = jnp.dot(f.astype(jnp.bfloat16), w2_ref[...],
                preferred_element_type=jnp.float32) + b2_ref[...]
    # (FFN dropout: identity in eval mode)
    o_ref[...] = (x1 + f).astype(o_ref.dtype)


def transformer_block(x, g1, bt1, w_qkv, wp, bp, g2, bt2, w1, b1, w2, b2,
                      *, num_heads, batch_block=None):
    """x: (B, T, C); w_qkv: (C, 3*H*D) (Q-scale folded); wp: (H*D, C);
    w1: (C, 4C); w2: (4C, C)."""
    B, T, C = x.shape
    HD = w_qkv.shape[1] // 3
    D = HD // num_heads
    F = w1.shape[1]

    if batch_block is None:
        # v7x has 2 TensorCores per chip: keep one batch element per grid step so
        # the "parallel" grid axis splits batches across TCs.  v5e/v6e are
        # single-TC: flatten the whole batch into one step (M = B*T matmuls, no
        # per-step grid-loop overhead).
        try:
            kind = jax.devices()[0].device_kind.lower()
        except Exception:
            kind = ""
        batch_block = 1 if ("v7" in kind or "7x" in kind) else B
    batch_block = max(1, min(batch_block, B))
    if B % batch_block:
        batch_block = 1
    num_steps = B // batch_block
    R = batch_block * T

    # Weights live in HBM as bf16 (half the DMA bytes, native MXU input rate).
    wqkv_bf = w_qkv.astype(jnp.bfloat16)
    wp_bf = wp.astype(jnp.bfloat16)
    w1_bf = w1.astype(jnp.bfloat16)
    w2_bf = w2.astype(jnp.bfloat16)

    # 1-D params -> (1, N) so every operand is >= 2-D on TPU; kept in f32.
    g1_2, bt1_2 = g1.reshape(1, C), bt1.reshape(1, C)
    g2_2, bt2_2 = g2.reshape(1, C), bt2.reshape(1, C)
    bp_2, b1_2, b2_2 = bp.reshape(1, C), b1.reshape(1, F), b2.reshape(1, C)

    x2 = x.reshape(B * T, C)                              # free XLA reshape

    kernel = functools.partial(_block_kernel, num_heads=num_heads,
                               head_size=D, seq_len=T)

    out2 = pl.pallas_call(
        kernel,
        out_shape=jax.ShapeDtypeStruct((B * T, C), x.dtype),
        grid_spec=pltpu.PrefetchScalarGridSpec(
            num_scalar_prefetch=0,
            grid=(num_steps,),
            in_specs=[
                pl.BlockSpec((R, C), lambda i: (i, 0)),          # x rows
                pl.BlockSpec((1, C), lambda i: (0, 0)),          # ln1 gamma
                pl.BlockSpec((1, C), lambda i: (0, 0)),          # ln1 beta
                pl.BlockSpec((C, 3 * HD), lambda i: (0, 0)),     # W_qkv (bf16, fused)
                pl.BlockSpec((HD, C), lambda i: (0, 0)),         # W_proj (bf16)
                pl.BlockSpec((1, C), lambda i: (0, 0)),          # b_proj
                pl.BlockSpec((1, C), lambda i: (0, 0)),          # ln2 gamma
                pl.BlockSpec((1, C), lambda i: (0, 0)),          # ln2 beta
                pl.BlockSpec((C, F), lambda i: (0, 0)),          # W_ff1 (bf16)
                pl.BlockSpec((1, F), lambda i: (0, 0)),          # b_ff1
                pl.BlockSpec((F, C), lambda i: (0, 0)),          # W_ff2 (bf16)
                pl.BlockSpec((1, C), lambda i: (0, 0)),          # b_ff2
            ],
            out_specs=pl.BlockSpec((R, C), lambda i: (i, 0)),
            scratch_shapes=[pltpu.VMEM((R, HD), jnp.float32)],   # head outputs
        ),
        compiler_params=pltpu.CompilerParams(
            dimension_semantics=("parallel",)),                  # B across TCs on v7x
    )(x2, g1_2, bt1_2, wqkv_bf, wp_bf, bp_2, g2_2, bt2_2,
      w1_bf, b1_2, w2_bf, b2_2)

    return out2.reshape(B, T, C)


def _reference(x, wq, wk, wv, wp, bp, g1, bt1, g2, bt2, w1, b1, w2, b2):
    """Pure-JAX f32 reference mirroring the PyTorch Block.forward (eval mode)."""
    def ln(v, g, bb):
        mu = v.mean(-1, keepdims=True)
        var = ((v - mu) ** 2).mean(-1, keepdims=True)
        return (v - mu) / jnp.sqrt(var + LN_EPS) * g + bb

    B, T, C = x.shape
    H, _, D = wq.shape

    h = ln(x, g1, bt1)
    mask = jnp.tril(jnp.ones((T, T), dtype=bool))
    outs = []
    for hh in range(H):
        q = h @ wq[hh]
        k = h @ wk[hh]
        v = h @ wv[hh]
        s = (q @ jnp.swapaxes(k, -1, -2)) / (D ** 0.5)
        s = jnp.where(mask, s, -jnp.inf)
        p = jax.nn.softmax(s, axis=-1)
        outs.append(p @ v)
    cat = jnp.concatenate(outs, axis=-1)
    x1 = x + cat @ wp + bp

    h2 = ln(x1, g2, bt2)
    f = jax.nn.relu(h2 @ w1 + b1)
    return x1 + f @ w2 + b2


if __name__ == "__main__":
    key = jax.random.PRNGKey(0)
    keys = jax.random.split(key, 14)

    # Small but lane-/sublane-friendly shapes consistent with the module
    # (real defaults are C=384, T=256, H=6).
    B, T, C, H = 2, 128, 128, 4
    D = C // H            # 32
    F = 4 * C             # 512

    x = jax.random.normal(keys[0], (B, T, C), dtype=jnp.float32)

    # Per-head nn.Linear(C, D, bias=False) weights, stored transposed (C, D).
    wq = jax.random.normal(keys[1], (H, C, D), dtype=jnp.float32) * (1.0 / C ** 0.5)
    wk = jax.random.normal(keys[2], (H, C, D), dtype=jnp.float32) * (1.0 / C ** 0.5)
    wv = jax.random.normal(keys[3], (H, C, D), dtype=jnp.float32) * (1.0 / C ** 0.5)
    # nn.Linear(H*D, C): weight stored transposed (H*D, C), bias (C,).
    wp = jax.random.normal(keys[4], (H * D, C), dtype=jnp.float32) * (1.0 / (H * D) ** 0.5)
    bp = jax.random.normal(keys[5], (C,), dtype=jnp.float32) * 0.01
    # LayerNorm affine params.
    g1 = 1.0 + 0.1 * jax.random.normal(keys[6], (C,), dtype=jnp.float32)
    bt1 = 0.1 * jax.random.normal(keys[7], (C,), dtype=jnp.float32)
    g2 = 1.0 + 0.1 * jax.random.normal(keys[8], (C,), dtype=jnp.float32)
    bt2 = 0.1 * jax.random.normal(keys[9], (C,), dtype=jnp.float32)
    # FeedForward: Linear(C, 4C) and Linear(4C, C), stored transposed.
    w1 = jax.random.normal(keys[10], (C, F), dtype=jnp.float32) * (1.0 / C ** 0.5)
    b1 = jax.random.normal(keys[11], (F,), dtype=jnp.float32) * 0.01
    w2 = jax.random.normal(keys[12], (F, C), dtype=jnp.float32) * (1.0 / F ** 0.5)
    b2 = jax.random.normal(keys[13], (C,), dtype=jnp.float32) * 0.01

    # ---- one-time parameter prep: fused, lane-dense QKV weight with the
    # ---- 1/sqrt(D) attention scale folded into the Q columns (before bf16 cast).
    scale = 1.0 / (D ** 0.5)
    wq_packed = jnp.transpose(wq, (1, 0, 2)).reshape(C, H * D) * scale
    wk_packed = jnp.transpose(wk, (1, 0, 2)).reshape(C, H * D)
    wv_packed = jnp.transpose(wv, (1, 0, 2)).reshape(C, H * D)
    w_qkv = jnp.concatenate([wq_packed, wk_packed, wv_packed], axis=-1)  # (C, 3*H*D)

    out = transformer_block(x, g1, bt1, w_qkv, wp, bp, g2, bt2, w1, b1, w2, b2,
                            num_heads=H)
    out = jax.block_until_ready(out)

    ref = _reference(x, wq, wk, wv, wp, bp, g1, bt1, g2, bt2, w1, b1, w2, b2)
    # Tolerance reflects bf16 MXU inputs (f32 accumulation) vs. the full-f32
    # reference; softmax/LayerNorm/residual math is kept in f32 in-kernel.
    np.testing.assert_allclose(np.asarray(out), np.asarray(ref), rtol=2e-2, atol=5e-2)

    print("KERNEL_OK")
</pallas_src>

<mosaic_0001>
module attributes {stable_mosaic.version = 11 : i64} {
  func.func @_block_kernel(%arg0: i32, %arg1: memref<256x128xf32, #tpu.memory_space<vmem>>, %arg2: memref<1x128xf32, #tpu.memory_space<vmem>>, %arg3: memref<1x128xf32, #tpu.memory_space<vmem>>, %arg4: memref<128x384xbf16, #tpu.memory_space<vmem>>, %arg5: memref<128x128xbf16, #tpu.memory_space<vmem>>, %arg6: memref<1x128xf32, #tpu.memory_space<vmem>>, %arg7: memref<1x128xf32, #tpu.memory_space<vmem>>, %arg8: memref<1x128xf32, #tpu.memory_space<vmem>>, %arg9: memref<128x512xbf16, #tpu.memory_space<vmem>>, %arg10: memref<1x512xf32, #tpu.memory_space<vmem>>, %arg11: memref<512x128xbf16, #tpu.memory_space<vmem>>, %arg12: memref<1x128xf32, #tpu.memory_space<vmem>>, %arg13: memref<256x128xf32, #tpu.memory_space<vmem>>, %arg14: memref<256x128xf32, #tpu.memory_space<vmem>>) attributes {dimension_semantics = [#tpu.dimension_semantics<parallel>], iteration_bounds = array<i64: 1>, scalar_prefetch = 0 : i64, scratch_operands = 1 : i64, tpu.core_type = #tpu.core_type<tc>, window_params = [{transform_indices = @transform_0, window_bounds = array<i64: 256, 128>}, {pipeline_mode = #tpu.pipeline_mode<synchronous>, transform_indices = @transform_1, window_bounds = array<i64: 1, 128>}, {pipeline_mode = #tpu.pipeline_mode<synchronous>, transform_indices = @transform_2, window_bounds = array<i64: 1, 128>}, {pipeline_mode = #tpu.pipeline_mode<synchronous>, transform_indices = @transform_3, window_bounds = array<i64: 128, 384>}, {pipeline_mode = #tpu.pipeline_mode<synchronous>, transform_indices = @transform_4, window_bounds = array<i64: 128, 128>}, {pipeline_mode = #tpu.pipeline_mode<synchronous>, transform_indices = @transform_5, window_bounds = array<i64: 1, 128>}, {pipeline_mode = #tpu.pipeline_mode<synchronous>, transform_indices = @transform_6, window_bounds = array<i64: 1, 128>}, {pipeline_mode = #tpu.pipeline_mode<synchronous>, transform_indices = @transform_7, window_bounds = array<i64: 1, 128>}, {pipeline_mode = #tpu.pipeline_mode<synchronous>, transform_indices = @transform_8, window_bounds = array<i64: 128, 512>}, {pipeline_mode = #tpu.pipeline_mode<synchronous>, transform_indices = @transform_9, window_bounds = array<i64: 1, 512>}, {pipeline_mode = #tpu.pipeline_mode<synchronous>, transform_indices = @transform_10, window_bounds = array<i64: 512, 128>}, {pipeline_mode = #tpu.pipeline_mode<synchronous>, transform_indices = @transform_11, window_bounds = array<i64: 1, 128>}, {transform_indices = @transform_12, window_bounds = array<i64: 256, 128>}]} {
    %c0 = arith.constant 0 : index
    %c0_0 = arith.constant 0 : index
    %0 = vector.load %arg1[%c0, %c0_0] : memref<256x128xf32, #tpu.memory_space<vmem>>, vector<256x128xf32>
    %cst = arith.constant dense<0.000000e+00> : vector<256xf32>
    %1 = vector.multi_reduction <add>, %0, %cst [1] : vector<256x128xf32> to vector<256xf32>
    %2 = vector.shape_cast %1 : vector<256xf32> to vector<256x1xf32>
    %cst_1 = arith.constant 1.280000e+02 : f32
    %3 = vector.broadcast %cst_1 : f32 to vector<256x1xf32>
    %4 = arith.divf %2, %3 : vector<256x1xf32>
    %5 = vector.broadcast %4 : vector<256x1xf32> to vector<256x128xf32>
    %6 = arith.subf %0, %5 : vector<256x128xf32>
    %7 = arith.mulf %6, %6 : vector<256x128xf32>
    %cst_2 = arith.constant dense<0.000000e+00> : vector<256xf32>
    %8 = vector.multi_reduction <add>, %7, %cst_2 [1] : vector<256x128xf32> to vector<256xf32>
    %9 = vector.shape_cast %8 : vector<256xf32> to vector<256x1xf32>
    %cst_3 = arith.constant 1.280000e+02 : f32
    %10 = vector.broadcast %cst_3 : f32 to vector<256x1xf32>
    %11 = arith.divf %9, %10 : vector<256x1xf32>
    %cst_4 = arith.constant 9.99999974E-6 : f32
    %12 = vector.broadcast %cst_4 : f32 to vector<256x1xf32>
    %13 = arith.addf %11, %12 : vector<256x1xf32>
    %14 = math.rsqrt %13 : vector<256x1xf32>
    %15 = vector.broadcast %14 : vector<256x1xf32> to vector<256x128xf32>
    %16 = arith.mulf %6, %15 : vector<256x128xf32>
    %c0_5 = arith.constant 0 : index
    %c0_6 = arith.constant 0 : index
    %17 = vector.load %arg2[%c0_5, %c0_6] : memref<1x128xf32, #tpu.memory_space<vmem>>, vector<1x128xf32>
    %18 = vector.broadcast %17 : vector<1x128xf32> to vector<256x128xf32>
    %19 = arith.mulf %16, %18 : vector<256x128xf32>
    %c0_7 = arith.constant 0 : index
    %c0_8 = arith.constant 0 : index
    %20 = vector.load %arg3[%c0_7, %c0_8] : memref<1x128xf32, #tpu.memory_space<vmem>>, vector<1x128xf32>
    %21 = vector.broadcast %20 : vector<1x128xf32> to vector<256x128xf32>
    %22 = arith.addf %19, %21 : vector<256x128xf32>
    %23 = arith.truncf %22 : vector<256x128xf32> to vector<256x128xbf16>
    %c0_9 = arith.constant 0 : index
    %c0_10 = arith.constant 0 : index
    %24 = vector.load %arg4[%c0_9, %c0_10] : memref<128x384xbf16, #tpu.memory_space<vmem>>, vector<128x384xbf16>
    %cst_11 = arith.constant dense<0.000000e+00> : vector<256x384xf32>
    %25 = tpu.matmul %23, %24, %cst_11 {dimension_numbers = #tpu.dot_dimension_numbers<[1], [0], [0], [1], [0, 0, 1, 1], [], []>} : vector<256x128xbf16>, vector<128x384xbf16>, vector<256x384xf32> -> vector<256x384xf32>
    %26 = tpu.iota {dimensions = array<i32: 0>} : vector<128x128xi32>
    %27 = tpu.iota {dimensions = array<i32: 1>} : vector<128x128xi32>
    %28 = arith.cmpi sge, %26, %27 : vector<128x128xi32>
    %29 = vector.extract_strided_slice %25 {offsets = [0, 0], sizes = [128, 32], strides = [1, 1]} : vector<256x384xf32> to vector<128x32xf32>
    %30 = arith.truncf %29 : vector<128x32xf32> to vector<128x32xbf16>
    %31 = vector.extract_strided_slice %25 {offsets = [0, 128], sizes = [128, 32], strides = [1, 1]} : vector<256x384xf32> to vector<128x32xf32>
    %32 = arith.truncf %31 : vector<128x32xf32> to vector<128x32xbf16>
    %33 = vector.extract_strided_slice %25 {offsets = [0, 256], sizes = [128, 32], strides = [1, 1]} : vector<256x384xf32> to vector<128x32xf32>
    %34 = arith.truncf %33 : vector<128x32xf32> to vector<128x32xbf16>
    %cst_12 = arith.constant dense<0.000000e+00> : vector<128x128xf32>
    %35 = tpu.matmul %30, %32, %cst_12 {dimension_numbers = #tpu.dot_dimension_numbers<[1], [1], [0], [0], [0, 0, 1, 0], [], []>} : vector<128x32xbf16>, vector<128x32xbf16>, vector<128x128xf32> -> vector<128x128xf32>
    %cst_13 = arith.constant -1.000000e+30 : f32
    %36 = vector.broadcast %cst_13 : f32 to vector<128x128xf32>
    %37 = arith.select %28, %35, %36 : vector<128x128xi1>, vector<128x128xf32>
    %cst_14 = arith.constant dense<0xFF800000> : vector<128xf32>
    %38 = vector.multi_reduction <maximumf>, %37, %cst_14 [1] : vector<128x128xf32> to vector<128xf32>
    %39 = vector.shape_cast %38 : vector<128xf32> to vector<128x1xf32>
    %40 = vector.broadcast %39 : vector<128x1xf32> to vector<128x128xf32>
    %41 = arith.subf %37, %40 : vector<128x128xf32>
    %42 = math.exp %41 : vector<128x128xf32>
    %cst_15 = arith.constant dense<0.000000e+00> : vector<128xf32>
    %43 = vector.multi_reduction <add>, %42, %cst_15 [1] : vector<128x128xf32> to vector<128xf32>
    %44 = vector.shape_cast %43 : vector<128xf32> to vector<128x1xf32>
    %45 = arith.truncf %42 : vector<128x128xf32> to vector<128x128xbf16>
    %cst_16 = arith.constant dense<0.000000e+00> : vector<128x32xf32>
    %46 = tpu.matmul %45, %34, %cst_16 {dimension_numbers = #tpu.dot_dimension_numbers<[1], [0], [0], [1], [0, 0, 1, 1], [], []>} : vector<128x128xbf16>, vector<128x32xbf16>, vector<128x32xf32> -> vector<128x32xf32>
    %47 = tpu.reciprocal %44 : vector<128x1xf32> -> vector<128x1xf32>
    %48 = vector.broadcast %47 : vector<128x1xf32> to vector<128x32xf32>
    %49 = arith.mulf %46, %48 : vector<128x32xf32>
    %c0_17 = arith.constant 0 : index
    %c0_18 = arith.constant 0 : index
    %50 = vector.load %arg14[%c0_17, %c0_18] : memref<256x128xf32, #tpu.memory_space<vmem>>, vector<128x32xf32>
    tpu.vector_store %arg14[%c0_17, %c0_18], %49 {strides = array<i32>} : memref<256x128xf32, #tpu.memory_space<vmem>>, vector<128x32xf32>,
    %51 = vector.extract_strided_slice %25 {offsets = [0, 32], sizes = [128, 32], strides = [1, 1]} : vector<256x384xf32> to vector<128x32xf32>
    %52 = arith.truncf %51 : vector<128x32xf32> to vector<128x32xbf16>
    %53 = vector.extract_strided_slice %25 {offsets = [0, 160], sizes = [128, 32], strides = [1, 1]} : vector<256x384xf32> to vector<128x32xf32>
    %54 = arith.truncf %53 : vector<128x32xf32> to vector<128x32xbf16>
    %55 = vector.extract_strided_slice %25 {offsets = [0, 288], sizes = [128, 32], strides = [1, 1]} : vector<256x384xf32> to vector<128x32xf32>
    %56 = arith.truncf %55 : vector<128x32xf32> to vector<128x32xbf16>
    %cst_19 = arith.constant dense<0.000000e+00> : vector<128x128xf32>
    %57 = tpu.matmul %52, %54, %cst_19 {dimension_numbers = #tpu.dot_dimension_numbers<[1], [1], [0], [0], [0, 0, 1, 0], [], []>} : vector<128x32xbf16>, vector<128x32xbf16>, vector<128x128xf32> -> vector<128x128xf32>
    %cst_20 = arith.constant -1.000000e+30 : f32
    %58 = vector.broadcast %cst_20 : f32 to vector<128x128xf32>
    %59 = arith.select %28, %57, %58 : vector<128x128xi1>, vector<128x128xf32>
    %cst_21 = arith.constant dense<0xFF800000> : vector<128xf32>
    %60 = vector.multi_reduction <maximumf>, %59, %cst_21 [1] : vector<128x128xf32> to vector<128xf32>
    %61 = vector.shape_cast %60 : vector<128xf32> to vector<128x1xf32>
    %62 = vector.broadcast %61 : vector<128x1xf32> to vector<128x128xf32>
    %63 = arith.subf %59, %62 : vector<128x128xf32>
    %64 = math.exp %63 : vector<128x128xf32>
    %cst_22 = arith.constant dense<0.000000e+00> : vector<128xf32>
    %65 = vector.multi_reduction <add>, %64, %cst_22 [1] : vector<128x128xf32> to vector<128xf32>
    %66 = vector.shape_cast %65 : vector<128xf32> to vector<128x1xf32>
    %67 = arith.truncf %64 : vector<128x128xf32> to vector<128x128xbf16>
    %cst_23 = arith.constant dense<0.000000e+00> : vector<128x32xf32>
    %68 = tpu.matmul %67, %56, %cst_23 {dimension_numbers = #tpu.dot_dimension_numbers<[1], [0], [0], [1], [0, 0, 1, 1], [], []>} : vector<128x128xbf16>, vector<128x32xbf16>, vector<128x32xf32> -> vector<128x32xf32>
    %69 = tpu.reciprocal %66 : vector<128x1xf32> -> vector<128x1xf32>
    %70 = vector.broadcast %69 : vector<128x1xf32> to vector<128x32xf32>
    %71 = arith.mulf %68, %70 : vector<128x32xf32>
    %c0_24 = arith.constant 0 : index
    %c32 = arith.constant 32 : index
    %72 = vector.load %arg14[%c0_24, %c32] : memref<256x128xf32, #tpu.memory_space<vmem>>, vector<128x32xf32>
    tpu.vector_store %arg14[%c0_24, %c32], %71 {strides = array<i32>} : memref<256x128xf32, #tpu.memory_space<vmem>>, vector<128x32xf32>,
    %73 = vector.extract_strided_slice %25 {offsets = [0, 64], sizes = [128, 32], strides = [1, 1]} : vector<256x384xf32> to vector<128x32xf32>
    %74 = arith.truncf %73 : vector<128x32xf32> to vector<128x32xbf16>
    %75 = vector.extract_strided_slice %25 {offsets = [0, 192], sizes = [128, 32], strides = [1, 1]} : vector<256x384xf32> to vector<128x32xf32>
    %76 = arith.truncf %75 : vector<128x32xf32> to vector<128x32xbf16>
    %77 = vector.extract_strided_slice %25 {offsets = [0, 320], sizes = [128, 32], strides = [1, 1]} : vector<256x384xf32> to vector<128x32xf32>
    %78 = arith.truncf %77 : vector<128x32xf32> to vector<128x32xbf16>
    %cst_25 = arith.constant dense<0.000000e+00> : vector<128x128xf32>
    %79 = tpu.matmul %74, %76, %cst_25 {dimension_numbers = #tpu.dot_dimension_numbers<[1], [1], [0], [0], [0, 0, 1, 0], [], []>} : vector<128x32xbf16>, vector<128x32xbf16>, vector<128x128xf32> -> vector<128x128xf32>
    %cst_26 = arith.constant -1.000000e+30 : f32
    %80 = vector.broadcast %cst_26 : f32 to vector<128x128xf32>
    %81 = arith.select %28, %79, %80 : vector<128x128xi1>, vector<128x128xf32>
    %cst_27 = arith.constant dense<0xFF800000> : vector<128xf32>
    %82 = vector.multi_reduction <maximumf>, %81, %cst_27 [1] : vector<128x128xf32> to vector<128xf32>
    %83 = vector.shape_cast %82 : vector<128xf32> to vector<128x1xf32>
    %84 = vector.broadcast %83 : vector<128x1xf32> to vector<128x128xf32>
    %85 = arith.subf %81, %84 : vector<128x128xf32>
    %86 = math.exp %85 : vector<128x128xf32>
    %cst_28 = arith.constant dense<0.000000e+00> : vector<128xf32>
    %87 = vector.multi_reduction <add>, %86, %cst_28 [1] : vector<128x128xf32> to vector<128xf32>
    %88 = vector.shape_cast %87 : vector<128xf32> to vector<128x1xf32>
    %89 = arith.truncf %86 : vector<128x128xf32> to vector<128x128xbf16>
    %cst_29 = arith.constant dense<0.000000e+00> : vector<128x32xf32>
    %90 = tpu.matmul %89, %78, %cst_29 {dimension_numbers = #tpu.dot_dimension_numbers<[1], [0], [0], [1], [0, 0, 1, 1], [], []>} : vector<128x128xbf16>, vector<128x32xbf16>, vector<128x32xf32> -> vector<128x32xf32>
    %91 = tpu.reciprocal %88 : vector<128x1xf32> -> vector<128x1xf32>
    %92 = vector.broadcast %91 : vector<128x1xf32> to vector<128x32xf32>
    %93 = arith.mulf %90, %92 : vector<128x32xf32>
    %c0_30 = arith.constant 0 : index
    %c64 = arith.constant 64 : index
    %94 = vector.load %arg14[%c0_30, %c64] : memref<256x128xf32, #tpu.memory_space<vmem>>, vector<128x32xf32>
    tpu.vector_store %arg14[%c0_30, %c64], %93 {strides = array<i32>} : memref<256x128xf32, #tpu.memory_space<vmem>>, vector<128x32xf32>,
    %95 = vector.extract_strided_slice %25 {offsets = [0, 96], sizes = [128, 32], strides = [1, 1]} : vector<256x384xf32> to vector<128x32xf32>
    %96 = arith.truncf %95 : vector<128x32xf32> to vector<128x32xbf16>
    %97 = vector.extract_strided_slice %25 {offsets = [0, 224], sizes = [128, 32], strides = [1, 1]} : vector<256x384xf32> to vector<128x32xf32>
    %98 = arith.truncf %97 : vector<128x32xf32> to vector<128x32xbf16>
    %99 = vector.extract_strided_slice %25 {offsets = [0, 352], sizes = [128, 32], strides = [1, 1]} : vector<256x384xf32> to vector<128x32xf32>
    %100 = arith.truncf %99 : vector<128x32xf32> to vector<128x32xbf16>
    %cst_31 = arith.constant dense<0.000000e+00> : vector<128x128xf32>
    %101 = tpu.matmul %96, %98, %cst_31 {dimension_numbers = #tpu.dot_dimension_numbers<[1], [1], [0], [0], [0, 0, 1, 0], [], []>} : vector<128x32xbf16>, vector<128x32xbf16>, vector<128x128xf32> -> vector<128x128xf32>
    %cst_32 = arith.constant -1.000000e+30 : f32
    %102 = vector.broadcast %cst_32 : f32 to vector<128x128xf32>
    %103 = arith.select %28, %101, %102 : vector<128x128xi1>, vector<128x128xf32>
    %cst_33 = arith.constant dense<0xFF800000> : vector<128xf32>
    %104 = vector.multi_reduction <maximumf>, %103, %cst_33 [1] : vector<128x128xf32> to vector<128xf32>
    %105 = vector.shape_cast %104 : vector<128xf32> to vector<128x1xf32>
    %106 = vector.broadcast %105 : vector<128x1xf32> to vector<128x128xf32>
    %107 = arith.subf %103, %106 : vector<128x128xf32>
    %108 = math.exp %107 : vector<128x128xf32>
    %cst_34 = arith.constant dense<0.000000e+00> : vector<128xf32>
    %109 = vector.multi_reduction <add>, %108, %cst_34 [1] : vector<128x128xf32> to vector<128xf32>
    %110 = vector.shape_cast %109 : vector<128xf32> to vector<128x1xf32>
    %111 = arith.truncf %108 : vector<128x128xf32> to vector<128x128xbf16>
    %cst_35 = arith.constant dense<0.000000e+00> : vector<128x32xf32>
    %112 = tpu.matmul %111, %100, %cst_35 {dimension_numbers = #tpu.dot_dimension_numbers<[1], [0], [0], [1], [0, 0, 1, 1], [], []>} : vector<128x128xbf16>, vector<128x32xbf16>, vector<128x32xf32> -> vector<128x32xf32>
    %113 = tpu.reciprocal %110 : vector<128x1xf32> -> vector<128x1xf32>
    %114 = vector.broadcast %113 : vector<128x1xf32> to vector<128x32xf32>
    %115 = arith.mulf %112, %114 : vector<128x32xf32>
    %c0_36 = arith.constant 0 : index
    %c96 = arith.constant 96 : index
    %116 = vector.load %arg14[%c0_36, %c96] : memref<256x128xf32, #tpu.memory_space<vmem>>, vector<128x32xf32>
    tpu.vector_store %arg14[%c0_36, %c96], %115 {strides = array<i32>} : memref<256x128xf32, #tpu.memory_space<vmem>>, vector<128x32xf32>,
    %117 = vector.extract_strided_slice %25 {offsets = [128, 0], sizes = [128, 32], strides = [1, 1]} : vector<256x384xf32> to vector<128x32xf32>
    %118 = arith.truncf %117 : vector<128x32xf32> to vector<128x32xbf16>
    %119 = vector.extract_strided_slice %25 {offsets = [128, 128], sizes = [128, 32], strides = [1, 1]} : vector<256x384xf32> to vector<128x32xf32>
    %120 = arith.truncf %119 : vector<128x32xf32> to vector<128x32xbf16>
    %121 = vector.extract_strided_slice %25 {offsets = [128, 256], sizes = [128, 32], strides = [1, 1]} : vector<256x384xf32> to vector<128x32xf32>
    %122 = arith.truncf %121 : vector<128x32xf32> to vector<128x32xbf16>
    %cst_37 = arith.constant dense<0.000000e+00> : vector<128x128xf32>
    %123 = tpu.matmul %118, %120, %cst_37 {dimension_numbers = #tpu.dot_dimension_numbers<[1], [1], [0], [0], [0, 0, 1, 0], [], []>} : vector<128x32xbf16>, vector<128x32xbf16>, vector<128x128xf32> -> vector<128x128xf32>
    %cst_38 = arith.constant -1.000000e+30 : f32
    %124 = vector.broadcast %cst_38 : f32 to vector<128x128xf32>
    %125 = arith.select %28, %123, %124 : vector<128x128xi1>, vector<128x128xf32>
    %cst_39 = arith.constant dense<0xFF800000> : vector<128xf32>
    %126 = vector.multi_reduction <maximumf>, %125, %cst_39 [1] : vector<128x128xf32> to vector<128xf32>
    %127 = vector.shape_cast %126 : vector<128xf32> to vector<128x1xf32>
    %128 = vector.broadcast %127 : vector<128x1xf32> to vector<128x128xf32>
    %129 = arith.subf %125, %128 : vector<128x128xf32>
    %130 = math.exp %129 : vector<128x128xf32>
    %cst_40 = arith.constant dense<0.000000e+00> : vector<128xf32>
    %131 = vector.multi_reduction <add>, %130, %cst_40 [1] : vector<128x128xf32> to vector<128xf32>
    %132 = vector.shape_cast %131 : vector<128xf32> to vector<128x1xf32>
    %133 = arith.truncf %130 : vector<128x128xf32> to vector<128x128xbf16>
    %cst_41 = arith.constant dense<0.000000e+00> : vector<128x32xf32>
    %134 = tpu.matmul %133, %122, %cst_41 {dimension_numbers = #tpu.dot_dimension_numbers<[1], [0], [0], [1], [0, 0, 1, 1], [], []>} : vector<128x128xbf16>, vector<128x32xbf16>, vector<128x32xf32> -> vector<128x32xf32>
    %135 = tpu.reciprocal %132 : vector<128x1xf32> -> vector<128x1xf32>
    %136 = vector.broadcast %135 : vector<128x1xf32> to vector<128x32xf32>
    %137 = arith.mulf %134, %136 : vector<128x32xf32>
    %c128 = arith.constant 128 : index
    %c0_42 = arith.constant 0 : index
    %138 = vector.load %arg14[%c128, %c0_42] : memref<256x128xf32, #tpu.memory_space<vmem>>, vector<128x32xf32>
    tpu.vector_store %arg14[%c128, %c0_42], %137 {strides = array<i32>} : memref<256x128xf32, #tpu.memory_space<vmem>>, vector<128x32xf32>,
    %139 = vector.extract_strided_slice %25 {offsets = [128, 32], sizes = [128, 32], strides = [1, 1]} : vector<256x384xf32> to vector<128x32xf32>
    %140 = arith.truncf %139 : vector<128x32xf32> to vector<128x32xbf16>
    %141 = vector.extract_strided_slice %25 {offsets = [128, 160], sizes = [128, 32], strides = [1, 1]} : vector<256x384xf32> to vector<128x32xf32>
    %142 = arith.truncf %141 : vector<128x32xf32> to vector<128x32xbf16>
    %143 = vector.extract_strided_slice %25 {offsets = [128, 288], sizes = [128, 32], strides = [1, 1]} : vector<256x384xf32> to vector<128x32xf32>
    %144 = arith.truncf %143 : vector<128x32xf32> to vector<128x32xbf16>
    %cst_43 = arith.constant dense<0.000000e+00> : vector<128x128xf32>
    %145 = tpu.matmul %140, %142, %cst_43 {dimension_numbers = #tpu.dot_dimension_numbers<[1], [1], [0], [0], [0, 0, 1, 0], [], []>} : vector<128x32xbf16>, vector<128x32xbf16>, vector<128x128xf32> -> vector<128x128xf32>
    %cst_44 = arith.constant -1.000000e+30 : f32
    %146 = vector.broadcast %cst_44 : f32 to vector<128x128xf32>
    %147 = arith.select %28, %145, %146 : vector<128x128xi1>, vector<128x128xf32>
    %cst_45 = arith.constant dense<0xFF800000> : vector<128xf32>
    %148 = vector.multi_reduction <maximumf>, %147, %cst_45 [1] : vector<128x128xf32> to vector<128xf32>
    %149 = vector.shape_cast %148 : vector<128xf32> to vector<128x1xf32>
    %150 = vector.broadcast %149 : vector<128x1xf32> to vector<128x128xf32>
    %151 = arith.subf %147, %150 : vector<128x128xf32>
    %152 = math.exp %151 : vector<128x128xf32>
    %cst_46 = arith.constant dense<0.000000e+00> : vector<128xf32>
    %153 = vector.multi_reduction <add>, %152, %cst_46 [1] : vector<128x128xf32> to vector<128xf32>
    %154 = vector.shape_cast %153 : vector<128xf32> to vector<128x1xf32>
    %155 = arith.truncf %152 : vector<128x128xf32> to vector<128x128xbf16>
    %cst_47 = arith.constant dense<0.000000e+00> : vector<128x32xf32>
    %156 = tpu.matmul %155, %144, %cst_47 {dimension_numbers = #tpu.dot_dimension_numbers<[1], [0], [0], [1], [0, 0, 1, 1], [], []>} : vector<128x128xbf16>, vector<128x32xbf16>, vector<128x32xf32> -> vector<128x32xf32>
    %157 = tpu.reciprocal %154 : vector<128x1xf32> -> vector<128x1xf32>
    %158 = vector.broadcast %157 : vector<128x1xf32> to vector<128x32xf32>
    %159 = arith.mulf %156, %158 : vector<128x32xf32>
    %c128_48 = arith.constant 128 : index
    %c32_49 = arith.constant 32 : index
    %160 = vector.load %arg14[%c128_48, %c32_49] : memref<256x128xf32, #tpu.memory_space<vmem>>, vector<128x32xf32>
    tpu.vector_store %arg14[%c128_48, %c32_49], %159 {strides = array<i32>} : memref<256x128xf32, #tpu.memory_space<vmem>>, vector<128x32xf32>,
    %161 = vector.extract_strided_slice %25 {offsets = [128, 64], sizes = [128, 32], strides = [1, 1]} : vector<256x384xf32> to vector<128x32xf32>
    %162 = arith.truncf %161 : vector<128x32xf32> to vector<128x32xbf16>
    %163 = vector.extract_strided_slice %25 {offsets = [128, 192], sizes = [128, 32], strides = [1, 1]} : vector<256x384xf32> to vector<128x32xf32>
    %164 = arith.truncf %163 : vector<128x32xf32> to vector<128x32xbf16>
    %165 = vector.extract_strided_slice %25 {offsets = [128, 320], sizes = [128, 32], strides = [1, 1]} : vector<256x384xf32> to vector<128x32xf32>
    %166 = arith.truncf %165 : vector<128x32xf32> to vector<128x32xbf16>
    %cst_50 = arith.constant dense<0.000000e+00> : vector<128x128xf32>
    %167 = tpu.matmul %162, %164, %cst_50 {dimension_numbers = #tpu.dot_dimension_numbers<[1], [1], [0], [0], [0, 0, 1, 0], [], []>} : vector<128x32xbf16>, vector<128x32xbf16>, vector<128x128xf32> -> vector<128x128xf32>
    %cst_51 = arith.constant -1.000000e+30 : f32
    %168 = vector.broadcast %cst_51 : f32 to vector<128x128xf32>
    %169 = arith.select %28, %167, %168 : vector<128x128xi1>, vector<128x128xf32>
    %cst_52 = arith.constant dense<0xFF800000> : vector<128xf32>
    %170 = vector.multi_reduction <maximumf>, %169, %cst_52 [1] : vector<128x128xf32> to vector<128xf32>
    %171 = vector.shape_cast %170 : vector<128xf32> to vector<128x1xf32>
    %172 = vector.broadcast %171 : vector<128x1xf32> to vector<128x128xf32>
    %173 = arith.subf %169, %172 : vector<128x128xf32>
    %174 = math.exp %173 : vector<128x128xf32>
    %cst_53 = arith.constant dense<0.000000e+00> : vector<128xf32>
    %175 = vector.multi_reduction <add>, %174, %cst_53 [1] : vector<128x128xf32> to vector<128xf32>
    %176 = vector.shape_cast %175 : vector<128xf32> to vector<128x1xf32>
    %177 = arith.truncf %174 : vector<128x128xf32> to vector<128x128xbf16>
    %cst_54 = arith.constant dense<0.000000e+00> : vector<128x32xf32>
    %178 = tpu.matmul %177, %166, %cst_54 {dimension_numbers = #tpu.dot_dimension_numbers<[1], [0], [0], [1], [0, 0, 1, 1], [], []>} : vector<128x128xbf16>, vector<128x32xbf16>, vector<128x32xf32> -> vector<128x32xf32>
    %179 = tpu.reciprocal %176 : vector<128x1xf32> -> vector<128x1xf32>
    %180 = vector.broadcast %179 : vector<128x1xf32> to vector<128x32xf32>
    %181 = arith.mulf %178, %180 : vector<128x32xf32>
    %c128_55 = arith.constant 128 : index
    %c64_56 = arith.constant 64 : index
    %182 = vector.load %arg14[%c128_55, %c64_56] : memref<256x128xf32, #tpu.memory_space<vmem>>, vector<128x32xf32>
    tpu.vector_store %arg14[%c128_55, %c64_56], %181 {strides = array<i32>} : memref<256x128xf32, #tpu.memory_space<vmem>>, vector<128x32xf32>,
    %183 = vector.extract_strided_slice %25 {offsets = [128, 96], sizes = [128, 32], strides = [1, 1]} : vector<256x384xf32> to vector<128x32xf32>
    %184 = arith.truncf %183 : vector<128x32xf32> to vector<128x32xbf16>
    %185 = vector.extract_strided_slice %25 {offsets = [128, 224], sizes = [128, 32], strides = [1, 1]} : vector<256x384xf32> to vector<128x32xf32>
    %186 = arith.truncf %185 : vector<128x32xf32> to vector<128x32xbf16>
    %187 = vector.extract_strided_slice %25 {offsets = [128, 352], sizes = [128, 32], strides = [1, 1]} : vector<256x384xf32> to vector<128x32xf32>
    %188 = arith.truncf %187 : vector<128x32xf32> to vector<128x32xbf16>
    %cst_57 = arith.constant dense<0.000000e+00> : vector<128x128xf32>
    %189 = tpu.matmul %184, %186, %cst_57 {dimension_numbers = #tpu.dot_dimension_numbers<[1], [1], [0], [0], [0, 0, 1, 0], [], []>} : vector<128x32xbf16>, vector<128x32xbf16>, vector<128x128xf32> -> vector<128x128xf32>
    %cst_58 = arith.constant -1.000000e+30 : f32
    %190 = vector.broadcast %cst_58 : f32 to vector<128x128xf32>
    %191 = arith.select %28, %189, %190 : vector<128x128xi1>, vector<128x128xf32>
    %cst_59 = arith.constant dense<0xFF800000> : vector<128xf32>
    %192 = vector.multi_reduction <maximumf>, %191, %cst_59 [1] : vector<128x128xf32> to vector<128xf32>
    %193 = vector.shape_cast %192 : vector<128xf32> to vector<128x1xf32>
    %194 = vector.broadcast %193 : vector<128x1xf32> to vector<128x128xf32>
    %195 = arith.subf %191, %194 : vector<128x128xf32>
    %196 = math.exp %195 : vector<128x128xf32>
    %cst_60 = arith.constant dense<0.000000e+00> : vector<128xf32>
    %197 = vector.multi_reduction <add>, %196, %cst_60 [1] : vector<128x128xf32> to vector<128xf32>
    %198 = vector.shape_cast %197 : vector<128xf32> to vector<128x1xf32>
    %199 = arith.truncf %196 : vector<128x128xf32> to vector<128x128xbf16>
    %cst_61 = arith.constant dense<0.000000e+00> : vector<128x32xf32>
    %200 = tpu.matmul %199, %188, %cst_61 {dimension_numbers = #tpu.dot_dimension_numbers<[1], [0], [0], [1], [0, 0, 1, 1], [], []>} : vector<128x128xbf16>, vector<128x32xbf16>, vector<128x32xf32> -> vector<128x32xf32>
    %201 = tpu.reciprocal %198 : vector<128x1xf32> -> vector<128x1xf32>
    %202 = vector.broadcast %201 : vector<128x1xf32> to vector<128x32xf32>
    %203 = arith.mulf %200, %202 : vector<128x32xf32>
    %c128_62 = arith.constant 128 : index
    %c96_63 = arith.constant 96 : index
    %204 = vector.load %arg14[%c128_62, %c96_63] : memref<256x128xf32, #tpu.memory_space<vmem>>, vector<128x32xf32>
    tpu.vector_store %arg14[%c128_62, %c96_63], %203 {strides = array<i32>} : memref<256x128xf32, #tpu.memory_space<vmem>>, vector<128x32xf32>,
    %c0_64 = arith.constant 0 : index
    %c0_65 = arith.constant 0 : index
    %205 = vector.load %arg14[%c0_64, %c0_65] : memref<256x128xf32, #tpu.memory_space<vmem>>, vector<256x128xf32>
    %206 = arith.truncf %205 : vector<256x128xf32> to vector<256x128xbf16>
    %c0_66 = arith.constant 0 : index
    %c0_67 = arith.constant 0 : index
    %207 = vector.load %arg5[%c0_66, %c0_67] : memref<128x128xbf16, #tpu.memory_space<vmem>>, vector<128x128xbf16>
    %cst_68 = arith.constant dense<0.000000e+00> : vector<256x128xf32>
    %208 = tpu.matmul %206, %207, %cst_68 {dimension_numbers = #tpu.dot_dimension_numbers<[1], [0], [0], [1], [0, 0, 1, 1], [], []>} : vector<256x128xbf16>, vector<128x128xbf16>, vector<256x128xf32> -> vector<256x128xf32>
    %c0_69 = arith.constant 0 : index
    %c0_70 = arith.constant 0 : index
    %209 = vector.load %arg6[%c0_69, %c0_70] : memref<1x128xf32, #tpu.memory_space<vmem>>, vector<1x128xf32>
    %210 = vector.broadcast %209 : vector<1x128xf32> to vector<256x128xf32>
    %211 = arith.addf %208, %210 : vector<256x128xf32>
    %212 = arith.addf %0, %211 : vector<256x128xf32>
    %cst_71 = arith.constant dense<0.000000e+00> : vector<256xf32>
    %213 = vector.multi_reduction <add>, %212, %cst_71 [1] : vector<256x128xf32> to vector<256xf32>
    %214 = vector.shape_cast %213 : vector<256xf32> to vector<256x1xf32>
    %cst_72 = arith.constant 1.280000e+02 : f32
    %215 = vector.broadcast %cst_72 : f32 to vector<256x1xf32>
    %216 = arith.divf %214, %215 : vector<256x1xf32>
    %217 = vector.broadcast %216 : vector<256x1xf32> to vector<256x128xf32>
    %218 = arith.subf %212, %217 : vector<256x128xf32>
    %219 = arith.mulf %218, %218 : vector<256x128xf32>
    %cst_73 = arith.constant dense<0.000000e+00> : vector<256xf32>
    %220 = vector.multi_reduction <add>, %219, %cst_73 [1] : vector<256x128xf32> to vector<256xf32>
    %221 = vector.shape_cast %220 : vector<256xf32> to vector<256x1xf32>
    %cst_74 = arith.constant 1.280000e+02 : f32
    %222 = vector.broadcast %cst_74 : f32 to vector<256x1xf32>
    %223 = arith.divf %221, %222 : vector<256x1xf32>
    %cst_75 = arith.constant 9.99999974E-6 : f32
    %224 = vector.broadcast %cst_75 : f32 to vector<256x1xf32>
    %225 = arith.addf %223, %224 : vector<256x1xf32>
    %226 = math.rsqrt %225 : vector<256x1xf32>
    %227 = vector.broadcast %226 : vector<256x1xf32> to vector<256x128xf32>
    %228 = arith.mulf %218, %227 : vector<256x128xf32>
    %c0_76 = arith.constant 0 : index
    %c0_77 = arith.constant 0 : index
    %229 = vector.load %arg7[%c0_76, %c0_77] : memref<1x128xf32, #tpu.memory_space<vmem>>, vector<1x128xf32>
    %230 = vector.broadcast %229 : vector<1x128xf32> to vector<256x128xf32>
    %231 = arith.mulf %228, %230 : vector<256x128xf32>
    %c0_78 = arith.constant 0 : index
    %c0_79 = arith.constant 0 : index
    %232 = vector.load %arg8[%c0_78, %c0_79] : memref<1x128xf32, #tpu.memory_space<vmem>>, vector<1x128xf32>
    %233 = vector.broadcast %232 : vector<1x128xf32> to vector<256x128xf32>
    %234 = arith.addf %231, %233 : vector<256x128xf32>
    %235 = arith.truncf %234 : vector<256x128xf32> to vector<256x128xbf16>
    %c0_80 = arith.constant 0 : index
    %c0_81 = arith.constant 0 : index
    %236 = vector.load %arg9[%c0_80, %c0_81] : memref<128x512xbf16, #tpu.memory_space<vmem>>, vector<128x512xbf16>
    %cst_82 = arith.constant dense<0.000000e+00> : vector<256x512xf32>
    %237 = tpu.matmul %235, %236, %cst_82 {dimension_numbers = #tpu.dot_dimension_numbers<[1], [0], [0], [1], [0, 0, 1, 1], [], []>} : vector<256x128xbf16>, vector<128x512xbf16>, vector<256x512xf32> -> vector<256x512xf32>
    %c0_83 = arith.constant 0 : index
    %c0_84 = arith.constant 0 : index
    %238 = vector.load %arg10[%c0_83, %c0_84] : memref<1x512xf32, #tpu.memory_space<vmem>>, vector<1x512xf32>
    %239 = vector.broadcast %238 : vector<1x512xf32> to vector<256x512xf32>
    %240 = arith.addf %237, %239 : vector<256x512xf32>
    %cst_85 = arith.constant 0.000000e+00 : f32
    %241 = vector.broadcast %cst_85 : f32 to vector<256x512xf32>
    %242 = arith.maximumf %240, %241 : vector<256x512xf32>
    %243 = arith.truncf %242 : vector<256x512xf32> to vector<256x512xbf16>
    %c0_86 = arith.constant 0 : index
    %c0_87 = arith.constant 0 : index
    %244 = vector.load %arg11[%c0_86, %c0_87] : memref<512x128xbf16, #tpu.memory_space<vmem>>, vector<512x128xbf16>
    %cst_88 = arith.constant dense<0.000000e+00> : vector<256x128xf32>
    %245 = tpu.matmul %243, %244, %cst_88 {dimension_numbers = #tpu.dot_dimension_numbers<[1], [0], [0], [1], [0, 0, 1, 1], [], []>} : vector<256x512xbf16>, vector<512x128xbf16>, vector<256x128xf32> -> vector<256x128xf32>
    %c0_89 = arith.constant 0 : index
    %c0_90 = arith.constant 0 : index
    %246 = vector.load %arg12[%c0_89, %c0_90] : memref<1x128xf32, #tpu.memory_space<vmem>>, vector<1x128xf32>
    %247 = vector.broadcast %246 : vector<1x128xf32> to vector<256x128xf32>
    %248 = arith.addf %245, %247 : vector<256x128xf32>
    %249 = arith.addf %212, %248 : vector<256x128xf32>
    %c0_91 = arith.constant 0 : index
    %c0_92 = arith.constant 0 : index
    %250 = vector.load %arg13[%c0_91, %c0_92] : memref<256x128xf32, #tpu.memory_space<vmem>>, vector<256x128xf32>
    tpu.vector_store %arg13[%c0_91, %c0_92], %249 {strides = array<i32>} : memref<256x128xf32, #tpu.memory_space<vmem>>, vector<256x128xf32>,
    return
  }
  func.func @transform_0(%arg0: i32) -> (i32, i32) {
    %c0_i32 = arith.constant 0 : i32
    %c0_i32_0 = arith.constant 0 : i32
    return %arg0, %c0_i32 : i32, i32
  }
  func.func @transform_1(%arg0: i32) -> (i32, i32) {
    %c0_i32 = arith.constant 0 : i32
    %c0_i32_0 = arith.constant 0 : i32
    %c0_i32_1 = arith.constant 0 : i32
    return %c0_i32, %c0_i32_0 : i32, i32
  }
  func.func @transform_2(%arg0: i32) -> (i32, i32) {
    %c0_i32 = arith.constant 0 : i32
    %c0_i32_0 = arith.constant 0 : i32
    %c0_i32_1 = arith.constant 0 : i32
    return %c0_i32, %c0_i32_0 : i32, i32
  }
  func.func @transform_3(%arg0: i32) -> (i32, i32) {
    %c0_i32 = arith.constant 0 : i32
    %c0_i32_0 = arith.constant 0 : i32
    %c0_i32_1 = arith.constant 0 : i32
    return %c0_i32, %c0_i32_0 : i32, i32
  }
  func.func @transform_4(%arg0: i32) -> (i32, i32) {
    %c0_i32 = arith.constant 0 : i32
    %c0_i32_0 = arith.constant 0 : i32
    %c0_i32_1 = arith.constant 0 : i32
    return %c0_i32, %c0_i32_0 : i32, i32
  }
  func.func @transform_5(%arg0: i32) -> (i32, i32) {
    %c0_i32 = arith.constant 0 : i32
    %c0_i32_0 = arith.constant 0 : i32
    %c0_i32_1 = arith.constant 0 : i32
    return %c0_i32, %c0_i32_0 : i32, i32
  }
  func.func @transform_6(%arg0: i32) -> (i32, i32) {
    %c0_i32 = arith.constant 0 : i32
    %c0_i32_0 = arith.constant 0 : i32
    %c0_i32_1 = arith.constant 0 : i32
    return %c0_i32, %c0_i32_0 : i32, i32
  }
  func.func @transform_7(%arg0: i32) -> (i32, i32) {
    %c0_i32 = arith.constant 0 : i32
    %c0_i32_0 = arith.constant 0 : i32
    %c0_i32_1 = arith.constant 0 : i32
    return %c0_i32, %c0_i32_0 : i32, i32
  }
  func.func @transform_8(%arg0: i32) -> (i32, i32) {
    %c0_i32 = arith.constant 0 : i32
    %c0_i32_0 = arith.constant 0 : i32
    %c0_i32_1 = arith.constant 0 : i32
    return %c0_i32, %c0_i32_0 : i32, i32
  }
  func.func @transform_9(%arg0: i32) -> (i32, i32) {
    %c0_i32 = arith.constant 0 : i32
    %c0_i32_0 = arith.constant 0 : i32
    %c0_i32_1 = arith.constant 0 : i32
    return %c0_i32, %c0_i32_0 : i32, i32
  }
  func.func @transform_10(%arg0: i32) -> (i32, i32) {
    %c0_i32 = arith.constant 0 : i32
    %c0_i32_0 = arith.constant 0 : i32
    %c0_i32_1 = arith.constant 0 : i32
    return %c0_i32, %c0_i32_0 : i32, i32
  }
  func.func @transform_11(%arg0: i32) -> (i32, i32) {
    %c0_i32 = arith.constant 0 : i32
    %c0_i32_0 = arith.constant 0 : i32
    %c0_i32_1 = arith.constant 0 : i32
    return %c0_i32, %c0_i32_0 : i32, i32
  }
  func.func @transform_12(%arg0: i32) -> (i32, i32) {
    %c0_i32 = arith.constant 0 : i32
    %c0_i32_0 = arith.constant 0 : i32
    return %arg0, %c0_i32 : i32, i32
  }
}

</mosaic_0001>

<bundles_post_ra>
// kernel: tpu_custom_call.1
= control target key start
LH: loop header
LB: loop body
LE: loop exit
PB: predicated region body
PF: predicated region fallthrough
CT: control target
= control target key end

     0   :  { %17 = vsyncpa [#allocation4], 0  ;;  %s14170_s0 = inlined_call_operand.hbm [shape: f32[256,128], index: 0, kind: input, shape index: {}]   ;;  %s14171_s1 = inlined_call_operand.vmem [shape: f32[1,128], index: 1, kind: input, shape index: {}]   ;;  %s14172_s2 = inlined_call_operand.vmem [shape: f32[1,128], index: 2, kind: input, shape index: {}]   ;;  %s14173_s3 = inlined_call_operand.hbm [shape: bf16[128,384], index: 3, kind: input, shape index: {}]   ;;  %s14174_s4 = inlined_call_operand.hbm [shape: bf16[128,128], index: 4, kind: input, shape index: {}]   ;;  %s14175_s5 = inlined_call_operand.vmem [shape: f32[1,128], index: 5, kind: input, shape index: {}]   ;;  %s14176_s6 = inlined_call_operand.vmem [shape: f32[1,128], index: 6, kind: input, shape index: {}]   ;;  %s14177_s7 = inlined_call_operand.vmem [shape: f32[1,128], index: 7, kind: input, shape index: {}]   ;;  %s14178_s8 = inlined_call_operand.hbm [shape: bf16[128,512], index: 8, kind: input, shape index: {}]   ;;  %s14179_s9 = inlined_call_operand.vmem [shape: f32[1,512], index: 9, kind: input, shape index: {}]   ;;  %s14180_s10 = inlined_call_operand.hbm [shape: bf16[512,128], index: 10, kind: input, shape index: {}]   ;;  %s14181_s11 = inlined_call_operand.vmem [shape: f32[1,128], index: 11, kind: input, shape index: {}]   ;;  %s14182_s12 = inlined_call_operand.hbm [shape: f32[256,128], index: 12, kind: output, shape index: {}]  }
   0x1   :  { %18 = vsyncpa [#allocation7], 0 }
   0x2   :  { %19 = vsyncpa [#allocation10], 0 }
   0x3   :  { %20 = vsyncpa [#allocation5], 0  ;;  %s9916_s21 = smov [#allocation6]   ;;  %s9776_s25 = scalar_lea.hbm %s14173_s3, 3072 }
   0x4   :  { %s42_s22 = sshll.u32 %s9916_s21, 4  ;;  %p9777_p0 = scmp.ne.s32.totalorder %s14173_s3, %s9776_s25  ;;  %s43_s22 = int_to_ptr.vmem [resolvable:$true] %s42_s22 }
   0x5   :  { %p9780_p1 = scmp.lt.u32.totalorder %s9776_s25, %s14173_s3 }
   0x7   :  { %p9782_p2 = pnand %p9780_p1, %p9777_p0 }
   0x9   :  { %9785 = shalt.err (!%p9782_p2)
}
   0xa   :  { %s9786_s30 = scalar_lea.vmem %s43_s22, 3072  ;;  %p9791_p4 = scmp.lt.s32.totalorder %s43_s22, %s43_s22 }
   0xb   :  { %p9787_p3 = scmp.ne.s32.totalorder %s43_s22, %s9786_s30  ;;  %p9792_p5 = scmp.lt.s32.totalorder %s9786_s30, %s9786_s30 }
   0xd   :  { %p9793_p6 = por %p9792_p5, %p9791_p4 }
   0xf   :  { %p9794_p7 = pnand %p9793_p6, %p9787_p3 }
  0x11   :  { %9797 = shalt.err (!%p9794_p7)
}
  0x12   :  { %s9917_s13 = smov 192   ;;  %s9918_s14 = smov 12  }
  0x13   :  { %48 = dma.hbm_to_vmem [thread:$0]  %s14173_s3, 3072, %s43_s22, [#allocation7], %s9917_s13, %s9917_s13, %s9918_s14  }
  0x14   :  { %s9919_s17 = smov [#allocation9]   ;;  %s9798_s21 = scalar_lea.hbm %s14178_s8, 4096 }
  0x15   :  { %s72_s18 = sshll.u32 %s9919_s17, 4  ;;  %p9799_p8 = scmp.ne.s32.totalorder %s14178_s8, %s9798_s21  ;;  %s73_s18 = int_to_ptr.vmem [resolvable:$true] %s72_s18 }
  0x16   :  { %p9802_p9 = scmp.lt.u32.totalorder %s9798_s21, %s14178_s8 }
  0x18   :  { %p9804_p10 = pnand %p9802_p9, %p9799_p8 }
  0x1a   :  { %9807 = shalt.err (!%p9804_p10)
}
  0x1b   :  { %s9808_s27 = scalar_lea.vmem %s73_s18, 4096  ;;  %p9813_p12 = scmp.lt.s32.totalorder %s73_s18, %s73_s18 }
  0x1c   :  { %p9809_p11 = scmp.ne.s32.totalorder %s73_s18, %s9808_s27  ;;  %p9814_p13 = scmp.lt.s32.totalorder %s9808_s27, %s9808_s27 }
  0x1e   :  { %p9815_p0 = por %p9814_p13, %p9813_p12 }
  0x20   :  { %p9816_p1 = pnand %p9815_p0, %p9809_p11 }
  0x22   :  { %9819 = shalt.err (!%p9816_p1)
}
  0x23   :  { %s9920_s3 = smov 256   ;;  %s9921_s22 = smov 16  }
  0x24   :  { %78 = dma.hbm_to_vmem [thread:$0]  %s14178_s8, 4096, %s73_s18, [#allocation10], %s9920_s3, %s9920_s3, %s9921_s22  }
  0x25   :  { %s9922_s30 = smov [#allocation3]   ;;  %s9820_s16 = scalar_lea.hbm %s14170_s0, 4096 }
  0x26   :  { %s26_s13 = sshll.u32 %s9922_s30, 4  ;;  %p9821_p2 = scmp.ne.s32.totalorder %s14170_s0, %s9820_s16  ;;  %s27_s13 = int_to_ptr.vmem [resolvable:$true] %s26_s13 }
  0x27   :  { %p9824_p3 = scmp.lt.u32.totalorder %s9820_s16, %s14170_s0 }
  0x29   :  { %p9826_p4 = pnand %p9824_p3, %p9821_p2 }
  0x2b   :  { %9829 = shalt.err (!%p9826_p4)
}
  0x2c   :  { %s9830_s23 = scalar_lea.vmem %s27_s13, 4096  ;;  %p9835_p6 = scmp.lt.s32.totalorder %s27_s13, %s27_s13 }
  0x2d   :  { %p9831_p5 = scmp.ne.s32.totalorder %s27_s13, %s9830_s23  ;;  %p9836_p7 = scmp.lt.s32.totalorder %s9830_s23, %s9830_s23 }
  0x2f   :  { %p9837_p8 = por %p9836_p7, %p9835_p6 }
  0x31   :  { %p9838_p9 = pnand %p9837_p8, %p9831_p5 }
  0x33   :  { %9841 = shalt.err (!%p9838_p9)
}
  0x34   :  { %s9923_s8 = smov 128   ;;  %s9924_s18 = smov 8  }
  0x35   :  { %32 = dma.hbm_to_vmem [thread:$0]  %s14170_s0, 4096, %s27_s13, [#allocation4], %s9923_s8, %s9923_s8, %s9924_s18  }
  0x36   :  { %s9925_s26 = smov [#allocation8]   ;;  %s9842_s28 = scalar_lea.hbm %s14174_s4, 1024 }
  0x37   :  { %s54_s27 = sshll.u32 %s9925_s26, 4  ;;  %p9843_p10 = scmp.ne.s32.totalorder %s14174_s4, %s9842_s28  ;;  %s55_s27 = int_to_ptr.vmem [resolvable:$true] %s54_s27 }
  0x38   :  { %p9846_p11 = scmp.lt.u32.totalorder %s9842_s28, %s14174_s4 }
  0x3a   :  { %p9848_p12 = pnand %p9846_p11, %p9843_p10 }
  0x3c   :  { %9851 = shalt.err (!%p9848_p12)
}
  0x3d   :  { %s9852_s16 = scalar_lea.vmem %s55_s27, 1024  ;;  %p9857_p0 = scmp.lt.s32.totalorder %s55_s27, %s55_s27 }
  0x3e   :  { %p9853_p13 = scmp.ne.s32.totalorder %s55_s27, %s9852_s16  ;;  %p9858_p1 = scmp.lt.s32.totalorder %s9852_s16, %s9852_s16 }
  0x40   :  { %p9859_p2 = por %p9858_p1, %p9857_p0 }
  0x42   :  { %p9860_p3 = pnand %p9859_p2, %p9853_p13 }
  0x44   :  { %9863 = shalt.err (!%p9860_p3)
}
  0x45   :  { %s9926_s0 = smov 64   ;;  %s9927_s13 = smov 4  }
  0x46   :  { %60 = dma.hbm_to_vmem [thread:$0]  %s14174_s4, 1024, %s55_s27, [#allocation7], %s9926_s0, %s9926_s0, %s9927_s13  }
  0x47   :  { %s9928_s20 = smov [#allocation11]   ;;  %s9864_s25 = scalar_lea.hbm %s14180_s10, 4096 }
  0x48   :  { %s86_s21 = sshll.u32 %s9928_s20, 4  ;;  %p9865_p4 = scmp.ne.s32.totalorder %s14180_s10, %s9864_s25  ;;  %s87_s21 = int_to_ptr.vmem [resolvable:$true] %s86_s21 }
  0x49   :  { %p9868_p5 = scmp.lt.u32.totalorder %s9864_s25, %s14180_s10 }
  0x4b   :  { %p9870_p6 = pnand %p9868_p5, %p9865_p4 }
  0x4d   :  { %9873 = shalt.err (!%p9870_p6)
}
  0x4e   :  { %s9874_s29 = scalar_lea.vmem %s87_s21, 4096  ;;  %p9879_p8 = scmp.lt.s32.totalorder %s87_s21, %s87_s21 }
  0x4f   :  { %p9875_p7 = scmp.ne.s32.totalorder %s87_s21, %s9874_s29  ;;  %p9880_p9 = scmp.lt.s32.totalorder %s9874_s29, %s9874_s29 }
  0x51   :  { %p9881_p10 = por %p9880_p9, %p9879_p8 }
  0x53   :  { %p9882_p11 = pnand %p9881_p10, %p9875_p7 }
  0x55   :  { %9885 = shalt.err (!%p9882_p11)
}
  0x56   :  { %92 = dma.hbm_to_vmem [thread:$0]  %s14180_s10, 4096, %s87_s21, [#allocation10], %s9926_s0, %s9926_s0, %s9927_s13  }
  0x57   :  { %9908 = dma.done.wait [#allocation4], 4096  }
  0x58   :  { %9909 = vsyncadd [#allocation4], 4294963200 }
  0x59   :  { %9910 = dma.done.wait [#allocation7], 4096  }
  0x5a   :  { %9911 = vsyncadd [#allocation7], 4294963200 }
  0x5b   :  { %9912 = dma.done.wait [#allocation10], 8192  }
  0x5c   :  { %9913 = vsyncadd [#allocation10], 4294959104  ;;  %v111_v0 = vld [vmem:[#allocation3] sm:$0xff]  ;;  %v113_v1 = vld [vmem:[#allocation3 + $0x10] sm:$0xff]  ;;  %vm14205_vm0 = vcmask 261120  }
  0x5d   :  { %143 = vadd.xlane.f32.xlu0 %v111_v0  ;;  %147 = vadd.xlane.f32.xlu1 %v113_v1  ;;  %v112_v2 = vld [vmem:[#allocation3 + $0x8] sm:$0xff]  ;;  %v114_v3 = vld [vmem:[#allocation3 + $0x18] sm:$0xff]  ;;  %v115_v4 = vld [vmem:[#allocation3 + $0x20] sm:$0xff] }
  0x5e   :  { %v116_v5 = vld [vmem:[#allocation3 + $0x28] sm:$0xff]  ;;  %v10065_v6 = vld [vmem:[#allocation3 + $0x30] sm:$0xff]  ;;  %v10067_v7 = vld [vmem:[#allocation3 + $0x38] sm:$0xff] }
  0x5f   :  { %v10069_v8 = vld [vmem:[#allocation3 + $0x40] sm:$0xff]  ;;  %v10071_v9 = vld [vmem:[#allocation3 + $0x48] sm:$0xff]  ;;  %v10075_v10 = vld [vmem:[#allocation3 + $0x50] sm:$0xff] }
  0x60   :  { %v10077_v11 = vld [vmem:[#allocation3 + $0x58] sm:$0xff]  ;;  %v10081_v12 = vld [vmem:[#allocation3 + $0x60] sm:$0xff]  ;;  %v10083_v13 = vld [vmem:[#allocation3 + $0x68] sm:$0xff] }
  0x61   :  { %145 = vadd.xlane.f32.xlu0 %v112_v2  ;;  %149 = vadd.xlane.f32.xlu1 %v114_v3  ;;  %v10087_v14 = vld [vmem:[#allocation3 + $0x70] sm:$0xff]  ;;  %v10089_v15 = vld [vmem:[#allocation3 + $0x78] sm:$0xff]  ;;  %v8986_v17 = vld [vmem:[#allocation6] ss:$12 sps:$4 sm:$0xff]  }
  0x62   :  { %v8984_v16 = vld [vmem:[#allocation6 + $0x4] ss:$12 sps:$4 sm:$0xff]   ;;  %v8987_v18 = vld [vmem:[#allocation6 + $0x1c] ss:$12 sps:$4 sm:$0xff]   ;;  %v8990_v63 = vld [vmem:[#allocation6 + $0x34] ss:$12 sps:$4 sm:$0xff]  }
  0x63   :  { %750 = vmatprep.subr.bf16.mxu0 %v8984_v16  ;;  %8887 = vmatprep.subr.bf16.mxu1 %v8984_v16  ;;  %v8989_v57 = vld [vmem:[#allocation6 + $0x18] ss:$12 sps:$4 sm:$0xff]  }
  0x64   :  { %751 = vmatpush1.bf16.msra.mxu0 %v8986_v17  ;;  %8895 = vmatpush1.bf16.msra.mxu1 %v8986_v17  ;;  %v8993_v16 = vld [vmem:[#allocation6 + $0x4c] ss:$12 sps:$4 sm:$0xff]  }
  0x65   :  { %151 = vadd.xlane.f32.xlu0 %v115_v4  ;;  %153 = vadd.xlane.f32.xlu1 %v116_v5 }
  0x66   :  { %752 = vmatprep.subr.bf16.mxu0 %v8987_v18  ;;  %8888 = vmatprep.subr.bf16.mxu1 %v8987_v18 }
  0x68   :  { %753 = vmatpush1.bf16.msra.mxu0 %v8989_v57  ;;  %8896 = vmatpush1.bf16.msra.mxu1 %v8989_v57  ;;  %v10212_v57 = vld [vmem:[#allocation3 + $0xb0] sm:$0xff] }
  0x69   :  { %155 = vadd.xlane.f32.xlu0 %v10065_v6  ;;  %157 = vadd.xlane.f32.xlu1 %v10067_v7 }
  0x6a   :  { %754 = vmatprep.subr.bf16.mxu0 %v8990_v63  ;;  %8889 = vmatprep.subr.bf16.mxu1 %v8990_v63 }
  0x6d   :  { %159 = vadd.xlane.f32.xlu0 %v10069_v8  ;;  %161 = vadd.xlane.f32.xlu1 %v10071_v9 }
  0x71   :  { %163 = vadd.xlane.f32.xlu0 %v10075_v10  ;;  %165 = vadd.xlane.f32.xlu1 %v10077_v11 }
  0x75   :  { %167 = vadd.xlane.f32.xlu0 %v10081_v12  ;;  %169 = vadd.xlane.f32.xlu1 %v10083_v13 }
  0x79   :  { %171 = vadd.xlane.f32.xlu0 %v10087_v14  ;;  %173 = vadd.xlane.f32.xlu1 %v10089_v15 }
  0xea   :  { %v144_v19 = vpop.xlane.xlu0 %143  ;;  %v148_v20 = vpop.xlane.xlu1 %147 }
  0xeb   :  { %v208_v21 = vmul.f32 0.0078125, %v144_v19  ;;  %v210_v22 = vmul.f32 0.0078125, %v148_v20  ;;  %v8995_v19 = vld [vmem:[#allocation6 + $0x48] ss:$12 sps:$4 sm:$0xff]  }
  0xed   :  { %v10095_v23 = vsub.f32 %v111_v0, %v208_v21  ;;  %v10097_v24 = vsub.f32 %v113_v1, %v210_v22 }
  0xee   :  { %v146_v25 = vpop.xlane.xlu0 %145  ;;  %v150_v26 = vpop.xlane.xlu1 %149 }
  0xef   :  { %v209_v27 = vmul.f32 0.0078125, %v146_v25  ;;  %v272_v28 = vmul.f32 %v10095_v23, %v10095_v23  ;;  %v211_v29 = vmul.f32 0.0078125, %v150_v26  ;;  %v274_v30 = vmul.f32 %v10097_v24, %v10097_v24  ;;  %v8996_v26 = vld [vmem:[#allocation6 + $0x64] ss:$12 sps:$4 sm:$0xff]  }
  0xf1   :  { %304 = vadd.xlane.f32.xlu0 %v272_v28  ;;  %v10103_v31 = vsub.f32 %v112_v2, %v209_v27  ;;  %v10105_v32 = vsub.f32 %v114_v3, %v211_v29  ;;  %v8998_v27 = vld [vmem:[#allocation6 + $0x60] ss:$12 sps:$4 sm:$0xff]  }
  0xf2   :  { %v152_v33 = vpop.xlane.xlu0 %151  ;;  %v154_v34 = vpop.xlane.xlu1 %153 }
  0xf3   :  { %v212_v35 = vmul.f32 0.0078125, %v152_v33  ;;  %v273_v36 = vmul.f32 %v10103_v31, %v10103_v31  ;;  %v213_v37 = vmul.f32 0.0078125, %v154_v34  ;;  %v275_v38 = vmul.f32 %v10105_v32, %v10105_v32  ;;  %v9001_v33 = vld [vmem:[#allocation6 + $0x78] ss:$12 sps:$4 sm:$0xff]   ;;  %v10172_v34 = vld [vmem:[#allocation3 + $0xc8] sm:$0xff] }
  0xf5   :  { %308 = vadd.xlane.f32.xlu0 %v274_v30  ;;  %306 = vadd.xlane.f32.xlu1 %v273_v36  ;;  %v10111_v39 = vsub.f32 %v115_v4, %v212_v35  ;;  %v10113_v40 = vsub.f32 %v116_v5, %v213_v37  ;;  %v8992_v5 = vld [vmem:[#allocation6 + $0x30] ss:$12 sps:$4 sm:$0xff]   ;;  %v9005_v37 = vld [vmem:[#allocation6 + $0xac] ss:$12 sps:$4 sm:$0xff]  }
  0xf6   :  { %v156_v41 = vpop.xlane.xlu0 %155  ;;  %v158_v42 = vpop.xlane.xlu1 %157  ;;  %755 = vmatpush1.bf16.msra.mxu0 %v8992_v5  ;;  %8897 = vmatpush1.bf16.msra.mxu1 %v8992_v5  ;;  %v8999_v30 = vld [vmem:[#allocation6 + $0x7c] ss:$12 sps:$4 sm:$0xff]   ;;  %v10174_v35 = vld [vmem:[#allocation3 + $0xd0] sm:$0xff] }
  0xf7   :  { %v214_v43 = vmul.f32 0.0078125, %v156_v41  ;;  %v276_v44 = vmul.f32 %v10111_v39, %v10111_v39  ;;  %v215_v45 = vmul.f32 0.0078125, %v158_v42  ;;  %v277_v46 = vmul.f32 %v10113_v40, %v10113_v40  ;;  %756 = vmatprep.subr.bf16.mxu0 %v8993_v16  ;;  %8890 = vmatprep.subr.bf16.mxu1 %v8993_v16  ;;  %v9004_v36 = vld [vmem:[#allocation6 + $0x90] ss:$12 sps:$4 sm:$0xff]   ;;  %v10180_v41 = vld [vmem:[#allocation3 + $0xe0] sm:$0xff] }
  0xf8   :  { %v9007_v42 = vld [vmem:[#allocation6 + $0xa8] ss:$12 sps:$4 sm:$0xff]  }
  0xf9   :  { %310 = vadd.xlane.f32.xlu1 %v275_v38  ;;  %312 = vadd.xlane.f32.xlu0 %v276_v44  ;;  %v10120_v47 = vsub.f32 %v10065_v6, %v214_v43  ;;  %v10123_v48 = vsub.f32 %v10067_v7, %v215_v45  ;;  %v10178_v38 = vld [vmem:[#allocation3 + $0xd8] sm:$0xff]  ;;  %v10184_v43 = vld [vmem:[#allocation3 + $0xe8] sm:$0xff]  ;;  %v10186_v44 = vld [vmem:[#allocation3 + $0xf0] sm:$0xff]  ;;  %v14183_v45 = vmov 0  }
  0xfa   :  { %v160_v49 = vpop.xlane.xlu0 %159  ;;  %v162_v50 = vpop.xlane.xlu1 %161  ;;  %757 = vmatpush1.bf16.msra.mxu0 %v8995_v19  ;;  %8898 = vmatpush1.bf16.msra.mxu1 %v8995_v19 }
  0xfb   :  { %v216_v51 = vmul.f32 0.0078125, %v160_v49  ;;  %v278_v52 = vmul.f32 %v10120_v47, %v10120_v47  ;;  %v217_v53 = vmul.f32 0.0078125, %v162_v50  ;;  %v279_v54 = vmul.f32 %v10123_v48, %v10123_v48  ;;  %758 = vmatprep.subr.bf16.mxu0 %v8996_v26  ;;  %8891 = vmatprep.subr.bf16.mxu1 %v8996_v26  ;;  %v10194_v49 = vld [vmem:[#allocation3 + $0x80] sm:$0xff]  ;;  %v10198_v50 = vld [vmem:[#allocation3 + $0x88] sm:$0xff] }
  0xfc   :  { %782 = vmatprep.mubr.bf16.mxu0 %v14183_v45  ;;  %902 = vmatprep.mubr.bf16.mxu1 %v14183_v45 }
  0xfd   :  { %314 = vadd.xlane.f32.xlu1 %v277_v46  ;;  %316 = vadd.xlane.f32.xlu0 %v278_v52  ;;  %v10130_v55 = vsub.f32 %v10069_v8, %v216_v51  ;;  %v10133_v56 = vsub.f32 %v10071_v9, %v217_v53  ;;  %v10192_v46 = vld [vmem:[#allocation3 + $0xf8] sm:$0xff]  ;;  %v10200_v51 = vld [vmem:[#allocation3 + $0x90] sm:$0xff]  ;;  %v10206_v53 = vld [vmem:[#allocation3 + $0xa0] sm:$0xff] }
  0xfe   :  { %v164_v58 = vpop.xlane.xlu0 %163  ;;  %v166_v59 = vpop.xlane.xlu1 %165  ;;  %759 = vmatpush1.bf16.msra.mxu0 %v8998_v27  ;;  %8899 = vmatpush1.bf16.msra.mxu1 %v8998_v27  ;;  %v10204_v52 = vld [vmem:[#allocation3 + $0x98] sm:$0xff] }
  0xff   :  { %v218_v60 = vmul.f32 0.0078125, %v164_v58  ;;  %v280_v61 = vmul.f32 %v10130_v55, %v10130_v55  ;;  %v219_v62 = vmul.f32 0.0078125, %v166_v59  ;;  %v281_v0 = vmul.f32 %v10133_v56, %v10133_v56  ;;  %760 = vmatprep.subr.bf16.mxu0 %v8999_v30  ;;  %8892 = vmatprep.subr.bf16.mxu1 %v8999_v30  ;;  %v10216_v58 = vld [vmem:[#allocation3 + $0xb8] sm:$0xff] }
 0x101   :  { %318 = vadd.xlane.f32.xlu1 %v279_v54  ;;  %320 = vadd.xlane.f32.xlu0 %v280_v61  ;;  %v10140_v1 = vsub.f32 %v10075_v10, %v218_v60  ;;  %v10143_v2 = vsub.f32 %v10077_v11, %v219_v62  ;;  %v10210_v54 = vld [vmem:[#allocation3 + $0xa8] sm:$0xff] }
 0x102   :  { %v168_v3 = vpop.xlane.xlu0 %167  ;;  %v170_v4 = vpop.xlane.xlu1 %169  ;;  %761 = vmatpush1.bf16.msra.mxu0 %v9001_v33  ;;  %8900 = vmatpush1.bf16.msra.mxu1 %v9001_v33 }
 0x103   :  { %v220_v6 = vmul.f32 0.0078125, %v168_v3  ;;  %v282_v7 = vmul.f32 %v10140_v1, %v10140_v1  ;;  %v221_v8 = vmul.f32 0.0078125, %v170_v4  ;;  %v283_v9 = vmul.f32 %v10143_v2, %v10143_v2 }
 0x105   :  { %322 = vadd.xlane.f32.xlu1 %v281_v0  ;;  %324 = vadd.xlane.f32.xlu0 %v282_v7  ;;  %v10150_v10 = vsub.f32 %v10081_v12, %v220_v6  ;;  %v10153_v11 = vsub.f32 %v10083_v13, %v221_v8 }
 0x106   :  { %v172_v17 = vpop.xlane.xlu0 %171  ;;  %v174_v18 = vpop.xlane.xlu1 %173 }
 0x107   :  { %v222_v20 = vmul.f32 0.0078125, %v172_v17  ;;  %v284_v21 = vmul.f32 %v10150_v10, %v10150_v10  ;;  %v223_v22 = vmul.f32 0.0078125, %v174_v18  ;;  %v285_v12 = vmul.f32 %v10153_v11, %v10153_v11 }
 0x109   :  { %326 = vadd.xlane.f32.xlu1 %v283_v9  ;;  %328 = vadd.xlane.f32.xlu0 %v284_v21  ;;  %v10160_v13 = vsub.f32 %v10087_v14, %v222_v20  ;;  %v10163_v25 = vsub.f32 %v10089_v15, %v223_v22  ;;  %v10169_v14 = vld [vmem:[#allocation3 + $0xc0] sm:$0xff] }
 0x10a   :  { %v9002_v15 = vld [vmem:[#allocation6 + $0x94] ss:$12 sps:$4 sm:$0xff]  }
 0x10b   :  { %v286_v28 = vmul.f32 %v10160_v13, %v10160_v13  ;;  %v287_v29 = vmul.f32 %v10163_v25, %v10163_v25  ;;  %762 = vmatprep.subr.bf16.mxu0 %v9002_v15  ;;  %8893 = vmatprep.subr.bf16.mxu1 %v9002_v15 }
 0x10c   :  { %763 = vmatpush1.bf16.msra.mxu0 %v9004_v36  ;;  %8901 = vmatpush1.bf16.msra.mxu1 %v9004_v36 }
 0x10d   :  { %330 = vadd.xlane.f32.xlu1 %v285_v12  ;;  %332 = vadd.xlane.f32.xlu0 %v286_v28 }
 0x10e   :  { %764 = vmatprep.subr.bf16.mxu0 %v9005_v37  ;;  %8894 = vmatprep.subr.bf16.mxu1 %v9005_v37 }
 0x110   :  { %765 = vmatpush1.bf16.msra.mxu0 %v9007_v42  ;;  %8902 = vmatpush1.bf16.msra.mxu1 %v9007_v42 }
 0x111   :  { %334 = vadd.xlane.f32.xlu1 %v287_v29  ;;  %191 = vadd.xlane.f32.xlu0 %v10169_v14  ;;  %v10223_v29 = vld [vmem:[%s14171_s1] ss:$0 sm:$0xff]  ;;  %s9930_s1 = smov 96  }
 0x115   :  { %193 = vadd.xlane.f32.xlu1 %v10172_v34  ;;  %195 = vadd.xlane.f32.xlu0 %v10174_v35 }
 0x119   :  { %197 = vadd.xlane.f32.xlu1 %v10178_v38  ;;  %199 = vadd.xlane.f32.xlu0 %v10180_v41 }
 0x11d   :  { %201 = vadd.xlane.f32.xlu1 %v10184_v43  ;;  %203 = vadd.xlane.f32.xlu0 %v10186_v44 }
 0x121   :  { %205 = vadd.xlane.f32.xlu1 %v10192_v46  ;;  %175 = vadd.xlane.f32.xlu0 %v10194_v49 }
 0x125   :  { %177 = vadd.xlane.f32.xlu1 %v10198_v50  ;;  %179 = vadd.xlane.f32.xlu0 %v10200_v51 }
 0x129   :  { %181 = vadd.xlane.f32.xlu1 %v10204_v52  ;;  %183 = vadd.xlane.f32.xlu0 %v10206_v53 }
 0x12d   :  { %185 = vadd.xlane.f32.xlu1 %v10210_v54  ;;  %187 = vadd.xlane.f32.xlu0 %v10212_v57 }
 0x131   :  { %189 = vadd.xlane.f32.xlu1 %v10216_v58 }
 0x17e   :  { %v305_v59 = vpop.xlane.xlu0 %304 }
 0x17f   :  { %v368_v60 = vmul.f32 0.0078125, %v305_v59 }
 0x181   :  { %v400_v61 = vadd.f32 1e-05, %v368_v60 }
 0x182   :  { %v307_v62 = vpop.xlane.xlu1 %306  ;;  %v309_v63 = vpop.xlane.xlu0 %308 }
 0x183   :  { %9104 = vrsqrt.f32 %v400_v61  ;;  %v369_v0 = vmul.f32 0.0078125, %v307_v62  ;;  %v370_v3 = vmul.f32 0.0078125, %v309_v63 }
 0x185   :  { %v401_v4 = vadd.f32 1e-05, %v369_v0  ;;  %v402_v5 = vadd.f32 1e-05, %v370_v3 }
 0x186   :  { %v311_v6 = vpop.xlane.xlu1 %310  ;;  %v313_v7 = vpop.xlane.xlu0 %312 }
 0x187   :  { %9106 = vrsqrt.f32 %v401_v4  ;;  %v371_v8 = vmul.f32 0.0078125, %v311_v6  ;;  %v372_v16 = vmul.f32 0.0078125, %v313_v7 }
 0x188   :  { %9108 = vrsqrt.f32 %v402_v5 }
 0x189   :  { %v403_v9 = vadd.f32 1e-05, %v371_v8  ;;  %v404_v21 = vadd.f32 1e-05, %v372_v16 }
 0x18a   :  { %v315_v17 = vpop.xlane.xlu1 %314  ;;  %v317_v18 = vpop.xlane.xlu0 %316 }
 0x18b   :  { %9110 = vrsqrt.f32 %v403_v9  ;;  %v373_v19 = vmul.f32 0.0078125, %v315_v17  ;;  %v374_v33 = vmul.f32 0.0078125, %v317_v18 }
 0x18d   :  { %v9105_v20 = vpop.eup %9104  ;;  %v405_v22 = vadd.f32 1e-05, %v373_v19  ;;  %v406_v63 = vadd.f32 1e-05, %v374_v33 }
 0x18e   :  { %v319_v12 = vpop.xlane.xlu1 %318  ;;  %v321_v26 = vpop.xlane.xlu0 %320  ;;  %v464_v27 = vmul.f32 %v9105_v20, %v10095_v23  ;;  %v10230_v23 = vld [vmem:[%s14172_s2] ss:$0 sm:$0xff]  ;;  %s9931_s2 = smov 32  }
 0x18f   :  { %9112 = vrsqrt.f32 %v405_v22  ;;  %v375_v28 = vmul.f32 0.0078125, %v319_v12  ;;  %v376_v17 = vmul.f32 0.0078125, %v321_v26 }
 0x190   :  { %9114 = vrsqrt.f32 %v404_v21  ;;  %v503_v42 = vmul.f32 %v10223_v29, %v464_v27 }
 0x191   :  { %v9107_v30 = vpop.eup %9106  ;;  %v407_v60 = vadd.f32 1e-05, %v375_v28  ;;  %v408_v12 = vadd.f32 1e-05, %v376_v17 }
 0x192   :  { %v323_v15 = vpop.xlane.xlu1 %322  ;;  %v325_v36 = vpop.xlane.xlu0 %324  ;;  %v465_v37 = vmul.f32 %v9107_v30, %v10103_v31  ;;  %v542_v4 = vadd.f32 %v10230_v23, %v503_v42 }
 0x193   :  { %v9109_v59 = vpop.eup %9108  ;;  %9116 = vrsqrt.f32 %v407_v60  ;;  %v377_v7 = vmul.f32 0.0078125, %v323_v15  ;;  %v378_v60 = vmul.f32 0.0078125, %v325_v36 }
 0x194   :  { %v504_v61 = vmul.f32 %v10223_v29, %v465_v37  ;;  %v466_v5 = vmul.f32 %v9109_v59, %v10097_v24  ;;  %9118 = vrsqrt.f32 %v406_v63 }
 0x195   :  { %v9111_v62 = vpop.eup %9110  ;;  %v409_v24 = vadd.f32 1e-05, %v377_v7 }
 0x196   :  { %v327_v0 = vpop.xlane.xlu1 %326  ;;  %v10233_v3 = vpop.xlane.xlu0 %328  ;;  %v543_v31 = vadd.f32 %v10230_v23, %v504_v61  ;;  %v467_v6 = vmul.f32 %v9111_v62, %v10105_v32  ;;  %v505_v20 = vmul.f32 %v10223_v29, %v466_v5 }
 0x197   :  { %v379_v27 = vmul.f32 0.0078125, %v327_v0  ;;  %9120 = vrsqrt.f32 %v409_v24 }
 0x198   :  { %v10239_v8 = vpack.c.bf16 %v543_v31, %v542_v4  ;;  %v506_v9 = vmul.f32 %v10223_v29, %v467_v6  ;;  %v544_v30 = vadd.f32 %v10230_v23, %v505_v20  ;;  %9122 = vrsqrt.f32 %v408_v12 }
 0x199   :  { %v9113_v16 = vpop.eup %9112  ;;  %v411_v61 = vadd.f32 1e-05, %v379_v27  ;;  %v410_v6 = vadd.f32 1e-05, %v378_v60 }
 0x19a   :  { %v331_v18 = vpop.xlane.xlu1 %330  ;;  %783 = vmatmul.mubr.bf16.vlgmr.msra.gmra.mrb[0].mxu0 %v10239_v8  ;;  %v10243_v19 = vpop.xlane.xlu0 %332  ;;  %v545_v32 = vadd.f32 %v10230_v23, %v506_v9  ;;  %v469_v22 = vmul.f32 %v9113_v16, %v10113_v40 }
 0x19b   :  { %v9115_v21 = vpop.eup %9114  ;;  %792 = vmatprep.mubr.bf16.mxu0 %v14183_v45  ;;  %9124 = vrsqrt.f32 %v411_v61  ;;  %v381_v16 = vmul.f32 0.0078125, %v331_v18  ;;  %v380_v18 = vmul.f32 0.0078125, %v10233_v3 }
 0x19c   :  { %v468_v33 = vmul.f32 %v9115_v21, %v10111_v39  ;;  %v10253_v37 = vpack.c.bf16 %v545_v32, %v544_v30  ;;  %v508_v42 = vmul.f32 %v10223_v29, %v469_v22  ;;  %9126 = vrsqrt.f32 %v410_v6 }
 0x19d   :  { %v9117_v59 = vpop.eup %9116  ;;  %v413_v30 = vadd.f32 1e-05, %v381_v16 }
 0x19e   :  { %v10249_v28 = vpop.xlane.xlu1 %334  ;;  %v192_v26 = vpop.xlane.xlu0 %191  ;;  %v507_v0 = vmul.f32 %v10223_v29, %v468_v33  ;;  %v547_v36 = vadd.f32 %v10230_v23, %v508_v42 }
 0x19f   :  { %v232_v15 = vmul.f32 0.0078125, %v192_v26  ;;  %v9119_v39 = vpop.eup %9118  ;;  %9128 = vrsqrt.f32 %v413_v30 }
 0x1a0   :  { %v546_v21 = vadd.f32 %v10230_v23, %v507_v0  ;;  %v470_v24 = vmul.f32 %v9119_v39, %v10120_v47 }
 0x1a1   :  { %v10257_v40 = vsub.f32 %v10169_v14, %v232_v15  ;;  %v471_v14 = vmul.f32 %v9117_v59, %v10123_v48  ;;  %v9121_v27 = vpop.eup %9120 }
 0x1a2   :  { %v194_v62 = vpop.xlane.xlu1 %193  ;;  %793 = vmatmul.mubr.bf16.gmra.mrb[4].mxu0 %v10253_v37  ;;  %v196_v63 = vpop.xlane.xlu0 %195  ;;  %v10278_v12 = vpack.c.bf16 %v547_v36, %v546_v21  ;;  %v509_v42 = vmul.f32 %v10223_v29, %v470_v24 }
 0x1a3   :  { %v233_v4 = vmul.f32 0.0078125, %v194_v62  ;;  %v234_v31 = vmul.f32 0.0078125, %v196_v63  ;;  %v296_v5 = vmul.f32 %v10257_v40, %v10257_v40  ;;  %802 = vmatprep.mubr.bf16.mxu0 %v14183_v45  ;;  %v9123_v59 = vpop.eup %9122  ;;  %v473_v62 = vmul.f32 %v9121_v27, %v10133_v56 }
 0x1a4   :  { %v412_v63 = vadd.f32 1e-05, %v380_v18  ;;  %v548_v36 = vadd.f32 %v10230_v23, %v509_v42 }
 0x1a5   :  { %352 = vadd.xlane.f32.xlu0 %v296_v5  ;;  %v10267_v7 = vsub.f32 %v10172_v34, %v233_v4  ;;  %v10270_v9 = vsub.f32 %v10174_v35, %v234_v31  ;;  %v510_v35 = vmul.f32 %v10223_v29, %v471_v14  ;;  %v383_v4 = vmul.f32 0.0078125, %v10249_v28 }
 0x1a6   :  { %v198_v17 = vpop.xlane.xlu1 %197  ;;  %v200_v20 = vpop.xlane.xlu0 %199  ;;  %v472_v14 = vmul.f32 %v9123_v59, %v10130_v55  ;;  %9130 = vrsqrt.f32 %v412_v63  ;;  %v382_v28 = vmul.f32 0.0078125, %v10243_v19 }
 0x1a7   :  { %v235_v32 = vmul.f32 0.0078125, %v198_v17  ;;  %v236_v22 = vmul.f32 0.0078125, %v200_v20  ;;  %v297_v48 = vmul.f32 %v10267_v7, %v10267_v7  ;;  %v298_v34 = vmul.f32 %v10270_v9, %v10270_v9  ;;  %v9125_v17 = vpop.eup %9124 }
 0x1a8   :  { %v512_v20 = vmul.f32 %v10223_v29, %v473_v62  ;;  %v415_v24 = vadd.f32 1e-05, %v383_v4  ;;  %v475_v18 = vmul.f32 %v9125_v17, %v10143_v2  ;;  %v414_v30 = vadd.f32 1e-05, %v382_v28 }
 0x1a9   :  { %354 = vadd.xlane.f32.xlu1 %v297_v48  ;;  %356 = vadd.xlane.f32.xlu0 %v298_v34  ;;  %v10283_v47 = vsub.f32 %v10178_v38, %v235_v32  ;;  %v10286_v26 = vsub.f32 %v10180_v41, %v236_v22  ;;  %v549_v41 = vadd.f32 %v10230_v23, %v510_v35  ;;  %v9127_v34 = vpop.eup %9126 }
 0x1aa   :  { %v202_v33 = vpop.xlane.xlu1 %201  ;;  %803 = vmatmul.mubr.bf16.gmra.mrb[8].mxu0 %v10278_v12  ;;  %v204_v15 = vpop.xlane.xlu0 %203  ;;  %v511_v48 = vmul.f32 %v10223_v29, %v472_v14  ;;  %9132 = vrsqrt.f32 %v415_v24 }
 0x1ab   :  { %v237_v60 = vmul.f32 0.0078125, %v202_v33  ;;  %v238_v61 = vmul.f32 0.0078125, %v204_v15  ;;  %v299_v3 = vmul.f32 %v10283_v47, %v10283_v47  ;;  %v300_v38 = vmul.f32 %v10286_v26, %v10286_v26  ;;  %812 = vmatprep.mubr.bf16.mxu0 %v14183_v45 }
 0x1ac   :  { %9134 = vrsqrt.f32 %v414_v30 }
 0x1ad   :  { %358 = vadd.xlane.f32.xlu1 %v299_v3  ;;  %360 = vadd.xlane.f32.xlu0 %v300_v38  ;;  %v10298_v0 = vsub.f32 %v10184_v43, %v237_v60  ;;  %v10301_v39 = vsub.f32 %v10186_v44, %v238_v61  ;;  %v10310_v44 = vpack.c.bf16 %v549_v41, %v548_v36 }
 0x1ae   :  { %v206_v31 = vpop.xlane.xlu1 %205  ;;  %v176_v5 = vpop.xlane.xlu0 %175  ;;  %v550_v60 = vadd.f32 %v10230_v23, %v511_v48  ;;  %v474_v61 = vmul.f32 %v9127_v34, %v10140_v1 }
 0x1af   :  { %v239_v6 = vmul.f32 0.0078125, %v206_v31  ;;  %v224_v56 = vmul.f32 0.0078125, %v176_v5  ;;  %v301_v16 = vmul.f32 %v10298_v0, %v10298_v0  ;;  %v302_v43 = vmul.f32 %v10301_v39, %v10301_v39 }
 0x1b0   :  { %v513_v5 = vmul.f32 %v10223_v29, %v474_v61 }
 0x1b1   :  { %362 = vadd.xlane.f32.xlu1 %v301_v16  ;;  %364 = vadd.xlane.f32.xlu0 %v302_v43  ;;  %v10315_v55 = vsub.f32 %v10192_v46, %v239_v6  ;;  %v10318_v21 = vsub.f32 %v10194_v49, %v224_v56  ;;  %v551_v49 = vadd.f32 %v10230_v23, %v512_v20 }
 0x1b2   :  { %v178_v32 = vpop.xlane.xlu1 %177  ;;  %813 = vmatmul.mubr.bf16.gmra.mrb[12].mxu0 %v10310_v44  ;;  %v180_v22 = vpop.xlane.xlu0 %179  ;;  %v552_v28 = vadd.f32 %v10230_v23, %v513_v5 }
 0x1b3   :  { %v225_v35 = vmul.f32 0.0078125, %v178_v32  ;;  %v226_v27 = vmul.f32 0.0078125, %v180_v22  ;;  %v303_v19 = vmul.f32 %v10315_v55, %v10315_v55  ;;  %v288_v46 = vmul.f32 %v10318_v21, %v10318_v21  ;;  %822 = vmatprep.mubr.bf16.mxu0 %v14183_v45 }
 0x1b4   :  { %v10341_v62 = vpack.c.bf16 %v551_v49, %v550_v60 }
 0x1b5   :  { %366 = vadd.xlane.f32.xlu1 %v303_v19  ;;  %336 = vadd.xlane.f32.xlu0 %v288_v46  ;;  %v10330_v33 = vsub.f32 %v10198_v50, %v225_v35  ;;  %v10333_v15 = vsub.f32 %v10200_v51, %v226_v27  ;;  %v9129_v50 = vpop.eup %9128  ;;  %v514_v51 = vmul.f32 %v10223_v29, %v475_v18 }
 0x1b6   :  { %v182_v42 = vpop.xlane.xlu1 %181  ;;  %v184_v59 = vpop.xlane.xlu0 %183 }
 0x1b7   :  { %v227_v3 = vmul.f32 0.0078125, %v182_v42  ;;  %v228_v38 = vmul.f32 0.0078125, %v184_v59  ;;  %v289_v2 = vmul.f32 %v10330_v33, %v10330_v33  ;;  %v290_v41 = vmul.f32 %v10333_v15, %v10333_v15  ;;  %v9131_v36 = vpop.eup %9130 }
 0x1b8   :  { %v476_v24 = vmul.f32 %v9131_v36, %v10150_v10  ;;  %v9133_v48 = vpop.eup %9132 }
 0x1b9   :  { %338 = vadd.xlane.f32.xlu1 %v289_v2  ;;  %340 = vadd.xlane.f32.xlu0 %v290_v41  ;;  %v10345_v63 = vsub.f32 %v10204_v52, %v227_v3  ;;  %v10348_v1 = vsub.f32 %v10206_v53, %v228_v38  ;;  %v553_v52 = vadd.f32 %v10230_v23, %v514_v51  ;;  %v9135_v35 = vpop.eup %9134 }
 0x1ba   :  { %v186_v4 = vpop.xlane.xlu1 %185  ;;  %823 = vmatmul.mubr.bf16.gmra.mrb[16].mxu0 %v10341_v62  ;;  %v188_v31 = vpop.xlane.xlu0 %187  ;;  %v477_v53 = vmul.f32 %v9129_v50, %v10153_v11  ;;  %v515_v10 = vmul.f32 %v10223_v29, %v476_v24  ;;  %v479_v46 = vmul.f32 %v9133_v48, %v10163_v25  ;;  %v10394_v25 = vld [vmem:[#allocation6 + $0x8] ss:$12 sps:$4 sm:$0xff]  }
 0x1bb   :  { %v229_v14 = vmul.f32 0.0078125, %v186_v4  ;;  %v230_v6 = vmul.f32 0.0078125, %v188_v31  ;;  %v291_v56 = vmul.f32 %v10345_v63, %v10345_v63  ;;  %v292_v16 = vmul.f32 %v10348_v1, %v10348_v1  ;;  %832 = vmatprep.mubr.bf16.mxu0 %v14183_v45  ;;  %8279 = vmatprep.subr.bf16.mxu1 %v10394_v25 }
 0x1bc   :  { %v10371_v34 = vpack.c.bf16 %v553_v52, %v552_v28  ;;  %v554_v49 = vadd.f32 %v10230_v23, %v515_v10  ;;  %v518_v30 = vmul.f32 %v10223_v29, %v479_v46 }
 0x1bd   :  { %342 = vadd.xlane.f32.xlu1 %v291_v56  ;;  %344 = vadd.xlane.f32.xlu0 %v292_v16  ;;  %v10360_v43 = vsub.f32 %v10210_v54, %v229_v14  ;;  %v10363_v17 = vsub.f32 %v10212_v57, %v230_v6  ;;  %v516_v54 = vmul.f32 %v10223_v29, %v477_v53 }
 0x1be   :  { %v190_v20 = vpop.xlane.xlu1 %189  ;;  %v557_v59 = vadd.f32 %v10230_v23, %v518_v30 }
 0x1bf   :  { %v231_v32 = vmul.f32 0.0078125, %v190_v20  ;;  %v293_v22 = vmul.f32 %v10360_v43, %v10360_v43  ;;  %v294_v11 = vmul.f32 %v10363_v17, %v10363_v17  ;;  %v555_v19 = vadd.f32 %v10230_v23, %v516_v54 }
 0x1c1   :  { %346 = vadd.xlane.f32.xlu1 %v293_v22  ;;  %348 = vadd.xlane.f32.xlu0 %v294_v11  ;;  %v10375_v57 = vsub.f32 %v10216_v58, %v231_v32  ;;  %v478_v58 = vmul.f32 %v9135_v35, %v10160_v13  ;;  %v10386_v18 = vpack.c.bf16 %v555_v19, %v554_v49 }
 0x1c2   :  { %833 = vmatmul.mubr.bf16.gmra.mrb[20].mxu0 %v10371_v34 }
 0x1c3   :  { %v295_v27 = vmul.f32 %v10375_v57, %v10375_v57  ;;  %842 = vmatprep.mubr.bf16.mxu0 %v14183_v45  ;;  %v517_v42 = vmul.f32 %v10223_v29, %v478_v58 }
 0x1c5   :  { %350 = vadd.xlane.f32.xlu1 %v295_v27  ;;  %v556_v60 = vadd.f32 %v10230_v23, %v517_v42 }
 0x1c7   :  { %v10396_v61 = vpack.c.bf16 %v557_v59, %v556_v60 }
 0x1ca   :  { %843 = vmatmul.mubr.bf16.gmra.mrb[24].mxu0 %v10386_v18 }
 0x1cb   :  { %852 = vmatprep.mubr.bf16.mxu0 %v14183_v45 }
 0x1d2   :  { %853 = vmatmul.mubr.bf16.gmra.mrb[28].mxu0 %v10396_v61 }
 0x1d3   :  { %862 = vmatprep.mubr.bf16.mxu0 %v14183_v45 }
 0x232   :  { %v353_v13 = vpop.xlane.xlu0 %352 }
 0x233   :  { %v392_v3 = vmul.f32 0.0078125, %v353_v13 }
 0x235   :  { %v424_v38 = vadd.f32 1e-05, %v392_v3 }
 0x236   :  { %v355_v2 = vpop.xlane.xlu1 %354  ;;  %v357_v41 = vpop.xlane.xlu0 %356 }
 0x237   :  { %9136 = vrsqrt.f32 %v424_v38  ;;  %v393_v50 = vmul.f32 0.0078125, %v355_v2  ;;  %v394_v51 = vmul.f32 0.0078125, %v357_v41 }
 0x239   :  { %v425_v4 = vadd.f32 1e-05, %v393_v50  ;;  %v426_v31 = vadd.f32 1e-05, %v394_v51 }
 0x23a   :  { %v359_v5 = vpop.xlane.xlu1 %358  ;;  %v361_v36 = vpop.xlane.xlu0 %360 }
 0x23b   :  { %9138 = vrsqrt.f32 %v425_v4  ;;  %v395_v14 = vmul.f32 0.0078125, %v359_v5  ;;  %v396_v6 = vmul.f32 0.0078125, %v361_v36 }
 0x23c   :  { %9140 = vrsqrt.f32 %v426_v31 }
 0x23d   :  { %v427_v56 = vadd.f32 1e-05, %v395_v14  ;;  %v428_v20 = vadd.f32 1e-05, %v396_v6  ;;  %v9009_v14 = vld [vmem:[#allocation6 + $0x20] ss:$12 sps:$4 sm:$0xff]  }
 0x23e   :  { %v363_v16 = vpop.xlane.xlu1 %362  ;;  %v365_v52 = vpop.xlane.xlu0 %364 }
 0x23f   :  { %9142 = vrsqrt.f32 %v427_v56  ;;  %v397_v53 = vmul.f32 0.0078125, %v363_v16  ;;  %v398_v10 = vmul.f32 0.0078125, %v365_v52 }
 0x241   :  { %v9137_v28 = vpop.eup %9136  ;;  %v429_v24 = vadd.f32 1e-05, %v397_v53  ;;  %v430_v13 = vadd.f32 1e-05, %v398_v10 }
 0x242   :  { %v367_v32 = vpop.xlane.xlu1 %366  ;;  %v337_v22 = vpop.xlane.xlu0 %336  ;;  %v488_v11 = vmul.f32 %v9137_v28, %v10257_v40 }
 0x243   :  { %9144 = vrsqrt.f32 %v429_v24  ;;  %v399_v48 = vmul.f32 0.0078125, %v367_v32  ;;  %v384_v54 = vmul.f32 0.0078125, %v337_v22  ;;  %v9010_v24 = vld [vmem:[#allocation6 + $0x38] ss:$12 sps:$4 sm:$0xff]  }
 0x244   :  { %9146 = vrsqrt.f32 %v428_v20  ;;  %v527_v19 = vmul.f32 %v10223_v29, %v488_v11 }
 0x245   :  { %v9139_v35 = vpop.eup %9138  ;;  %v416_v27 = vadd.f32 1e-05, %v384_v54  ;;  %v431_v46 = vadd.f32 1e-05, %v399_v48 }
 0x246   :  { %v339_v49 = vpop.xlane.xlu1 %338  ;;  %v341_v58 = vpop.xlane.xlu0 %340  ;;  %v489_v30 = vmul.f32 %v9139_v35, %v10267_v7  ;;  %v566_v41 = vadd.f32 %v10230_v23, %v527_v19 }
 0x247   :  { %v9141_v42 = vpop.eup %9140  ;;  %v385_v59 = vmul.f32 0.0078125, %v339_v49  ;;  %v386_v60 = vmul.f32 0.0078125, %v341_v58  ;;  %9148 = vrsqrt.f32 %v416_v27  ;;  %v9011_v58 = vld [vmem:[#allocation6 + $0x50] ss:$12 sps:$4 sm:$0xff]  }
 0x248   :  { %v528_v40 = vmul.f32 %v10223_v29, %v489_v30  ;;  %9150 = vrsqrt.f32 %v431_v46  ;;  %v490_v31 = vmul.f32 %v9141_v42, %v10270_v9 }
 0x249   :  { %v9143_v3 = vpop.eup %9142  ;;  %v417_v38 = vadd.f32 1e-05, %v385_v59  ;;  %v418_v2 = vadd.f32 1e-05, %v386_v60 }
 0x24a   :  { %v343_v50 = vpop.xlane.xlu1 %342  ;;  %v345_v51 = vpop.xlane.xlu0 %344  ;;  %v567_v4 = vadd.f32 %v10230_v23, %v528_v40  ;;  %v491_v7 = vmul.f32 %v9143_v3, %v10283_v47  ;;  %v529_v9 = vmul.f32 %v10223_v29, %v490_v31 }
 0x24b   :  { %9152 = vrsqrt.f32 %v417_v38  ;;  %v387_v5 = vmul.f32 0.0078125, %v343_v50  ;;  %v388_v52 = vmul.f32 0.0078125, %v345_v51 }
 0x24c   :  { %9154 = vrsqrt.f32 %v430_v13  ;;  %v10409_v36 = vpack.c.bf16 %v567_v4, %v566_v41  ;;  %v530_v6 = vmul.f32 %v10223_v29, %v491_v7  ;;  %v568_v27 = vadd.f32 %v10230_v23, %v529_v9 }
 0x24d   :  { %v9145_v56 = vpop.eup %9144  ;;  %9156 = vrsqrt.f32 %v418_v2  ;;  %v419_v16 = vadd.f32 1e-05, %v387_v5  ;;  %v420_v22 = vadd.f32 1e-05, %v388_v52  ;;  %v9012_v2 = vld [vmem:[#allocation6 + $0x68] ss:$12 sps:$4 sm:$0xff]  }
 0x24e   :  { %v9147_v53 = vpop.eup %9146  ;;  %v347_v20 = vpop.xlane.xlu1 %346  ;;  %903 = vmatmul.mubr.bf16.vlgmr.msra.gmra.mrb[0].mxu1 %v10409_v36  ;;  %v569_v28 = vadd.f32 %v10230_v23, %v530_v6  ;;  %v493_v32 = vmul.f32 %v9145_v56, %v10298_v0 }
 0x24f   :  { %9158 = vrsqrt.f32 %v419_v16  ;;  %v389_v47 = vmul.f32 0.0078125, %v347_v20  ;;  %8280 = vmatpush3.bf16.msra.mxu1 %v10394_v25  ;;  %912 = vmatprep.mubr.bf16.mxu1 %v14183_v45  ;;  %v492_v48 = vmul.f32 %v9147_v53, %v10286_v26  ;;  %v349_v10 = vpop.xlane.xlu0 %348 }
 0x250   :  { %8281 = vmatprep.subr.bf16.mxu1 %v9009_v14  ;;  %v10421_v49 = vpack.c.bf16 %v569_v28, %v568_v27  ;;  %v532_v0 = vmul.f32 %v10223_v29, %v493_v32  ;;  %v390_v26 = vmul.f32 0.0078125, %v349_v10 }
 0x251   :  { %v421_v11 = vadd.f32 1e-05, %v389_v47  ;;  %v9149_v54 = vpop.eup %9148  ;;  %v531_v42 = vmul.f32 %v10223_v29, %v492_v48  ;;  %v9014_v47 = vld [vmem:[#allocation6 + $0x98] ss:$12 sps:$4 sm:$0xff]  }
 0x252   :  { %v351_v35 = vpop.xlane.xlu1 %350  ;;  %v480_v25 = vmul.f32 %v9149_v54, %v10318_v21  ;;  %v9151_v46 = vpop.eup %9150  ;;  %v571_v38 = vadd.f32 %v10230_v23, %v532_v0  ;;  %v422_v51 = vadd.f32 1e-05, %v390_v26  ;;  %v9015_v54 = vld [vmem:[#allocation6 + $0xb0] ss:$12 sps:$4 sm:$0xff]  }
 0x253   :  { %9160 = vrsqrt.f32 %v421_v11  ;;  %v391_v19 = vmul.f32 0.0078125, %v351_v35  ;;  %8282 = vmatpush3.bf16.msra.mxu1 %v9009_v14  ;;  %v495_v41 = vmul.f32 %v9151_v46, %v10315_v55  ;;  %v570_v4 = vadd.f32 %v10230_v23, %v531_v42  ;;  %v9013_v55 = vld [vmem:[#allocation6 + $0x80] ss:$12 sps:$4 sm:$0xff]  }
 0x254   :  { %8283 = vmatprep.subr.bf16.mxu1 %v9010_v24  ;;  %9162 = vrsqrt.f32 %v420_v22  ;;  %v519_v13 = vmul.f32 %v10223_v29, %v480_v25 }
 0x255   :  { %v9153_v30 = vpop.eup %9152  ;;  %v423_v40 = vadd.f32 1e-05, %v391_v19  ;;  %v10440_v56 = vpack.c.bf16 %v571_v38, %v570_v4 }
 0x256   :  { %v9155_v59 = vpop.eup %9154  ;;  %913 = vmatmul.mubr.bf16.gmra.mrb[4].mxu1 %v10421_v49  ;;  %v481_v60 = vmul.f32 %v9153_v30, %v10330_v33  ;;  %v558_v31 = vadd.f32 %v10230_v23, %v519_v13 }
 0x257   :  { %v9157_v21 = vpop.eup %9156  ;;  %8284 = vmatpush3.bf16.msra.mxu1 %v9010_v24  ;;  %922 = vmatprep.mubr.bf16.mxu1 %v14183_v45  ;;  %v494_v33 = vmul.f32 %v9155_v59, %v10301_v39  ;;  %9164 = vrsqrt.f32 %v423_v40  ;;  %v534_v39 = vmul.f32 %v10223_v29, %v495_v41 }
 0x258   :  { %8285 = vmatprep.subr.bf16.mxu1 %v9011_v58  ;;  %v520_v3 = vmul.f32 %v10223_v29, %v481_v60  ;;  %v482_v5 = vmul.f32 %v9157_v21, %v10333_v15  ;;  %9166 = vrsqrt.f32 %v422_v51 }
 0x259   :  { %v9159_v50 = vpop.eup %9158  ;;  %v573_v9 = vadd.f32 %v10230_v23, %v534_v39 }
 0x25a   :  { %v559_v7 = vadd.f32 %v10230_v23, %v520_v3  ;;  %v483_v14 = vmul.f32 %v9159_v50, %v10345_v63  ;;  %v521_v15 = vmul.f32 %v10223_v29, %v482_v5  ;;  %v533_v63 = vmul.f32 %v10223_v29, %v494_v33 }
 0x25b   :  { %8286 = vmatpush3.bf16.msra.mxu1 %v9011_v58 }
 0x25c   :  { %v10438_v6 = vpack.c.bf16 %v559_v7, %v558_v31  ;;  %8287 = vmatprep.subr.bf16.mxu1 %v9012_v2  ;;  %v522_v16 = vmul.f32 %v10223_v29, %v483_v14  ;;  %v560_v24 = vadd.f32 %v10230_v23, %v521_v15  ;;  %v572_v32 = vadd.f32 %v10230_v23, %v533_v63 }
 0x25d   :  { %v9161_v52 = vpop.eup %9160 }
 0x25e   :  { %863 = vmatmul.mubr.bf16.gmra.mrb[32].mxu0 %v10438_v6  ;;  %923 = vmatmul.mubr.bf16.gmra.mrb[8].mxu1 %v10440_v56  ;;  %v9163_v53 = vpop.eup %9162  ;;  %v561_v20 = vadd.f32 %v10230_v23, %v522_v16  ;;  %v485_v28 = vmul.f32 %v9161_v52, %v10360_v43  ;;  %v10458_v48 = vpack.c.bf16 %v573_v9, %v572_v32 }
 0x25f   :  { %8288 = vmatpush3.bf16.msra.mxu1 %v9012_v2  ;;  %872 = vmatprep.mubr.bf16.mxu0 %v14183_v45  ;;  %v484_v22 = vmul.f32 %v9163_v53, %v10348_v1 }
 0x260   :  { %8289 = vmatprep.subr.bf16.mxu1 %v9013_v55  ;;  %932 = vmatprep.mubr.bf16.mxu1 %v14183_v45  ;;  %v10456_v11 = vpack.c.bf16 %v561_v20, %v560_v24  ;;  %v524_v10 = vmul.f32 %v10223_v29, %v485_v28 }
 0x261   :  { %v9165_v35 = vpop.eup %9164  ;;  %v523_v43 = vmul.f32 %v10223_v29, %v484_v22 }
 0x262   :  { %v9167_v27 = vpop.eup %9166  ;;  %v563_v1 = vadd.f32 %v10230_v23, %v524_v10  ;;  %v487_v19 = vmul.f32 %v9165_v35, %v10375_v57 }
 0x263   :  { %8290 = vmatpush3.bf16.msra.mxu1 %v9013_v55  ;;  %v562_v25 = vadd.f32 %v10230_v23, %v523_v43  ;;  %v486_v46 = vmul.f32 %v9167_v27, %v10363_v17 }
 0x264   :  { %8291 = vmatprep.subr.bf16.mxu1 %v9014_v47  ;;  %v526_v0 = vmul.f32 %v10223_v29, %v487_v19 }
 0x265   :  { %v584_v58 = vpack.c.bf16 %v563_v1, %v562_v25 }
 0x266   :  { %873 = vmatmul.mubr.bf16.gmra.mrb[36].mxu0 %v10456_v11  ;;  %933 = vmatmul.mubr.bf16.gmra.mrb[12].mxu1 %v10458_v48  ;;  %v565_v17 = vadd.f32 %v10230_v23, %v526_v0 }
 0x267   :  { %8292 = vmatpush3.bf16.msra.mxu1 %v9014_v47  ;;  %8295 = vmatprep.mubr.bf16.mxu1 %v10239_v8  ;;  %v525_v8 = vmul.f32 %v10223_v29, %v486_v46 }
 0x268   :  { %8293 = vmatprep.subr.bf16.mxu1 %v9015_v54  ;;  %882 = vmatprep.mubr.bf16.mxu0 %v14183_v45 }
 0x269   :  { %v564_v13 = vadd.f32 %v10230_v23, %v525_v8 }
 0x26b   :  { %8294 = vmatpush3.bf16.msra.mxu1 %v9015_v54 }
 0x26d   :  { %v784_v30 = vpop.f32.mrb[0].mxu0 }
 0x26e   :  { %v786_v26 = vpop.f32.mrb[1].mxu0  ;;  %883 = vmatmul.mubr.bf16.gmra.mrb[40].mxu0 %v584_v58  ;;  %8296 = vmatmul.mubr.bf16.vlgmr.msra.gmra.mrb[16].mxu1 %v10253_v37  ;;  %v585_v37 = vpack.c.bf16 %v565_v17, %v564_v13 }
 0x26f   :  { %v788_v42 = vpop.f32.mrb[2].mxu0  ;;  %8299 = vmatprep.mubr.bf16.mxu1 %v10278_v12  ;;  %892 = vmatprep.mubr.bf16.mxu0 %v14183_v45  ;;  %v14446_v45 = vmov 0 }
 0x270   :  { %v10475_v57 = vpack.c.bf16 %v788_v42, %v784_v30  ;;  %v790_v59 = vpop.f32.mrb[3].mxu0 }
 0x271   :  { %v10478_v60 = vpack.c.bf16 %v790_v59, %v786_v26 }
 0x272   :  { %14395 = vst [vmem:[#allocation17_spill] sm:$0xff] %v10475_v57 }
 0x273   :  { %1622 = vrot.lane.b32.xlu0 %v10478_v60, %s9930_s1  ;;  %8903 = vmatprep.subr.msk.bf16.mxu1 %vm14205_vm0, %v10478_v60  ;;  %v1189_v29 = vsel %vm14205_vm0, %v10478_v60, 0 }
 0x274   :  { %8328 = vmatpush3.bf16.xpose.msra.mxu1 %v1189_v29 }
 0x275   :  { %v794_v12 = vpop.f32.mrb[4].mxu0 }
 0x276   :  { %v796_v21 = vpop.f32.mrb[5].mxu0  ;;  %893 = vmatmul.mubr.bf16.gmra.mrb[44].mxu0 %v585_v37  ;;  %8300 = vmatmul.mubr.bf16.gmra.mrb[20].mxu1 %v10310_v44 }
 0x277   :  { %v798_v40 = vpop.f32.mrb[6].mxu0  ;;  %8303 = vmatprep.mubr.bf16.mxu1 %v10341_v62 }
 0x278   :  { %v10489_v23 = vpack.c.bf16 %v798_v40, %v794_v12  ;;  %v800_v3 = vpop.f32.mrb[7].mxu0 }
 0x279   :  { %v10491_v38 = vpack.c.bf16 %v800_v3, %v796_v21 }
 0x27b   :  { %1624 = vrot.lane.b32.xlu1 %v10491_v38, %s9930_s1  ;;  %8904 = vmatprep.subr.msk.bf16.mxu1 %vm14205_vm0, %v10491_v38  ;;  %v1192_v2 = vsel %vm14205_vm0, %v10491_v38, 0 }
 0x27c   :  { %8330 = vmatpush3.bf16.xpose.msra.mxu1 %v1192_v2 }
 0x27d   :  { %v804_v41 = vpop.f32.mrb[8].mxu0 }
 0x27e   :  { %v806_v44 = vpop.f32.mrb[9].mxu0  ;;  %8304 = vmatmul.mubr.bf16.gmra.mrb[24].mxu1 %v10371_v34 }
 0x27f   :  { %v808_v62 = vpop.f32.mrb[10].mxu0  ;;  %8307 = vmatprep.mubr.bf16.mxu1 %v10386_v18 }
 0x280   :  { %v10501_v50 = vpack.c.bf16 %v808_v62, %v804_v41  ;;  %v810_v51 = vpop.f32.mrb[11].mxu0 }
 0x281   :  { %v10503_v4 = vpack.c.bf16 %v810_v51, %v806_v44 }
 0x282   :  { %14396 = vst [vmem:[#allocation18_spill] sm:$0xff] %v10501_v50 }
 0x283   :  { %1626 = vrot.lane.b32.xlu1 %v10503_v4, %s9930_s1  ;;  %8905 = vmatprep.subr.msk.bf16.mxu1 %vm14205_vm0, %v10503_v4  ;;  %v1195_v33 = vsel %vm14205_vm0, %v10503_v4, 0 }
 0x284   :  { %8332 = vmatpush3.bf16.xpose.msra.mxu1 %v1195_v33 }
 0x285   :  { %v814_v31 = vpop.f32.mrb[12].mxu0 }
 0x286   :  { %v816_v34 = vpop.f32.mrb[13].mxu0  ;;  %8308 = vmatmul.mubr.bf16.gmra.mrb[28].mxu1 %v10396_v61 }
 0x287   :  { %v818_v18 = vpop.f32.mrb[14].mxu0  ;;  %8311 = vmatprep.mubr.bf16.mxu1 %v10438_v6 }
 0x288   :  { %v10513_v7 = vpack.c.bf16 %v818_v18, %v814_v31  ;;  %v820_v5 = vpop.f32.mrb[15].mxu0 }
 0x289   :  { %v10515_v14 = vpack.c.bf16 %v820_v5, %v816_v34 }
 0x28a   :  { %14397 = vst [vmem:[#allocation19_spill] sm:$0xff] %v10513_v7 }
 0x28b   :  { %1628 = vrot.lane.b32.xlu1 %v10515_v14, %s9930_s1  ;;  %8906 = vmatprep.subr.msk.bf16.mxu1 %vm14205_vm0, %v10515_v14  ;;  %v1198_v55 = vsel %vm14205_vm0, %v10515_v14, 0 }
 0x28c   :  { %8334 = vmatpush3.bf16.xpose.msra.mxu1 %v1198_v55 }
 0x28d   :  { %v824_v16 = vpop.f32.mrb[16].mxu0 }
 0x28e   :  { %v826_v61 = vpop.f32.mrb[17].mxu0  ;;  %8312 = vmatmul.mubr.bf16.gmra.mrb[32].mxu1 %v10456_v11 }
 0x28f   :  { %v828_v6 = vpop.f32.mrb[18].mxu0  ;;  %8315 = vmatprep.mubr.bf16.mxu1 %v584_v58 }
 0x290   :  { %v10524_v39 = vpack.c.bf16 %v828_v6, %v824_v16  ;;  %v830_v52 = vpop.f32.mrb[19].mxu0 }
 0x291   :  { %v10526_v15 = vpack.c.bf16 %v830_v52, %v826_v61 }
 0x292   :  { %14398 = vst [vmem:[#allocation20_spill] sm:$0xff] %v10524_v39 }
 0x293   :  { %1630 = vrot.lane.b32.xlu0 %v10526_v15, %s9930_s1  ;;  %8907 = vmatprep.subr.msk.bf16.mxu1 %vm14205_vm0, %v10526_v15  ;;  %v1201_v63 = vsel %vm14205_vm0, %v10526_v15, 0 }
 0x294   :  { %8336 = vmatpush3.bf16.xpose.msra.mxu1 %v1201_v63 }
 0x295   :  { %v834_v53 = vpop.f32.mrb[20].mxu0 }
 0x296   :  { %v836_v20 = vpop.f32.mrb[21].mxu0  ;;  %8316 = vmatmul.mubr.bf16.gmra.mrb[36].mxu1 %v585_v37 }
 0x297   :  { %v838_v9 = vpop.f32.mrb[22].mxu0  ;;  %8319 = vmatprep.mubr.bf16.mxu1 %v10409_v36 }
 0x298   :  { %v10535_v47 = vpack.c.bf16 %v838_v9, %v834_v53  ;;  %v840_v28 = vpop.f32.mrb[23].mxu0 }
 0x299   :  { %v10537_v24 = vpack.c.bf16 %v840_v28, %v836_v20 }
 0x29a   :  { %14399 = vst [vmem:[#allocation21_spill] sm:$0xff] %v10535_v47 }
 0x29b   :  { %1632 = vrot.lane.b32.xlu1 %v10537_v24, %s9930_s1  ;;  %8908 = vmatprep.subr.msk.bf16.mxu1 %vm14205_vm0, %v10537_v24  ;;  %v1204_v32 = vsel %vm14205_vm0, %v10537_v24, 0 }
 0x29c   :  { %8338 = vmatpush3.bf16.xpose.msra.mxu1 %v1204_v32 }
 0x29d   :  { %v844_v22 = vpop.f32.mrb[24].mxu0 }
 0x29e   :  { %v846_v11 = vpop.f32.mrb[25].mxu0  ;;  %8320 = vmatmul.mubr.bf16.gmra.mrb[40].mxu1 %v10421_v49 }
 0x29f   :  { %v848_v36 = vpop.f32.mrb[26].mxu0  ;;  %8323 = vmatprep.mubr.bf16.mxu1 %v10440_v56 }
 0x2a0   :  { %v10547_v54 = vpack.c.bf16 %v848_v36, %v844_v22  ;;  %v850_v10 = vpop.f32.mrb[27].mxu0 }
 0x2a1   :  { %v10549_v35 = vpack.c.bf16 %v850_v10, %v846_v11 }
 0x2a2   :  { %14400 = vst [vmem:[#allocation22_spill] sm:$0xff] %v10547_v54 }
 0x2a3   :  { %14401 = vst [vmem:[#allocation23_spill] sm:$0xff] %v10549_v35  ;;  %1634 = vrot.lane.b32.xlu0 %v10549_v35, %s9930_s1  ;;  %8909 = vmatprep.subr.msk.bf16.mxu1 %vm14205_vm0, %v10549_v35  ;;  %v1207_v43 = vsel %vm14205_vm0, %v10549_v35, 0 }
 0x2a4   :  { %8340 = vmatpush3.bf16.xpose.msra.mxu1 %v1207_v43 }
 0x2a5   :  { %v854_v27 = vpop.f32.mrb[28].mxu0 }
 0x2a6   :  { %v856_v49 = vpop.f32.mrb[29].mxu0  ;;  %8324 = vmatmul.mubr.bf16.gmra.mrb[44].mxu1 %v10458_v48 }
 0x2a7   :  { %v858_v56 = vpop.f32.mrb[30].mxu0  ;;  %1598 = vrot.lane.b32.xlu0 %v10475_v57, %s9930_s1  ;;  %8343 = vmatprep.mubr.msk.bf16.mxu1 %vm14205_vm0, %v10475_v57 }
 0x2a8   :  { %v10562_v1 = vpack.c.bf16 %v858_v56, %v854_v27  ;;  %v860_v19 = vpop.f32.mrb[31].mxu0 }
 0x2a9   :  { %v10564_v25 = vpack.c.bf16 %v860_v19, %v856_v49 }
 0x2aa   :  { %14402 = vst [vmem:[#allocation24_spill] sm:$0xff] %v10562_v1 }
 0x2ab   :  { %14403 = vst [vmem:[#allocation25_spill] sm:$0xff] %v10564_v25  ;;  %1636 = vrot.lane.b32.xlu1 %v10564_v25, %s9930_s1  ;;  %1600 = vrot.lane.b32.xlu0 %v10489_v23, %s9930_s1  ;;  %v1210_v48 = vsel %vm14205_vm0, %v10564_v25, 0 }
 0x2ac   :  { %8910 = vmatprep.subr.msk.bf16.mxu1 %vm14205_vm0, %v10564_v25 }
 0x2ad   :  { %8342 = vmatpush3.bf16.xpose.msra.mxu1 %v1210_v48 }
 0x2af   :  { %2177 = vrot.lane.b32.xlu1 %v10478_v60, %s9926_s0  ;;  %2181 = vrot.lane.b32.xlu0 %v10503_v4, %s9926_s0 }
 0x2b3   :  { %2179 = vrot.lane.b32.xlu1 %v10491_v38, %s9926_s0  ;;  %2185 = vrot.lane.b32.xlu0 %v10526_v15, %s9926_s0 }
 0x2b4   :  { %8344 = vmatmul.mubr.msk.bf16.vlgmr.msra.gmra.mrb[48].mxu1 %vm14205_vm0, %v10489_v23 }
 0x2b5   :  { %8347 = vmatprep.mubr.msk.bf16.mxu1 %vm14205_vm0, %v10501_v50 }
 0x2b7   :  { %2183 = vrot.lane.b32.xlu1 %v10515_v14, %s9926_s0  ;;  %1604 = vrot.lane.b32.xlu0 %v10513_v7, %s9930_s1 }
 0x2bb   :  { %1602 = vrot.lane.b32.xlu1 %v10501_v50, %s9930_s1  ;;  %1606 = vrot.lane.b32.xlu0 %v10524_v39, %s9930_s1 }
 0x2bc   :  { %8348 = vmatmul.mubr.msk.bf16.gmra.mrb[52].mxu1 %vm14205_vm0, %v10513_v7 }
 0x2bd   :  { %8351 = vmatprep.mubr.msk.bf16.mxu1 %vm14205_vm0, %v10524_v39 }
 0x2bf   :  { %2187 = vrot.lane.b32.xlu1 %v10537_v24, %s9926_s0  ;;  %2189 = vrot.lane.b32.xlu0 %v10549_v35, %s9926_s0 }
 0x2c3   :  { %1608 = vrot.lane.b32.xlu1 %v10535_v47, %s9930_s1  ;;  %1612 = vrot.lane.b32.xlu0 %v10562_v1, %s9930_s1 }
 0x2c4   :  { %8352 = vmatmul.mubr.msk.bf16.gmra.mrb[56].mxu1 %vm14205_vm0, %v10535_v47 }
 0x2c5   :  { %8355 = vmatprep.mubr.msk.bf16.mxu1 %vm14205_vm0, %v10547_v54 }
 0x2c7   :  { %1610 = vrot.lane.b32.xlu1 %v10547_v54, %s9930_s1  ;;  %2161 = vrot.lane.b32.xlu0 %v10475_v57, %s9926_s0 }
 0x2cb   :  { %2191 = vrot.lane.b32.xlu1 %v10564_v25, %s9926_s0  ;;  %2165 = vrot.lane.b32.xlu0 %v10501_v50, %s9926_s0 }
 0x2cc   :  { %8356 = vmatmul.mubr.msk.bf16.gmra.mrb[60].mxu1 %vm14205_vm0, %v10562_v1 }
 0x2cf   :  { %2163 = vrot.lane.b32.xlu1 %v10489_v23, %s9926_s0  ;;  %2169 = vrot.lane.b32.xlu0 %v10524_v39, %s9926_s0 }
 0x2d3   :  { %2167 = vrot.lane.b32.xlu1 %v10513_v7, %s9926_s0  ;;  %2173 = vrot.lane.b32.xlu0 %v10547_v54, %s9926_s0 }
 0x2d7   :  { %2171 = vrot.lane.b32.xlu1 %v10535_v47, %s9926_s0 }
 0x2db   :  { %2175 = vrot.lane.b32.xlu1 %v10562_v1, %s9926_s0 }
 0x2e5   :  { %v1623_v46 = vpop.permute.xlu0 %1622 }
 0x2e6   :  { %8911 = vmatprep.subr.msk.bf16.mxu0 %vm14205_vm0, %v1623_v46  ;;  %v1663_v58 = vsel %vm14205_vm0, %v1623_v46, 0 }
 0x2e7   :  { %8392 = vmatpush3.bf16.xpose.msra.mxu0 %v1663_v58 }
 0x2ed   :  { %v1625_v0 = vpop.permute.xlu1 %1624 }
 0x2ee   :  { %8912 = vmatprep.subr.msk.bf16.mxu0 %vm14205_vm0, %v1625_v0  ;;  %v1666_v30 = vsel %vm14205_vm0, %v1625_v0, 0 }
 0x2ef   :  { %8394 = vmatpush3.bf16.xpose.msra.mxu0 %v1666_v30 }
 0x2f5   :  { %v1627_v26 = vpop.permute.xlu1 %1626 }
 0x2f6   :  { %8913 = vmatprep.subr.msk.bf16.mxu0 %vm14205_vm0, %v1627_v26  ;;  %v1669_v8 = vsel %vm14205_vm0, %v1627_v26, 0 }
 0x2f7   :  { %8396 = vmatpush3.bf16.xpose.msra.mxu0 %v1669_v8 }
 0x2fd   :  { %v1629_v42 = vpop.permute.xlu1 %1628 }
 0x2fe   :  { %8914 = vmatprep.subr.msk.bf16.mxu0 %vm14205_vm0, %v1629_v42  ;;  %v1672_v59 = vsel %vm14205_vm0, %v1629_v42, 0 }
 0x2ff   :  { %8398 = vmatpush3.bf16.xpose.msra.mxu0 %v1672_v59 }
 0x305   :  { %v1631_v17 = vpop.permute.xlu0 %1630 }
 0x306   :  { %8915 = vmatprep.subr.msk.bf16.mxu0 %vm14205_vm0, %v1631_v17  ;;  %v1675_v13 = vsel %vm14205_vm0, %v1631_v17, 0 }
 0x307   :  { %8400 = vmatpush3.bf16.xpose.msra.mxu0 %v1675_v13 }
 0x30d   :  { %v1633_v29 = vpop.permute.xlu1 %1632 }
 0x30e   :  { %8916 = vmatprep.subr.msk.bf16.mxu0 %vm14205_vm0, %v1633_v29  ;;  %v1678_v37 = vsel %vm14205_vm0, %v1633_v29, 0 }
 0x30f   :  { %8402 = vmatpush3.bf16.xpose.msra.mxu0 %v1678_v37 }
 0x315   :  { %v1635_v12 = vpop.permute.xlu0 %1634 }
 0x316   :  { %8917 = vmatprep.subr.msk.bf16.mxu0 %vm14205_vm0, %v1635_v12  ;;  %v1681_v21 = vsel %vm14205_vm0, %v1635_v12, 0 }
 0x317   :  { %8404 = vmatpush3.bf16.xpose.msra.mxu0 %v1681_v21 }
 0x319   :  { %v1599_v40 = vpop.permute.xlu0 %1598 }
 0x31a   :  { %8407 = vmatprep.mubr.msk.bf16.mxu0 %vm14205_vm0, %v1599_v40 }
 0x31d   :  { %v1637_v3 = vpop.permute.xlu1 %1636  ;;  %v1601_v2 = vpop.permute.xlu0 %1600 }
 0x31e   :  { %8918 = vmatprep.subr.msk.bf16.mxu0 %vm14205_vm0, %v1637_v3  ;;  %v1684_v41 = vsel %vm14205_vm0, %v1637_v3, 0 }
 0x31f   :  { %8406 = vmatpush3.bf16.xpose.msra.mxu0 %v1684_v41 }
 0x321   :  { %v2178_v44 = vpop.permute.xlu1 %2177  ;;  %v904_v62 = vpop.f32.mrb[0].mxu1 }
 0x322   :  { %v2182_v51 = vpop.permute.xlu0 %2181  ;;  %v906_v33 = vpop.f32.mrb[1].mxu1  ;;  %8919 = vmatprep.subr.msk.bf16.mxu0 %vm14205_vm0, %v2178_v44  ;;  %v2218_v61 = vsel %vm14205_vm0, %v2178_v44, 0 }
 0x323   :  { %v908_v31 = vpop.f32.mrb[2].mxu1  ;;  %v2224_v17 = vsel %vm14205_vm0, %v2182_v51, 0 }
 0x324   :  { %v10650_v34 = vpack.c.bf16 %v908_v31, %v904_v62  ;;  %v910_v18 = vpop.f32.mrb[3].mxu1 }
 0x325   :  { %v10652_v5 = vpack.c.bf16 %v910_v18, %v906_v33  ;;  %v2180_v55 = vpop.permute.xlu1 %2179 }
 0x326   :  { %14404 = vst [vmem:[#allocation26_spill] sm:$0xff] %v10650_v34  ;;  %v10654_v16 = vpop.permute.xlu0 %2185  ;;  %8408 = vmatmul.mubr.msk.bf16.vlgmr.msra.gmra.mrb[48].mxu0 %vm14205_vm0, %v1601_v2  ;;  %v2221_v36 = vsel %vm14205_vm0, %v2180_v55, 0 }
 0x327   :  { %14405 = vst [vmem:[#allocation27_spill] sm:$0xff] %v10652_v5  ;;  %8456 = vmatpush3.bf16.xpose.msra.mxu0 %v2218_v61 }
 0x328   :  { %8920 = vmatprep.subr.msk.bf16.mxu0 %vm14205_vm0, %v2180_v55 }
 0x329   :  { %v2184_v6 = vpop.permute.xlu1 %2183  ;;  %v914_v52 = vpop.f32.mrb[4].mxu1 }
 0x32a   :  { %v1605_v63 = vpop.permute.xlu0 %1604  ;;  %v916_v53 = vpop.f32.mrb[5].mxu1  ;;  %v2227_v55 = vsel %vm14205_vm0, %v2184_v6, 0 }
 0x32b   :  { %v918_v20 = vpop.f32.mrb[6].mxu1 }
 0x32c   :  { %v10659_v9 = vpack.c.bf16 %v918_v20, %v914_v52  ;;  %v920_v28 = vpop.f32.mrb[7].mxu1 }
 0x32d   :  { %v10661_v32 = vpack.c.bf16 %v920_v28, %v916_v53  ;;  %v1603_v22 = vpop.permute.xlu1 %1602 }
 0x32e   :  { %14406 = vst [vmem:[#allocation28_spill] sm:$0xff] %v10659_v9  ;;  %v1607_v11 = vpop.permute.xlu0 %1606  ;;  %8411 = vmatprep.mubr.msk.bf16.mxu0 %vm14205_vm0, %v1603_v22 }
 0x32f   :  { %14407 = vst [vmem:[#allocation29_spill] sm:$0xff] %v10661_v32  ;;  %8412 = vmatmul.mubr.msk.bf16.gmra.mrb[52].mxu0 %vm14205_vm0, %v1605_v63 }
 0x330   :  { %8458 = vmatpush3.bf16.xpose.msra.mxu0 %v2221_v36  ;;  %8415 = vmatprep.mubr.msk.bf16.mxu0 %vm14205_vm0, %v1607_v11 }
 0x331   :  { %8921 = vmatprep.subr.msk.bf16.mxu0 %vm14205_vm0, %v2182_v51  ;;  %v10668_v10 = vpop.permute.xlu1 %2187  ;;  %v864_v43 = vpop.f32.mrb[32].mxu0 }
 0x332   :  { %v924_v27 = vpop.f32.mrb[8].mxu1  ;;  %v10670_v49 = vpop.permute.xlu0 %2189 }
 0x333   :  { %v866_v56 = vpop.f32.mrb[33].mxu0  ;;  %v926_v19 = vpop.f32.mrb[9].mxu1 }
 0x334   :  { %v868_v48 = vpop.f32.mrb[34].mxu0  ;;  %v928_v46 = vpop.f32.mrb[10].mxu1 }
 0x335   :  { %v10672_v58 = vpack.c.bf16 %v868_v48, %v864_v43  ;;  %v10674_v0 = vpack.c.bf16 %v928_v46, %v924_v27  ;;  %v870_v30 = vpop.f32.mrb[35].mxu0  ;;  %v930_v26 = vpop.f32.mrb[11].mxu1 }
 0x336   :  { %v10676_v8 = vpack.c.bf16 %v870_v30, %v866_v56  ;;  %v10678_v42 = vpack.c.bf16 %v930_v26, %v926_v19  ;;  %v1609_v59 = vpop.permute.xlu1 %1608  ;;  %v1613_v13 = vpop.permute.xlu0 %1612  ;;  %v2230_v56 = vsel %vm14205_vm0, %v10654_v16, 0 }
 0x337   :  { %14408 = vst [vmem:[#allocation30_spill] sm:$0xff] %v10672_v58  ;;  %14409 = vst [vmem:[#allocation31_spill] sm:$0xff] %v10674_v0  ;;  %8416 = vmatmul.mubr.msk.bf16.gmra.mrb[56].mxu0 %vm14205_vm0, %v1609_v59  ;;  %v14449_v0 = vmov 0 }
 0x338   :  { %14410 = vst [vmem:[#allocation32_spill] sm:$0xff] %v10676_v8  ;;  %14411 = vst [vmem:[#allocation33_spill] sm:$0xff] %v10678_v42  ;;  %8460 = vmatpush3.bf16.xpose.msra.mxu0 %v2224_v17  ;;  %v14461_v42 = vmov 0 }
 0x339   :  { %8922 = vmatprep.subr.msk.bf16.mxu0 %vm14205_vm0, %v2184_v6  ;;  %v874_v29 = vpop.f32.mrb[36].mxu0  ;;  %v934_v37 = vpop.f32.mrb[12].mxu1 }
 0x33a   :  { %v1611_v12 = vpop.permute.xlu1 %1610  ;;  %v876_v21 = vpop.f32.mrb[37].mxu0 }
 0x33b   :  { %v936_v40 = vpop.f32.mrb[13].mxu1  ;;  %8419 = vmatprep.mubr.msk.bf16.mxu0 %vm14205_vm0, %v1611_v12  ;;  %v878_v3 = vpop.f32.mrb[38].mxu0 }
 0x33c   :  { %v938_v2 = vpop.f32.mrb[14].mxu1  ;;  %v10684_v41 = vpack.c.bf16 %v878_v3, %v874_v29  ;;  %v880_v62 = vpop.f32.mrb[39].mxu0 }
 0x33d   :  { %v10686_v44 = vpack.c.bf16 %v938_v2, %v934_v37  ;;  %v940_v33 = vpop.f32.mrb[15].mxu1  ;;  %v10688_v51 = vpack.c.bf16 %v880_v62, %v876_v21  ;;  %v2162_v18 = vpop.permute.xlu0 %2161  ;;  %v2233_v21 = vsel %vm14205_vm0, %v10668_v10, 0 }
 0x33e   :  { %14412 = vst [vmem:[#allocation34_spill] sm:$0xff] %v10684_v41  ;;  %v10690_v31 = vpack.c.bf16 %v940_v33, %v936_v40 }
 0x33f   :  { %14413 = vst [vmem:[#allocation35_spill] sm:$0xff] %v10686_v44  ;;  %14414 = vst [vmem:[#allocation36_spill] sm:$0xff] %v10688_v51  ;;  %8420 = vmatmul.mubr.msk.bf16.gmra.mrb[60].mxu0 %vm14205_vm0, %v1613_v13 }
 0x340   :  { %14415 = vst [vmem:[#allocation37_spill] sm:$0xff] %v10690_v31  ;;  %8462 = vmatpush3.bf16.xpose.msra.mxu0 %v2227_v55  ;;  %8471 = vmatprep.mubr.msk.bf16.mxu0 %vm14205_vm0, %v2162_v18  ;;  %v2192_v55 = vpop.permute.xlu1 %2191 }
 0x341   :  { %8923 = vmatprep.subr.msk.bf16.mxu0 %vm14205_vm0, %v10654_v16  ;;  %v884_v61 = vpop.f32.mrb[40].mxu0  ;;  %v8297_v52 = vpop.f32.mrb[16].mxu1 }
 0x342   :  { %v886_v63 = vpop.f32.mrb[41].mxu0  ;;  %v977_v53 = vpop.f32.mrb[17].mxu1 }
 0x343   :  { %v888_v20 = vpop.f32.mrb[42].mxu0  ;;  %v8298_v28 = vpop.f32.mrb[18].mxu1 }
 0x344   :  { %v10697_v22 = vpack.c.bf16 %v888_v20, %v884_v61  ;;  %v10699_v11 = vpack.c.bf16 %v8298_v28, %v8297_v52  ;;  %v890_v36 = vpop.f32.mrb[43].mxu0  ;;  %v980_v43 = vpop.f32.mrb[19].mxu1 }
 0x345   :  { %v10701_v27 = vpack.c.bf16 %v890_v36, %v886_v63  ;;  %v10703_v6 = vpack.c.bf16 %v980_v43, %v977_v53 }
 0x346   :  { %14416 = vst [vmem:[#allocation38_spill] sm:$0xff] %v10697_v22  ;;  %14417 = vst [vmem:[#allocation39_spill] sm:$0xff] %v10699_v11  ;;  %1929 = vrot.lane.b32.xlu1 %v10699_v11, %s9930_s1 }
 0x347   :  { %14418 = vst [vmem:[#allocation40_spill] sm:$0xff] %v10701_v27  ;;  %14419 = vst [vmem:[#allocation41_spill] sm:$0xff] %v10703_v6  ;;  %1927 = vrot.lane.b32.xlu0 %v10703_v6, %s9930_s1  ;;  %8359 = vmatprep.subr.bf16.mxu1 %v10703_v6 }
 0x348   :  { %8464 = vmatpush3.bf16.xpose.msra.mxu0 %v2230_v56  ;;  %8360 = vmatpush3.bf16.msra.mxu1 %v10703_v6 }
 0x349   :  { %v894_v19 = vpop.f32.mrb[44].mxu0  ;;  %v8301_v48 = vpop.f32.mrb[20].mxu1  ;;  %8924 = vmatprep.subr.msk.bf16.mxu0 %vm14205_vm0, %v10668_v10  ;;  %8361 = vmatprep.subr.bf16.mxu1 %v10699_v11  ;;  %v2236_v10 = vsel %vm14205_vm0, %v10670_v49, 0 }
 0x34a   :  { %v896_v46 = vpop.f32.mrb[45].mxu0  ;;  %v993_v30 = vpop.f32.mrb[21].mxu1 }
 0x34b   :  { %v898_v26 = vpop.f32.mrb[46].mxu0  ;;  %v8302_v17 = vpop.f32.mrb[22].mxu1 }
 0x34c   :  { %v10716_v59 = vpack.c.bf16 %v898_v26, %v894_v19  ;;  %v900_v13 = vpop.f32.mrb[47].mxu0  ;;  %v10718_v29 = vpack.c.bf16 %v8302_v17, %v8301_v48  ;;  %v996_v37 = vpop.f32.mrb[23].mxu1  ;;  %8362 = vmatpush3.bf16.msra.mxu1 %v10699_v11 }
 0x34d   :  { %v10720_v16 = vpack.c.bf16 %v900_v13, %v896_v46  ;;  %v10723_v12 = vpack.c.bf16 %v996_v37, %v993_v30  ;;  %v2164_v30 = vpop.permute.xlu1 %2163  ;;  %v2166_v26 = vpop.permute.xlu0 %2165 }
 0x34e   :  { %14420 = vst [vmem:[#allocation42_spill] sm:$0xff] %v10716_v59  ;;  %14421 = vst [vmem:[#allocation43_spill] sm:$0xff] %v10718_v29 }
 0x34f   :  { %14422 = vst [vmem:[#allocation44_spill] sm:$0xff] %v10720_v16  ;;  %14423 = vst [vmem:[#allocation45_spill] sm:$0xff] %v10723_v12  ;;  %1931 = vrot.lane.b32.xlu0 %v10723_v12, %s9930_s1  ;;  %8363 = vmatprep.subr.bf16.mxu1 %v10723_v12 }
 0x350   :  { %8466 = vmatpush3.bf16.xpose.msra.mxu0 %v2233_v21  ;;  %8364 = vmatpush3.bf16.msra.mxu1 %v10723_v12 }
 0x351   :  { %v8305_v40 = vpop.f32.mrb[24].mxu1  ;;  %8925 = vmatprep.subr.msk.bf16.mxu0 %vm14205_vm0, %v10670_v49  ;;  %8365 = vmatprep.subr.bf16.mxu1 %v10718_v29  ;;  %v2239_v49 = vsel %vm14205_vm0, %v2192_v55, 0 }
 0x352   :  { %v1009_v3 = vpop.f32.mrb[25].mxu1 }
 0x353   :  { %v8306_v2 = vpop.f32.mrb[26].mxu1  ;;  %1933 = vrot.lane.b32.xlu0 %v10718_v29, %s9930_s1 }
 0x354   :  { %v10736_v62 = vpack.c.bf16 %v8306_v2, %v8305_v40  ;;  %v1012_v33 = vpop.f32.mrb[27].mxu1  ;;  %8366 = vmatpush3.bf16.msra.mxu1 %v10718_v29 }
 0x355   :  { %v10738_v18 = vpack.c.bf16 %v1012_v33, %v1009_v3  ;;  %v2170_v3 = vpop.permute.xlu0 %2169 }
 0x356   :  { %14424 = vst [vmem:[#allocation46_spill] sm:$0xff] %v10736_v62  ;;  %1937 = vrot.lane.b32.xlu1 %v10736_v62, %s9930_s1 }
 0x357   :  { %14425 = vst [vmem:[#allocation47_spill] sm:$0xff] %v10738_v18  ;;  %8367 = vmatprep.subr.bf16.mxu1 %v10738_v18  ;;  %1935 = vrot.lane.b32.xlu0 %v10738_v18, %s9930_s1 }
 0x358   :  { %8468 = vmatpush3.bf16.xpose.msra.mxu0 %v2236_v10  ;;  %8368 = vmatpush3.bf16.msra.mxu1 %v10738_v18 }
 0x359   :  { %v8309_v61 = vpop.f32.mrb[28].mxu1  ;;  %8926 = vmatprep.subr.msk.bf16.mxu0 %vm14205_vm0, %v2192_v55  ;;  %8369 = vmatprep.subr.bf16.mxu1 %v10736_v62 }
 0x35a   :  { %v1025_v52 = vpop.f32.mrb[29].mxu1 }
 0x35b   :  { %v8310_v63 = vpop.f32.mrb[30].mxu1  ;;  %2474 = vrot.lane.b32.xlu0 %v10703_v6, %s9926_s0 }
 0x35c   :  { %v10753_v53 = vpack.c.bf16 %v8310_v63, %v8309_v61  ;;  %v1028_v20 = vpop.f32.mrb[31].mxu1  ;;  %8370 = vmatpush3.bf16.msra.mxu1 %v10736_v62 }
 0x35d   :  { %v10755_v28 = vpack.c.bf16 %v1028_v20, %v1025_v52  ;;  %v2174_v20 = vpop.permute.xlu0 %2173 }
 0x35e   :  { %14426 = vst [vmem:[#allocation48_spill] sm:$0xff] %v10753_v53  ;;  %1941 = vrot.lane.b32.xlu1 %v10753_v53, %s9930_s1 }
 0x35f   :  { %14427 = vst [vmem:[#allocation49_spill] sm:$0xff] %v10755_v28  ;;  %8371 = vmatprep.subr.bf16.mxu1 %v10755_v28  ;;  %2478 = vrot.lane.b32.xlu0 %v10723_v12, %s9926_s0 }
 0x360   :  { %8470 = vmatpush3.bf16.xpose.msra.mxu0 %v2239_v49  ;;  %8372 = vmatpush3.bf16.msra.mxu1 %v10755_v28 }
 0x361   :  { %v8313_v36 = vpop.f32.mrb[32].mxu1  ;;  %8373 = vmatprep.subr.bf16.mxu1 %v10753_v53 }
 0x362   :  { %2476 = vrot.lane.b32.xlu1 %v10699_v11, %s9926_s0  ;;  %v1041_v43 = vpop.f32.mrb[33].mxu1 }
 0x363   :  { %v8314_v56 = vpop.f32.mrb[34].mxu1  ;;  %2724 = vrot.lane.b32.xlu0 %v10478_v60, %s9931_s2 }
 0x364   :  { %v10770_v19 = vpack.c.bf16 %v8314_v56, %v8313_v36  ;;  %v1044_v48 = vpop.f32.mrb[35].mxu1  ;;  %8374 = vmatpush3.bf16.msra.mxu1 %v10753_v53 }
 0x365   :  { %v10772_v46 = vpack.c.bf16 %v1044_v48, %v1041_v43 }
 0x366   :  { %14428 = vst [vmem:[#allocation50_spill] sm:$0xff] %v10770_v19  ;;  %2480 = vrot.lane.b32.xlu1 %v10718_v29, %s9926_s0 }
 0x367   :  { %14429 = vst [vmem:[#allocation51_spill] sm:$0xff] %v10772_v46  ;;  %8472 = vmatmul.mubr.msk.bf16.vlgmr.msra.gmra.mrb[64].mxu0 %vm14205_vm0, %v2164_v30  ;;  %2726 = vrot.lane.b32.xlu0 %v10491_v38, %s9931_s2  ;;  %v2168_v38 = vpop.permute.xlu1 %2167 }
 0x368   :  { %8475 = vmatprep.mubr.msk.bf16.mxu0 %vm14205_vm0, %v2166_v26 }
 0x369   :  { %v8317_v60 = vpop.f32.mrb[36].mxu1 }
 0x36a   :  { %2482 = vrot.lane.b32.xlu1 %v10738_v18, %s9926_s0  ;;  %v1057_v17 = vpop.f32.mrb[37].mxu1 }
 0x36b   :  { %v8318_v13 = vpop.f32.mrb[38].mxu1  ;;  %1939 = vrot.lane.b32.xlu0 %v10755_v28, %s9930_s1  ;;  %v2172_v63 = vpop.permute.xlu1 %2171 }
 0x36c   :  { %v10785_v37 = vpack.c.bf16 %v8318_v13, %v8317_v60  ;;  %v1060_v21 = vpop.f32.mrb[39].mxu1  ;;  %v1104_v60 = vlaneseq }
 0x36d   :  { %v10787_v40 = vpack.c.bf16 %v1060_v21, %v1057_v17 }
 0x36e   :  { %14430 = vst [vmem:[#allocation52_spill] sm:$0xff] %v10785_v37  ;;  %2484 = vrot.lane.b32.xlu1 %v10736_v62, %s9926_s0  ;;  %v10808_v17 = vshrl.u32 %v1104_v60, 7 }
 0x36f   :  { %14431 = vst [vmem:[#allocation53_spill] sm:$0xff] %v10787_v40  ;;  %8476 = vmatmul.mubr.msk.bf16.gmra.mrb[68].mxu0 %vm14205_vm0, %v2168_v38  ;;  %2486 = vrot.lane.b32.xlu0 %v10755_v28, %s9926_s0  ;;  %v2176_v26 = vpop.permute.xlu1 %2175  ;;  %v10811_v38 = vand.u32 127, %v1104_v60 }
 0x370   :  { %8479 = vmatprep.mubr.msk.bf16.mxu0 %vm14205_vm0, %v2170_v3  ;;  %14436 = vst [vmem:[#allocation58_spill] sm:$0xff] %v10808_v17  ;;  %v1107_v21 = vadd.s32 16, %v10808_v17  ;;  %v1111_v44 = vadd.s32 48, %v10808_v17  ;;  %v1116_v58 = vadd.s32 88, %v10808_v17  ;;  %v1115_v31 = vadd.s32 80, %v10808_v17 }
 0x371   :  { %v8321_v2 = vpop.f32.mrb[40].mxu1  ;;  %vm10826_vm2 = vcmp.ge.s32.totalorder %v10808_v17, %v10811_v38  ;;  %v1120_v51 = vadd.s32 120, %v10808_v17  ;;  %v1119_v28 = vadd.s32 112, %v10808_v17 }
 0x372   :  { %2488 = vrot.lane.b32.xlu1 %v10753_v53, %s9926_s0  ;;  %v1073_v33 = vpop.f32.mrb[41].mxu1  ;;  %vm10814_vm1 = vcmp.ge.s32.totalorder %v1107_v21, %v10811_v38  ;;  %v1112_v21 = vadd.s32 56, %v10808_v17  ;;  %vm10865_vm6 = vcmp.ge.s32.totalorder %v1111_v44, %v10811_v38  ;;  %v14455_v44 = vmov 0 }
 0x373   :  { %v8322_v10 = vpop.f32.mrb[42].mxu1  ;;  %vm10902_vm9 = vcmp.ge.s32.totalorder %v1116_v58, %v10811_v38  ;;  %vm10909_vm10 = vcmp.ge.s32.totalorder %v1115_v31, %v10811_v38  ;;  %v14467_v31 = vmov 0  ;;  %vm10946_vm13 = vcmp.ge.s32.totalorder %v1120_v51, %v10811_v38 }
 0x374   :  { %v10797_v55 = vpack.c.bf16 %v8322_v10, %v8321_v2  ;;  %v1076_v61 = vpop.f32.mrb[43].mxu1  ;;  %v14437_v10 = vmov 0  ;;  %vm10858_vm5 = vcmp.ge.s32.totalorder %v1112_v21, %v10811_v38  ;;  %v14462_v42 = vsel %vm10902_vm9, 4294967295, %v14461_v42 }
 0x375   :  { %v10799_v52 = vpack.c.bf16 %v1076_v61, %v1073_v33  ;;  %v14438_v10 = vsel %vm10814_vm1, 4294967295, %v14437_v10  ;;  %v14450_v0 = vsel %vm10858_vm5, 4294967295, %v14449_v0  ;;  %14463 = vst [vmem:[#allocation67_spill] sm:$0xff] %v14462_v42  ;;  %v14473_v53 = vmov 0 }
 0x376   :  { %14432 = vst [vmem:[#allocation54_spill] sm:$0xff] %v10797_v55  ;;  %14439 = vst [vmem:[#allocation59_spill] sm:$0xff] %v14438_v10  ;;  %v14474_v53 = vsel %vm10946_vm13, 4294967295, %v14473_v53  ;;  %vm10953_vm14 = vcmp.ge.s32.totalorder %v1119_v28, %v10811_v38  ;;  %v14482_v28 = vmov 0 }
 0x377   :  { %14433 = vst [vmem:[#allocation55_spill] sm:$0xff] %v10799_v52  ;;  %8480 = vmatmul.mubr.msk.bf16.gmra.mrb[72].mxu0 %vm14205_vm0, %v2172_v63  ;;  %v1106_v63 = vadd.s32 8, %v10808_v17  ;;  %14451 = vst [vmem:[#allocation63_spill] sm:$0xff] %v14450_v0 }
 0x378   :  { %8483 = vmatprep.mubr.msk.bf16.mxu0 %vm14205_vm0, %v2174_v20  ;;  %14475 = vst [vmem:[#allocation71_spill] sm:$0xff] %v14474_v53 }
 0x379   :  { %v8325_v49 = vpop.f32.mrb[44].mxu1  ;;  %vm10836_vm3 = vcmp.ge.s32.totalorder %v1106_v63, %v10811_v38 }
 0x37a   :  { %v1089_v36 = vpop.f32.mrb[45].mxu1 }
 0x37b   :  { %v8326_v43 = vpop.f32.mrb[46].mxu1 }
 0x37c   :  { %v10803_v56 = vpack.c.bf16 %v8326_v43, %v8325_v49  ;;  %v1092_v48 = vpop.f32.mrb[47].mxu1  ;;  %v14440_v49 = vmov 0 }
 0x37d   :  { %v10805_v30 = vpack.c.bf16 %v1092_v48, %v1089_v36  ;;  %v14441_v49 = vsel %vm10826_vm2, 4294967295, %v14440_v49  ;;  %v1108_v36 = vadd.s32 24, %v10808_v17 }
 0x37e   :  { %14434 = vst [vmem:[#allocation56_spill] sm:$0xff] %v10803_v56  ;;  %14442 = vst [vmem:[#allocation60_spill] sm:$0xff] %v14441_v49  ;;  %v14476_v56 = vmov 0 }
 0x37f   :  { %14435 = vst [vmem:[#allocation57_spill] sm:$0xff] %v10805_v30  ;;  %8484 = vmatmul.mubr.msk.bf16.gmra.mrb[76].mxu0 %vm14205_vm0, %v2176_v26  ;;  %vm10843_vm4 = vcmp.ge.s32.totalorder %v1108_v36, %v10811_v38  ;;  %v1110_v36 = vadd.s32 40, %v10808_v17  ;;  %v14477_v56 = vsel %vm10953_vm14, 4294967295, %v14476_v56  ;;  %v14479_v30 = vmov 0 }
 0x380   :  { %v14447_v45 = vsel %vm10843_vm4, 4294967295, %v14446_v45  ;;  %14478 = vst [vmem:[#allocation72_spill] sm:$0xff] %v14477_v56 }
 0x381   :  { %14448 = vst [vmem:[#allocation62_spill] sm:$0xff] %v14447_v45  ;;  %vm10880_vm7 = vcmp.ge.s32.totalorder %v1110_v36, %v10811_v38 }
 0x382   :  { %v14456_v44 = vsel %vm10880_vm7, 4294967295, %v14455_v44 }
 0x383   :  { %14457 = vst [vmem:[#allocation65_spill] sm:$0xff] %v14456_v44 }
 0x387   :  { %v8345_v13 = vpop.f32.mrb[48].mxu1 }
 0x388   :  { %v1246_v3 = vpop.f32.mrb[49].mxu1  ;;  %v10820_v61 = vsel %vm10814_vm1, %v8345_v13, -1e+30  ;;  %v14443_v13 = vmov 0 }
 0x389   :  { %v8346_v2 = vpop.f32.mrb[50].mxu1  ;;  %v10833_v60 = vsel %vm10826_vm2, %v1246_v3, -1e+30  ;;  %v14444_v13 = vsel %vm10836_vm3, 4294967295, %v14443_v13 }
 0x38a   :  { %v1249_v33 = vpop.f32.mrb[51].mxu1  ;;  %14445 = vst [vmem:[#allocation61_spill] sm:$0xff] %v14444_v13  ;;  %v10854_v63 = vsel %vm10843_vm4, %v8346_v2, -1e+30  ;;  %v1109_v2 = vadd.s32 32, %v10808_v17 }
 0x38b   :  { %v10850_v3 = vsel %vm10836_vm3, %v1249_v33, -1e+30  ;;  %v14452_v33 = vmov 0 }
 0x38c   :  { %v14453_v33 = vsel %vm10865_vm6, 4294967295, %v14452_v33  ;;  %vm10887_vm8 = vcmp.ge.s32.totalorder %v1109_v2, %v10811_v38  ;;  %v1114_v2 = vadd.s32 72, %v10808_v17 }
 0x38d   :  { %14454 = vst [vmem:[#allocation64_spill] sm:$0xff] %v14453_v33 }
 0x38e   :  { %1329 = vmax.xlane.f32.xlu0 %v10820_v61  ;;  %vm10924_vm11 = vcmp.ge.s32.totalorder %v1114_v2, %v10811_v38 }
 0x38f   :  { %v8349_v20 = vpop.f32.mrb[52].mxu1  ;;  %v14468_v31 = vsel %vm10924_vm11, 4294967295, %v14467_v31 }
 0x390   :  { %v1262_v43 = vpop.f32.mrb[53].mxu1  ;;  %v10876_v41 = vsel %vm10865_vm6, %v8349_v20, -1e+30  ;;  %14469 = vst [vmem:[#allocation69_spill] sm:$0xff] %v14468_v31 }
 0x391   :  { %v8350_v48 = vpop.f32.mrb[54].mxu1  ;;  %v10898_v36 = vsel %vm10887_vm8, %v1262_v43, -1e+30  ;;  %v1113_v43 = vadd.s32 64, %v10808_v17 }
 0x392   :  { %v1265_v26 = vpop.f32.mrb[55].mxu1  ;;  %1325 = vmax.xlane.f32.xlu0 %v10833_v60  ;;  %v10872_v21 = vsel %vm10858_vm5, %v8350_v48, -1e+30  ;;  %v14458_v48 = vmov 0 }
 0x393   :  { %v14459_v48 = vsel %vm10887_vm8, 4294967295, %v14458_v48  ;;  %v10894_v20 = vsel %vm10880_vm7, %v1265_v26, -1e+30  ;;  %v14464_v26 = vmov 0  ;;  %vm10931_vm12 = vcmp.ge.s32.totalorder %v1113_v43, %v10811_v38 }
 0x394   :  { %14460 = vst [vmem:[#allocation66_spill] sm:$0xff] %v14459_v48  ;;  %v14465_v26 = vsel %vm10909_vm10, 4294967295, %v14464_v26  ;;  %v1118_v43 = vadd.s32 104, %v10808_v17 }
 0x395   :  { %14466 = vst [vmem:[#allocation68_spill] sm:$0xff] %v14465_v26 }
 0x396   :  { %1327 = vmax.xlane.f32.xlu1 %v10850_v3  ;;  %1331 = vmax.xlane.f32.xlu0 %v10854_v63  ;;  %vm10968_vm15 = vcmp.ge.s32.totalorder %v1118_v43, %v10811_v38 }
 0x397   :  { %v8353_v9 = vpop.f32.mrb[56].mxu1  ;;  %v14480_v30 = vsel %vm10968_vm15, 4294967295, %v14479_v30 }
 0x398   :  { %v1278_v34 = vpop.f32.mrb[57].mxu1  ;;  %v10920_v8 = vsel %vm10909_vm10, %v8353_v9, -1e+30  ;;  %14481 = vst [vmem:[#allocation73_spill] sm:$0xff] %v14480_v30 }
 0x399   :  { %v8354_v59 = vpop.f32.mrb[58].mxu1  ;;  %v10942_v2 = vsel %vm10931_vm12, %v1278_v34, -1e+30 }
 0x39a   :  { %v1281_v22 = vpop.f32.mrb[59].mxu1  ;;  %1339 = vmax.xlane.f32.xlu1 %v10872_v21  ;;  %1337 = vmax.xlane.f32.xlu0 %v10876_v41  ;;  %v10916_v58 = vsel %vm10902_vm9, %v8354_v59, -1e+30  ;;  %v14470_v59 = vmov 0 }
 0x39b   :  { %v14471_v59 = vsel %vm10931_vm12, 4294967295, %v14470_v59  ;;  %v10938_v9 = vsel %vm10924_vm11, %v1281_v22, -1e+30  ;;  %v1117_v22 = vadd.s32 96, %v10808_v17 }
 0x39c   :  { %14472 = vst [vmem:[#allocation70_spill] sm:$0xff] %v14471_v59 }
 0x39d   :  { %vm10974_vm0 = vcmp.ge.s32.totalorder %v1117_v22, %v10811_v38 }
 0x39e   :  { %1335 = vmax.xlane.f32.xlu1 %v10894_v20  ;;  %1333 = vmax.xlane.f32.xlu0 %v10898_v36  ;;  %v14483_v28 = vsel %vm10974_vm0, 4294967295, %v14482_v28 }
 0x39f   :  { %v8357_v32 = vpop.f32.mrb[60].mxu1  ;;  %14484 = vst [vmem:[#allocation74_spill] sm:$0xff] %v14483_v28 }
 0x3a0   :  { %v1294_v5 = vpop.f32.mrb[61].mxu1  ;;  %v10964_v51 = vsel %vm10953_vm14, %v8357_v32, -1e+30 }
 0x3a1   :  { %v8358_v16 = vpop.f32.mrb[62].mxu1  ;;  %v10984_v32 = vsel %vm10974_vm0, %v1294_v5, -1e+30 }
 0x3a2   :  { %v1297_v27 = vpop.f32.mrb[63].mxu1  ;;  %1347 = vmax.xlane.f32.xlu1 %v10916_v58  ;;  %1345 = vmax.xlane.f32.xlu0 %v10920_v8  ;;  %v10960_v34 = vsel %vm10946_vm13, %v8358_v16, -1e+30 }
 0x3a3   :  { %v10980_v16 = vsel %vm10968_vm15, %v1297_v27, -1e+30 }
 0x3a6   :  { %1343 = vmax.xlane.f32.xlu1 %v10938_v9  ;;  %1341 = vmax.xlane.f32.xlu0 %v10942_v2 }
 0x3aa   :  { %1355 = vmax.xlane.f32.xlu1 %v10960_v34  ;;  %1353 = vmax.xlane.f32.xlu0 %v10964_v51 }
 0x3ae   :  { %1351 = vmax.xlane.f32.xlu1 %v10980_v16  ;;  %1349 = vmax.xlane.f32.xlu0 %v10984_v32 }
 0x3b8   :  { %v10999_v17 = vpop.permute.xlu1 %1929 }
 0x3b9   :  { %v10988_v43 = vpop.permute.xlu0 %1927 }
 0x3ba   :  { %8423 = vmatprep.subr.bf16.mxu1 %v10988_v43 }
 0x3c1   :  { %v10993_v38 = vpop.permute.xlu0 %1931 }
 0x3c4   :  { %2730 = vrot.lane.b32.xlu0 %v10515_v14, %s9931_s2 }
 0x3c5   :  { %v10995_v22 = vpop.permute.xlu0 %1933 }
 0x3c8   :  { %v11008_v19 = vpop.permute.xlu1 %1937 }
 0x3c9   :  { %v10997_v27 = vpop.permute.xlu0 %1935 }
 0x3cd   :  { %v11001_v55 = vpop.permute.xlu0 %2474 }
 0x3d0   :  { %v11017_v6 = vpop.permute.xlu1 %1941 }
 0x3d1   :  { %v11015_v12 = vpop.permute.xlu0 %2478 }
 0x3d2   :  { %14486 = vst [vmem:[#allocation76_spill] sm:$0xff] %v11015_v12 }
 0x3d5   :  { %v11031_v12 = vpop.permute.xlu0 %2724 }
 0x3d6   :  { %14489 = vst [vmem:[#allocation79_spill] sm:$0xff] %v11031_v12 }
 0x3d9   :  { %v11051_v18 = vpop.permute.xlu0 %2726 }
 0x3da   :  { %14494 = vst [vmem:[#allocation84_spill] sm:$0xff] %v11051_v18 }
 0x3f9   :  { %v8409_v5 = vpop.f32.mrb[48].mxu0 }
 0x3fa   :  { %v1720_v52 = vpop.f32.mrb[49].mxu0  ;;  %v11005_v37 = vsel %vm10814_vm1, %v8409_v5, -1e+30 }
 0x3fb   :  { %14485 = vst [vmem:[#allocation75_spill] sm:$0xff] %v11005_v37  ;;  %1803 = vmax.xlane.f32.xlu1 %v11005_v37  ;;  %v8410_v40 = vpop.f32.mrb[50].mxu0  ;;  %v11012_v46 = vsel %vm10826_vm2, %v1720_v52, -1e+30 }
 0x3fc   :  { %v1723_v14 = vpop.f32.mrb[51].mxu0  ;;  %v11021_v5 = vsel %vm10843_vm4, %v8410_v40, -1e+30  ;;  %v11037_v40 = vpop.permute.xlu1 %2476 }
 0x3fd   :  { %14487 = vst [vmem:[#allocation77_spill] sm:$0xff] %v11021_v5  ;;  %v11035_v62 = vsel %vm10836_vm3, %v1723_v14, -1e+30  ;;  %14491 = vst [vmem:[#allocation81_spill] sm:$0xff] %v11037_v40 }
 0x3fe   :  { %14490 = vst [vmem:[#allocation80_spill] sm:$0xff] %v11035_v62 }
 0x3ff   :  { %1799 = vmax.xlane.f32.xlu1 %v11012_v46 }
 0x400   :  { %v11056_v40 = vpop.permute.xlu1 %2480 }
 0x401   :  { %14495 = vst [vmem:[#allocation85_spill] sm:$0xff] %v11056_v40 }
 0x402   :  { %v8413_v54 = vpop.f32.mrb[52].mxu0 }
 0x403   :  { %1805 = vmax.xlane.f32.xlu1 %v11021_v5  ;;  %v1736_v39 = vpop.f32.mrb[53].mxu0  ;;  %v11026_v50 = vsel %vm10865_vm6, %v8413_v54, -1e+30 }
 0x404   :  { %14488 = vst [vmem:[#allocation78_spill] sm:$0xff] %v11026_v50  ;;  %1811 = vmax.xlane.f32.xlu0 %v11026_v50  ;;  %v8414_v52 = vpop.f32.mrb[54].mxu0  ;;  %v11042_v25 = vsel %vm10887_vm8, %v1736_v39, -1e+30 }
 0x405   :  { %v11029_v57 = vpop.f32.mrb[55].mxu0  ;;  %14492 = vst [vmem:[#allocation82_spill] sm:$0xff] %v11042_v25  ;;  %v11049_v12 = vsel %vm10858_vm5, %v8414_v52, -1e+30  ;;  %v11065_v52 = vpop.permute.xlu1 %2482 }
 0x406   :  { %14493 = vst [vmem:[#allocation83_spill] sm:$0xff] %v11049_v12  ;;  %14497 = vst [vmem:[#allocation87_spill] sm:$0xff] %v11065_v52 }
 0x407   :  { %1801 = vmax.xlane.f32.xlu1 %v11035_v62 }
 0x408   :  { %1807 = vmax.xlane.f32.xlu0 %v11042_v25  ;;  %v11063_v25 = vpop.permute.xlu0 %1939 }
 0x409   :  { %v11085_v52 = vpop.permute.xlu1 %2484 }
 0x40a   :  { %v8417_v54 = vpop.f32.mrb[56].mxu0  ;;  %14501 = vst [vmem:[#allocation91_spill] sm:$0xff] %v11085_v52 }
 0x40b   :  { %v11045_v50 = vpop.f32.mrb[57].mxu0  ;;  %v11060_v39 = vsel %vm10909_vm10, %v8417_v54, -1e+30 }
 0x40c   :  { %1813 = vmax.xlane.f32.xlu0 %v11049_v12  ;;  %v11054_v14 = vpop.f32.mrb[58].mxu0  ;;  %14496 = vst [vmem:[#allocation86_spill] sm:$0xff] %v11060_v39 }
 0x40d   :  { %v1755_v35 = vpop.f32.mrb[59].mxu0 }
 0x40e   :  { %v11071_v18 = vsel %vm10924_vm11, %v1755_v35, -1e+30 }
 0x40f   :  { %14498 = vst [vmem:[#allocation88_spill] sm:$0xff] %v11071_v18 }
 0x410   :  { %1819 = vmax.xlane.f32.xlu0 %v11060_v39  ;;  %v11080_v39 = vpop.permute.xlu0 %2486 }
 0x411   :  { %14500 = vst [vmem:[#allocation90_spill] sm:$0xff] %v11080_v39 }
 0x412   :  { %v8421_v29 = vpop.f32.mrb[60].mxu0 }
 0x413   :  { %v11067_v11 = vpop.f32.mrb[61].mxu0  ;;  %v11078_v54 = vsel %vm10953_vm14, %v8421_v29, -1e+30  ;;  %v11093_v29 = vpop.permute.xlu1 %2488 }
 0x414   :  { %1817 = vmax.xlane.f32.xlu0 %v11071_v18  ;;  %v11074_v12 = vpop.f32.mrb[62].mxu0  ;;  %14499 = vst [vmem:[#allocation89_spill] sm:$0xff] %v11078_v54 }
 0x415   :  { %v1771_v40 = vpop.f32.mrb[63].mxu0 }
 0x416   :  { %v11089_v35 = vsel %vm10968_vm15, %v1771_v40, -1e+30 }
 0x417   :  { %14502 = vst [vmem:[#allocation92_spill] sm:$0xff] %v11089_v35 }
 0x418   :  { %2728 = vrot.lane.b32.xlu1 %v10503_v4, %s9931_s2  ;;  %1827 = vmax.xlane.f32.xlu0 %v11078_v54 }
 0x41b   :  { %v1330_v18 = vpop.xlane.xlu0 %1329 }
 0x41c   :  { %1825 = vmax.xlane.f32.xlu0 %v11089_v35  ;;  %v1359_v1 = vsub.f32 %v10820_v61, %v1330_v18 }
 0x41e   :  { %v1377_v47 = vmul.f32 1.442695, %v1359_v1 }
 0x41f   :  { %v1326_v62 = vpop.xlane.xlu0 %1325 }
 0x420   :  { %v1357_v39 = vsub.f32 %v10833_v60, %v1326_v62  ;;  %9168 = vpow2.f32 %v1377_v47 }
 0x422   :  { %v1373_v4 = vmul.f32 1.442695, %v1357_v39 }
 0x423   :  { %v1328_v37 = vpop.xlane.xlu1 %1327  ;;  %v1332_v52 = vpop.xlane.xlu0 %1331 }
 0x424   :  { %v1358_v54 = vsub.f32 %v10850_v3, %v1328_v37  ;;  %v1360_v5 = vsub.f32 %v10854_v63, %v1332_v52  ;;  %9170 = vpow2.f32 %v1373_v4 }
 0x426   :  { %v1375_v40 = vmul.f32 1.442695, %v1358_v54  ;;  %v1379_v7 = vmul.f32 1.442695, %v1360_v5 }
 0x427   :  { %v1340_v35 = vpop.xlane.xlu1 %1339  ;;  %v1338_v61 = vpop.xlane.xlu0 %1337 }
 0x428   :  { %9172 = vpow2.f32 %v1375_v40  ;;  %v1364_v18 = vsub.f32 %v10872_v21, %v1340_v35  ;;  %v1363_v62 = vsub.f32 %v10876_v41, %v1338_v61 }
 0x429   :  { %9174 = vpow2.f32 %v1379_v7 }
 0x42a   :  { %v1387_v1 = vmul.f32 1.442695, %v1364_v18  ;;  %v1385_v60 = vmul.f32 1.442695, %v1363_v62  ;;  %v11102_v54 = vpop.eup %9168 }
 0x42b   :  { %v1336_v39 = vpop.xlane.xlu1 %1335  ;;  %v1334_v3 = vpop.xlane.xlu0 %1333  ;;  %14503 = vst [vmem:[#allocation93_spill] sm:$0xff] %v11102_v54 }
 0x42c   :  { %v1362_v37 = vsub.f32 %v10894_v20, %v1336_v39  ;;  %v1361_v63 = vsub.f32 %v10898_v36, %v1334_v3  ;;  %9176 = vpow2.f32 %v1387_v1 }
 0x42d   :  { %9178 = vpow2.f32 %v1385_v60 }
 0x42e   :  { %v1383_v47 = vmul.f32 1.442695, %v1362_v37  ;;  %v1381_v5 = vmul.f32 1.442695, %v1361_v63  ;;  %v11105_v41 = vpop.eup %9170 }
 0x42f   :  { %v1348_v52 = vpop.xlane.xlu1 %1347  ;;  %v1346_v21 = vpop.xlane.xlu0 %1345  ;;  %14504 = vst [vmem:[#allocation94_spill] sm:$0xff] %v11105_v41 }
 0x430   :  { %9180 = vpow2.f32 %v1383_v47  ;;  %v1368_v7 = vsub.f32 %v10916_v58, %v1348_v52  ;;  %v1367_v35 = vsub.f32 %v10920_v8, %v1346_v21 }
 0x431   :  { %9182 = vpow2.f32 %v1381_v5 }
 0x432   :  { %v11108_v20 = vpop.eup %9172  ;;  %v1395_v4 = vmul.f32 1.442695, %v1368_v7  ;;  %v1393_v40 = vmul.f32 1.442695, %v1367_v35 }
 0x433   :  { %14505 = vst [vmem:[#allocation95_spill] sm:$0xff] %v11108_v20  ;;  %v11110_v36 = vpop.eup %9174  ;;  %v1344_v18 = vpop.xlane.xlu1 %1343  ;;  %v1437_v61 = vpack.c.bf16 %v11108_v20, %v11105_v41 }
 0x434   :  { %14506 = vst [vmem:[#allocation96_spill] sm:$0xff] %v11110_v36  ;;  %v1366_v62 = vsub.f32 %v10938_v9, %v1344_v18  ;;  %v1342_v1 = vpop.xlane.xlu0 %1341  ;;  %v1438_v58 = vpack.c.bf16 %v11110_v36, %v11102_v54  ;;  %9184 = vpow2.f32 %v1395_v4 }
 0x435   :  { %v1365_v60 = vsub.f32 %v10942_v2, %v1342_v1  ;;  %8375 = vmatprep.mubr.bf16.mxu1 %v1437_v61  ;;  %9186 = vpow2.f32 %v1393_v40 }
 0x436   :  { %v1391_v8 = vmul.f32 1.442695, %v1366_v62  ;;  %8376 = vmatmul.mubr.bf16.vlgmr.msra.gmra.mrb[64].mxu1 %v1438_v58  ;;  %v11119_v3 = vpop.eup %9176 }
 0x437   :  { %v1389_v39 = vmul.f32 1.442695, %v1365_v60  ;;  %8424 = vmatpush3.bf16.msra.mxu1 %v10988_v43  ;;  %v1356_v37 = vpop.xlane.xlu1 %1355  ;;  %14507 = vst [vmem:[#allocation97_spill] sm:$0xff] %v11119_v3  ;;  %v11123_v47 = vpop.eup %9178 }
 0x438   :  { %9188 = vpow2.f32 %v1391_v8  ;;  %v1372_v9 = vsub.f32 %v10960_v34, %v1356_v37  ;;  %8425 = vmatprep.subr.bf16.mxu1 %v10999_v17  ;;  %v1354_v63 = vpop.xlane.xlu0 %1353  ;;  %14508 = vst [vmem:[#allocation98_spill] sm:$0xff] %v11123_v47  ;;  %v11134_v34 = vsel %vm10880_vm7, %v11029_v57, -1e+30  ;;  %v1440_v62 = vpack.c.bf16 %v11119_v3, %v11123_v47 }
 0x439   :  { %9190 = vpow2.f32 %v1389_v39  ;;  %v1371_v2 = vsub.f32 %v10964_v51, %v1354_v63  ;;  %v11160_v8 = vsel %vm10931_vm12, %v11045_v50, -1e+30  ;;  %v11177_v63 = vsel %vm10902_vm9, %v11054_v14, -1e+30 }
 0x43a   :  { %v11126_v5 = vpop.eup %9180  ;;  %v1403_v52 = vmul.f32 1.442695, %v1372_v9  ;;  %v8473_v21 = vpop.f32.mrb[64].mxu0 }
 0x43b   :  { %14509 = vst [vmem:[#allocation99_spill] sm:$0xff] %v11126_v5  ;;  %v11128_v7 = vpop.eup %9182  ;;  %v1401_v43 = vmul.f32 1.442695, %v1371_v2  ;;  %8426 = vmatpush3.bf16.msra.mxu1 %v10999_v17  ;;  %v1352_v35 = vpop.xlane.xlu1 %1351  ;;  %v11138_v4 = vsel %vm10814_vm1, %v8473_v21, -1e+30 }
 0x43c   :  { %14510 = vst [vmem:[#allocation100_spill] sm:$0xff] %v11128_v7  ;;  %v11140_v51 = vpop.f32.mrb[65].mxu0  ;;  %v1370_v40 = vsub.f32 %v10980_v16, %v1352_v35  ;;  %8427 = vmatprep.subr.bf16.mxu1 %v10993_v38  ;;  %v1350_v18 = vpop.xlane.xlu0 %1349  ;;  %1809 = vmax.xlane.f32.xlu1 %v11134_v34  ;;  %v1439_v17 = vpack.c.bf16 %v11126_v5, %v11128_v7  ;;  %9192 = vpow2.f32 %v1403_v52  ;;  %v11197_v35 = vsel %vm10974_vm0, %v11067_v11, -1e+30 }
 0x43d   :  { %2358 = vmax.xlane.f32.xlu0 %v11138_v4  ;;  %v11148_v57 = vpop.f32.mrb[66].mxu0  ;;  %v1369_v61 = vsub.f32 %v10984_v32, %v1350_v18  ;;  %9194 = vpow2.f32 %v1401_v43 }
 0x43e   :  { %v1399_v1 = vmul.f32 1.442695, %v1370_v40  ;;  %v2278_v16 = vpop.f32.mrb[67].mxu0  ;;  %8379 = vmatprep.mubr.bf16.mxu1 %v1439_v17  ;;  %v11162_v32 = vpop.eup %9184 }
 0x43f   :  { %v1397_v58 = vmul.f32 1.442695, %v1369_v61  ;;  %v11155_v60 = vsel %vm10836_vm3, %v2278_v16, -1e+30  ;;  %8380 = vmatmul.mubr.bf16.gmra.mrb[68].mxu1 %v1440_v62  ;;  %14511 = vst [vmem:[#allocation101_spill] sm:$0xff] %v11162_v32  ;;  %v11166_v39 = vpop.eup %9186 }
 0x440   :  { %9196 = vpow2.f32 %v1399_v1  ;;  %8428 = vmatpush3.bf16.msra.mxu1 %v10993_v38  ;;  %1815 = vmax.xlane.f32.xlu1 %v11160_v8  ;;  %14512 = vst [vmem:[#allocation102_spill] sm:$0xff] %v11166_v39  ;;  %v1442_v43 = vpack.c.bf16 %v11162_v32, %v11166_v39  ;;  %v11219_v16 = vsel %vm10946_vm13, %v11074_v12, -1e+30 }
 0x441   :  { %9198 = vpow2.f32 %v1397_v58  ;;  %2356 = vmax.xlane.f32.xlu0 %v11155_v60  ;;  %8429 = vmatprep.subr.bf16.mxu1 %v10995_v22 }
 0x442   :  { %v11170_v37 = vpop.eup %9188  ;;  %v8477_v50 = vpop.f32.mrb[68].mxu0 }
 0x443   :  { %14513 = vst [vmem:[#allocation103_spill] sm:$0xff] %v11170_v37  ;;  %v11172_v9 = vpop.eup %9190  ;;  %v2291_v38 = vpop.f32.mrb[69].mxu0 }
 0x444   :  { %14514 = vst [vmem:[#allocation104_spill] sm:$0xff] %v11172_v9  ;;  %8430 = vmatpush3.bf16.msra.mxu1 %v10995_v22  ;;  %1821 = vmax.xlane.f32.xlu1 %v11177_v63  ;;  %v1441_v2 = vpack.c.bf16 %v11170_v37, %v11172_v9  ;;  %v8478_v52 = vpop.f32.mrb[70].mxu0 }
 0x445   :  { %8431 = vmatprep.subr.bf16.mxu1 %v10997_v27  ;;  %v2294_v21 = vpop.f32.mrb[71].mxu0 }
 0x446   :  { %8383 = vmatprep.mubr.bf16.mxu1 %v1441_v2  ;;  %v11188_v14 = vsel %vm10880_vm7, %v2294_v21, -1e+30  ;;  %v11190_v22 = vpop.eup %9192  ;;  %v11228_v2 = vsel %vm10826_vm2, %v11140_v51, -1e+30  ;;  %v11236_v21 = vsel %vm10843_vm4, %v11148_v57, -1e+30 }
 0x447   :  { %8384 = vmatmul.mubr.bf16.gmra.mrb[72].mxu1 %v1442_v43  ;;  %14515 = vst [vmem:[#allocation105_spill] sm:$0xff] %v11190_v22  ;;  %2364 = vmax.xlane.f32.xlu0 %v11188_v14  ;;  %v11199_v40 = vpop.eup %9194  ;;  %v11252_v57 = vsel %vm10887_vm8, %v2291_v38, -1e+30 }
 0x448   :  { %8432 = vmatpush3.bf16.msra.mxu1 %v10997_v27  ;;  %14516 = vst [vmem:[#allocation106_spill] sm:$0xff] %v11199_v40  ;;  %1823 = vmax.xlane.f32.xlu1 %v11197_v35  ;;  %v1444_v58 = vpack.c.bf16 %v11190_v22, %v11199_v40  ;;  %v14520_v22 = vld [vmem:[#allocation77_spill] sm:$0xff] }
 0x449   :  { %8433 = vmatprep.subr.bf16.mxu1 %v11008_v19 }
 0x44a   :  { %v11203_v18 = vpop.eup %9196  ;;  %v8481_v61 = vpop.f32.mrb[72].mxu0 }
 0x44b   :  { %14517 = vst [vmem:[#allocation107_spill] sm:$0xff] %v11203_v18  ;;  %v11205_v17 = vpop.eup %9198  ;;  %v11209_v62 = vsel %vm10909_vm10, %v8481_v61, -1e+30  ;;  %v2307_v27 = vpop.f32.mrb[73].mxu0 }
 0x44c   :  { %14518 = vst [vmem:[#allocation108_spill] sm:$0xff] %v11205_v17  ;;  %8434 = vmatpush3.bf16.msra.mxu1 %v11008_v19  ;;  %v1443_v11 = vpack.c.bf16 %v11203_v18, %v11205_v17  ;;  %2374 = vmax.xlane.f32.xlu0 %v11209_v62  ;;  %v8482_v1 = vpop.f32.mrb[74].mxu0 }
 0x44d   :  { %8435 = vmatprep.subr.bf16.mxu1 %v11063_v25  ;;  %1829 = vmax.xlane.f32.xlu1 %v11219_v16  ;;  %v2310_v19 = vpop.f32.mrb[75].mxu0 }
 0x44e   :  { %8387 = vmatprep.mubr.bf16.mxu1 %v1443_v11  ;;  %v11257_v11 = vsel %vm10858_vm5, %v8478_v52, -1e+30  ;;  %v11274_v38 = vsel %vm10924_vm11, %v2310_v19, -1e+30 }
 0x44f   :  { %8388 = vmatmul.mubr.bf16.gmra.mrb[76].mxu1 %v1444_v58  ;;  %v11262_v58 = vsel %vm10931_vm12, %v2307_v27, -1e+30 }
 0x450   :  { %8436 = vmatpush3.bf16.msra.mxu1 %v11063_v25 }
 0x451   :  { %8437 = vmatprep.subr.bf16.mxu1 %v11017_v6  ;;  %2354 = vmax.xlane.f32.xlu1 %v11228_v2 }
 0x452   :  { %v8485_v12 = vpop.f32.mrb[76].mxu0 }
 0x453   :  { %v2323_v43 = vpop.f32.mrb[77].mxu0  ;;  %v11279_v52 = vsel %vm10953_vm14, %v8485_v12, -1e+30  ;;  %vm14550_vm14 = vcmask 261120  }
 0x454   :  { %8438 = vmatpush3.bf16.msra.mxu1 %v11017_v6  ;;  %v11240_v25 = vsel %vm10974_vm0, %v2323_v43, -1e+30  ;;  %v8486_v61 = vpop.f32.mrb[78].mxu0  ;;  %v11247_v6 = vsel %vm10865_vm6, %v8477_v50, -1e+30  ;;  %v14519_v43 = vld [vmem:[#allocation19_spill] sm:$0xff]  ;;  %vm14573_vm0 = vmmov %vm14550_vm14 }
 0x455   :  { %8487 = vmatprep.subr.bf16.mxu1 %v11001_v55  ;;  %2360 = vmax.xlane.f32.xlu1 %v11236_v21  ;;  %v2326_v51 = vpop.f32.mrb[79].mxu0  ;;  %v11267_v50 = vsel %vm10902_vm9, %v8482_v1, -1e+30  ;;  %v11284_v27 = vsel %vm10946_vm13, %v8486_v61, -1e+30  ;;  %vm14579_vm10 = vmmov %vm14573_vm0 }
 0x456   :  { %2378 = vmax.xlane.f32.xlu0 %v11240_v25  ;;  %v11291_v1 = vsel %vm10968_vm15, %v2326_v51, -1e+30  ;;  %v14522_v51 = vld [vmem:[#allocation21_spill] sm:$0xff]  ;;  %vm14613_vm12 = vmmov %vm14573_vm0 }
 0x459   :  { %2366 = vmax.xlane.f32.xlu1 %v11247_v6 }
 0x45d   :  { %2362 = vmax.xlane.f32.xlu1 %v11252_v57 }
 0x461   :  { %2368 = vmax.xlane.f32.xlu1 %v11257_v11 }
 0x465   :  { %2370 = vmax.xlane.f32.xlu1 %v11262_v58 }
 0x469   :  { %2376 = vmax.xlane.f32.xlu1 %v11267_v50 }
 0x46c   :  { %2734 = vrot.lane.b32.xlu0 %v10537_v24, %s9931_s2 }
 0x46d   :  { %2372 = vmax.xlane.f32.xlu1 %v11274_v38 }
 0x471   :  { %2382 = vmax.xlane.f32.xlu1 %v11279_v52 }
 0x475   :  { %2384 = vmax.xlane.f32.xlu1 %v11284_v27 }
 0x486   :  { %2732 = vrot.lane.b32.xlu1 %v10526_v15, %s9931_s2  ;;  %v14521_v15 = vld [vmem:[#allocation75_spill] sm:$0xff] }
 0x488   :  { %v1804_v24 = vpop.xlane.xlu1 %1803 }
 0x489   :  { %v1833_v40 = vsub.f32 %v14521_v15, %v1804_v24  ;;  %v14526_v24 = vld [vmem:[#allocation43_spill] sm:$0xff]  ;;  %v14536_v15 = vld [vmem:[#allocation81_spill] sm:$0xff] }
 0x48a   :  { %2710 = vrot.lane.b32.xlu1 %v10489_v23, %s9931_s2  ;;  %v14523_v23 = vld [vmem:[#allocation80_spill] sm:$0xff] }
 0x48b   :  { %2380 = vmax.xlane.f32.xlu0 %v11291_v1  ;;  %v1851_v9 = vmul.f32 1.442695, %v1833_v40  ;;  %v14531_v40 = vld [vmem:[#allocation47_spill] sm:$0xff] }
 0x48c   :  { %v1800_v19 = vpop.xlane.xlu1 %1799 }
 0x48d   :  { %v1831_v12 = vsub.f32 %v11012_v46, %v1800_v19  ;;  %v14524_v46 = vld [vmem:[#allocation24_spill] sm:$0xff] }
 0x48e   :  { %2714 = vrot.lane.b32.xlu1 %v14519_v43, %s9931_s2  ;;  %v14534_v43 = vld [vmem:[#allocation46_spill] sm:$0xff] }
 0x48f   :  { %v1847_v17 = vmul.f32 1.442695, %v1831_v12  ;;  %v11328_v12 = vpop.permute.xlu0 %2730 }
 0x490   :  { %v1806_v61 = vpop.xlane.xlu1 %1805 }
 0x491   :  { %v1834_v18 = vsub.f32 %v14520_v22, %v1806_v61  ;;  %9200 = vpow2.f32 %v1847_v17  ;;  %v14525_v22 = vld [vmem:[#allocation39_spill] sm:$0xff]  ;;  %v14535_v61 = vld [vmem:[#allocation17_spill] sm:$0xff] }
 0x492   :  { %2718 = vrot.lane.b32.xlu1 %v14522_v51, %s9931_s2 }
 0x493   :  { %v1853_v32 = vmul.f32 1.442695, %v1834_v18  ;;  %v14528_v18 = vld [vmem:[#allocation23_spill] sm:$0xff]  ;;  %v1812_v51 = vpop.xlane.xlu0 %1811 }
 0x494   :  { %v1802_v37 = vpop.xlane.xlu1 %1801 }
 0x495   :  { %v1832_v39 = vsub.f32 %v14523_v23, %v1802_v37  ;;  %9202 = vpow2.f32 %v1853_v32  ;;  %v14537_v23 = vld [vmem:[#allocation18_spill] sm:$0xff] }
 0x496   :  { %2722 = vrot.lane.b32.xlu1 %v14524_v46, %s9931_s2  ;;  %v14538_v46 = vld [vmem:[#allocation76_spill] sm:$0xff] }
 0x497   :  { %v1849_v47 = vmul.f32 1.442695, %v1832_v39 }
 0x499   :  { %9204 = vpow2.f32 %v1849_v47 }
 0x49a   :  { %9206 = vpow2.f32 %v1851_v9  ;;  %3023 = vrot.lane.b32.xlu1 %v14525_v22, %s9931_s2  ;;  %v14533_v9 = vld [vmem:[#allocation25_spill] sm:$0xff]  ;;  %v1808_v22 = vpop.xlane.xlu0 %1807 }
 0x49b   :  { %v11310_v19 = vpop.eup %9200 }
 0x49c   :  { %14527 = vst [vmem:[#allocation19_spill] sm:$0xff] %v11310_v19 }
 0x49e   :  { %3027 = vrot.lane.b32.xlu1 %v14526_v24, %s9931_s2  ;;  %v14539_v24 = vld [vmem:[#allocation20_spill] sm:$0xff] }
 0x49f   :  { %v11314_v37 = vpop.eup %9202 }
 0x4a0   :  { %14529 = vst [vmem:[#allocation77_spill] sm:$0xff] %v11314_v37 }
 0x4a1   :  { %2736 = vrot.lane.b32.xlu0 %v14528_v18, %s9931_s2  ;;  %v14541_v18 = vld [vmem:[#allocation22_spill] sm:$0xff] }
 0x4a2   :  { %3029 = vrot.lane.b32.xlu1 %v14531_v40, %s9931_s2  ;;  %v14542_v40 = vld [vmem:[#allocation87_spill] sm:$0xff] }
 0x4a3   :  { %v11316_v39 = vpop.eup %9204 }
 0x4a4   :  { %14530 = vst [vmem:[#allocation75_spill] sm:$0xff] %v11316_v39  ;;  %v11320_v47 = vpop.eup %9206  ;;  %v1911_v32 = vpack.c.bf16 %v11316_v39, %v11310_v19 }
 0x4a5   :  { %14532 = vst [vmem:[#allocation21_spill] sm:$0xff] %v11320_v47  ;;  %2738 = vrot.lane.b32.xlu0 %v14533_v9, %s9931_s2  ;;  %v1912_v17 = vpack.c.bf16 %v11314_v37, %v11320_v47  ;;  %v14543_v9 = vld [vmem:[#allocation41_spill] sm:$0xff] }
 0x4a6   :  { %8439 = vmatprep.mubr.bf16.mxu1 %v1911_v32  ;;  %3031 = vrot.lane.b32.xlu1 %v14534_v43, %s9931_s2  ;;  %v1814_v32 = vpop.xlane.xlu0 %1813 }
 0x4a7   :  { %8440 = vmatmul.mubr.bf16.vlgmr.msra.gmra.mrb[80].mxu1 %v1912_v17  ;;  %v14544_v17 = vld [vmem:[#allocation91_spill] sm:$0xff] }
 0x4a8   :  { %8488 = vmatpush3.bf16.msra.mxu1 %v11001_v55  ;;  %v14540_v55 = vld [vmem:[#allocation85_spill] sm:$0xff] }
 0x4a9   :  { %2708 = vrot.lane.b32.xlu0 %v14535_v61, %s9931_s2  ;;  %8489 = vmatprep.subr.bf16.mxu1 %v14536_v15  ;;  %v14545_v61 = vld [vmem:[#allocation45_spill] sm:$0xff] }
 0x4aa   :  { %v1820_v43 = vpop.xlane.xlu0 %1819 }
 0x4ac   :  { %8490 = vmatpush3.bf16.msra.mxu1 %v14536_v15  ;;  %v14546_v15 = vld [vmem:[#allocation90_spill] sm:$0xff] }
 0x4ad   :  { %2712 = vrot.lane.b32.xlu0 %v14537_v23, %s9931_s2  ;;  %8491 = vmatprep.subr.bf16.mxu1 %v14538_v46 }
 0x4ae   :  { %v1818_v23 = vpop.xlane.xlu0 %1817 }
 0x4b0   :  { %8492 = vmatpush3.bf16.msra.mxu1 %v14538_v46  ;;  %v14547_v46 = vld [vmem:[#allocation82_spill] sm:$0xff] }
 0x4b1   :  { %2716 = vrot.lane.b32.xlu0 %v14539_v24, %s9931_s2  ;;  %8493 = vmatprep.subr.bf16.mxu1 %v14540_v55  ;;  %v1835_v24 = vsub.f32 %v14547_v46, %v1808_v22  ;;  %v14553_v46 = vld [vmem:[#allocation86_spill] sm:$0xff] }
 0x4b2   :  { %v1828_v54 = vpop.xlane.xlu0 %1827  ;;  %v1841_v20 = vsub.f32 %v14553_v46, %v1820_v43 }
 0x4b3   :  { %v1855_v7 = vmul.f32 1.442695, %v1835_v24 }
 0x4b4   :  { %8494 = vmatpush3.bf16.msra.mxu1 %v14540_v55  ;;  %v11360_v55 = vpop.permute.xlu1 %2728 }
 0x4b5   :  { %2720 = vrot.lane.b32.xlu0 %v14541_v18, %s9931_s2  ;;  %8495 = vmatprep.subr.bf16.mxu1 %v14542_v40  ;;  %v14548_v18 = vld [vmem:[#allocation83_spill] sm:$0xff]  ;;  %9208 = vpow2.f32 %v1855_v7 }
 0x4b6   :  { %v1826_v47 = vpop.xlane.xlu0 %1825 }
 0x4b8   :  { %8496 = vmatpush3.bf16.msra.mxu1 %v14542_v40  ;;  %v1838_v40 = vsub.f32 %v14548_v18, %v1814_v32 }
 0x4b9   :  { %3021 = vrot.lane.b32.xlu0 %v14543_v9, %s9931_s2  ;;  %8497 = vmatprep.subr.bf16.mxu1 %v14544_v17  ;;  %v14549_v9 = vld [vmem:[#allocation79_spill] sm:$0xff] }
 0x4ba   :  { %v1861_v41 = vmul.f32 1.442695, %v1838_v40  ;;  %v1867_v40 = vmul.f32 1.442695, %v1841_v20 }
 0x4bc   :  { %8498 = vmatpush3.bf16.msra.mxu1 %v14544_v17  ;;  %v14551_v17 = vld [vmem:[#allocation78_spill] sm:$0xff]  ;;  %9210 = vpow2.f32 %v1861_v41 }
 0x4bd   :  { %3025 = vrot.lane.b32.xlu0 %v14545_v61, %s9931_s2  ;;  %8499 = vmatprep.subr.bf16.mxu1 %v14546_v15  ;;  %v1837_v61 = vsub.f32 %v14551_v17, %v1812_v51  ;;  %v14554_v17 = vld [vmem:[#allocation92_spill] sm:$0xff] }
 0x4bf   :  { %v1859_v22 = vmul.f32 1.442695, %v1837_v61  ;;  %v11372_v7 = vpop.eup %9208 }
 0x4c0   :  { %8500 = vmatpush3.bf16.msra.mxu1 %v14546_v15  ;;  %v14552_v15 = vld [vmem:[#allocation88_spill] sm:$0xff]  ;;  %14555 = vst [vmem:[#allocation80_spill] sm:$0xff] %v11372_v7 }
 0x4c1   :  { %8501 = vmatprep.subr.bf16.mxu1 %v11093_v29  ;;  %v1840_v3 = vsub.f32 %v14552_v15, %v1818_v23  ;;  %v1844_v15 = vsub.f32 %v14554_v17, %v1826_v47 }
 0x4c3   :  { %v1865_v32 = vmul.f32 1.442695, %v1840_v3  ;;  %v1873_v3 = vmul.f32 1.442695, %v1844_v15 }
 0x4c4   :  { %8502 = vmatpush3.bf16.msra.mxu1 %v11093_v29 }
 0x4c5   :  { %8927 = vmatprep.subr.msk.bf16.mxu1 %vm14550_vm14, %v14549_v9 }
 0x4c6   :  { %v11374_v43 = vpop.eup %9210 }
 0x4c7   :  { %14556 = vst [vmem:[#allocation24_spill] sm:$0xff] %v11374_v43 }
 0x4c9   :  { %v1810_v5 = vpop.xlane.xlu1 %1809 }
 0x4ca   :  { %v1836_v36 = vsub.f32 %v11134_v34, %v1810_v5  ;;  %v2359_v5 = vpop.xlane.xlu0 %2358 }
 0x4cc   :  { %v1857_v29 = vmul.f32 1.442695, %v1836_v36 }
 0x4cd   :  { %v1816_v18 = vpop.xlane.xlu1 %1815 }
 0x4ce   :  { %9212 = vpow2.f32 %v1857_v29  ;;  %v1839_v51 = vsub.f32 %v11160_v8, %v1816_v18  ;;  %v14557_v8 = vld [vmem:[#allocation89_spill] sm:$0xff]  ;;  %v2357_v47 = vpop.xlane.xlu0 %2356 }
 0x4cf   :  { %9214 = vpow2.f32 %v1859_v22  ;;  %v1845_v61 = vsub.f32 %v14557_v8, %v1828_v54  ;;  %v2387_v54 = vsub.f32 %v11155_v60, %v2357_v47 }
 0x4d0   :  { %v1863_v24 = vmul.f32 1.442695, %v1839_v51  ;;  %9216 = vpow2.f32 %v1865_v32 }
 0x4d1   :  { %v1822_v23 = vpop.xlane.xlu1 %1821  ;;  %v1875_v51 = vmul.f32 1.442695, %v1845_v61 }
 0x4d2   :  { %9218 = vpow2.f32 %v1863_v24  ;;  %v1842_v36 = vsub.f32 %v11177_v63, %v1822_v23 }
 0x4d3   :  { %9220 = vpow2.f32 %v1867_v40 }
 0x4d4   :  { %v1869_v41 = vmul.f32 1.442695, %v1842_v36  ;;  %v2388_v36 = vsub.f32 %v11138_v4, %v2359_v5 }
 0x4d5   :  { %v1824_v34 = vpop.xlane.xlu1 %1823 }
 0x4d6   :  { %9222 = vpow2.f32 %v1869_v41  ;;  %v1843_v20 = vsub.f32 %v11197_v35, %v1824_v34  ;;  %v2404_v41 = vmul.f32 1.442695, %v2387_v54  ;;  %v2406_v61 = vmul.f32 1.442695, %v2388_v36 }
 0x4d7   :  { %9224 = vpow2.f32 %v1873_v3 }
 0x4d8   :  { %v11378_v22 = vpop.eup %9212  ;;  %v1871_v46 = vmul.f32 1.442695, %v1843_v20 }
 0x4d9   :  { %14558 = vst [vmem:[#allocation39_spill] sm:$0xff] %v11378_v22  ;;  %v11380_v29 = vpop.eup %9214  ;;  %v1913_v63 = vpack.c.bf16 %v11378_v22, %v11372_v7 }
 0x4da   :  { %14559 = vst [vmem:[#allocation43_spill] sm:$0xff] %v11380_v29  ;;  %v1914_v32 = vpack.c.bf16 %v11374_v43, %v11380_v29  ;;  %v11386_v18 = vpop.eup %9216  ;;  %9226 = vpow2.f32 %v1871_v46  ;;  %v1830_v35 = vpop.xlane.xlu1 %1829 }
 0x4db   :  { %14560 = vst [vmem:[#allocation23_spill] sm:$0xff] %v11386_v18  ;;  %8443 = vmatprep.mubr.bf16.mxu1 %v1913_v63  ;;  %v1846_v40 = vsub.f32 %v11219_v16, %v1830_v35  ;;  %9228 = vpow2.f32 %v1875_v51  ;;  %v2365_v46 = vpop.xlane.xlu0 %2364 }
 0x4dc   :  { %v11389_v24 = vpop.eup %9218  ;;  %8444 = vmatmul.mubr.bf16.gmra.mrb[84].mxu1 %v1914_v32  ;;  %v2391_v32 = vsub.f32 %v11188_v14, %v2365_v46 }
 0x4dd   :  { %14561 = vst [vmem:[#allocation47_spill] sm:$0xff] %v11389_v24  ;;  %v1915_v23 = vpack.c.bf16 %v11386_v18, %v11389_v24  ;;  %v1877_v17 = vmul.f32 1.442695, %v1846_v40  ;;  %v11394_v15 = vpop.eup %9220  ;;  %v14664_v24 = vld [vmem:[#allocation40_spill] sm:$0xff] }
 0x4de   :  { %14562 = vst [vmem:[#allocation25_spill] sm:$0xff] %v11394_v15  ;;  %v2355_v3 = vpop.xlane.xlu1 %2354  ;;  %v2412_v40 = vmul.f32 1.442695, %v2391_v32 }
 0x4df   :  { %8447 = vmatprep.mubr.bf16.mxu1 %v1915_v23  ;;  %9230 = vpow2.f32 %v1877_v17  ;;  %v2386_v34 = vsub.f32 %v11228_v2, %v2355_v3 }
 0x4e0   :  { %v11397_v60 = vpop.eup %9222  ;;  %9232 = vpow2.f32 %v2404_v41 }
 0x4e1   :  { %14563 = vst [vmem:[#allocation46_spill] sm:$0xff] %v11397_v60  ;;  %v1916_v16 = vpack.c.bf16 %v11397_v60, %v11394_v15  ;;  %v2402_v8 = vmul.f32 1.442695, %v2386_v34  ;;  %v11402_v47 = vpop.eup %9224  ;;  %v14657_v15 = vld [vmem:[#allocation49_spill] sm:$0xff] }
 0x4e2   :  { %v2361_v20 = vpop.xlane.xlu1 %2360  ;;  %14564 = vst [vmem:[#allocation17_spill] sm:$0xff] %v11402_v47 }
 0x4e3   :  { %9234 = vpow2.f32 %v2402_v8  ;;  %v2389_v4 = vsub.f32 %v11236_v21, %v2361_v20 }
 0x4e4   :  { %8448 = vmatmul.mubr.bf16.gmra.mrb[88].mxu1 %v1916_v16  ;;  %v11405_v5 = vpop.eup %9226  ;;  %9236 = vpow2.f32 %v2406_v61 }
 0x4e5   :  { %14565 = vst [vmem:[#allocation81_spill] sm:$0xff] %v11405_v5  ;;  %v2408_v63 = vmul.f32 1.442695, %v2389_v4  ;;  %v1917_v2 = vpack.c.bf16 %v11402_v47, %v11405_v5  ;;  %v11410_v54 = vpop.eup %9228 }
 0x4e6   :  { %v2367_v51 = vpop.xlane.xlu1 %2366  ;;  %14566 = vst [vmem:[#allocation18_spill] sm:$0xff] %v11410_v54 }
 0x4e7   :  { %9238 = vpow2.f32 %v2408_v63  ;;  %8451 = vmatprep.mubr.bf16.mxu1 %v1917_v2  ;;  %v2392_v21 = vsub.f32 %v11247_v6, %v2367_v51  ;;  %v2765_v63 = vsel %vm14550_vm14, %v14549_v9, 0  ;;  %v2375_v2 = vpop.xlane.xlu0 %2374  ;;  %v14572_v51 = vld [vmem:[#allocation84_spill] sm:$0xff]  ;;  %vm14578_vm14 = vmmov %vm14573_vm0 }
 0x4e8   :  { %9240 = vpow2.f32 %v2412_v40 }
 0x4e9   :  { %v11412_v35 = vpop.eup %9230  ;;  %v2414_v34 = vmul.f32 1.442695, %v2392_v21 }
 0x4ea   :  { %14567 = vst [vmem:[#allocation76_spill] sm:$0xff] %v11412_v35  ;;  %v2363_v23 = vpop.xlane.xlu1 %2362  ;;  %v1918_v17 = vpack.c.bf16 %v11412_v35, %v11410_v54  ;;  %v11418_v41 = vpop.eup %9232 }
 0x4eb   :  { %v2390_v36 = vsub.f32 %v11252_v57, %v2363_v23  ;;  %14568 = vst [vmem:[#allocation20_spill] sm:$0xff] %v11418_v41  ;;  %v2396_v23 = vsub.f32 %v11209_v62, %v2375_v2 }
 0x4ec   :  { %8452 = vmatmul.mubr.bf16.gmra.mrb[92].mxu1 %v1918_v17 }
 0x4ed   :  { %v11420_v14 = vpop.eup %9234  ;;  %v2410_v3 = vmul.f32 1.442695, %v2390_v36 }
 0x4ee   :  { %14569 = vst [vmem:[#allocation85_spill] sm:$0xff] %v11420_v14  ;;  %v2369_v16 = vpop.xlane.xlu1 %2368  ;;  %v2466_v8 = vpack.c.bf16 %v11418_v41, %v11420_v14  ;;  %v11425_v61 = vpop.eup %9236 }
 0x4ef   :  { %9242 = vpow2.f32 %v2410_v3  ;;  %v2393_v6 = vsub.f32 %v11257_v11, %v2369_v16  ;;  %14570 = vst [vmem:[#allocation22_spill] sm:$0xff] %v11425_v61 }
 0x4f0   :  { %8503 = vmatprep.mubr.bf16.mxu1 %v2466_v8  ;;  %9244 = vpow2.f32 %v2414_v34  ;;  %v2422_v8 = vmul.f32 1.442695, %v2396_v23 }
 0x4f1   :  { %v11427_v20 = vpop.eup %9238  ;;  %v2416_v57 = vmul.f32 1.442695, %v2393_v6 }
 0x4f2   :  { %14571 = vst [vmem:[#allocation87_spill] sm:$0xff] %v11427_v20  ;;  %v2371_v46 = vpop.xlane.xlu1 %2370  ;;  %v2467_v4 = vpack.c.bf16 %v11427_v20, %v11425_v61  ;;  %v11437_v21 = vpop.eup %9240 }
 0x4f3   :  { %9246 = vpow2.f32 %v2416_v57  ;;  %v2394_v32 = vsub.f32 %v11262_v58, %v2371_v46  ;;  %14574 = vst [vmem:[#allocation41_spill] sm:$0xff] %v11437_v21  ;;  %v2771_v46 = vsel %vm14579_vm10, %v11360_v55, 0  ;;  %vm14588_vm10 = vmmov %vm14573_vm0 }
 0x4f4   :  { %8504 = vmatmul.mubr.bf16.vlgmr.msra.gmra.mrb[96].mxu1 %v2467_v4 }
 0x4f5   :  { %8520 = vmatpush3.bf16.xpose.msra.mxu1 %v2765_v63  ;;  %v2418_v36 = vmul.f32 1.442695, %v2394_v32 }
 0x4f6   :  { %v2377_v11 = vpop.xlane.xlu1 %2376  ;;  %8928 = vmatprep.subr.msk.bf16.mxu1 %vm14573_vm0, %v14572_v51 }
 0x4f7   :  { %v2397_v40 = vsub.f32 %v11267_v50, %v2377_v11  ;;  %v2768_v50 = vsel %vm14573_vm0, %v14572_v51, 0  ;;  %9248 = vpow2.f32 %v2418_v36 }
 0x4f9   :  { %v11440_v17 = vpop.eup %9242  ;;  %v2424_v3 = vmul.f32 1.442695, %v2397_v40 }
 0x4fa   :  { %14575 = vst [vmem:[#allocation91_spill] sm:$0xff] %v11440_v17  ;;  %v2373_v34 = vpop.xlane.xlu1 %2372  ;;  %v2468_v9 = vpack.c.bf16 %v11437_v21, %v11440_v17  ;;  %v11445_v16 = vpop.eup %9244 }
 0x4fb   :  { %v2395_v58 = vsub.f32 %v11274_v38, %v2373_v34  ;;  %14576 = vst [vmem:[#allocation45_spill] sm:$0xff] %v11445_v16  ;;  %9250 = vpow2.f32 %v2424_v3  ;;  %v2379_v34 = vpop.xlane.xlu0 %2378 }
 0x4fc   :  { %8507 = vmatprep.mubr.bf16.mxu1 %v2468_v9  ;;  %v2774_v9 = vsel %vm14588_vm10, %v11328_v12, 0  ;;  %vm14594_vm10 = vmmov %vm14573_vm0 }
 0x4fd   :  { %v11449_v6 = vpop.eup %9246  ;;  %v2420_v62 = vmul.f32 1.442695, %v2395_v58  ;;  %8522 = vmatpush3.bf16.xpose.msra.mxu1 %v2768_v50  ;;  %v2398_v50 = vsub.f32 %v11240_v25, %v2379_v34 }
 0x4fe   :  { %14577 = vst [vmem:[#allocation90_spill] sm:$0xff] %v11449_v6  ;;  %8929 = vmatprep.subr.msk.bf16.mxu1 %vm14578_vm14, %v11360_v55  ;;  %v2469_v57 = vpack.c.bf16 %v11449_v6, %v11445_v16  ;;  %v2383_v38 = vpop.xlane.xlu1 %2382  ;;  %vm14589_vm14 = vmmov %vm14573_vm0 }
 0x4ff   :  { %9252 = vpow2.f32 %v2420_v62 }
 0x500   :  { %9254 = vpow2.f32 %v2422_v8  ;;  %8508 = vmatmul.mubr.bf16.gmra.mrb[100].mxu1 %v2469_v57  ;;  %v2735_v57 = vpop.permute.xlu0 %2734 }
 0x501   :  { %v11459_v4 = vpop.eup %9248 }
 0x502   :  { %14580 = vst [vmem:[#allocation82_spill] sm:$0xff] %v11459_v4  ;;  %v2385_v2 = vpop.xlane.xlu1 %2384 }
 0x505   :  { %8524 = vmatpush3.bf16.xpose.msra.mxu1 %v2771_v46  ;;  %v11461_v63 = vpop.eup %9250  ;;  %v2401_v46 = vsub.f32 %v11284_v27, %v2385_v2 }
 0x506   :  { %8930 = vmatprep.subr.msk.bf16.mxu1 %vm14573_vm0, %v11328_v12  ;;  %14581 = vst [vmem:[#allocation83_spill] sm:$0xff] %v11461_v63  ;;  %v2733_v58 = vpop.permute.xlu1 %2732 }
 0x507   :  { %v2777_v12 = vsel %vm14573_vm0, %v2733_v58, 0 }
 0x509   :  { %v11463_v32 = vpop.f32.mrb[64].mxu1  ;;  %v11465_v11 = vpop.eup %9252 }
 0x50a   :  { %14582 = vst [vmem:[#allocation79_spill] sm:$0xff] %v11463_v32  ;;  %14583 = vst [vmem:[#allocation78_spill] sm:$0xff] %v11465_v11  ;;  %v11467_v51 = vpop.f32.mrb[65].mxu1  ;;  %v11469_v40 = vpop.eup %9254  ;;  %v2470_v55 = vpack.c.bf16 %v11465_v11, %v11459_v4 }
 0x50b   :  { %14584 = vst [vmem:[#allocation88_spill] sm:$0xff] %v11467_v51  ;;  %14585 = vst [vmem:[#allocation86_spill] sm:$0xff] %v11469_v40  ;;  %v11471_v23 = vpop.f32.mrb[66].mxu1  ;;  %v2471_v3 = vpack.c.bf16 %v11461_v63, %v11469_v40  ;;  %v2432_v51 = vmul.f32 1.442695, %v2401_v46 }
 0x50c   :  { %14586 = vst [vmem:[#allocation92_spill] sm:$0xff] %v11471_v23  ;;  %v11475_v36 = vpop.f32.mrb[67].mxu1  ;;  %8511 = vmatprep.mubr.bf16.mxu1 %v2470_v55 }
 0x50d   :  { %14587 = vst [vmem:[#allocation89_spill] sm:$0xff] %v11475_v36  ;;  %8512 = vmatmul.mubr.bf16.gmra.mrb[104].mxu1 %v2471_v3  ;;  %v2400_v3 = vsub.f32 %v11279_v52, %v2383_v38  ;;  %v2711_v38 = vpop.permute.xlu1 %2710 }
 0x50e   :  { %8526 = vmatpush3.bf16.xpose.msra.mxu1 %v2774_v9  ;;  %v2426_v9 = vmul.f32 1.442695, %v2398_v50 }
 0x50f   :  { %8931 = vmatprep.subr.msk.bf16.mxu1 %vm14589_vm14, %v2733_v58  ;;  %v2430_v34 = vmul.f32 1.442695, %v2400_v3  ;;  %vm14599_vm14 = vmmov %vm14573_vm0 }
 0x510   :  { %9256 = vpow2.f32 %v2426_v9  ;;  %v2780_v50 = vsel %vm14599_vm14, %v2735_v57, 0  ;;  %vm14609_vm14 = vmmov %vm14573_vm0 }
 0x511   :  { %9258 = vpow2.f32 %v2432_v51  ;;  %v2715_v46 = vpop.permute.xlu1 %2714 }
 0x512   :  { %v11482_v8 = vpop.f32.mrb[68].mxu1 }
 0x513   :  { %14590 = vst [vmem:[#allocation84_spill] sm:$0xff] %v11482_v8  ;;  %v11485_v62 = vpop.f32.mrb[69].mxu1 }
 0x514   :  { %14591 = vst [vmem:[#allocation109_spill] sm:$0xff] %v11485_v62  ;;  %v11488_v32 = vpop.f32.mrb[70].mxu1 }
 0x515   :  { %14592 = vst [vmem:[#allocation110_spill] sm:$0xff] %v11488_v32  ;;  %v11490_v55 = vpop.f32.mrb[71].mxu1 }
 0x516   :  { %14593 = vst [vmem:[#allocation111_spill] sm:$0xff] %v11490_v55  ;;  %8528 = vmatpush3.bf16.xpose.msra.mxu1 %v2777_v12 }
 0x517   :  { %8932 = vmatprep.subr.msk.bf16.mxu1 %vm14594_vm10, %v2735_v57  ;;  %vm14606_vm10 = vmmov %vm14573_vm0 }
 0x518   :  { %v2381_v8 = vpop.xlane.xlu0 %2380 }
 0x519   :  { %v2399_v25 = vsub.f32 %v11291_v1, %v2381_v8 }
 0x51a   :  { %v11496_v62 = vpop.f32.mrb[72].mxu1  ;;  %v11512_v9 = vpop.eup %9256 }
 0x51b   :  { %14595 = vst [vmem:[#allocation112_spill] sm:$0xff] %v11496_v62  ;;  %v2428_v27 = vmul.f32 1.442695, %v2399_v25  ;;  %v11498_v2 = vpop.f32.mrb[73].mxu1  ;;  %14603 = vst [vmem:[#allocation119_spill] sm:$0xff] %v11512_v9 }
 0x51c   :  { %14596 = vst [vmem:[#allocation113_spill] sm:$0xff] %v11498_v2  ;;  %v2737_v32 = vpop.permute.xlu0 %2736  ;;  %v11500_v52 = vpop.f32.mrb[74].mxu1 }
 0x51d   :  { %14597 = vst [vmem:[#allocation114_spill] sm:$0xff] %v11500_v52  ;;  %9260 = vpow2.f32 %v2428_v27  ;;  %v11502_v58 = vpop.f32.mrb[75].mxu1  ;;  %v11516_v27 = vpop.eup %9258  ;;  %v2783_v57 = vsel %vm14606_vm10, %v2737_v32, 0  ;;  %vm14610_vm10 = vmmov %vm14573_vm0 }
 0x51e   :  { %14598 = vst [vmem:[#allocation115_spill] sm:$0xff] %v11502_v58  ;;  %9262 = vpow2.f32 %v2430_v34  ;;  %8530 = vmatpush3.bf16.xpose.msra.mxu1 %v2780_v50  ;;  %14605 = vst [vmem:[#allocation121_spill] sm:$0xff] %v11516_v27  ;;  %v14611_v58 = vld [vmem:[#allocation51_spill] sm:$0xff] }
 0x51f   :  { %8933 = vmatprep.subr.msk.bf16.mxu1 %vm14573_vm0, %v2737_v32 }
 0x520   :  { %v2739_v1 = vpop.permute.xlu0 %2738 }
 0x522   :  { %v11506_v8 = vpop.f32.mrb[76].mxu1 }
 0x523   :  { %14600 = vst [vmem:[#allocation116_spill] sm:$0xff] %v11506_v8  ;;  %v11508_v3 = vpop.f32.mrb[77].mxu1 }
 0x524   :  { %14601 = vst [vmem:[#allocation117_spill] sm:$0xff] %v11508_v3  ;;  %v2709_v51 = vpop.permute.xlu0 %2708  ;;  %v11510_v12 = vpop.f32.mrb[78].mxu1 }
 0x525   :  { %14602 = vst [vmem:[#allocation118_spill] sm:$0xff] %v11510_v12  ;;  %v11514_v25 = vpop.f32.mrb[79].mxu1  ;;  %v2719_v12 = vpop.permute.xlu1 %2718 }
 0x526   :  { %14604 = vst [vmem:[#allocation120_spill] sm:$0xff] %v11514_v25  ;;  %8532 = vmatpush3.bf16.xpose.msra.mxu1 %v2783_v57  ;;  %v2786_v25 = vsel %vm14610_vm10, %v2739_v1, 0  ;;  %vm14616_vm10 = vmmov %vm14573_vm0 }
 0x527   :  { %v11519_v34 = vpop.eup %9260  ;;  %8934 = vmatprep.subr.msk.bf16.mxu1 %vm14609_vm14, %v2739_v1  ;;  %vm14612_vm14 = vmmov %vm14573_vm0 }
 0x528   :  { %14607 = vst [vmem:[#allocation122_spill] sm:$0xff] %v11519_v34  ;;  %v11521_v50 = vpop.eup %9262  ;;  %v2713_v8 = vpop.permute.xlu0 %2712  ;;  %v2472_v3 = vpack.c.bf16 %v11519_v34, %v11512_v9  ;;  %v14656_v34 = vld [vmem:[#allocation48_spill] sm:$0xff] }
 0x529   :  { %14608 = vst [vmem:[#allocation123_spill] sm:$0xff] %v11521_v50  ;;  %v2473_v52 = vpack.c.bf16 %v11516_v27, %v11521_v50  ;;  %v2723_v57 = vpop.permute.xlu1 %2722 }
 0x52a   :  { %8515 = vmatprep.mubr.bf16.mxu1 %v2472_v3 }
 0x52b   :  { %8516 = vmatmul.mubr.bf16.gmra.mrb[108].mxu1 %v2473_v52  ;;  %v14614_v52 = vld [vmem:[#allocation50_spill] sm:$0xff] }
 0x52c   :  { %8535 = vmatprep.mubr.msk.bf16.mxu1 %vm14573_vm0, %v2709_v51  ;;  %v2717_v32 = vpop.permute.xlu0 %2716  ;;  %v14615_v51 = vld [vmem:[#allocation53_spill] sm:$0xff] }
 0x52d   :  { %v3024_v55 = vpop.permute.xlu1 %3023 }
 0x52e   :  { %8534 = vmatpush3.bf16.xpose.msra.mxu1 %v2786_v25  ;;  %v14622_v25 = vld [vmem:[#allocation57_spill] sm:$0xff] }
 0x52f   :  { %8615 = vmatprep.subr.bf16.mxu1 %v14611_v58 }
 0x530   :  { %v2721_v62 = vpop.permute.xlu0 %2720 }
 0x531   :  { %v3028_v1 = vpop.permute.xlu1 %3027 }
 0x534   :  { %v3022_v2 = vpop.permute.xlu0 %3021 }
 0x535   :  { %8551 = vmatprep.subr.bf16.mxu0 %v3022_v2  ;;  %8536 = vmatmul.mubr.msk.bf16.vlgmr.msra.gmra.mrb[112].mxu1 %vm14612_vm14, %v2711_v38  ;;  %v3030_v38 = vpop.permute.xlu1 %3029  ;;  %vm14620_vm14 = vmmov %vm14573_vm0 }
 0x536   :  { %8552 = vmatpush3.bf16.msra.mxu0 %v3022_v2  ;;  %8539 = vmatprep.mubr.msk.bf16.mxu1 %vm14613_vm12, %v2713_v8  ;;  %v14617_v2 = vld [vmem:[#allocation52_spill] sm:$0xff]  ;;  %vm14619_vm12 = vmmov %vm14573_vm0 }
 0x537   :  { %8616 = vmatpush3.bf16.msra.mxu1 %v14611_v58  ;;  %8553 = vmatprep.subr.bf16.mxu0 %v3024_v55 }
 0x538   :  { %8617 = vmatprep.subr.bf16.mxu1 %v14614_v52  ;;  %v3026_v3 = vpop.permute.xlu0 %3025 }
 0x539   :  { %v3032_v8 = vpop.permute.xlu1 %3031 }
 0x53a   :  { %8554 = vmatpush3.bf16.msra.mxu0 %v3024_v55  ;;  %v14618_v55 = vld [vmem:[#allocation55_spill] sm:$0xff] }
 0x53b   :  { %8618 = vmatpush3.bf16.msra.mxu1 %v14614_v52  ;;  %8555 = vmatprep.subr.bf16.mxu0 %v3026_v3 }
 0x53c   :  { %8619 = vmatprep.subr.bf16.mxu1 %v14615_v51 }
 0x53d   :  { %8540 = vmatmul.mubr.msk.bf16.gmra.mrb[116].mxu1 %vm14573_vm0, %v2715_v46  ;;  %v14621_v46 = vld [vmem:[#allocation54_spill] sm:$0xff] }
 0x53e   :  { %8556 = vmatpush3.bf16.msra.mxu0 %v3026_v3  ;;  %8543 = vmatprep.mubr.msk.bf16.mxu1 %vm14616_vm10, %v2717_v32  ;;  %v14623_v32 = vld [vmem:[#allocation56_spill] sm:$0xff]  ;;  %vm14658_vm10 = vnez %v14471_v59  ;;  %v14950_v59 = vld [vmem:[#allocation73_spill] sm:$0xff] }
 0x53f   :  { %8620 = vmatpush3.bf16.msra.mxu1 %v14615_v51  ;;  %8557 = vmatprep.subr.bf16.mxu0 %v3028_v1 }
 0x540   :  { %8621 = vmatprep.subr.bf16.mxu1 %v14617_v2 }
 0x542   :  { %8558 = vmatpush3.bf16.msra.mxu0 %v3028_v1 }
 0x543   :  { %8622 = vmatpush3.bf16.msra.mxu1 %v14617_v2  ;;  %8559 = vmatprep.subr.bf16.mxu0 %v3030_v38 }
 0x544   :  { %8623 = vmatprep.subr.bf16.mxu1 %v14618_v55 }
 0x545   :  { %8544 = vmatmul.mubr.msk.bf16.gmra.mrb[120].mxu1 %vm14619_vm12, %v2719_v12  ;;  %vm14659_vm12 = vnez %v14465_v26 }
 0x546   :  { %8560 = vmatpush3.bf16.msra.mxu0 %v3030_v38  ;;  %8547 = vmatprep.mubr.msk.bf16.mxu1 %vm14620_vm14, %v2721_v62  ;;  %vm14660_vm14 = vnez %v14483_v28 }
 0x547   :  { %8624 = vmatpush3.bf16.msra.mxu1 %v14618_v55  ;;  %8561 = vmatprep.subr.bf16.mxu0 %v3032_v8 }
 0x548   :  { %8625 = vmatprep.subr.bf16.mxu1 %v14621_v46 }
 0x54a   :  { %8562 = vmatpush3.bf16.msra.mxu0 %v3032_v8 }
 0x54b   :  { %8626 = vmatpush3.bf16.msra.mxu1 %v14621_v46 }
 0x54c   :  { %8627 = vmatprep.subr.bf16.mxu1 %v14622_v25 }
 0x54d   :  { %8548 = vmatmul.mubr.msk.bf16.gmra.mrb[124].mxu1 %vm14573_vm0, %v2723_v57  ;;  %vm14661_vm0 = vnez %v14477_v56 }
 0x54f   :  { %8628 = vmatpush3.bf16.msra.mxu1 %v14622_v25 }
 0x550   :  { %8629 = vmatprep.subr.bf16.mxu1 %v14623_v32 }
 0x553   :  { %8630 = vmatpush3.bf16.msra.mxu1 %v14623_v32 }
 0x57a   :  { %v11553_v12 = vpop.f32.mrb[80].mxu1 }
 0x57b   :  { %14624 = vst [vmem:[#allocation51_spill] sm:$0xff] %v11553_v12  ;;  %v11555_v62 = vpop.f32.mrb[81].mxu1 }
 0x57c   :  { %14625 = vst [vmem:[#allocation50_spill] sm:$0xff] %v11555_v62  ;;  %v11557_v3 = vpop.f32.mrb[82].mxu1 }
 0x57d   :  { %14626 = vst [vmem:[#allocation53_spill] sm:$0xff] %v11557_v3  ;;  %v11559_v1 = vpop.f32.mrb[83].mxu1 }
 0x57e   :  { %14627 = vst [vmem:[#allocation52_spill] sm:$0xff] %v11559_v1 }
 0x5af   :  { %v11561_v38 = vpop.f32.mrb[84].mxu1 }
 0x5b0   :  { %14628 = vst [vmem:[#allocation55_spill] sm:$0xff] %v11561_v38  ;;  %v11563_v8 = vpop.f32.mrb[85].mxu1 }
 0x5b1   :  { %14629 = vst [vmem:[#allocation54_spill] sm:$0xff] %v11563_v8  ;;  %v11565_v23 = vpop.f32.mrb[86].mxu1 }
 0x5b2   :  { %14630 = vst [vmem:[#allocation57_spill] sm:$0xff] %v11565_v23  ;;  %v11567_v57 = vpop.f32.mrb[87].mxu1 }
 0x5b3   :  { %14631 = vst [vmem:[#allocation56_spill] sm:$0xff] %v11567_v57 }
 0x5b7   :  { %v11569_v36 = vpop.f32.mrb[88].mxu1 }
 0x5b8   :  { %14632 = vst [vmem:[#allocation124_spill] sm:$0xff] %v11569_v36  ;;  %v11571_v50 = vpop.f32.mrb[89].mxu1 }
 0x5b9   :  { %14633 = vst [vmem:[#allocation125_spill] sm:$0xff] %v11571_v50  ;;  %v11573_v9 = vpop.f32.mrb[90].mxu1 }
 0x5ba   :  { %14634 = vst [vmem:[#allocation126_spill] sm:$0xff] %v11573_v9  ;;  %v11575_v12 = vpop.f32.mrb[91].mxu1 }
 0x5bb   :  { %14635 = vst [vmem:[#allocation127_spill] sm:$0xff] %v11575_v12 }
 0x5bf   :  { %v11577_v62 = vpop.f32.mrb[92].mxu1 }
 0x5c0   :  { %14636 = vst [vmem:[#allocation128_spill] sm:$0xff] %v11577_v62  ;;  %v11579_v3 = vpop.f32.mrb[93].mxu1 }
 0x5c1   :  { %14637 = vst [vmem:[#allocation129_spill] sm:$0xff] %v11579_v3  ;;  %v11581_v1 = vpop.f32.mrb[94].mxu1 }
 0x5c2   :  { %14638 = vst [vmem:[#allocation130_spill] sm:$0xff] %v11581_v1  ;;  %v11583_v38 = vpop.f32.mrb[95].mxu1 }
 0x5c3   :  { %14639 = vst [vmem:[#allocation131_spill] sm:$0xff] %v11583_v38 }
 0x5c7   :  { %v11585_v8 = vpop.f32.mrb[96].mxu1 }
 0x5c8   :  { %14640 = vst [vmem:[#allocation132_spill] sm:$0xff] %v11585_v8  ;;  %v11587_v23 = vpop.f32.mrb[97].mxu1 }
 0x5c9   :  { %14641 = vst [vmem:[#allocation133_spill] sm:$0xff] %v11587_v23  ;;  %v11589_v57 = vpop.f32.mrb[98].mxu1 }
 0x5ca   :  { %14642 = vst [vmem:[#allocation134_spill] sm:$0xff] %v11589_v57  ;;  %v11591_v36 = vpop.f32.mrb[99].mxu1 }
 0x5cb   :  { %14643 = vst [vmem:[#allocation135_spill] sm:$0xff] %v11591_v36 }
 0x5d3   :  { %v11593_v50 = vpop.f32.mrb[100].mxu1 }
 0x5d4   :  { %14644 = vst [vmem:[#allocation136_spill] sm:$0xff] %v11593_v50  ;;  %v11595_v9 = vpop.f32.mrb[101].mxu1 }
 0x5d5   :  { %14645 = vst [vmem:[#allocation137_spill] sm:$0xff] %v11595_v9  ;;  %v11597_v12 = vpop.f32.mrb[102].mxu1 }
 0x5d6   :  { %14646 = vst [vmem:[#allocation138_spill] sm:$0xff] %v11597_v12  ;;  %v11599_v62 = vpop.f32.mrb[103].mxu1 }
 0x5d7   :  { %14647 = vst [vmem:[#allocation139_spill] sm:$0xff] %v11599_v62 }
 0x5e0   :  { %v11601_v3 = vpop.f32.mrb[104].mxu1 }
 0x5e1   :  { %14648 = vst [vmem:[#allocation140_spill] sm:$0xff] %v11601_v3  ;;  %v11603_v1 = vpop.f32.mrb[105].mxu1 }
 0x5e2   :  { %14649 = vst [vmem:[#allocation141_spill] sm:$0xff] %v11603_v1  ;;  %v11605_v38 = vpop.f32.mrb[106].mxu1 }
 0x5e3   :  { %14650 = vst [vmem:[#allocation142_spill] sm:$0xff] %v11605_v38  ;;  %v11607_v8 = vpop.f32.mrb[107].mxu1 }
 0x5e4   :  { %14651 = vst [vmem:[#allocation143_spill] sm:$0xff] %v11607_v8 }
 0x5fe   :  { %v11609_v23 = vpop.f32.mrb[108].mxu1 }
 0x5ff   :  { %14652 = vst [vmem:[#allocation144_spill] sm:$0xff] %v11609_v23  ;;  %v11611_v57 = vpop.f32.mrb[109].mxu1 }
 0x600   :  { %14653 = vst [vmem:[#allocation145_spill] sm:$0xff] %v11611_v57  ;;  %v11613_v36 = vpop.f32.mrb[110].mxu1 }
 0x601   :  { %14654 = vst [vmem:[#allocation146_spill] sm:$0xff] %v11613_v36  ;;  %v11615_v50 = vpop.f32.mrb[111].mxu1 }
 0x602   :  { %14655 = vst [vmem:[#allocation147_spill] sm:$0xff] %v11615_v50 }
 0x608   :  { %v8537_v9 = vpop.f32.mrb[112].mxu1 }
 0x609   :  { %v2887_v12 = vsel %vm10814_vm1, %v8537_v9, -1e+30  ;;  %v2822_v62 = vpop.f32.mrb[113].mxu1 }
 0x60a   :  { %2905 = vmax.xlane.f32.xlu0 %v2887_v12  ;;  %v8538_v3 = vpop.f32.mrb[114].mxu1  ;;  %v2885_v23 = vsel %vm10826_vm2, %v2822_v62, -1e+30 }
 0x60b   :  { %v2825_v1 = vpop.f32.mrb[115].mxu1  ;;  %v2888_v36 = vsel %vm10843_vm4, %v8538_v3, -1e+30 }
 0x60c   :  { %v2886_v38 = vsel %vm10836_vm3, %v2825_v1, -1e+30 }
 0x60d   :  { %2903 = vmax.xlane.f32.xlu1 %v2886_v38 }
 0x60e   :  { %2901 = vmax.xlane.f32.xlu0 %v2885_v23 }
 0x610   :  { %v8541_v57 = vpop.f32.mrb[116].mxu1 }
 0x611   :  { %v2838_v50 = vpop.f32.mrb[117].mxu1 }
 0x612   :  { %2907 = vmax.xlane.f32.xlu0 %v2888_v36  ;;  %v8542_v8 = vpop.f32.mrb[118].mxu1 }
 0x613   :  { %v2841_v9 = vpop.f32.mrb[119].mxu1 }
 0x614   :  { %v11631_v3 = vsel %vm10880_vm7, %v2841_v9, -1e+30  ;;  %v11650_v9 = vsel %vm10865_vm6, %v8541_v57, -1e+30 }
 0x618   :  { %v8545_v54 = vpop.f32.mrb[120].mxu1 }
 0x619   :  { %v2854_v5 = vpop.f32.mrb[121].mxu1 }
 0x61a   :  { %v8546_v27 = vpop.f32.mrb[122].mxu1  ;;  %v11670_v57 = vsel %vm14658_vm10, %v2854_v5, -1e+30 }
 0x61b   :  { %v2857_v40 = vpop.f32.mrb[123].mxu1 }
 0x61c   :  { %v11636_v47 = vsel %vm10924_vm11, %v2857_v40, -1e+30 }
 0x61e   :  { %3035 = vrot.lane.b32.xlu1 %v14656_v34, %s9931_s2  ;;  %v11640_v34 = vsel %vm10887_vm8, %v2838_v50, -1e+30  ;;  %v11660_v50 = vsel %vm10858_vm5, %v8542_v8, -1e+30 }
 0x620   :  { %v8549_v1 = vpop.f32.mrb[124].mxu1 }
 0x621   :  { %v2870_v4 = vpop.f32.mrb[125].mxu1  ;;  %v11686_v5 = vsel %vm14661_vm0, %v8549_v1, -1e+30 }
 0x622   :  { %v8550_v62 = vpop.f32.mrb[126].mxu1  ;;  %v11681_v8 = vsel %vm14660_vm14, %v2870_v4, -1e+30 }
 0x623   :  { %v2873_v35 = vpop.f32.mrb[127].mxu1 }
 0x624   :  { %v11656_v40 = vsel %vm10968_vm15, %v2873_v35, -1e+30  ;;  %v11676_v35 = vsel %vm14659_vm12, %v8545_v54, -1e+30  ;;  %v14663_v54 = vld [vmem:[#allocation32_spill] sm:$0xff]  ;;  %vm14667_vm15 = vcmask 261120  }
 0x628   :  { %3033 = vrot.lane.b32.xlu0 %v14657_v15, %s9931_s2  ;;  %v11646_v15 = vsel %vm10902_vm9, %v8546_v27, -1e+30  ;;  %v11666_v27 = vsel %vm10946_vm13, %v8550_v62, -1e+30  ;;  %v14662_v62 = vld [vmem:[#allocation36_spill] sm:$0xff]  ;;  %vm14670_vm13 = vmmov %vm14667_vm15 }
 0x629   :  { %vm14671_vm14 = vmmov %vm14670_vm13 }
 0x62a   :  { %vm14673_vm9 = vmmov %vm14670_vm13 }
 0x62b   :  { %vm14674_vm12 = vmmov %vm14673_vm9 }
 0x62c   :  { %vm14676_vm0 = vmmov %vm14673_vm9 }
 0x62d   :  { %vm14714_vm7 = vmmov %vm14676_vm0 }
 0x642   :  { %2911 = vmax.xlane.f32.xlu1 %v11631_v3 }
 0x646   :  { %2919 = vmax.xlane.f32.xlu1 %v11636_v47 }
 0x647   :  { %2909 = vmax.xlane.f32.xlu0 %v11640_v34 }
 0x64a   :  { %2923 = vmax.xlane.f32.xlu1 %v11646_v15 }
 0x64b   :  { %2913 = vmax.xlane.f32.xlu0 %v11650_v9 }
 0x64e   :  { %2927 = vmax.xlane.f32.xlu1 %v11656_v40 }
 0x64f   :  { %2915 = vmax.xlane.f32.xlu0 %v11660_v50 }
 0x652   :  { %2931 = vmax.xlane.f32.xlu1 %v11666_v27 }
 0x653   :  { %2917 = vmax.xlane.f32.xlu0 %v11670_v57 }
 0x657   :  { %2921 = vmax.xlane.f32.xlu0 %v11676_v35 }
 0x65b   :  { %2925 = vmax.xlane.f32.xlu0 %v11681_v8 }
 0x65f   :  { %2929 = vmax.xlane.f32.xlu0 %v11686_v5 }
 0x663   :  { %3739 = vrot.lane.b32.xlu1 %v14662_v62, %s9930_s1 }
 0x675   :  { %3737 = vrot.lane.b32.xlu0 %v14663_v54, %s9930_s1 }
 0x679   :  { %3741 = vrot.lane.b32.xlu0 %v14664_v24, %s9930_s1 }
 0x697   :  { %v2906_v63 = vpop.xlane.xlu0 %2905 }
 0x698   :  { %v2935_v16 = vsub.f32 %v2887_v12, %v2906_v63 }
 0x69a   :  { %v2904_v4 = vpop.xlane.xlu1 %2903  ;;  %v2953_v18 = vmul.f32 1.442695, %v2935_v16 }
 0x69b   :  { %v2934_v11 = vsub.f32 %v2886_v38, %v2904_v4  ;;  %v2902_v17 = vpop.xlane.xlu0 %2901  ;;  %v14681_v38 = vld [vmem:[#allocation29_spill] sm:$0xff] }
 0x69c   :  { %v2933_v60 = vsub.f32 %v2885_v23, %v2902_v17  ;;  %v14675_v17 = vld [vmem:[#allocation44_spill] sm:$0xff] }
 0x69d   :  { %v2951_v29 = vmul.f32 1.442695, %v2934_v11 }
 0x69e   :  { %v2949_v1 = vmul.f32 1.442695, %v2933_v60  ;;  %v3036_v14 = vpop.permute.xlu1 %3035 }
 0x69f   :  { %9264 = vpow2.f32 %v2951_v29  ;;  %v2908_v7 = vpop.xlane.xlu0 %2907 }
 0x6a0   :  { %9266 = vpow2.f32 %v2949_v1  ;;  %v2936_v6 = vsub.f32 %v2888_v36, %v2908_v7 }
 0x6a1   :  { %9268 = vpow2.f32 %v2953_v18 }
 0x6a2   :  { %v2955_v61 = vmul.f32 1.442695, %v2936_v6  ;;  %v14678_v6 = vld [vmem:[#allocation27_spill] sm:$0xff] }
 0x6a3   :  { %v3034_v21 = vpop.permute.xlu0 %3033 }
 0x6a4   :  { %9270 = vpow2.f32 %v2955_v61  ;;  %8563 = vmatprep.subr.bf16.mxu0 %v3034_v21 }
 0x6a5   :  { %8564 = vmatpush3.bf16.msra.mxu0 %v3034_v21  ;;  %v3310_v21 = vsel %vm14674_vm12, %v14664_v24, 0  ;;  %vm14683_vm12 = vmmov %vm14676_vm0 }
 0x6a6   :  { %8565 = vmatprep.subr.bf16.mxu0 %v3036_v14 }
 0x6a9   :  { %v11695_v43 = vpop.eup %9264  ;;  %8566 = vmatpush3.bf16.msra.mxu0 %v3036_v14  ;;  %v3304_v14 = vsel %vm14670_vm13, %v14663_v54, 0 }
 0x6aa   :  { %14665 = vst [vmem:[#allocation48_spill] sm:$0xff] %v11695_v43  ;;  %v11697_v63 = vpop.eup %9266  ;;  %8935 = vmatprep.subr.msk.bf16.mxu0 %vm14667_vm15, %v14663_v54  ;;  %vm14672_vm15 = vmmov %vm14670_vm13 }
 0x6ab   :  { %14666 = vst [vmem:[#allocation49_spill] sm:$0xff] %v11697_v63  ;;  %v3013_v29 = vpack.c.bf16 %v11695_v43, %v11697_v63  ;;  %v11703_v7 = vpop.eup %9268  ;;  %v3307_v61 = vsel %vm14672_vm15, %v14662_v62, 0  ;;  %vm14677_vm13 = vmmov %vm14676_vm0 }
 0x6ac   :  { %14668 = vst [vmem:[#allocation40_spill] sm:$0xff] %v11703_v7  ;;  %v3313_v16 = vsel %vm14677_vm13, %v14675_v17, 0  ;;  %vm14680_vm15 = vmmov %vm14676_vm0 }
 0x6ad   :  { %8567 = vmatprep.mubr.bf16.mxu0 %v3013_v29  ;;  %v3316_v36 = vsel %vm14680_vm15, %v14678_v6, 0  ;;  %vm14685_vm13 = vmmov %vm14676_vm0 }
 0x6ae   :  { %v11705_v18 = vpop.eup %9270  ;;  %vm14690_vm15 = vmmov %vm14676_vm0 }
 0x6af   :  { %14669 = vst [vmem:[#allocation148_spill] sm:$0xff] %v11705_v18  ;;  %v3014_v60 = vpack.c.bf16 %v11705_v18, %v11703_v7 }
 0x6b1   :  { %8568 = vmatmul.mubr.bf16.vlgmr.msra.gmra.mrb[80].mxu0 %v3014_v60 }
 0x6b2   :  { %8584 = vmatpush3.bf16.xpose.msra.mxu0 %v3304_v14 }
 0x6b3   :  { %8936 = vmatprep.subr.msk.bf16.mxu0 %vm14671_vm14, %v14662_v62  ;;  %vm14679_vm14 = vmmov %vm14676_vm0 }
 0x6ba   :  { %8586 = vmatpush3.bf16.xpose.msra.mxu0 %v3307_v61 }
 0x6bb   :  { %8937 = vmatprep.subr.msk.bf16.mxu0 %vm14673_vm9, %v14664_v24  ;;  %vm14682_vm9 = vmmov %vm14676_vm0 }
 0x6c2   :  { %8588 = vmatpush3.bf16.xpose.msra.mxu0 %v3310_v21 }
 0x6c3   :  { %8938 = vmatprep.subr.msk.bf16.mxu0 %vm14676_vm0, %v14675_v17 }
 0x6ca   :  { %8590 = vmatpush3.bf16.xpose.msra.mxu0 %v3313_v16  ;;  %v14684_v16 = vld [vmem:[#allocation33_spill] sm:$0xff] }
 0x6cb   :  { %8939 = vmatprep.subr.msk.bf16.mxu0 %vm14679_vm14, %v14678_v6  ;;  %vm14689_vm14 = vmmov %vm14676_vm0 }
 0x6cf   :  { %v2912_v11 = vpop.xlane.xlu1 %2911 }
 0x6d0   :  { %v2938_v23 = vsub.f32 %v11631_v3, %v2912_v11  ;;  %v3319_v3 = vsel %vm14683_vm12, %v14681_v38, 0  ;;  %vm14703_vm12 = vmmov %vm14676_vm0 }
 0x6d2   :  { %8592 = vmatpush3.bf16.xpose.msra.mxu0 %v3316_v36  ;;  %v2959_v4 = vmul.f32 1.442695, %v2938_v23 }
 0x6d3   :  { %v2920_v12 = vpop.xlane.xlu1 %2919  ;;  %8940 = vmatprep.subr.msk.bf16.mxu0 %vm14682_vm9, %v14681_v38  ;;  %vm14695_vm9 = vmmov %vm14676_vm0 }
 0x6d4   :  { %v2910_v1 = vpop.xlane.xlu0 %2909  ;;  %9272 = vpow2.f32 %v2959_v4  ;;  %v2942_v11 = vsub.f32 %v11636_v47, %v2920_v12 }
 0x6d5   :  { %v2937_v29 = vsub.f32 %v11640_v34, %v2910_v1 }
 0x6d7   :  { %v2957_v60 = vmul.f32 1.442695, %v2937_v29  ;;  %v2924_v61 = vpop.xlane.xlu1 %2923  ;;  %v2967_v29 = vmul.f32 1.442695, %v2942_v11 }
 0x6d8   :  { %v2914_v14 = vpop.xlane.xlu0 %2913 }
 0x6d9   :  { %9274 = vpow2.f32 %v2957_v60  ;;  %v2939_v21 = vsub.f32 %v11650_v9, %v2914_v14  ;;  %v2944_v60 = vsub.f32 %v11646_v15, %v2924_v61 }
 0x6da   :  { %8594 = vmatpush3.bf16.xpose.msra.mxu0 %v3319_v3  ;;  %v3322_v3 = vsel %vm14685_vm13, %v14684_v16, 0  ;;  %vm14706_vm13 = vmmov %vm14676_vm0 }
 0x6db   :  { %8941 = vmatprep.subr.msk.bf16.mxu0 %vm14676_vm0, %v14684_v16  ;;  %v2961_v23 = vmul.f32 1.442695, %v2939_v21  ;;  %v2928_v1 = vpop.xlane.xlu1 %2927  ;;  %v2971_v21 = vmul.f32 1.442695, %v2944_v60 }
 0x6dc   :  { %v2916_v36 = vpop.xlane.xlu0 %2915  ;;  %v2946_v15 = vsub.f32 %v11656_v40, %v2928_v1 }
 0x6dd   :  { %v2940_v34 = vsub.f32 %v11660_v50, %v2916_v36  ;;  %9276 = vpow2.f32 %v2961_v23  ;;  %v14688_v50 = vld [vmem:[#allocation37_spill] sm:$0xff] }
 0x6de   :  { %v11742_v7 = vpop.eup %9272  ;;  %v3325_v40 = vsel %vm14690_vm15, %v14688_v50, 0  ;;  %vm14710_vm15 = vmmov %vm14676_vm0 }
 0x6df   :  { %v2963_v4 = vmul.f32 1.442695, %v2940_v34  ;;  %14686 = vst [vmem:[#allocation27_spill] sm:$0xff] %v11742_v7  ;;  %v2932_v11 = vpop.xlane.xlu1 %2931  ;;  %v2975_v34 = vmul.f32 1.442695, %v2946_v15 }
 0x6e0   :  { %v2918_v9 = vpop.xlane.xlu0 %2917 }
 0x6e1   :  { %9278 = vpow2.f32 %v2963_v4  ;;  %v2941_v14 = vsub.f32 %v11670_v57, %v2918_v9  ;;  %v2948_v4 = vsub.f32 %v11666_v27, %v2932_v11 }
 0x6e2   :  { %8596 = vmatpush3.bf16.xpose.msra.mxu0 %v3322_v3  ;;  %9280 = vpow2.f32 %v2967_v29 }
 0x6e3   :  { %v11744_v47 = vpop.eup %9274  ;;  %v2965_v12 = vmul.f32 1.442695, %v2941_v14  ;;  %8942 = vmatprep.subr.msk.bf16.mxu0 %vm14689_vm14, %v14688_v50  ;;  %vm14708_vm14 = vmmov %vm14676_vm0 }
 0x6e4   :  { %14687 = vst [vmem:[#allocation33_spill] sm:$0xff] %v11744_v47  ;;  %v2922_v61 = vpop.xlane.xlu0 %2921  ;;  %v3015_v57 = vpack.c.bf16 %v11742_v7, %v11744_v47 }
 0x6e5   :  { %9282 = vpow2.f32 %v2965_v12  ;;  %v2943_v23 = vsub.f32 %v11676_v35, %v2922_v61  ;;  %v2979_v35 = vmul.f32 1.442695, %v2948_v4 }
 0x6e6   :  { %8571 = vmatprep.mubr.bf16.mxu0 %v3015_v57  ;;  %9284 = vpow2.f32 %v2971_v21 }
 0x6e7   :  { %v2969_v36 = vmul.f32 1.442695, %v2943_v23  ;;  %v11756_v1 = vpop.eup %9276 }
 0x6e8   :  { %v2926_v9 = vpop.xlane.xlu0 %2925  ;;  %14691 = vst [vmem:[#allocation37_spill] sm:$0xff] %v11756_v1 }
 0x6e9   :  { %9286 = vpow2.f32 %v2969_v36  ;;  %v2945_v29 = vsub.f32 %v11681_v8, %v2926_v9 }
 0x6ea   :  { %8598 = vmatpush3.bf16.xpose.msra.mxu0 %v3325_v40  ;;  %9288 = vpow2.f32 %v2975_v34 }
 0x6eb   :  { %v11758_v60 = vpop.eup %9278  ;;  %v2973_v14 = vmul.f32 1.442695, %v2945_v29 }
 0x6ec   :  { %14692 = vst [vmem:[#allocation149_spill] sm:$0xff] %v11758_v60  ;;  %v2930_v3 = vpop.xlane.xlu0 %2929  ;;  %v3016_v12 = vpack.c.bf16 %v11758_v60, %v11756_v1  ;;  %v11763_v21 = vpop.eup %9280 }
 0x6ed   :  { %9290 = vpow2.f32 %v2973_v14  ;;  %v2947_v27 = vsub.f32 %v11686_v5, %v2930_v3  ;;  %14693 = vst [vmem:[#allocation150_spill] sm:$0xff] %v11763_v21  ;;  %v14702_v14 = vld [vmem:[#allocation30_spill] sm:$0xff] }
 0x6ee   :  { %8572 = vmatmul.mubr.bf16.gmra.mrb[84].mxu0 %v3016_v12  ;;  %9292 = vpow2.f32 %v2979_v35  ;;  %v14704_v35 = vld [vmem:[#allocation34_spill] sm:$0xff] }
 0x6ef   :  { %v11765_v8 = vpop.eup %9282  ;;  %v2977_v15 = vmul.f32 1.442695, %v2947_v27  ;;  %v14705_v3 = vld [vmem:[#allocation38_spill] sm:$0xff] }
 0x6f0   :  { %14694 = vst [vmem:[#allocation151_spill] sm:$0xff] %v11765_v8  ;;  %v11767_v61 = vpop.permute.xlu0 %3737  ;;  %v3017_v57 = vpack.c.bf16 %v11763_v21, %v11765_v8  ;;  %v11773_v11 = vpop.eup %9284  ;;  %v14707_v12 = vld [vmem:[#allocation42_spill] sm:$0xff] }
 0x6f1   :  { %9294 = vpow2.f32 %v2977_v15  ;;  %8943 = vmatprep.subr.msk.bf16.mxu1 %vm14695_vm9, %v11767_v61  ;;  %14696 = vst [vmem:[#allocation152_spill] sm:$0xff] %v11773_v11  ;;  %v14709_v27 = vld [vmem:[#allocation26_spill] sm:$0xff]  ;;  %v14711_v15 = vld [vmem:[#allocation28_spill] sm:$0xff]  ;;  %vm14712_vm9 = vmmov %vm14676_vm0 }
 0x6f2   :  { %8575 = vmatprep.mubr.bf16.mxu0 %v3017_v57  ;;  %v14713_v57 = vld [vmem:[#allocation31_spill] sm:$0xff] }
 0x6f3   :  { %v11775_v5 = vpop.eup %9286 }
 0x6f4   :  { %14697 = vst [vmem:[#allocation153_spill] sm:$0xff] %v11775_v5  ;;  %v3018_v23 = vpack.c.bf16 %v11773_v11, %v11775_v5  ;;  %v11779_v36 = vpop.eup %9288 }
 0x6f5   :  { %14698 = vst [vmem:[#allocation154_spill] sm:$0xff] %v11779_v36 }
 0x6f6   :  { %8576 = vmatmul.mubr.bf16.gmra.mrb[88].mxu0 %v3018_v23  ;;  %v14715_v23 = vld [vmem:[#allocation35_spill] sm:$0xff] }
 0x6f7   :  { %v11781_v34 = vpop.eup %9290 }
 0x6f8   :  { %14699 = vst [vmem:[#allocation155_spill] sm:$0xff] %v11781_v34  ;;  %v3019_v4 = vpack.c.bf16 %v11779_v36, %v11781_v34  ;;  %v11785_v9 = vpop.eup %9292 }
 0x6f9   :  { %14700 = vst [vmem:[#allocation156_spill] sm:$0xff] %v11785_v9 }
 0x6fa   :  { %8579 = vmatprep.mubr.bf16.mxu0 %v3019_v4 }
 0x6fb   :  { %v11787_v29 = vpop.eup %9294 }
 0x6fc   :  { %14701 = vst [vmem:[#allocation157_spill] sm:$0xff] %v11787_v29  ;;  %v3020_v40 = vpack.c.bf16 %v11785_v9, %v11787_v29 }
 0x6fe   :  { %8580 = vmatmul.mubr.bf16.gmra.mrb[92].mxu0 %v3020_v40 }
 0x6ff   :  { %8599 = vmatprep.mubr.msk.bf16.mxu0 %vm14703_vm12, %v14702_v14  ;;  %vm14716_vm12 = vmmov %vm14676_vm0 }
 0x706   :  { %8600 = vmatmul.mubr.msk.bf16.vlgmr.msra.gmra.mrb[96].mxu0 %vm14676_vm0, %v14704_v35  ;;  %vm14734_vm0 = vnez %v14477_v56 }
 0x707   :  { %8603 = vmatprep.mubr.msk.bf16.mxu0 %vm14706_vm13, %v14705_v3  ;;  %vm14735_vm13 = vnez %v14465_v26 }
 0x70e   :  { %8604 = vmatmul.mubr.msk.bf16.gmra.mrb[100].mxu0 %vm14708_vm14, %v14707_v12  ;;  %vm14736_vm14 = vnez %v14462_v42 }
 0x70f   :  { %8607 = vmatprep.mubr.msk.bf16.mxu0 %vm14710_vm15, %v14709_v27  ;;  %vm14737_vm15 = vnez %v14483_v28 }
 0x716   :  { %8608 = vmatmul.mubr.msk.bf16.gmra.mrb[104].mxu0 %vm14712_vm9, %v14711_v15  ;;  %vm14738_vm9 = vnez %v14474_v53 }
 0x717   :  { %8611 = vmatprep.mubr.msk.bf16.mxu0 %vm14714_vm7, %v14713_v57  ;;  %vm14733_vm7 = vnez %v14456_v44 }
 0x71e   :  { %8612 = vmatmul.mubr.msk.bf16.gmra.mrb[108].mxu0 %vm14716_vm12, %v14715_v23  ;;  %vm14739_vm12 = vnez %v14480_v30 }
 0x784   :  { %v11807_v4 = vpop.f32.mrb[80].mxu0 }
 0x785   :  { %14717 = vst [vmem:[#allocation30_spill] sm:$0xff] %v11807_v4  ;;  %v11809_v40 = vpop.f32.mrb[81].mxu0 }
 0x786   :  { %14718 = vst [vmem:[#allocation34_spill] sm:$0xff] %v11809_v40  ;;  %v11811_v29 = vpop.f32.mrb[82].mxu0 }
 0x787   :  { %14719 = vst [vmem:[#allocation38_spill] sm:$0xff] %v11811_v29  ;;  %v11813_v34 = vpop.f32.mrb[83].mxu0 }
 0x788   :  { %14720 = vst [vmem:[#allocation42_spill] sm:$0xff] %v11813_v34 }
 0x7c1   :  { %v11815_v9 = vpop.f32.mrb[84].mxu0 }
 0x7c2   :  { %14721 = vst [vmem:[#allocation26_spill] sm:$0xff] %v11815_v9  ;;  %v11817_v5 = vpop.f32.mrb[85].mxu0 }
 0x7c3   :  { %14722 = vst [vmem:[#allocation28_spill] sm:$0xff] %v11817_v5  ;;  %v11819_v36 = vpop.f32.mrb[86].mxu0 }
 0x7c4   :  { %14723 = vst [vmem:[#allocation31_spill] sm:$0xff] %v11819_v36  ;;  %v11821_v8 = vpop.f32.mrb[87].mxu0 }
 0x7c5   :  { %14724 = vst [vmem:[#allocation35_spill] sm:$0xff] %v11821_v8 }
 0x7c9   :  { %v11823_v11 = vpop.f32.mrb[88].mxu0 }
 0x7ca   :  { %14725 = vst [vmem:[#allocation158_spill] sm:$0xff] %v11823_v11  ;;  %v11825_v1 = vpop.f32.mrb[89].mxu0 }
 0x7cb   :  { %14726 = vst [vmem:[#allocation159_spill] sm:$0xff] %v11825_v1  ;;  %v11827_v21 = vpop.f32.mrb[90].mxu0 }
 0x7cc   :  { %14727 = vst [vmem:[#allocation160_spill] sm:$0xff] %v11827_v21  ;;  %v11829_v4 = vpop.f32.mrb[91].mxu0 }
 0x7cd   :  { %14728 = vst [vmem:[#allocation161_spill] sm:$0xff] %v11829_v4 }
 0x7d1   :  { %v11831_v40 = vpop.f32.mrb[92].mxu0 }
 0x7d2   :  { %14729 = vst [vmem:[#allocation162_spill] sm:$0xff] %v11831_v40  ;;  %v11833_v29 = vpop.f32.mrb[93].mxu0 }
 0x7d3   :  { %14730 = vst [vmem:[#allocation163_spill] sm:$0xff] %v11833_v29  ;;  %v11835_v34 = vpop.f32.mrb[94].mxu0 }
 0x7d4   :  { %14731 = vst [vmem:[#allocation164_spill] sm:$0xff] %v11835_v34  ;;  %v11837_v9 = vpop.f32.mrb[95].mxu0 }
 0x7d5   :  { %14732 = vst [vmem:[#allocation165_spill] sm:$0xff] %v11837_v9 }
 0x7d9   :  { %v8601_v5 = vpop.f32.mrb[96].mxu0 }
 0x7da   :  { %v11841_v36 = vsel %vm10814_vm1, %v8601_v5, -1e+30  ;;  %v3361_v11 = vpop.f32.mrb[97].mxu0 }
 0x7db   :  { %3444 = vmax.xlane.f32.xlu0 %v11841_v36  ;;  %v8602_v1 = vpop.f32.mrb[98].mxu0  ;;  %v11851_v34 = vsel %vm10826_vm2, %v3361_v11, -1e+30 }
 0x7dc   :  { %v11846_v21 = vsel %vm10843_vm4, %v8602_v1, -1e+30  ;;  %v3364_v40 = vpop.f32.mrb[99].mxu0 }
 0x7dd   :  { %3446 = vmax.xlane.f32.xlu1 %v11846_v21  ;;  %v11856_v5 = vsel %vm10836_vm3, %v3364_v40, -1e+30 }
 0x7df   :  { %3440 = vmax.xlane.f32.xlu0 %v11851_v34 }
 0x7e1   :  { %3442 = vmax.xlane.f32.xlu1 %v11856_v5  ;;  %v8605_v9 = vpop.f32.mrb[100].mxu0 }
 0x7e2   :  { %v3377_v29 = vpop.f32.mrb[101].mxu0  ;;  %v11865_v40 = vsel %vm10865_vm6, %v8605_v9, -1e+30 }
 0x7e3   :  { %v8606_v4 = vpop.f32.mrb[102].mxu0  ;;  %v11870_v18 = vsel %vm10887_vm8, %v3377_v29, -1e+30 }
 0x7e4   :  { %v3380_v1 = vpop.f32.mrb[103].mxu0  ;;  %v11880_v20 = vsel %vm10858_vm5, %v8606_v4, -1e+30 }
 0x7e5   :  { %v11890_v29 = vsel %vm14733_vm7, %v3380_v1, -1e+30 }
 0x7e9   :  { %v8609_v8 = vpop.f32.mrb[104].mxu0 }
 0x7ea   :  { %v3393_v47 = vpop.f32.mrb[105].mxu0  ;;  %v11900_v4 = vsel %vm14735_vm13, %v8609_v8, -1e+30 }
 0x7eb   :  { %v8610_v60 = vpop.f32.mrb[106].mxu0  ;;  %v11875_v43 = vsel %vm14658_vm10, %v3393_v47, -1e+30 }
 0x7ec   :  { %v3396_v7 = vpop.f32.mrb[107].mxu0 }
 0x7ed   :  { %v11885_v9 = vsel %vm10924_vm11, %v3396_v7, -1e+30  ;;  %v11905_v7 = vsel %vm14736_vm14, %v8610_v60, -1e+30 }
 0x7f1   :  { %v8613_v63 = vpop.f32.mrb[108].mxu0 }
 0x7f2   :  { %3743 = vrot.lane.b32.xlu1 %v14675_v17, %s9930_s1  ;;  %v3409_v11 = vpop.f32.mrb[109].mxu0  ;;  %v11895_v47 = vsel %vm14734_vm0, %v8613_v63, -1e+30 }
 0x7f3   :  { %v8614_v22 = vpop.f32.mrb[110].mxu0  ;;  %v11910_v1 = vsel %vm14737_vm15, %v3409_v11, -1e+30 }
 0x7f4   :  { %v3412_v19 = vpop.f32.mrb[111].mxu0  ;;  %v11915_v63 = vsel %vm14738_vm9, %v8614_v22, -1e+30  ;;  %v3740_v22 = vpop.permute.xlu1 %3739  ;;  %vm14744_vm9 = vcmask 261120  }
 0x7f5   :  { %3745 = vrot.lane.b32.xlu0 %v14678_v6, %s9930_s1  ;;  %v11920_v8 = vsel %vm14739_vm12, %v3412_v19, -1e+30  ;;  %v3742_v19 = vpop.permute.xlu0 %3741  ;;  %vm14745_vm0 = vmmov %vm14744_vm9 }
 0x7f6   :  { %vm14746_vm11 = vmmov %vm14745_vm0 }
 0x7f7   :  { %vm14747_vm12 = vmmov %vm14745_vm0 }
 0x7f8   :  { %vm14749_vm14 = vmmov %vm14745_vm0 }
 0x7f9   :  { %vm14751_vm15 = vmmov %vm14745_vm0 }
 0x814   :  { %3452 = vmax.xlane.f32.xlu0 %v11865_v40 }
 0x816   :  { %3448 = vmax.xlane.f32.xlu1 %v11870_v18 }
 0x818   :  { %3456 = vmax.xlane.f32.xlu0 %v11875_v43 }
 0x81a   :  { %3454 = vmax.xlane.f32.xlu1 %v11880_v20 }
 0x81c   :  { %3458 = vmax.xlane.f32.xlu0 %v11885_v9 }
 0x81e   :  { %3450 = vmax.xlane.f32.xlu1 %v11890_v29 }
 0x820   :  { %3468 = vmax.xlane.f32.xlu0 %v11895_v47 }
 0x822   :  { %3460 = vmax.xlane.f32.xlu1 %v11900_v4 }
 0x826   :  { %3462 = vmax.xlane.f32.xlu1 %v11905_v7 }
 0x82a   :  { %3464 = vmax.xlane.f32.xlu1 %v11910_v1 }
 0x82e   :  { %3470 = vmax.xlane.f32.xlu1 %v11915_v63 }
 0x832   :  { %3466 = vmax.xlane.f32.xlu1 %v11920_v8 }
 0x836   :  { %3749 = vrot.lane.b32.xlu0 %v14684_v16, %s9930_s1 }
 0x83a   :  { %3751 = vrot.lane.b32.xlu0 %v14688_v50, %s9930_s1 }
 0x83e   :  { %3713 = vrot.lane.b32.xlu0 %v14702_v14, %s9930_s1 }
 0x842   :  { %3717 = vrot.lane.b32.xlu0 %v14705_v3, %s9930_s1 }
 0x843   :  { %3747 = vrot.lane.b32.xlu1 %v14681_v38, %s9930_s1 }
 0x846   :  { %3721 = vrot.lane.b32.xlu0 %v14709_v27, %s9930_s1 }
 0x847   :  { %3715 = vrot.lane.b32.xlu1 %v14704_v35, %s9930_s1 }
 0x84a   :  { %3725 = vrot.lane.b32.xlu0 %v14713_v57, %s9930_s1 }
 0x84b   :  { %3719 = vrot.lane.b32.xlu1 %v14707_v12, %s9930_s1 }
 0x84e   :  { %4042 = vrot.lane.b32.xlu0 %v14611_v58, %s9930_s1 }
 0x84f   :  { %3723 = vrot.lane.b32.xlu1 %v14711_v15, %s9930_s1 }
 0x852   :  { %4046 = vrot.lane.b32.xlu0 %v14615_v51, %s9930_s1 }
 0x853   :  { %3727 = vrot.lane.b32.xlu1 %v14715_v23, %s9930_s1 }
 0x856   :  { %4054 = vrot.lane.b32.xlu0 %v14622_v25, %s9930_s1 }
 0x857   :  { %4044 = vrot.lane.b32.xlu1 %v14614_v52, %s9930_s1 }
 0x85a   :  { %4291 = vrot.lane.b32.xlu0 %v14663_v54, %s9926_s0 }
 0x85b   :  { %4048 = vrot.lane.b32.xlu1 %v14617_v2, %s9930_s1 }
 0x85e   :  { %4293 = vrot.lane.b32.xlu0 %v14662_v62, %s9926_s0 }
 0x85f   :  { %4050 = vrot.lane.b32.xlu1 %v14618_v55, %s9930_s1 }
 0x862   :  { %4297 = vrot.lane.b32.xlu0 %v14675_v17, %s9926_s0 }
 0x863   :  { %4052 = vrot.lane.b32.xlu1 %v14621_v46, %s9930_s1 }
 0x866   :  { %4301 = vrot.lane.b32.xlu0 %v14681_v38, %s9926_s0 }
 0x867   :  { %4056 = vrot.lane.b32.xlu1 %v14623_v32, %s9930_s1 }
 0x868   :  { %v3445_v60 = vpop.xlane.xlu0 %3444 }
 0x869   :  { %v3474_v37 = vsub.f32 %v11841_v36, %v3445_v60 }
 0x86a   :  { %v3447_v11 = vpop.xlane.xlu1 %3446  ;;  %4303 = vrot.lane.b32.xlu0 %v14684_v16, %s9926_s0 }
 0x86b   :  { %v3475_v41 = vsub.f32 %v11846_v21, %v3447_v11  ;;  %4295 = vrot.lane.b32.xlu1 %v14664_v24, %s9926_s0  ;;  %v3492_v21 = vmul.f32 1.442695, %v3474_v37 }
 0x86c   :  { %v3441_v39 = vpop.xlane.xlu0 %3440 }
 0x86d   :  { %v3494_v17 = vmul.f32 1.442695, %v3475_v41  ;;  %v3472_v62 = vsub.f32 %v11851_v34, %v3441_v39 }
 0x86e   :  { %v3443_v38 = vpop.xlane.xlu1 %3442  ;;  %4305 = vrot.lane.b32.xlu0 %v14688_v50, %s9926_s0 }
 0x86f   :  { %v3488_v54 = vmul.f32 1.442695, %v3472_v62  ;;  %v3473_v53 = vsub.f32 %v11856_v5, %v3443_v38  ;;  %4299 = vrot.lane.b32.xlu1 %v14678_v6, %s9926_s0  ;;  %9296 = vpow2.f32 %v3494_v17  ;;  %v3778_v17 = vsel %vm14744_vm9, %v11767_v61, 0  ;;  %vm14748_vm9 = vmmov %vm14745_vm0 }
 0x870   :  { %v3781_v38 = vsel %vm14746_vm11, %v3740_v22, 0  ;;  %v3784_v61 = vsel %vm14745_vm0, %v3742_v19, 0  ;;  %v3746_v5 = vpop.permute.xlu0 %3745  ;;  %vm14750_vm11 = vmmov %vm14745_vm0 }
 0x871   :  { %v3490_v11 = vmul.f32 1.442695, %v3473_v53  ;;  %9298 = vpow2.f32 %v3488_v54 }
 0x872   :  { %4275 = vrot.lane.b32.xlu0 %v14702_v14, %s9926_s0  ;;  %v3744_v36 = vpop.permute.xlu1 %3743 }
 0x873   :  { %9300 = vpow2.f32 %v3490_v11  ;;  %4277 = vrot.lane.b32.xlu1 %v14704_v35, %s9926_s0  ;;  %v3787_v34 = vsel %vm14749_vm14, %v3744_v36, 0  ;;  %vm14760_vm14 = vmmov %vm14745_vm0 }
 0x874   :  { %9302 = vpow2.f32 %v3492_v21 }
 0x876   :  { %4279 = vrot.lane.b32.xlu0 %v14705_v3, %s9926_s0 }
 0x877   :  { %4281 = vrot.lane.b32.xlu1 %v14707_v12, %s9926_s0 }
 0x879   :  { %v11991_v37 = vpop.eup %9296 }
 0x87a   :  { %4283 = vrot.lane.b32.xlu0 %v14709_v27, %s9926_s0  ;;  %14740 = vst [vmem:[#allocation166_spill] sm:$0xff] %v11991_v37 }
 0x87b   :  { %4285 = vrot.lane.b32.xlu1 %v14711_v15, %s9926_s0  ;;  %v11995_v53 = vpop.eup %9298 }
 0x87c   :  { %14741 = vst [vmem:[#allocation167_spill] sm:$0xff] %v11995_v53 }
 0x87d   :  { %v11997_v39 = vpop.eup %9300 }
 0x87e   :  { %14742 = vst [vmem:[#allocation168_spill] sm:$0xff] %v11997_v39  ;;  %v11999_v41 = vpop.eup %9302  ;;  %4287 = vrot.lane.b32.xlu0 %v14713_v57, %s9926_s0  ;;  %v3552_v62 = vpack.c.bf16 %v11997_v39, %v11995_v53 }
 0x87f   :  { %14743 = vst [vmem:[#allocation169_spill] sm:$0xff] %v11999_v41  ;;  %4289 = vrot.lane.b32.xlu1 %v14715_v23, %s9926_s0  ;;  %v3553_v54 = vpack.c.bf16 %v11991_v37, %v11999_v41 }
 0x880   :  { %8631 = vmatprep.mubr.bf16.mxu1 %v3552_v62 }
 0x881   :  { %8632 = vmatmul.mubr.bf16.vlgmr.msra.gmra.mrb[128].mxu1 %v3553_v54 }
 0x882   :  { %8648 = vmatpush3.bf16.xpose.msra.mxu1 %v3778_v17  ;;  %4588 = vrot.lane.b32.xlu0 %v14611_v58, %s9926_s0 }
 0x883   :  { %8944 = vmatprep.subr.msk.bf16.mxu1 %vm14745_vm0, %v3740_v22  ;;  %4590 = vrot.lane.b32.xlu1 %v14614_v52, %s9926_s0  ;;  %v3790_v22 = vsel %vm14751_vm15, %v3746_v5, 0  ;;  %vm14761_vm15 = vmmov %vm14745_vm0 }
 0x886   :  { %4592 = vrot.lane.b32.xlu0 %v14615_v51, %s9926_s0 }
 0x887   :  { %4594 = vrot.lane.b32.xlu1 %v14617_v2, %s9926_s0 }
 0x88a   :  { %8650 = vmatpush3.bf16.xpose.msra.mxu1 %v3781_v38 }
 0x88b   :  { %8945 = vmatprep.subr.msk.bf16.mxu1 %vm14747_vm12, %v3742_v19  ;;  %4596 = vrot.lane.b32.xlu1 %v14618_v55, %s9926_s0  ;;  %vm14762_vm12 = vmmov %vm14745_vm0 }
 0x88f   :  { %4598 = vrot.lane.b32.xlu1 %v14621_v46, %s9926_s0 }
 0x892   :  { %8652 = vmatpush3.bf16.xpose.msra.mxu1 %v3784_v61 }
 0x893   :  { %8946 = vmatprep.subr.msk.bf16.mxu1 %vm14748_vm9, %v3744_v36  ;;  %vm14766_vm9 = vmmov %vm14745_vm0 }
 0x89a   :  { %8654 = vmatpush3.bf16.xpose.msra.mxu1 %v3787_v34 }
 0x89b   :  { %8947 = vmatprep.subr.msk.bf16.mxu1 %vm14750_vm11, %v3746_v5  ;;  %vm14768_vm11 = vmmov %vm14745_vm0 }
 0x8a1   :  { %v3453_v60 = vpop.xlane.xlu0 %3452 }
 0x8a2   :  { %8656 = vmatpush3.bf16.xpose.msra.mxu1 %v3790_v22  ;;  %v3478_v17 = vsub.f32 %v11865_v40, %v3453_v60 }
 0x8a3   :  { %v3449_v21 = vpop.xlane.xlu1 %3448 }
 0x8a4   :  { %v3476_v11 = vsub.f32 %v11870_v18, %v3449_v21  ;;  %v3500_v41 = vmul.f32 1.442695, %v3478_v17 }
 0x8a5   :  { %v3457_v62 = vpop.xlane.xlu0 %3456 }
 0x8a6   :  { %v3496_v38 = vmul.f32 1.442695, %v3476_v11  ;;  %v3480_v36 = vsub.f32 %v11875_v43, %v3457_v62 }
 0x8a7   :  { %v3455_v54 = vpop.xlane.xlu1 %3454 }
 0x8a8   :  { %v3479_v19 = vsub.f32 %v11880_v20, %v3455_v54  ;;  %9304 = vpow2.f32 %v3496_v38  ;;  %v3504_v21 = vmul.f32 1.442695, %v3480_v36 }
 0x8a9   :  { %v3459_v61 = vpop.xlane.xlu0 %3458 }
 0x8aa   :  { %v3502_v34 = vmul.f32 1.442695, %v3479_v19  ;;  %v3481_v37 = vsub.f32 %v11885_v9, %v3459_v61 }
 0x8ab   :  { %v3451_v39 = vpop.xlane.xlu1 %3450 }
 0x8ac   :  { %v3506_v5 = vmul.f32 1.442695, %v3481_v37  ;;  %v3477_v22 = vsub.f32 %v11890_v29, %v3451_v39  ;;  %9306 = vpow2.f32 %v3502_v34 }
 0x8ad   :  { %v3469_v18 = vpop.xlane.xlu0 %3468 }
 0x8ae   :  { %v3498_v53 = vmul.f32 1.442695, %v3477_v22  ;;  %9308 = vpow2.f32 %v3506_v5  ;;  %v3486_v5 = vsub.f32 %v11895_v47, %v3469_v18 }
 0x8af   :  { %v3461_v20 = vpop.xlane.xlu1 %3460 }
 0x8b0   :  { %9310 = vpow2.f32 %v3498_v53  ;;  %v3482_v40 = vsub.f32 %v11900_v4, %v3461_v20 }
 0x8b1   :  { %9312 = vpow2.f32 %v3500_v41  ;;  %v3750_v43 = vpop.permute.xlu0 %3749 }
 0x8b2   :  { %9314 = vpow2.f32 %v3504_v21  ;;  %v3508_v60 = vmul.f32 1.442695, %v3482_v40  ;;  %v12041_v39 = vpop.eup %9304 }
 0x8b3   :  { %v3463_v9 = vpop.xlane.xlu1 %3462  ;;  %14752 = vst [vmem:[#allocation170_spill] sm:$0xff] %v12041_v39 }
 0x8b4   :  { %v3483_v37 = vsub.f32 %v11905_v7, %v3463_v9  ;;  %9316 = vpow2.f32 %v3508_v60 }
 0x8b5   :  { %v12039_v11 = vpop.permute.xlu0 %3751 }
 0x8b6   :  { %v3510_v29 = vmul.f32 1.442695, %v3483_v37  ;;  %v12043_v54 = vpop.eup %9306 }
 0x8b7   :  { %v3465_v62 = vpop.xlane.xlu1 %3464  ;;  %14753 = vst [vmem:[#allocation171_spill] sm:$0xff] %v12043_v54 }
 0x8b8   :  { %9318 = vpow2.f32 %v3510_v29  ;;  %v12045_v53 = vpop.eup %9308  ;;  %v3484_v19 = vsub.f32 %v11910_v1, %v3465_v62 }
 0x8b9   :  { %14754 = vst [vmem:[#allocation172_spill] sm:$0xff] %v12045_v53  ;;  %v3714_v4 = vpop.permute.xlu0 %3713 }
 0x8ba   :  { %v12047_v41 = vpop.eup %9310  ;;  %v3512_v21 = vmul.f32 1.442695, %v3484_v19 }
 0x8bb   :  { %14755 = vst [vmem:[#allocation173_spill] sm:$0xff] %v12047_v41  ;;  %v12050_v17 = vpop.eup %9312  ;;  %v3471_v7 = vpop.xlane.xlu1 %3470  ;;  %v3554_v38 = vpack.c.bf16 %v12047_v41, %v12041_v39 }
 0x8bc   :  { %14756 = vst [vmem:[#allocation174_spill] sm:$0xff] %v12050_v17  ;;  %v12054_v61 = vpop.eup %9314  ;;  %v3487_v36 = vsub.f32 %v11915_v63, %v3471_v7  ;;  %v3555_v34 = vpack.c.bf16 %v12043_v54, %v12050_v17  ;;  %v3516_v63 = vmul.f32 1.442695, %v3486_v5  ;;  %9320 = vpow2.f32 %v3512_v21 }
 0x8bd   :  { %14757 = vst [vmem:[#allocation175_spill] sm:$0xff] %v12054_v61  ;;  %8635 = vmatprep.mubr.bf16.mxu1 %v3554_v38  ;;  %v3718_v22 = vpop.permute.xlu0 %3717  ;;  %v3556_v1 = vpack.c.bf16 %v12045_v53, %v12054_v61  ;;  %v3796_v5 = vsel %vm14745_vm0, %v3750_v43, 0 }
 0x8be   :  { %8636 = vmatmul.mubr.bf16.gmra.mrb[132].mxu1 %v3555_v34  ;;  %v3518_v20 = vmul.f32 1.442695, %v3487_v36  ;;  %v12063_v9 = vpop.eup %9316 }
 0x8bf   :  { %v3467_v40 = vpop.xlane.xlu1 %3466  ;;  %8639 = vmatprep.mubr.bf16.mxu1 %v3556_v1  ;;  %14758 = vst [vmem:[#allocation176_spill] sm:$0xff] %v12063_v9 }
 0x8c0   :  { %v3485_v60 = vsub.f32 %v11920_v8, %v3467_v40  ;;  %9322 = vpow2.f32 %v3518_v20 }
 0x8c1   :  { %v3722_v37 = vpop.permute.xlu0 %3721 }
 0x8c2   :  { %v12065_v29 = vpop.eup %9318  ;;  %v3514_v47 = vmul.f32 1.442695, %v3485_v60 }
 0x8c3   :  { %14759 = vst [vmem:[#allocation177_spill] sm:$0xff] %v12065_v29  ;;  %v3748_v18 = vpop.permute.xlu1 %3747  ;;  %v3557_v62 = vpack.c.bf16 %v12065_v29, %v12063_v9 }
 0x8c4   :  { %9324 = vpow2.f32 %v3514_v47  ;;  %8948 = vmatprep.subr.msk.bf16.mxu1 %vm14760_vm14, %v3748_v18  ;;  %v3793_v19 = vsel %vm14761_vm15, %v3748_v18, 0  ;;  %vm14769_vm14 = vmmov %vm14745_vm0 }
 0x8c5   :  { %9326 = vpow2.f32 %v3516_v63  ;;  %8658 = vmatpush3.bf16.xpose.msra.mxu1 %v3793_v19  ;;  %v3726_v8 = vpop.permute.xlu0 %3725  ;;  %vm14770_vm15 = vmmov %vm14745_vm0 }
 0x8c6   :  { %8640 = vmatmul.mubr.bf16.gmra.mrb[136].mxu1 %v3557_v62  ;;  %8949 = vmatprep.subr.msk.bf16.mxu1 %vm14762_vm12, %v3750_v43  ;;  %v12072_v34 = vpop.eup %9320  ;;  %v3799_v62 = vsel %vm14769_vm14, %v12039_v11, 0  ;;  %vm14771_vm12 = vmmov %vm14745_vm0 }
 0x8c7   :  { %v3716_v7 = vpop.permute.xlu1 %3715  ;;  %14763 = vst [vmem:[#allocation178_spill] sm:$0xff] %v12072_v34  ;;  %vm14774_vm14 = vmmov %vm14745_vm0 }
 0x8c9   :  { %v4043_v38 = vpop.permute.xlu0 %4042 }
 0x8ca   :  { %8679 = vmatprep.subr.bf16.mxu0 %v4043_v38  ;;  %v12075_v1 = vpop.eup %9322 }
 0x8cb   :  { %v3720_v36 = vpop.permute.xlu1 %3719  ;;  %8680 = vmatpush3.bf16.msra.mxu0 %v4043_v38  ;;  %14764 = vst [vmem:[#allocation179_spill] sm:$0xff] %v12075_v1 }
 0x8cd   :  { %8660 = vmatpush3.bf16.xpose.msra.mxu1 %v3796_v5  ;;  %v4047_v21 = vpop.permute.xlu0 %4046 }
 0x8ce   :  { %v12077_v20 = vpop.eup %9324  ;;  %8950 = vmatprep.subr.msk.bf16.mxu1 %vm14766_vm9, %v12039_v11  ;;  %vm14772_vm9 = vmmov %vm14745_vm0 }
 0x8cf   :  { %14765 = vst [vmem:[#allocation180_spill] sm:$0xff] %v12077_v20  ;;  %v12081_v40 = vpop.eup %9326  ;;  %v3724_v60 = vpop.permute.xlu1 %3723  ;;  %v3558_v63 = vpack.c.bf16 %v12077_v20, %v12072_v34 }
 0x8d0   :  { %14767 = vst [vmem:[#allocation181_spill] sm:$0xff] %v12081_v40  ;;  %v3559_v47 = vpack.c.bf16 %v12075_v1, %v12081_v40 }
 0x8d1   :  { %8643 = vmatprep.mubr.bf16.mxu1 %v3558_v63  ;;  %v4055_v43 = vpop.permute.xlu0 %4054 }
 0x8d2   :  { %8644 = vmatmul.mubr.bf16.gmra.mrb[140].mxu1 %v3559_v47 }
 0x8d3   :  { %v3728_v18 = vpop.permute.xlu1 %3727  ;;  %8663 = vmatprep.mubr.msk.bf16.mxu1 %vm14768_vm11, %v3714_v4  ;;  %vm14773_vm11 = vmmov %vm14745_vm0 }
 0x8d5   :  { %8662 = vmatpush3.bf16.xpose.msra.mxu1 %v3799_v62  ;;  %v12090_v19 = vpop.permute.xlu0 %4291 }
 0x8d7   :  { %v4045_v38 = vpop.permute.xlu1 %4044 }
 0x8d8   :  { %8681 = vmatprep.subr.bf16.mxu0 %v4045_v38 }
 0x8d9   :  { %8682 = vmatpush3.bf16.msra.mxu0 %v4045_v38  ;;  %v12092_v5 = vpop.permute.xlu0 %4293 }
 0x8da   :  { %8683 = vmatprep.subr.bf16.mxu0 %v4047_v21 }
 0x8db   :  { %v4049_v20 = vpop.permute.xlu1 %4048 }
 0x8dc   :  { %8664 = vmatmul.mubr.msk.bf16.vlgmr.msra.gmra.mrb[144].mxu1 %vm14770_vm15, %v3716_v7  ;;  %vm14775_vm15 = vmmov %vm14745_vm0 }
 0x8dd   :  { %8667 = vmatprep.mubr.msk.bf16.mxu1 %vm14771_vm12, %v3718_v22  ;;  %8684 = vmatpush3.bf16.msra.mxu0 %v4047_v21  ;;  %v12096_v63 = vpop.permute.xlu0 %4297  ;;  %vm14776_vm12 = vmmov %vm14745_vm0 }
 0x8de   :  { %8685 = vmatprep.subr.bf16.mxu0 %v4049_v20 }
 0x8df   :  { %v4051_v4 = vpop.permute.xlu1 %4050 }
 0x8e1   :  { %8686 = vmatpush3.bf16.msra.mxu0 %v4049_v20  ;;  %v12098_v11 = vpop.permute.xlu0 %4301 }
 0x8e2   :  { %8687 = vmatprep.subr.bf16.mxu0 %v4051_v4 }
 0x8e3   :  { %v4053_v47 = vpop.permute.xlu1 %4052 }
 0x8e4   :  { %8668 = vmatmul.mubr.msk.bf16.gmra.mrb[148].mxu1 %vm14745_vm0, %v3720_v36  ;;  %vm14793_vm0 = vnez %v14483_v28 }
 0x8e5   :  { %8671 = vmatprep.mubr.msk.bf16.mxu1 %vm14772_vm9, %v3722_v37  ;;  %8688 = vmatpush3.bf16.msra.mxu0 %v4051_v4  ;;  %v12102_v62 = vpop.permute.xlu0 %4303  ;;  %vm14794_vm9 = vnez %v14462_v42 }
 0x8e6   :  { %8689 = vmatprep.subr.bf16.mxu0 %v4053_v47 }
 0x8e7   :  { %v4057_v7 = vpop.permute.xlu1 %4056 }
 0x8e9   :  { %8690 = vmatpush3.bf16.msra.mxu0 %v4053_v47  ;;  %v12104_v22 = vpop.permute.xlu0 %4305 }
 0x8ea   :  { %8691 = vmatprep.subr.bf16.mxu0 %v4055_v43 }
 0x8eb   :  { %v12106_v21 = vpop.permute.xlu1 %4295 }
 0x8ec   :  { %8672 = vmatmul.mubr.msk.bf16.gmra.mrb[152].mxu1 %vm14773_vm11, %v3724_v60  ;;  %vm14795_vm11 = vnez %v14480_v30  ;;  %v14800_v30 = vld [vmem:[#allocation32_spill] sm:$0xff] }
 0x8ed   :  { %8675 = vmatprep.mubr.msk.bf16.mxu1 %vm14774_vm14, %v3726_v8  ;;  %8692 = vmatpush3.bf16.msra.mxu0 %v4055_v43  ;;  %v12110_v20 = vpop.permute.xlu0 %4275  ;;  %vm14796_vm14 = vnez %v14468_v31 }
 0x8ee   :  { %8693 = vmatprep.subr.bf16.mxu0 %v4057_v7 }
 0x8ef   :  { %v12112_v37 = vpop.permute.xlu1 %4299 }
 0x8f1   :  { %8694 = vmatpush3.bf16.msra.mxu0 %v4057_v7  ;;  %v12114_v36 = vpop.permute.xlu0 %4279 }
 0x8f2   :  { %8951 = vmatprep.subr.msk.bf16.mxu0 %vm14775_vm15, %v12090_v19  ;;  %vm14797_vm15 = vnez %v14477_v56 }
 0x8f3   :  { %v12118_v38 = vpop.permute.xlu1 %4277 }
 0x8f4   :  { %8676 = vmatmul.mubr.msk.bf16.gmra.mrb[156].mxu1 %vm14776_vm12, %v3728_v18 }
 0x8f5   :  { %v12121_v4 = vpop.permute.xlu0 %4283 }
 0x8f7   :  { %v12123_v60 = vpop.permute.xlu1 %4281 }
 0x8f9   :  { %v12125_v8 = vpop.permute.xlu0 %4287 }
 0x8fb   :  { %v12127_v43 = vpop.permute.xlu1 %4285 }
 0x8fd   :  { %v4589_v47 = vpop.permute.xlu0 %4588 }
 0x8fe   :  { %8743 = vmatprep.subr.bf16.mxu1 %v4589_v47 }
 0x8ff   :  { %v12129_v7 = vpop.permute.xlu1 %4289  ;;  %8744 = vmatpush3.bf16.msra.mxu1 %v4589_v47 }
 0x901   :  { %v4593_v40 = vpop.permute.xlu0 %4592 }
 0x903   :  { %v4591_v1 = vpop.permute.xlu1 %4590 }
 0x904   :  { %8745 = vmatprep.subr.bf16.mxu1 %v4591_v1 }
 0x905   :  { %8746 = vmatpush3.bf16.msra.mxu1 %v4591_v1 }
 0x906   :  { %8747 = vmatprep.subr.bf16.mxu1 %v4593_v40 }
 0x907   :  { %v4595_v34 = vpop.permute.xlu1 %4594 }
 0x909   :  { %8748 = vmatpush3.bf16.msra.mxu1 %v4593_v40 }
 0x90a   :  { %8749 = vmatprep.subr.bf16.mxu1 %v4595_v34 }
 0x90b   :  { %v4597_v18 = vpop.permute.xlu1 %4596 }
 0x90d   :  { %8750 = vmatpush3.bf16.msra.mxu1 %v4595_v34 }
 0x90e   :  { %8751 = vmatprep.subr.bf16.mxu1 %v4597_v18 }
 0x90f   :  { %v4599_v53 = vpop.permute.xlu1 %4598 }
 0x911   :  { %8752 = vmatpush3.bf16.msra.mxu1 %v4597_v18 }
 0x912   :  { %8753 = vmatprep.subr.bf16.mxu1 %v4599_v53 }
 0x915   :  { %8754 = vmatpush3.bf16.msra.mxu1 %v4599_v53 }
 0x954   :  { %v12131_v29 = vpop.f32.mrb[128].mxu1 }
 0x955   :  { %14777 = vst [vmem:[#allocation182_spill] sm:$0xff] %v12131_v29  ;;  %v12133_v9 = vpop.f32.mrb[129].mxu1 }
 0x956   :  { %14778 = vst [vmem:[#allocation183_spill] sm:$0xff] %v12133_v9  ;;  %v12135_v47 = vpop.f32.mrb[130].mxu1 }
 0x957   :  { %14779 = vst [vmem:[#allocation184_spill] sm:$0xff] %v12135_v47  ;;  %v12137_v61 = vpop.f32.mrb[131].mxu1 }
 0x958   :  { %14780 = vst [vmem:[#allocation185_spill] sm:$0xff] %v12137_v61 }
 0x991   :  { %v12139_v1 = vpop.f32.mrb[132].mxu1 }
 0x992   :  { %14781 = vst [vmem:[#allocation186_spill] sm:$0xff] %v12139_v1  ;;  %v12141_v54 = vpop.f32.mrb[133].mxu1 }
 0x993   :  { %14782 = vst [vmem:[#allocation187_spill] sm:$0xff] %v12141_v54  ;;  %v12143_v40 = vpop.f32.mrb[134].mxu1 }
 0x994   :  { %14783 = vst [vmem:[#allocation188_spill] sm:$0xff] %v12143_v40  ;;  %v12145_v34 = vpop.f32.mrb[135].mxu1 }
 0x995   :  { %14784 = vst [vmem:[#allocation189_spill] sm:$0xff] %v12145_v34 }
 0x999   :  { %v12147_v17 = vpop.f32.mrb[136].mxu1 }
 0x99a   :  { %14785 = vst [vmem:[#allocation190_spill] sm:$0xff] %v12147_v17  ;;  %v12149_v18 = vpop.f32.mrb[137].mxu1 }
 0x99b   :  { %14786 = vst [vmem:[#allocation191_spill] sm:$0xff] %v12149_v18  ;;  %v12151_v53 = vpop.f32.mrb[138].mxu1 }
 0x99c   :  { %14787 = vst [vmem:[#allocation192_spill] sm:$0xff] %v12151_v53  ;;  %v12153_v39 = vpop.f32.mrb[139].mxu1 }
 0x99d   :  { %14788 = vst [vmem:[#allocation193_spill] sm:$0xff] %v12153_v39 }
 0x9a5   :  { %v12155_v41 = vpop.f32.mrb[140].mxu1 }
 0x9a6   :  { %14789 = vst [vmem:[#allocation194_spill] sm:$0xff] %v12155_v41  ;;  %v12157_v47 = vpop.f32.mrb[141].mxu1 }
 0x9a7   :  { %14790 = vst [vmem:[#allocation195_spill] sm:$0xff] %v12157_v47  ;;  %v12159_v61 = vpop.f32.mrb[142].mxu1 }
 0x9a8   :  { %14791 = vst [vmem:[#allocation196_spill] sm:$0xff] %v12159_v61  ;;  %v12161_v1 = vpop.f32.mrb[143].mxu1 }
 0x9a9   :  { %14792 = vst [vmem:[#allocation197_spill] sm:$0xff] %v12161_v1 }
 0x9af   :  { %v8665_v54 = vpop.f32.mrb[144].mxu1 }
 0x9b0   :  { %v12165_v40 = vsel %vm10814_vm1, %v8665_v54, -1e+30  ;;  %v3835_v17 = vpop.f32.mrb[145].mxu1 }
 0x9b1   :  { %3918 = vmax.xlane.f32.xlu0 %v12165_v40  ;;  %v8666_v18 = vpop.f32.mrb[146].mxu1  ;;  %v12174_v41 = vsel %vm10826_vm2, %v3835_v17, -1e+30 }
 0x9b2   :  { %v3838_v53 = vpop.f32.mrb[147].mxu1  ;;  %v12180_v54 = vsel %vm10843_vm4, %v8666_v18, -1e+30 }
 0x9b3   :  { %v12170_v39 = vsel %vm10836_vm3, %v3838_v53, -1e+30 }
 0x9b4   :  { %3916 = vmax.xlane.f32.xlu1 %v12170_v39 }
 0x9b5   :  { %3914 = vmax.xlane.f32.xlu0 %v12174_v41 }
 0x9b7   :  { %v8669_v1 = vpop.f32.mrb[148].mxu1 }
 0x9b8   :  { %v12184_v61 = vsel %vm10865_vm6, %v8669_v1, -1e+30  ;;  %v3851_v47 = vpop.f32.mrb[149].mxu1 }
 0x9b9   :  { %3920 = vmax.xlane.f32.xlu0 %v12180_v54  ;;  %3926 = vmax.xlane.f32.xlu1 %v12184_v61  ;;  %v8670_v17 = vpop.f32.mrb[150].mxu1  ;;  %v12194_v29 = vsel %vm10887_vm8, %v3851_v47, -1e+30 }
 0x9ba   :  { %v3854_v53 = vpop.f32.mrb[151].mxu1  ;;  %v12200_v18 = vsel %vm10858_vm5, %v8670_v17, -1e+30 }
 0x9bb   :  { %v12190_v34 = vsel %vm14733_vm7, %v3854_v53, -1e+30 }
 0x9bd   :  { %3922 = vmax.xlane.f32.xlu1 %v12194_v29  ;;  %3924 = vmax.xlane.f32.xlu0 %v12190_v34 }
 0x9bf   :  { %v8673_v1 = vpop.f32.mrb[152].mxu1 }
 0x9c0   :  { %v3867_v9 = vpop.f32.mrb[153].mxu1  ;;  %v12209_v47 = vsel %vm14735_vm13, %v8673_v1, -1e+30 }
 0x9c1   :  { %3928 = vmax.xlane.f32.xlu1 %v12200_v18  ;;  %v8674_v45 = vpop.f32.mrb[154].mxu1  ;;  %v12214_v17 = vsel %vm14658_vm10, %v3867_v9, -1e+30 }
 0x9c2   :  { %v3870_v44 = vpop.f32.mrb[155].mxu1  ;;  %v12224_v13 = vsel %vm14794_vm9, %v8674_v45, -1e+30  ;;  %v14798_v45 = vld [vmem:[#allocation71_spill] sm:$0xff] }
 0x9c3   :  { %vm14799_vm12 = vnez %v14798_v45 }
 0x9c7   :  { %v8677_v53 = vpop.f32.mrb[156].mxu1 }
 0x9c8   :  { %v3883_v33 = vpop.f32.mrb[157].mxu1  ;;  %v12239_v9 = vsel %vm14797_vm15, %v8677_v53, -1e+30  ;;  %v14802_v53 = vld [vmem:[#allocation44_spill] sm:$0xff] }
 0x9c9   :  { %v8678_v49 = vpop.f32.mrb[158].mxu1  ;;  %v12218_v0 = vsel %vm14793_vm0, %v3883_v33, -1e+30  ;;  %v12234_v33 = vsel %vm14796_vm14, %v3870_v44, -1e+30  ;;  %v14801_v44 = vld [vmem:[#allocation36_spill] sm:$0xff] }
 0x9ca   :  { %v3886_v48 = vpop.f32.mrb[159].mxu1 }
 0x9cb   :  { %v12228_v1 = vsel %vm14795_vm11, %v3886_v48, -1e+30  ;;  %v12244_v48 = vsel %vm14799_vm12, %v8678_v49, -1e+30  ;;  %v14803_v49 = vld [vmem:[#allocation29_spill] sm:$0xff]  ;;  %vm14805_vm12 = vcmask 261120  }
 0x9cc   :  { %vm14806_vm15 = vmmov %vm14805_vm12 }
 0x9cd   :  { %vm14812_vm11 = vmmov %vm14805_vm12 }
 0x9ce   :  { %vm14813_vm14 = vmmov %vm14812_vm11 }
 0x9d2   :  { %4602 = vrot.lane.b32.xlu1 %v14623_v32, %s9926_s0 }
 0x9d3   :  { %4600 = vrot.lane.b32.xlu0 %v14622_v25, %s9926_s0 }
 0x9f2   :  { %3934 = vmax.xlane.f32.xlu0 %v12209_v47 }
 0x9f6   :  { %3930 = vmax.xlane.f32.xlu1 %v12214_v17  ;;  %3938 = vmax.xlane.f32.xlu0 %v12218_v0 }
 0x9fa   :  { %3936 = vmax.xlane.f32.xlu1 %v12224_v13  ;;  %3940 = vmax.xlane.f32.xlu0 %v12228_v1 }
 0x9fe   :  { %3932 = vmax.xlane.f32.xlu1 %v12234_v33 }
 0xa02   :  { %3942 = vmax.xlane.f32.xlu1 %v12239_v9 }
 0xa06   :  { %3944 = vmax.xlane.f32.xlu1 %v12244_v48 }
 0xa10   :  { %4837 = vrot.lane.b32.xlu0 %v14800_v30, %s9931_s2 }
 0xa14   :  { %4839 = vrot.lane.b32.xlu0 %v14801_v44, %s9931_s2 }
 0xa17   :  { %4841 = vrot.lane.b32.xlu1 %v14664_v24, %s9931_s2 }
 0xa18   :  { %4843 = vrot.lane.b32.xlu0 %v14802_v53, %s9931_s2 }
 0xa1b   :  { %4845 = vrot.lane.b32.xlu1 %v14678_v6, %s9931_s2 }
 0xa1c   :  { %4847 = vrot.lane.b32.xlu0 %v14803_v49, %s9931_s2  ;;  %v14804_v49 = vld [vmem:[#allocation75_spill] sm:$0xff] }
 0xa1f   :  { %4823 = vrot.lane.b32.xlu1 %v14704_v35, %s9931_s2 }
 0xa20   :  { %4849 = vrot.lane.b32.xlu0 %v14684_v16, %s9931_s2 }
 0xa23   :  { %4827 = vrot.lane.b32.xlu1 %v14707_v12, %s9931_s2 }
 0xa24   :  { %4851 = vrot.lane.b32.xlu0 %v14688_v50, %s9931_s2 }
 0xa27   :  { %4831 = vrot.lane.b32.xlu1 %v14711_v15, %s9931_s2 }
 0xa28   :  { %4821 = vrot.lane.b32.xlu0 %v14702_v14, %s9931_s2 }
 0xa2b   :  { %4835 = vrot.lane.b32.xlu1 %v14715_v23, %s9931_s2 }
 0xa2c   :  { %4825 = vrot.lane.b32.xlu0 %v14705_v3, %s9931_s2 }
 0xa2f   :  { %5136 = vrot.lane.b32.xlu1 %v14614_v52, %s9931_s2 }
 0xa30   :  { %4829 = vrot.lane.b32.xlu0 %v14709_v27, %s9931_s2 }
 0xa33   :  { %5144 = vrot.lane.b32.xlu1 %v14621_v46, %s9931_s2 }
 0xa34   :  { %4833 = vrot.lane.b32.xlu0 %v14713_v57, %s9931_s2 }
 0xa38   :  { %5134 = vrot.lane.b32.xlu0 %v14611_v58, %s9931_s2 }
 0xa3c   :  { %5138 = vrot.lane.b32.xlu0 %v14615_v51, %s9931_s2 }
 0xa3e   :  { %v3919_v30 = vpop.xlane.xlu0 %3918 }
 0xa3f   :  { %v3948_v16 = vsub.f32 %v12165_v40, %v3919_v30 }
 0xa40   :  { %5140 = vrot.lane.b32.xlu0 %v14617_v2, %s9931_s2 }
 0xa41   :  { %v3917_v24 = vpop.xlane.xlu1 %3916  ;;  %v3966_v35 = vmul.f32 1.442695, %v3948_v16  ;;  %v14807_v16 = vld [vmem:[#allocation77_spill] sm:$0xff] }
 0xa42   :  { %v3947_v52 = vsub.f32 %v12170_v39, %v3917_v24  ;;  %v3915_v6 = vpop.xlane.xlu0 %3914 }
 0xa43   :  { %v3946_v46 = vsub.f32 %v12174_v41, %v3915_v6 }
 0xa44   :  { %v3964_v50 = vmul.f32 1.442695, %v3947_v52  ;;  %5142 = vrot.lane.b32.xlu0 %v14618_v55, %s9931_s2  ;;  %v4332_v52 = vsel %vm14805_vm12, %v12090_v19, 0  ;;  %v14808_v19 = vld [vmem:[#allocation20_spill] sm:$0xff] }
 0xa45   :  { %v3962_v58 = vmul.f32 1.442695, %v3946_v46 }
 0xa46   :  { %9328 = vpow2.f32 %v3964_v50  ;;  %v3927_v14 = vpop.xlane.xlu1 %3926  ;;  %v3921_v51 = vpop.xlane.xlu0 %3920 }
 0xa47   :  { %9330 = vpow2.f32 %v3962_v58  ;;  %v3949_v2 = vsub.f32 %v12180_v54, %v3921_v51  ;;  %v3952_v12 = vsub.f32 %v12184_v61, %v3927_v14  ;;  %v4335_v51 = vsel %vm14805_vm12, %v12092_v5, 0 }
 0xa48   :  { %5146 = vrot.lane.b32.xlu0 %v14622_v25, %s9931_s2  ;;  %9332 = vpow2.f32 %v3966_v35  ;;  %v14810_v35 = vld [vmem:[#allocation87_spill] sm:$0xff] }
 0xa49   :  { %v3968_v3 = vmul.f32 1.442695, %v3949_v2  ;;  %v3974_v41 = vmul.f32 1.442695, %v3952_v12  ;;  %v14811_v2 = vld [vmem:[#allocation48_spill] sm:$0xff] }
 0xa4a   :  { %v3923_v27 = vpop.xlane.xlu1 %3922  ;;  %v3925_v15 = vpop.xlane.xlu0 %3924  ;;  %v14814_v12 = vld [vmem:[#allocation148_spill] sm:$0xff] }
 0xa4b   :  { %v3950_v57 = vsub.f32 %v12194_v29, %v3923_v27  ;;  %v3951_v55 = vsub.f32 %v12190_v34, %v3925_v15  ;;  %9334 = vpow2.f32 %v3968_v3  ;;  %v4338_v3 = vsel %vm14812_vm11, %v12106_v21, 0  ;;  %v14815_v27 = vld [vmem:[#allocation19_spill] sm:$0xff]  ;;  %v14817_v15 = vld [vmem:[#allocation21_spill] sm:$0xff] }
 0xa4c   :  { %5148 = vrot.lane.b32.xlu0 %v14623_v32, %s9931_s2 }
 0xa4d   :  { %v3970_v23 = vmul.f32 1.442695, %v3950_v57  ;;  %v3972_v39 = vmul.f32 1.442695, %v3951_v55  ;;  %v14821_v55 = vld [vmem:[#allocation85_spill] sm:$0xff] }
 0xa4e   :  { %v3929_v40 = vpop.xlane.xlu1 %3928  ;;  %v4601_v54 = vpop.permute.xlu0 %4600 }
 0xa4f   :  { %9336 = vpow2.f32 %v3970_v23  ;;  %v3953_v25 = vsub.f32 %v12200_v18, %v3929_v40  ;;  %8755 = vmatprep.subr.bf16.mxu1 %v4601_v54  ;;  %v14822_v23 = vld [vmem:[#allocation41_spill] sm:$0xff] }
 0xa50   :  { %v12303_v61 = vpop.eup %9328  ;;  %9338 = vpow2.f32 %v3972_v39  ;;  %8756 = vmatpush3.bf16.msra.mxu1 %v4601_v54  ;;  %v14823_v39 = vld [vmem:[#allocation22_spill] sm:$0xff]  ;;  %v14826_v40 = vld [vmem:[#allocation49_spill] sm:$0xff]  ;;  %v14827_v54 = vld [vmem:[#allocation27_spill] sm:$0xff] }
 0xa51   :  { %v12305_v29 = vpop.eup %9330  ;;  %v3976_v34 = vmul.f32 1.442695, %v3953_v25  ;;  %9340 = vpow2.f32 %v3974_v41  ;;  %v4344_v41 = vsel %vm14812_vm11, %v12112_v37, 0 }
 0xa52   :  { %v4603_v44 = vpop.permute.xlu1 %4602  ;;  %v4026_v32 = vpack.c.bf16 %v12303_v61, %v12305_v29  ;;  %v12309_v53 = vpop.eup %9332 }
 0xa53   :  { %9342 = vpow2.f32 %v3976_v34  ;;  %8757 = vmatprep.subr.bf16.mxu1 %v4603_v44  ;;  %v14828_v34 = vld [vmem:[#allocation40_spill] sm:$0xff] }
 0xa54   :  { %8695 = vmatprep.mubr.bf16.mxu0 %v4026_v32  ;;  %8758 = vmatpush3.bf16.msra.mxu1 %v4603_v44  ;;  %v14831_v32 = vld [vmem:[#allocation149_spill] sm:$0xff] }
 0xa55   :  { %v12311_v18 = vpop.eup %9334 }
 0xa56   :  { %v4027_v30 = vpack.c.bf16 %v12311_v18, %v12309_v53 }
 0xa57   :  { %1881 = vadd.xlane.f32.xlu1 %v14804_v49 }
 0xa58   :  { %8696 = vmatmul.mubr.bf16.vlgmr.msra.gmra.mrb[112].mxu0 %v4027_v30  ;;  %v14832_v30 = vld [vmem:[#allocation80_spill] sm:$0xff] }
 0xa59   :  { %v12316_v24 = vpop.eup %9336  ;;  %8712 = vmatpush3.bf16.xpose.msra.mxu0 %v4332_v52 }
 0xa5a   :  { %v12320_v6 = vpop.eup %9338  ;;  %8952 = vmatprep.subr.msk.bf16.mxu0 %vm14806_vm15, %v12092_v5  ;;  %vm14809_vm15 = vmmov %vm14805_vm12  ;;  %v14816_v5 = vld [vmem:[#allocation39_spill] sm:$0xff] }
 0xa5b   :  { %1885 = vadd.xlane.f32.xlu1 %v14807_v16  ;;  %v4028_v46 = vpack.c.bf16 %v12320_v6, %v12316_v24  ;;  %v12327_v50 = vpop.eup %9340  ;;  %vm14818_vm12 = vmmov %vm14812_vm11 }
 0xa5c   :  { %v4341_v57 = vsel %vm14818_vm12, %v12096_v63, 0  ;;  %vm14829_vm12 = vmmov %vm14812_vm11 }
 0xa5d   :  { %v12329_v58 = vpop.eup %9342  ;;  %8699 = vmatprep.mubr.bf16.mxu0 %v4028_v46  ;;  %v4347_v44 = vsel %vm14829_vm12, %v12098_v11, 0  ;;  %v14833_v46 = vld [vmem:[#allocation23_spill] sm:$0xff]  ;;  %vm14838_vm12 = vmmov %vm14812_vm11 }
 0xa5e   :  { %v4029_v14 = vpack.c.bf16 %v12329_v58, %v12327_v50 }
 0xa5f   :  { %2436 = vadd.xlane.f32.xlu1 %v14808_v19 }
 0xa60   :  { %8700 = vmatmul.mubr.bf16.gmra.mrb[116].mxu0 %v4029_v14 }
 0xa61   :  { %8714 = vmatpush3.bf16.xpose.msra.mxu0 %v4335_v51  ;;  %v14834_v51 = vld [vmem:[#allocation43_spill] sm:$0xff] }
 0xa62   :  { %8953 = vmatprep.subr.msk.bf16.mxu0 %vm14809_vm15, %v12106_v21  ;;  %vm14819_vm15 = vmmov %vm14812_vm11  ;;  %v14820_v21 = vld [vmem:[#allocation24_spill] sm:$0xff] }
 0xa63   :  { %2440 = vadd.xlane.f32.xlu1 %v14810_v35 }
 0xa67   :  { %2983 = vadd.xlane.f32.xlu1 %v14811_v2 }
 0xa69   :  { %8716 = vmatpush3.bf16.xpose.msra.mxu0 %v4338_v3  ;;  %v4350_v3 = vsel %vm14812_vm11, %v12102_v62, 0 }
 0xa6a   :  { %8954 = vmatprep.subr.msk.bf16.mxu0 %vm14813_vm14, %v12096_v63  ;;  %vm14824_vm14 = vmmov %vm14812_vm11  ;;  %v14825_v63 = vld [vmem:[#allocation90_spill] sm:$0xff] }
 0xa6b   :  { %2987 = vadd.xlane.f32.xlu1 %v14814_v12  ;;  %1879 = vadd.xlane.f32.xlu0 %v14815_v27 }
 0xa6f   :  { %1889 = vadd.xlane.f32.xlu1 %v14816_v5  ;;  %1883 = vadd.xlane.f32.xlu0 %v14817_v15 }
 0xa71   :  { %8718 = vmatpush3.bf16.xpose.msra.mxu0 %v4341_v57 }
 0xa72   :  { %8955 = vmatprep.subr.msk.bf16.mxu0 %vm14819_vm15, %v12112_v37  ;;  %vm14830_vm15 = vmmov %vm14812_vm11 }
 0xa73   :  { %1893 = vadd.xlane.f32.xlu1 %v14820_v21  ;;  %2434 = vadd.xlane.f32.xlu0 %v14821_v55  ;;  %v14839_v55 = vld [vmem:[#allocation78_spill] sm:$0xff] }
 0xa77   :  { %2444 = vadd.xlane.f32.xlu1 %v14822_v23  ;;  %2438 = vadd.xlane.f32.xlu0 %v14823_v39 }
 0xa79   :  { %8720 = vmatpush3.bf16.xpose.msra.mxu0 %v4344_v41 }
 0xa7a   :  { %8956 = vmatprep.subr.msk.bf16.mxu0 %vm14824_vm14, %v12098_v11  ;;  %vm14835_vm14 = vmmov %vm14812_vm11 }
 0xa7b   :  { %2448 = vadd.xlane.f32.xlu1 %v14825_v63  ;;  %2981 = vadd.xlane.f32.xlu0 %v14826_v40  ;;  %v14842_v40 = vld [vmem:[#allocation83_spill] sm:$0xff] }
 0xa7f   :  { %2991 = vadd.xlane.f32.xlu1 %v14827_v54  ;;  %v3935_v25 = vpop.xlane.xlu0 %3934  ;;  %2985 = vadd.xlane.f32.xlu0 %v14828_v34 }
 0xa80   :  { %v3956_v35 = vsub.f32 %v12209_v47, %v3935_v25  ;;  %v14837_v47 = vld [vmem:[#allocation91_spill] sm:$0xff] }
 0xa81   :  { %8722 = vmatpush3.bf16.xpose.msra.mxu0 %v4347_v44  ;;  %v14843_v44 = vld [vmem:[#allocation33_spill] sm:$0xff] }
 0xa82   :  { %8957 = vmatprep.subr.msk.bf16.mxu0 %vm14830_vm15, %v12102_v62  ;;  %v3982_v62 = vmul.f32 1.442695, %v3956_v35  ;;  %vm14841_vm15 = vmmov %vm14812_vm11 }
 0xa83   :  { %v3931_v37 = vpop.xlane.xlu1 %3930  ;;  %2995 = vadd.xlane.f32.xlu1 %v14831_v32  ;;  %v3939_v49 = vpop.xlane.xlu0 %3938  ;;  %1887 = vadd.xlane.f32.xlu0 %v14832_v30  ;;  %v4353_v41 = vsel %vm14841_vm15, %v12104_v22, 0  ;;  %v14844_v32 = vld [vmem:[#allocation150_spill] sm:$0xff]  ;;  %vm14871_vm15 = vmmov %vm14812_vm11 }
 0xa84   :  { %v3954_v52 = vsub.f32 %v12214_v17, %v3931_v37  ;;  %v3958_v12 = vsub.f32 %v12218_v0, %v3939_v49 }
 0xa86   :  { %v3978_v2 = vmul.f32 1.442695, %v3954_v52  ;;  %v3986_v0 = vmul.f32 1.442695, %v3958_v12  ;;  %v14845_v52 = vld [vmem:[#allocation37_spill] sm:$0xff] }
 0xa87   :  { %v3937_v16 = vpop.xlane.xlu1 %3936  ;;  %1897 = vadd.xlane.f32.xlu1 %v14833_v46  ;;  %v3941_v14 = vpop.xlane.xlu0 %3940  ;;  %1891 = vadd.xlane.f32.xlu0 %v14834_v51 }
 0xa88   :  { %v3957_v19 = vsub.f32 %v12224_v13, %v3937_v16  ;;  %v3959_v11 = vsub.f32 %v12228_v1, %v3941_v14  ;;  %v14836_v13 = vld [vmem:[#allocation46_spill] sm:$0xff]  ;;  %9344 = vpow2.f32 %v3978_v2  ;;  %v14846_v14 = vld [vmem:[#allocation152_spill] sm:$0xff]  ;;  %v14848_v2 = vld [vmem:[#allocation47_spill] sm:$0xff] }
 0xa89   :  { %8724 = vmatpush3.bf16.xpose.msra.mxu0 %v4350_v3 }
 0xa8a   :  { %v3984_v27 = vmul.f32 1.442695, %v3957_v19  ;;  %v3988_v17 = vmul.f32 1.442695, %v3959_v11  ;;  %8958 = vmatprep.subr.msk.bf16.mxu0 %vm14835_vm14, %v12104_v22  ;;  %vm14863_vm14 = vmmov %vm14812_vm11 }
 0xa8b   :  { %v3933_v5 = vpop.xlane.xlu1 %3932  ;;  %1901 = vadd.xlane.f32.xlu1 %v14836_v13  ;;  %v12382_v15 = vpop.permute.xlu0 %4837  ;;  %2442 = vadd.xlane.f32.xlu0 %v14837_v47  ;;  %v14852_v13 = vld [vmem:[#allocation25_spill] sm:$0xff] }
 0xa8c   :  { %v3955_v1 = vsub.f32 %v12234_v33, %v3933_v5  ;;  %8959 = vmatprep.subr.msk.bf16.mxu1 %vm14838_vm12, %v12382_v15  ;;  %9346 = vpow2.f32 %v3984_v27  ;;  %v14840_v33 = vld [vmem:[#allocation45_spill] sm:$0xff]  ;;  %vm14866_vm12 = vmmov %vm14812_vm11 }
 0xa8d   :  { %9348 = vpow2.f32 %v3988_v17  ;;  %v14849_v27 = vld [vmem:[#allocation17_spill] sm:$0xff] }
 0xa8e   :  { %v3980_v57 = vmul.f32 1.442695, %v3955_v1 }
 0xa8f   :  { %v3943_v21 = vpop.xlane.xlu1 %3942  ;;  %2452 = vadd.xlane.f32.xlu1 %v14839_v55  ;;  %v12389_v23 = vpop.permute.xlu0 %4839  ;;  %2446 = vadd.xlane.f32.xlu0 %v14840_v33  ;;  %v14855_v55 = vld [vmem:[#allocation82_spill] sm:$0xff] }
 0xa90   :  { %9350 = vpow2.f32 %v3980_v57  ;;  %v3960_v39 = vsub.f32 %v12239_v9, %v3943_v21 }
 0xa91   :  { %9352 = vpow2.f32 %v3982_v62  ;;  %8726 = vmatpush3.bf16.xpose.msra.mxu0 %v4353_v41  ;;  %v14853_v62 = vld [vmem:[#allocation76_spill] sm:$0xff]  ;;  %v14858_v41 = vld [vmem:[#allocation86_spill] sm:$0xff] }
 0xa92   :  { %9354 = vpow2.f32 %v3986_v0  ;;  %v3990_v63 = vmul.f32 1.442695, %v3960_v39  ;;  %v12400_v9 = vpop.eup %9344  ;;  %v14856_v39 = vld [vmem:[#allocation122_spill] sm:$0xff] }
 0xa93   :  { %2456 = vadd.xlane.f32.xlu1 %v14842_v40  ;;  %v3945_v54 = vpop.xlane.xlu1 %3944  ;;  %v12396_v25 = vpop.permute.xlu0 %4843  ;;  %2989 = vadd.xlane.f32.xlu0 %v14843_v44  ;;  %v14860_v40 = vld [vmem:[#allocation121_spill] sm:$0xff] }
 0xa94   :  { %v3961_v34 = vsub.f32 %v12244_v48, %v3945_v54  ;;  %9356 = vpow2.f32 %v3990_v63 }
 0xa96   :  { %v3992_v37 = vmul.f32 1.442695, %v3961_v34  ;;  %v12407_v30 = vpop.eup %9346  ;;  %v14862_v34 = vld [vmem:[#allocation151_spill] sm:$0xff] }
 0xa97   :  { %2999 = vadd.xlane.f32.xlu1 %v14844_v32  ;;  %v12403_v49 = vpop.permute.xlu1 %4841  ;;  %v12405_v22 = vpop.permute.xlu0 %4847  ;;  %2993 = vadd.xlane.f32.xlu0 %v14845_v52  ;;  %v14868_v32 = vld [vmem:[#allocation153_spill] sm:$0xff]  ;;  %v14869_v52 = vld [vmem:[#allocation156_spill] sm:$0xff] }
 0xa98   :  { %9358 = vpow2.f32 %v3992_v37  ;;  %v12410_v16 = vpop.eup %9348  ;;  %v14865_v37 = vld [vmem:[#allocation154_spill] sm:$0xff] }
 0xa9a   :  { %v12412_v48 = vpop.eup %9350 }
 0xa9b   :  { %v12414_v46 = vpop.eup %9352  ;;  %3003 = vadd.xlane.f32.xlu1 %v14846_v14  ;;  %v12417_v19 = vpop.permute.xlu1 %4845  ;;  %v4030_v11 = vpack.c.bf16 %v12412_v48, %v12400_v9  ;;  %1895 = vadd.xlane.f32.xlu0 %v14848_v2 }
 0xa9c   :  { %v12419_v51 = vpop.permute.xlu0 %4849  ;;  %v12423_v35 = vpop.eup %9354  ;;  %v4031_v3 = vpack.c.bf16 %v12407_v30, %v12414_v46 }
 0xa9d   :  { %14847 = vst [vmem:[#allocation32_spill] sm:$0xff] %v12419_v51  ;;  %8703 = vmatprep.mubr.bf16.mxu0 %v4030_v11  ;;  %v4032_v12 = vpack.c.bf16 %v12410_v16, %v12423_v35  ;;  %v14870_v11 = vld [vmem:[#allocation81_spill] sm:$0xff] }
 0xa9e   :  { %8704 = vmatmul.mubr.bf16.gmra.mrb[120].mxu0 %v4031_v3  ;;  %v12436_v1 = vpop.eup %9356  ;;  %v14873_v3 = vld [vmem:[#allocation18_spill] sm:$0xff] }
 0xa9f   :  { %1905 = vadd.xlane.f32.xlu1 %v14849_v27  ;;  %v12431_v17 = vpop.permute.xlu1 %4823  ;;  %8707 = vmatprep.mubr.bf16.mxu0 %v4032_v12  ;;  %v14874_v12 = vld [vmem:[#allocation96_spill] sm:$0xff] }
 0xaa0   :  { %14850 = vst [vmem:[#allocation36_spill] sm:$0xff] %v12431_v17  ;;  %v12433_v5 = vpop.permute.xlu0 %4851  ;;  %1899 = vadd.xlane.f32.xlu0 %v14852_v13  ;;  %v14875_v13 = vld [vmem:[#allocation119_spill] sm:$0xff] }
 0xaa1   :  { %14851 = vst [vmem:[#allocation44_spill] sm:$0xff] %v12433_v5 }
 0xaa2   :  { %v12438_v47 = vpop.eup %9358 }
 0xaa3   :  { %1909 = vadd.xlane.f32.xlu1 %v14853_v62  ;;  %v12441_v0 = vpop.permute.xlu1 %4827  ;;  %v4033_v21 = vpack.c.bf16 %v12438_v47, %v12436_v1 }
 0xaa4   :  { %14854 = vst [vmem:[#allocation29_spill] sm:$0xff] %v12441_v0  ;;  %v12443_v57 = vpop.permute.xlu0 %4821  ;;  %2450 = vadd.xlane.f32.xlu0 %v14855_v55  ;;  %v14881_v55 = vld [vmem:[#allocation155_spill] sm:$0xff] }
 0xaa6   :  { %8708 = vmatmul.mubr.bf16.gmra.mrb[124].mxu0 %v4033_v21  ;;  %v14880_v21 = vld [vmem:[#allocation97_spill] sm:$0xff] }
 0xaa7   :  { %2460 = vadd.xlane.f32.xlu1 %v14856_v39  ;;  %8727 = vmatprep.mubr.msk.bf16.mxu0 %vm14812_vm11, %v12110_v20  ;;  %v12454_v63 = vpop.permute.xlu1 %4831 }
 0xaa8   :  { %v12451_v33 = vpop.permute.xlu0 %4825  ;;  %2454 = vadd.xlane.f32.xlu0 %v14858_v41  ;;  %14859 = vst [vmem:[#allocation77_spill] sm:$0xff] %v12454_v63  ;;  %v14883_v41 = vld [vmem:[#allocation157_spill] sm:$0xff] }
 0xaa9   :  { %14857 = vst [vmem:[#allocation75_spill] sm:$0xff] %v12451_v33 }
 0xaab   :  { %2464 = vadd.xlane.f32.xlu1 %v14860_v40  ;;  %v12462_v44 = vpop.permute.xlu1 %4835 }
 0xaac   :  { %v12457_v54 = vpop.permute.xlu0 %4829  ;;  %2997 = vadd.xlane.f32.xlu0 %v14862_v34  ;;  %14864 = vst [vmem:[#allocation87_spill] sm:$0xff] %v12462_v44  ;;  %v14885_v34 = vld [vmem:[#allocation93_spill] sm:$0xff] }
 0xaad   :  { %14861 = vst [vmem:[#allocation20_spill] sm:$0xff] %v12457_v54 }
 0xaae   :  { %8728 = vmatmul.mubr.msk.bf16.vlgmr.msra.gmra.mrb[128].mxu0 %vm14863_vm14, %v12118_v38  ;;  %v14872_v38 = vld [vmem:[#allocation95_spill] sm:$0xff]  ;;  %vm14876_vm14 = vmmov %vm14812_vm11 }
 0xaaf   :  { %3007 = vadd.xlane.f32.xlu1 %v14865_v37  ;;  %8731 = vmatprep.mubr.msk.bf16.mxu0 %vm14866_vm12, %v12114_v36  ;;  %v5137_v2 = vpop.permute.xlu1 %5136  ;;  %vm14878_vm12 = vmmov %vm14812_vm11  ;;  %v14886_v37 = vld [vmem:[#allocation100_spill] sm:$0xff] }
 0xab0   :  { %v12467_v20 = vpop.permute.xlu0 %4833  ;;  %3001 = vadd.xlane.f32.xlu0 %v14868_v32  ;;  %v14887_v32 = vld [vmem:[#allocation98_spill] sm:$0xff] }
 0xab1   :  { %14867 = vst [vmem:[#allocation48_spill] sm:$0xff] %v12467_v20 }
 0xab3   :  { %3011 = vadd.xlane.f32.xlu1 %v14869_v52  ;;  %v5145_v39 = vpop.permute.xlu1 %5144 }
 0xab4   :  { %v5135_v14 = vpop.permute.xlu0 %5134  ;;  %1903 = vadd.xlane.f32.xlu0 %v14870_v11 }
 0xab5   :  { %8807 = vmatprep.subr.bf16.mxu0 %v5135_v14 }
 0xab6   :  { %8808 = vmatpush3.bf16.msra.mxu0 %v5135_v14 }
 0xab7   :  { %8732 = vmatmul.mubr.msk.bf16.gmra.mrb[132].mxu0 %vm14871_vm15, %v12123_v60  ;;  %8809 = vmatprep.subr.bf16.mxu0 %v5137_v2  ;;  %v14877_v60 = vld [vmem:[#allocation99_spill] sm:$0xff]  ;;  %vm14882_vm15 = vmmov %vm14812_vm11 }
 0xab8   :  { %1407 = vadd.xlane.f32.xlu1 %v14872_v38  ;;  %8735 = vmatprep.mubr.msk.bf16.mxu0 %vm14812_vm11, %v12121_v4  ;;  %v5139_v36 = vpop.permute.xlu0 %5138  ;;  %v14879_v4 = vld [vmem:[#allocation123_spill] sm:$0xff]  ;;  %v14888_v38 = vld [vmem:[#allocation52_spill] sm:$0xff] }
 0xab9   :  { %1907 = vadd.xlane.f32.xlu0 %v14873_v3 }
 0xaba   :  { %8810 = vmatpush3.bf16.msra.mxu0 %v5137_v2 }
 0xabb   :  { %8811 = vmatprep.subr.bf16.mxu0 %v5139_v36 }
 0xabc   :  { %1411 = vadd.xlane.f32.xlu1 %v14874_v12  ;;  %v5141_v27 = vpop.permute.xlu0 %5140 }
 0xabd   :  { %2458 = vadd.xlane.f32.xlu0 %v14875_v13 }
 0xabe   :  { %8812 = vmatpush3.bf16.msra.mxu0 %v5139_v36 }
 0xabf   :  { %8736 = vmatmul.mubr.msk.bf16.gmra.mrb[136].mxu0 %vm14876_vm14, %v12127_v43  ;;  %8813 = vmatprep.subr.bf16.mxu0 %v5141_v27  ;;  %vm14922_vm14 = vmmov %vm14812_vm11 }
 0xac0   :  { %1415 = vadd.xlane.f32.xlu1 %v14877_v60  ;;  %8739 = vmatprep.mubr.msk.bf16.mxu0 %vm14878_vm12, %v12125_v8  ;;  %v5143_v62 = vpop.permute.xlu0 %5142  ;;  %v14884_v8 = vld [vmem:[#allocation94_spill] sm:$0xff]  ;;  %vm14924_vm12 = vmmov %vm14812_vm11 }
 0xac1   :  { %2462 = vadd.xlane.f32.xlu0 %v14879_v4 }
 0xac2   :  { %8814 = vmatpush3.bf16.msra.mxu0 %v5141_v27 }
 0xac3   :  { %8815 = vmatprep.subr.bf16.mxu0 %v5143_v62 }
 0xac4   :  { %1419 = vadd.xlane.f32.xlu1 %v14880_v21  ;;  %v5147_v43 = vpop.permute.xlu0 %5146 }
 0xac5   :  { %3005 = vadd.xlane.f32.xlu0 %v14881_v55 }
 0xac6   :  { %8816 = vmatpush3.bf16.msra.mxu0 %v5143_v62 }
 0xac7   :  { %8740 = vmatmul.mubr.msk.bf16.gmra.mrb[140].mxu0 %vm14882_vm15, %v12129_v7  ;;  %8817 = vmatprep.subr.bf16.mxu0 %v5145_v39  ;;  %vm14926_vm15 = vmmov %vm14812_vm11 }
 0xac8   :  { %v5149_v40 = vpop.permute.xlu0 %5148 }
 0xac9   :  { %3009 = vadd.xlane.f32.xlu0 %v14883_v41 }
 0xaca   :  { %8818 = vmatpush3.bf16.msra.mxu0 %v5145_v39 }
 0xacb   :  { %8819 = vmatprep.subr.bf16.mxu0 %v5147_v43 }
 0xacd   :  { %1405 = vadd.xlane.f32.xlu0 %v14884_v8 }
 0xace   :  { %8820 = vmatpush3.bf16.msra.mxu0 %v5147_v43  ;;  %v14889_v43 = vld [vmem:[#allocation50_spill] sm:$0xff] }
 0xacf   :  { %8821 = vmatprep.subr.bf16.mxu0 %v5149_v40 }
 0xad1   :  { %1409 = vadd.xlane.f32.xlu0 %v14885_v34 }
 0xad2   :  { %8822 = vmatpush3.bf16.msra.mxu0 %v5149_v40 }
 0xad5   :  { %1413 = vadd.xlane.f32.xlu0 %v14886_v37  ;;  %v14890_v37 = vld [vmem:[#allocation51_spill] sm:$0xff] }
 0xad9   :  { %1417 = vadd.xlane.f32.xlu0 %v14887_v32 }
 0xae4   :  { %v1882_v52 = vpop.xlane.xlu1 %1881 }
 0xae5   :  { %9360 = vrcp.f32 %v1882_v52 }
 0xae8   :  { %v1886_v7 = vpop.xlane.xlu1 %1885 }
 0xaec   :  { %v2437_v14 = vpop.xlane.xlu1 %2436 }
 0xaef   :  { %v9361_v11 = vpop.eup %9360 }
 0xaf0   :  { %v2441_v2 = vpop.xlane.xlu1 %2440  ;;  %v2065_v36 = vmul.f32 %v9361_v11, %v14888_v38  ;;  %v14891_v38 = vld [vmem:[#allocation53_spill] sm:$0xff] }
 0xaf2   :  { %2098 = vrot.lane.b32.xlu1 %v2065_v36, %s9931_s2 }
 0xaf4   :  { %v2984_v3 = vpop.xlane.xlu1 %2983 }
 0xaf8   :  { %v12497_v12 = vpop.xlane.xlu1 %2987  ;;  %v1880_v27 = vpop.xlane.xlu0 %1879 }
 0xaf9   :  { %9362 = vrcp.f32 %v1880_v27  ;;  %v14892_v27 = vld [vmem:[#allocation133_spill] sm:$0xff] }
 0xafc   :  { %v12499_v13 = vpop.xlane.xlu1 %1889  ;;  %v1884_v60 = vpop.xlane.xlu0 %1883 }
 0xafd   :  { %9364 = vrcp.f32 %v1884_v60 }
 0xafe   :  { %9366 = vrcp.f32 %v1886_v7 }
 0xb00   :  { %v12501_v4 = vpop.xlane.xlu1 %1893  ;;  %v2435_v62 = vpop.xlane.xlu0 %2434 }
 0xb01   :  { %9368 = vrcp.f32 %v2435_v62 }
 0xb02   :  { %9370 = vrcp.f32 %v2437_v14 }
 0xb03   :  { %v9363_v21 = vpop.eup %9362 }
 0xb04   :  { %v12503_v55 = vpop.xlane.xlu1 %2444  ;;  %v2439_v39 = vpop.xlane.xlu0 %2438  ;;  %v2064_v41 = vmul.f32 %v9363_v21, %v14889_v43  ;;  %v14893_v43 = vld [vmem:[#allocation135_spill] sm:$0xff] }
 0xb05   :  { %9372 = vrcp.f32 %v2439_v39 }
 0xb06   :  { %2096 = vrot.lane.b32.xlu0 %v2064_v41, %s9931_s2  ;;  %9374 = vrcp.f32 %v2441_v2  ;;  %v14894_v41 = vld [vmem:[#allocation132_spill] sm:$0xff] }
 0xb07   :  { %v9365_v8 = vpop.eup %9364 }
 0xb08   :  { %v12507_v40 = vpop.xlane.xlu1 %2448  ;;  %v2982_v34 = vpop.xlane.xlu0 %2981  ;;  %v2066_v32 = vmul.f32 %v9365_v8, %v14890_v37 }
 0xb09   :  { %v9367_v52 = vpop.eup %9366  ;;  %9376 = vrcp.f32 %v2982_v34 }
 0xb0a   :  { %2100 = vrot.lane.b32.xlu1 %v2066_v32, %s9931_s2  ;;  %9378 = vrcp.f32 %v2984_v3  ;;  %v2067_v36 = vmul.f32 %v9367_v52, %v14891_v38 }
 0xb0b   :  { %v9369_v7 = vpop.eup %9368 }
 0xb0c   :  { %v12511_v14 = vpop.xlane.xlu1 %2991  ;;  %v12513_v11 = vpop.xlane.xlu0 %2985  ;;  %v2611_v60 = vmul.f32 %v9369_v7, %v14892_v27  ;;  %v14895_v7 = vld [vmem:[#allocation134_spill] sm:$0xff] }
 0xb0d   :  { %v9371_v2 = vpop.eup %9370 }
 0xb0e   :  { %2102 = vrot.lane.b32.xlu1 %v2067_v36, %s9931_s2  ;;  %2643 = vrot.lane.b32.xlu0 %v2611_v60, %s9926_s0  ;;  %v2612_v3 = vmul.f32 %v9371_v2, %v14893_v43  ;;  %v14896_v36 = vld [vmem:[#allocation34_spill] sm:$0xff] }
 0xb0f   :  { %v9373_v62 = vpop.eup %9372  ;;  %v14897_v43 = vld [vmem:[#allocation42_spill] sm:$0xff] }
 0xb10   :  { %v12519_v21 = vpop.xlane.xlu1 %2995  ;;  %v12521_v39 = vpop.xlane.xlu0 %1887  ;;  %v2613_v8 = vmul.f32 %v9373_v62, %v14894_v41 }
 0xb11   :  { %v9375_v34 = vpop.eup %9374 }
 0xb12   :  { %2645 = vrot.lane.b32.xlu1 %v2612_v3, %s9926_s0  ;;  %2647 = vrot.lane.b32.xlu0 %v2613_v8, %s9926_s0  ;;  %v2614_v38 = vmul.f32 %v9375_v34, %v14895_v7 }
 0xb13   :  { %v9377_v37 = vpop.eup %9376 }
 0xb14   :  { %v12527_v32 = vpop.xlane.xlu1 %1897  ;;  %v12529_v52 = vpop.xlane.xlu0 %1891  ;;  %v3158_v27 = vmul.f32 %v9377_v37, %v14896_v36 }
 0xb15   :  { %v9379_v60 = vpop.eup %9378 }
 0xb16   :  { %2649 = vrot.lane.b32.xlu1 %v2614_v38, %s9926_s0  ;;  %3190 = vrot.lane.b32.xlu0 %v3158_v27, %s9930_s1  ;;  %v3159_v3 = vmul.f32 %v9379_v60, %v14897_v43 }
 0xb18   :  { %v12535_v2 = vpop.xlane.xlu1 %1901  ;;  %v12537_v62 = vpop.xlane.xlu0 %2442 }
 0xb1a   :  { %3192 = vrot.lane.b32.xlu1 %v3159_v3, %s9930_s1 }
 0xb1c   :  { %v12541_v41 = vpop.xlane.xlu1 %2452  ;;  %v12543_v8 = vpop.xlane.xlu0 %2446 }
 0xb20   :  { %v12545_v34 = vpop.xlane.xlu1 %2456  ;;  %v12547_v37 = vpop.xlane.xlu0 %2989 }
 0xb24   :  { %v12549_v7 = vpop.xlane.xlu1 %2999  ;;  %v12551_v38 = vpop.xlane.xlu0 %2993 }
 0xb28   :  { %v12553_v36 = vpop.xlane.xlu1 %3003  ;;  %v12555_v27 = vpop.xlane.xlu0 %1895 }
 0xb29   :  { %14898 = vst [vmem:[#allocation148_spill] sm:$0xff] %v12553_v36 }
 0xb2b   :  { %v12557_v44 = vpop.f32.mrb[112].mxu0 }
 0xb2c   :  { %14899 = vst [vmem:[#allocation19_spill] sm:$0xff] %v12557_v44  ;;  %v12559_v60 = vpop.xlane.xlu1 %1905  ;;  %v12561_v43 = vpop.f32.mrb[113].mxu0 }
 0xb2d   :  { %14900 = vst [vmem:[#allocation39_spill] sm:$0xff] %v12559_v60  ;;  %14901 = vst [vmem:[#allocation21_spill] sm:$0xff] %v12561_v43  ;;  %v12563_v3 = vpop.xlane.xlu0 %1899  ;;  %v12565_v20 = vpop.f32.mrb[114].mxu0 }
 0xb2e   :  { %14902 = vst [vmem:[#allocation24_spill] sm:$0xff] %v12565_v20  ;;  %v12567_v63 = vpop.f32.mrb[115].mxu0 }
 0xb2f   :  { %14903 = vst [vmem:[#allocation85_spill] sm:$0xff] %v12567_v63 }
 0xb30   :  { %v12569_v54 = vpop.xlane.xlu1 %1909 }
 0xb31   :  { %14904 = vst [vmem:[#allocation41_spill] sm:$0xff] %v12569_v54  ;;  %v12571_v0 = vpop.xlane.xlu0 %2450 }
 0xb33   :  { %v12573_v33 = vpop.f32.mrb[116].mxu0 }
 0xb34   :  { %14905 = vst [vmem:[#allocation22_spill] sm:$0xff] %v12573_v33  ;;  %v12575_v17 = vpop.xlane.xlu1 %2460  ;;  %v12577_v5 = vpop.f32.mrb[117].mxu0 }
 0xb35   :  { %14906 = vst [vmem:[#allocation90_spill] sm:$0xff] %v12575_v17  ;;  %14907 = vst [vmem:[#allocation49_spill] sm:$0xff] %v12577_v5  ;;  %v12579_v44 = vpop.xlane.xlu0 %2454  ;;  %v12581_v60 = vpop.f32.mrb[118].mxu0  ;;  %3998 = vadd.xlane.f32.xlu0 %v12309_v53  ;;  %v14920_v17 = vld [vmem:[#allocation92_spill] sm:$0xff] }
 0xb36   :  { %14908 = vst [vmem:[#allocation27_spill] sm:$0xff] %v12581_v60  ;;  %v12584_v43 = vpop.f32.mrb[119].mxu0 }
 0xb37   :  { %14909 = vst [vmem:[#allocation40_spill] sm:$0xff] %v12584_v43 }
 0xb38   :  { %v12586_v20 = vpop.xlane.xlu1 %2464 }
 0xb39   :  { %14910 = vst [vmem:[#allocation149_spill] sm:$0xff] %v12586_v20  ;;  %v12588_v63 = vpop.xlane.xlu0 %2997  ;;  %3994 = vadd.xlane.f32.xlu0 %v12305_v29  ;;  %v14918_v20 = vld [vmem:[#allocation89_spill] sm:$0xff] }
 0xb3c   :  { %v12591_v54 = vpop.xlane.xlu1 %3007 }
 0xb3d   :  { %14911 = vst [vmem:[#allocation80_spill] sm:$0xff] %v12591_v54  ;;  %v12593_v33 = vpop.xlane.xlu0 %3001  ;;  %4006 = vadd.xlane.f32.xlu0 %v12327_v50 }
 0xb3e   :  { %14912 = vst [vmem:[#allocation23_spill] sm:$0xff] %v12593_v33  ;;  %4000 = vadd.xlane.f32.xlu1 %v12311_v18 }
 0xb40   :  { %v12597_v5 = vpop.xlane.xlu1 %3011 }
 0xb41   :  { %14913 = vst [vmem:[#allocation43_spill] sm:$0xff] %v12597_v5  ;;  %v12599_v60 = vpop.xlane.xlu0 %1903  ;;  %4002 = vadd.xlane.f32.xlu0 %v12316_v24 }
 0xb42   :  { %14914 = vst [vmem:[#allocation46_spill] sm:$0xff] %v12599_v60  ;;  %3996 = vadd.xlane.f32.xlu1 %v12303_v61 }
 0xb45   :  { %v1408_v53 = vpop.xlane.xlu1 %1407 }
 0xb46   :  { %9380 = vrcp.f32 %v1408_v53  ;;  %v12603_v43 = vpop.xlane.xlu0 %1907  ;;  %4008 = vadd.xlane.f32.xlu1 %v12329_v58 }
 0xb47   :  { %14915 = vst [vmem:[#allocation91_spill] sm:$0xff] %v12603_v43 }
 0xb49   :  { %v1412_v29 = vpop.xlane.xlu1 %1411 }
 0xb4a   :  { %9382 = vrcp.f32 %v1412_v29  ;;  %v12606_v54 = vpop.xlane.xlu0 %2458  ;;  %4004 = vadd.xlane.f32.xlu1 %v12320_v6 }
 0xb4b   :  { %14916 = vst [vmem:[#allocation78_spill] sm:$0xff] %v12606_v54 }
 0xb4d   :  { %v1416_v18 = vpop.xlane.xlu1 %1415 }
 0xb4e   :  { %9384 = vrcp.f32 %v1416_v18  ;;  %v12609_v50 = vpop.xlane.xlu0 %2462  ;;  %v14923_v18 = vld [vmem:[#allocation111_spill] sm:$0xff] }
 0xb4f   :  { %14917 = vst [vmem:[#allocation45_spill] sm:$0xff] %v12609_v50 }
 0xb50   :  { %v9381_v5 = vpop.eup %9380 }
 0xb51   :  { %v1420_v24 = vpop.xlane.xlu1 %1419  ;;  %v1559_v61 = vmul.f32 %v9381_v5, %v14918_v20  ;;  %v14925_v20 = vld [vmem:[#allocation110_spill] sm:$0xff] }
 0xb52   :  { %9386 = vrcp.f32 %v1420_v24  ;;  %v12612_v53 = vpop.xlane.xlu0 %3005 }
 0xb53   :  { %14919 = vst [vmem:[#allocation83_spill] sm:$0xff] %v12612_v53  ;;  %1575 = vst.msk [vmem:[#allocation2 + $0x8] sm:$0xff] %vm14812_vm11, %v1559_v61  ;;  %vm14374_vm11 = vcmask 523520  }
 0xb54   :  { %v9383_v58 = vpop.eup %9382 }
 0xb55   :  { %v1561_v29 = vmul.f32 %v9383_v58, %v14920_v17 }
 0xb56   :  { %v12616_v60 = vpop.xlane.xlu0 %3009 }
 0xb57   :  { %14921 = vst [vmem:[#allocation33_spill] sm:$0xff] %v12616_v60  ;;  %1577 = vst.msk [vmem:[#allocation2 + $0x18] sm:$0xff] %vm14922_vm14, %v1561_v29 }
 0xb58   :  { %v9385_v6 = vpop.eup %9384  ;;  %vm14928_vm14 = vmmov %vm14924_vm12 }
 0xb59   :  { %v1563_v54 = vmul.f32 %v9385_v6, %v14923_v18  ;;  %v14927_v6 = vld [vmem:[#allocation88_spill] sm:$0xff] }
 0xb5a   :  { %v1406_v50 = vpop.xlane.xlu0 %1405 }
 0xb5b   :  { %9388 = vrcp.f32 %v1406_v50  ;;  %1579 = vst.msk [vmem:[#allocation2 + $0x28] sm:$0xff] %vm14924_vm12, %v1563_v54  ;;  %v14929_v50 = vld [vmem:[#allocation79_spill] sm:$0xff] }
 0xb5c   :  { %v9387_v5 = vpop.eup %9386 }
 0xb5d   :  { %v1565_v24 = vmul.f32 %v9387_v5, %v14925_v20  ;;  %v14930_v20 = vld [vmem:[#allocation109_spill] sm:$0xff] }
 0xb5e   :  { %v1410_v53 = vpop.xlane.xlu0 %1409 }
 0xb5f   :  { %9390 = vrcp.f32 %v1410_v53  ;;  %1581 = vst.msk [vmem:[#allocation2 + $0x38] sm:$0xff] %vm14926_vm15, %v1565_v24  ;;  %vm14931_vm15 = vmmov %vm14924_vm12 }
 0xb62   :  { %v1414_v61 = vpop.xlane.xlu0 %1413 }
 0xb63   :  { %9392 = vrcp.f32 %v1414_v61 }
 0xb64   :  { %v2099_v58 = vpop.permute.xlu1 %2098 }
 0xb65   :  { %v9389_v17 = vpop.eup %9388  ;;  %2146 = vst.msk [vmem:[#allocation2 + $0x8] sm:$0xff] %vm14374_vm11, %v2099_v58  ;;  %v14933_v58 = vld [vmem:[#allocation84_spill] sm:$0xff] }
 0xb66   :  { %v1418_v29 = vpop.xlane.xlu0 %1417  ;;  %v1558_v18 = vmul.f32 %v9389_v17, %v14927_v6 }
 0xb67   :  { %9394 = vrcp.f32 %v1418_v29 }
 0xb68   :  { %1574 = vst.msk [vmem:[#allocation2] sm:$0xff] %vm14928_vm14, %v1558_v18  ;;  %vm14936_vm14 = vmmov %vm14924_vm12  ;;  %9396 = vrcp.f32 %v12513_v11  ;;  %v14959_v11 = vld [vmem:[#allocation101_spill] sm:$0xff] }
 0xb69   :  { %v9391_v54 = vpop.eup %9390  ;;  %9398 = vrcp.f32 %v12497_v12 }
 0xb6a   :  { %v1560_v5 = vmul.f32 %v9391_v54, %v14929_v50  ;;  %9400 = vrcp.f32 %v12499_v13 }
 0xb6b   :  { %9402 = vrcp.f32 %v12529_v52 }
 0xb6c   :  { %1576 = vst.msk [vmem:[#allocation2 + $0x10] sm:$0xff] %vm14924_vm12, %v1560_v5  ;;  %vm14372_vm12 = vcmask 785920   ;;  %9404 = vrcp.f32 %v12521_v39 }
 0xb6d   :  { %v9393_v53 = vpop.eup %9392  ;;  %9406 = vrcp.f32 %v12501_v4 }
 0xb6e   :  { %v1562_v24 = vmul.f32 %v9393_v53, %v14930_v20  ;;  %9408 = vrcp.f32 %v12537_v62 }
 0xb6f   :  { %9410 = vrcp.f32 %v12503_v55  ;;  %v14963_v55 = vld [vmem:[#allocation57_spill] sm:$0xff] }
 0xb70   :  { %1578 = vst.msk [vmem:[#allocation2 + $0x20] sm:$0xff] %vm14931_vm15, %v1562_v24  ;;  %vm14375_vm15 = vcmask 1048320   ;;  %9412 = vrcp.f32 %v12543_v8 }
 0xb71   :  { %v9395_v61 = vpop.eup %9394  ;;  %v12630_v60 = vpop.f32.mrb[120].mxu0  ;;  %9414 = vrcp.f32 %v12507_v40  ;;  %v14964_v40 = vld [vmem:[#allocation137_spill] sm:$0xff] }
 0xb72   :  { %14932 = vst [vmem:[#allocation150_spill] sm:$0xff] %v12630_v60  ;;  %v1564_v43 = vmul.f32 %v9395_v61, %v14933_v58  ;;  %v12633_v51 = vpop.f32.mrb[121].mxu0  ;;  %9416 = vrcp.f32 %v12547_v37 }
 0xb73   :  { %14934 = vst [vmem:[#allocation37_spill] sm:$0xff] %v12633_v51  ;;  %v12635_v17 = vpop.f32.mrb[122].mxu0  ;;  %9418 = vrcp.f32 %v12511_v14  ;;  %v14965_v14 = vld [vmem:[#allocation139_spill] sm:$0xff] }
 0xb74   :  { %14935 = vst [vmem:[#allocation152_spill] sm:$0xff] %v12635_v17  ;;  %1580 = vst.msk [vmem:[#allocation2 + $0x30] sm:$0xff] %vm14936_vm14, %v1564_v43  ;;  %v12638_v29 = vpop.f32.mrb[123].mxu0  ;;  %vm14949_vm14 = vnez %v14468_v31  ;;  %v14956_v31 = vld [vmem:[#allocation104_spill] sm:$0xff]  ;;  %9420 = vrcp.f32 %v12551_v38 }
 0xb75   :  { %14937 = vst [vmem:[#allocation47_spill] sm:$0xff] %v12638_v29  ;;  %9422 = vrcp.f32 %v12519_v21 }
 0xb78   :  { %v2097_v6 = vpop.permute.xlu0 %2096 }
 0xb79   :  { %v12640_v18 = vpop.f32.mrb[124].mxu0  ;;  %2145 = vst.msk [vmem:[#allocation2] sm:$0xff] %vm14374_vm11, %v2097_v6 }
 0xb7a   :  { %14938 = vst [vmem:[#allocation17_spill] sm:$0xff] %v12640_v18  ;;  %v12643_v54 = vpop.f32.mrb[125].mxu0 }
 0xb7b   :  { %14939 = vst [vmem:[#allocation25_spill] sm:$0xff] %v12643_v54  ;;  %v12645_v50 = vpop.f32.mrb[126].mxu0 }
 0xb7c   :  { %14940 = vst [vmem:[#allocation76_spill] sm:$0xff] %v12645_v50  ;;  %v12647_v5 = vpop.f32.mrb[127].mxu0  ;;  %v2101_v53 = vpop.permute.xlu1 %2100 }
 0xb7d   :  { %14941 = vst [vmem:[#allocation82_spill] sm:$0xff] %v12647_v5  ;;  %2147 = vst.msk [vmem:[#allocation2 + $0x10] sm:$0xff] %vm14374_vm11, %v2101_v53 }
 0xb80   :  { %v2103_v20 = vpop.permute.xlu1 %2102  ;;  %v2644_v24 = vpop.permute.xlu0 %2643 }
 0xb81   :  { %2148 = vst.msk [vmem:[#allocation2 + $0x18] sm:$0xff] %vm14374_vm11, %v2103_v20  ;;  %v8729_v43 = vpop.f32.mrb[128].mxu0  ;;  %vm14952_vm11 = vnez %v14477_v56 }
 0xb82   :  { %2692 = vst.msk [vmem:[#allocation2] sm:$0xff] %vm14372_vm12, %v2644_v24  ;;  %v12654_v61 = vsel %vm10814_vm1, %v8729_v43, -1e+30  ;;  %v4389_v58 = vpop.f32.mrb[129].mxu0 }
 0xb83   :  { %v8730_v6 = vpop.f32.mrb[130].mxu0  ;;  %4472 = vmax.xlane.f32.xlu0 %v12654_v61  ;;  %v12664_v24 = vsel %vm10826_vm2, %v4389_v58, -1e+30 }
 0xb84   :  { %v4392_v50 = vpop.f32.mrb[131].mxu0  ;;  %v2646_v5 = vpop.permute.xlu1 %2645  ;;  %v12676_v58 = vsel %vm10843_vm4, %v8730_v6, -1e+30 }
 0xb85   :  { %v12659_v53 = vsel %vm10836_vm3, %v4392_v50, -1e+30  ;;  %2693 = vst.msk [vmem:[#allocation2 + $0x8] sm:$0xff] %vm14372_vm12, %v2646_v5  ;;  %v2648_v20 = vpop.permute.xlu0 %2647 }
 0xb86   :  { %2694 = vst.msk [vmem:[#allocation2 + $0x10] sm:$0xff] %vm14372_vm12, %v2648_v20  ;;  %4470 = vmax.xlane.f32.xlu1 %v12659_v53 }
 0xb87   :  { %4468 = vmax.xlane.f32.xlu0 %v12664_v24 }
 0xb88   :  { %v2650_v43 = vpop.permute.xlu1 %2649 }
 0xb89   :  { %2695 = vst.msk [vmem:[#allocation2 + $0x18] sm:$0xff] %vm14372_vm12, %v2650_v43  ;;  %v3191_v50 = vpop.permute.xlu0 %3190  ;;  %vm14951_vm12 = vnez %v14950_v59  ;;  %v14954_v59 = vld [vmem:[#allocation30_spill] sm:$0xff] }
 0xb8a   :  { %v8733_v54 = vpop.f32.mrb[132].mxu0  ;;  %3239 = vst.msk [vmem:[#allocation2] sm:$0xff] %vm14375_vm15, %v3191_v50 }
 0xb8b   :  { %v12672_v5 = vsel %vm10865_vm6, %v8733_v54, -1e+30  ;;  %v4405_v60 = vpop.f32.mrb[133].mxu0  ;;  %4474 = vmax.xlane.f32.xlu0 %v12676_v58 }
 0xb8c   :  { %v8734_v20 = vpop.f32.mrb[134].mxu0  ;;  %4480 = vmax.xlane.f32.xlu1 %v12672_v5  ;;  %v3193_v51 = vpop.permute.xlu1 %3192  ;;  %v12687_v10 = vsel %vm10887_vm8, %v4405_v60, -1e+30 }
 0xb8d   :  { %v4408_v18 = vpop.f32.mrb[135].mxu0  ;;  %3240 = vst.msk [vmem:[#allocation2 + $0x8] sm:$0xff] %vm14375_vm15, %v3193_v51  ;;  %v12694_v29 = vsel %vm10858_vm5, %v8734_v20, -1e+30  ;;  %vm14953_vm15 = vnez %v14798_v45  ;;  %v14958_v45 = vld [vmem:[#allocation103_spill] sm:$0xff] }
 0xb8e   :  { %v12683_v43 = vsel %vm14733_vm7, %v4408_v18, -1e+30 }
 0xb8f   :  { %4478 = vmax.xlane.f32.xlu0 %v12683_v43 }
 0xb90   :  { %4476 = vmax.xlane.f32.xlu1 %v12687_v10 }
 0xb92   :  { %v8737_v6 = vpop.f32.mrb[136].mxu0 }
 0xb93   :  { %v12698_v18 = vsel %vm14735_vm13, %v8737_v6, -1e+30  ;;  %v4421_v17 = vpop.f32.mrb[137].mxu0 }
 0xb94   :  { %v8738_v36 = vpop.f32.mrb[138].mxu0  ;;  %4482 = vmax.xlane.f32.xlu1 %v12694_v29  ;;  %4488 = vmax.xlane.f32.xlu0 %v12698_v18  ;;  %v12704_v60 = vsel %vm14658_vm10, %v4421_v17, -1e+30 }
 0xb95   :  { %v4424_v51 = vpop.f32.mrb[139].mxu0  ;;  %v12709_v20 = vsel %vm14794_vm9, %v8738_v36, -1e+30 }
 0xb96   :  { %v12719_v17 = vsel %vm14949_vm14, %v4424_v51, -1e+30 }
 0xb98   :  { %4484 = vmax.xlane.f32.xlu1 %v12704_v60 }
 0xb9a   :  { %v8741_v50 = vpop.f32.mrb[140].mxu0 }
 0xb9b   :  { %v4437_v6 = vpop.f32.mrb[141].mxu0  ;;  %v12729_v36 = vsel %vm14952_vm11, %v8741_v50, -1e+30  ;;  %v14955_v50 = vld [vmem:[#allocation38_spill] sm:$0xff] }
 0xb9c   :  { %v12713_v26 = vsel %vm14793_vm0, %v4437_v6, -1e+30  ;;  %v8742_v54 = vpop.f32.mrb[142].mxu0  ;;  %4490 = vmax.xlane.f32.xlu1 %v12709_v20 }
 0xb9d   :  { %v4440_v33 = vpop.f32.mrb[143].mxu0  ;;  %4492 = vmax.xlane.f32.xlu0 %v12713_v26  ;;  %v12734_v6 = vsel %vm14953_vm15, %v8742_v54, -1e+30  ;;  %v14957_v54 = vld [vmem:[#allocation102_spill] sm:$0xff] }
 0xb9e   :  { %v12723_v42 = vsel %vm14951_vm12, %v4440_v33, -1e+30  ;;  %v9397_v33 = vpop.eup %9396  ;;  %vm14973_vm12 = vcmask 261120  }
 0xb9f   :  { %v9399_v51 = vpop.eup %9398  ;;  %v3160_v28 = vmul.f32 %v9397_v33, %v14954_v59  ;;  %vm14974_vm15 = vmmov %vm14973_vm12 }
 0xba0   :  { %4486 = vmax.xlane.f32.xlu1 %v12719_v17  ;;  %v3161_v56 = vmul.f32 %v9399_v51, %v14955_v50  ;;  %vm14979_vm0 = vmmov %vm14974_vm15 }
 0xba1   :  { %4494 = vmax.xlane.f32.xlu0 %v12723_v42  ;;  %vm15013_vm11 = vmmov %vm14979_vm0 }
 0xba2   :  { %vm15018_vm9 = vmmov %vm14979_vm0 }
 0xba4   :  { %4496 = vmax.xlane.f32.xlu1 %v12729_v36 }
 0xba8   :  { %4498 = vmax.xlane.f32.xlu1 %v12734_v6 }
 0xbb7   :  { %3194 = vrot.lane.b32.xlu0 %v3160_v28, %s9930_s1 }
 0xbb9   :  { %3196 = vrot.lane.b32.xlu1 %v3161_v56, %s9930_s1  ;;  %v9401_v56 = vpop.eup %9400 }
 0xbba   :  { %v9403_v28 = vpop.eup %9402 }
 0xbc2   :  { %v12766_v4 = vpop.xlane.xlu0 %3998 }
 0xbc6   :  { %v12778_v50 = vpop.xlane.xlu0 %3994 }
 0xbcb   :  { %v12774_v37 = vpop.xlane.xlu1 %4000 }
 0xbcf   :  { %v12784_v21 = vpop.xlane.xlu1 %3996 }
 0xbd6   :  { %1421 = vadd.xlane.f32.xlu0 %v14956_v31  ;;  %v14960_v31 = vld [vmem:[#allocation56_spill] sm:$0xff] }
 0xbd7   :  { %v2069_v59 = vmul.f32 %v9401_v56, %v14960_v31  ;;  %v14967_v56 = vld [vmem:[#allocation138_spill] sm:$0xff] }
 0xbda   :  { %1425 = vadd.xlane.f32.xlu0 %v14957_v54  ;;  %v14966_v54 = vld [vmem:[#allocation136_spill] sm:$0xff] }
 0xbdd   :  { %1423 = vadd.xlane.f32.xlu1 %v14958_v45  ;;  %v9405_v45 = vpop.eup %9404 }
 0xbde   :  { %1427 = vadd.xlane.f32.xlu0 %v14959_v11 }
 0xbe1   :  { %4012 = vadd.xlane.f32.xlu1 %v12412_v48  ;;  %v9407_v48 = vpop.eup %9406 }
 0xbe2   :  { %4010 = vadd.xlane.f32.xlu0 %v12400_v9  ;;  %v14961_v9 = vld [vmem:[#allocation55_spill] sm:$0xff]  ;;  %v9409_v13 = vpop.eup %9408  ;;  %v2071_v39 = vmul.f32 %v9407_v48, %v14963_v55 }
 0xbe3   :  { %v9411_v52 = vpop.eup %9410  ;;  %v2615_v62 = vmul.f32 %v9409_v13, %v14964_v40  ;;  %v14969_v48 = vld [vmem:[#allocation35_spill] sm:$0xff]  ;;  %v14970_v13 = vld [vmem:[#allocation26_spill] sm:$0xff] }
 0xbe4   :  { %v9413_v8 = vpop.eup %9412  ;;  %v2616_v33 = vmul.f32 %v9411_v52, %v14965_v14  ;;  %v14971_v52 = vld [vmem:[#allocation31_spill] sm:$0xff] }
 0xbe5   :  { %4016 = vadd.xlane.f32.xlu1 %v12407_v30  ;;  %v2070_v30 = vmul.f32 %v9403_v28, %v14961_v9  ;;  %v9415_v51 = vpop.eup %9414  ;;  %v2617_v38 = vmul.f32 %v9413_v8, %v14966_v54  ;;  %v14968_v28 = vld [vmem:[#allocation28_spill] sm:$0xff] }
 0xbe6   :  { %4014 = vadd.xlane.f32.xlu0 %v12414_v46  ;;  %v14962_v46 = vld [vmem:[#allocation54_spill] sm:$0xff]  ;;  %v9417_v11 = vpop.eup %9416  ;;  %v2618_v31 = vmul.f32 %v9415_v51, %v14967_v56 }
 0xbe7   :  { %v2068_v12 = vmul.f32 %v9405_v45, %v14962_v46  ;;  %v3162_v45 = vmul.f32 %v9417_v11, %v14968_v28 }
 0xbf6   :  { %2106 = vrot.lane.b32.xlu1 %v2069_v59, %s9931_s2  ;;  %v9419_v59 = vpop.eup %9418 }
 0xbf7   :  { %v9421_v9 = vpop.eup %9420  ;;  %v3163_v46 = vmul.f32 %v9419_v59, %v14969_v48 }
 0xbf8   :  { %v3164_v55 = vmul.f32 %v9421_v9, %v14970_v13 }
 0xbfa   :  { %2108 = vrot.lane.b32.xlu1 %v2070_v30, %s9931_s2  ;;  %v12788_v30 = vpop.xlane.xlu0 %4006 }
 0xbfc   :  { %2104 = vrot.lane.b32.xlu0 %v2068_v12, %s9931_s2  ;;  %v9423_v12 = vpop.eup %9422 }
 0xbfd   :  { %v3165_v40 = vmul.f32 %v9423_v12, %v14971_v52 }
 0xbfe   :  { %2110 = vrot.lane.b32.xlu1 %v2071_v39, %s9931_s2  ;;  %v12794_v39 = vpop.xlane.xlu1 %4008 }
 0xc00   :  { %2651 = vrot.lane.b32.xlu0 %v2615_v62, %s9926_s0  ;;  %v12798_v62 = vpop.xlane.xlu0 %4002 }
 0xc02   :  { %2653 = vrot.lane.b32.xlu1 %v2616_v33, %s9926_s0  ;;  %v12801_v8 = vpop.xlane.xlu1 %4004 }
 0xc04   :  { %2655 = vrot.lane.b32.xlu0 %v2617_v38, %s9926_s0 }
 0xc06   :  { %2657 = vrot.lane.b32.xlu1 %v2618_v31, %s9926_s0 }
 0xc08   :  { %3198 = vrot.lane.b32.xlu0 %v3162_v45, %s9930_s1 }
 0xc0a   :  { %3200 = vrot.lane.b32.xlu1 %v3163_v46, %s9930_s1 }
 0xc0c   :  { %3202 = vrot.lane.b32.xlu0 %v3164_v55, %s9930_s1 }
 0xc0e   :  { %3204 = vrot.lane.b32.xlu1 %v3165_v40, %s9930_s1 }
 0xc10   :  { %v4473_v14 = vpop.xlane.xlu0 %4472 }
 0xc11   :  { %v4502_v51 = vsub.f32 %v12654_v61, %v4473_v14 }
 0xc13   :  { %v4471_v33 = vpop.xlane.xlu1 %4470  ;;  %v4520_v28 = vmul.f32 1.442695, %v4502_v51 }
 0xc14   :  { %v4501_v54 = vsub.f32 %v12659_v53, %v4471_v33  ;;  %v4469_v38 = vpop.xlane.xlu0 %4468 }
 0xc15   :  { %v4500_v11 = vsub.f32 %v12664_v24, %v4469_v38 }
 0xc16   :  { %v4518_v56 = vmul.f32 1.442695, %v4501_v54 }
 0xc17   :  { %v4516_v31 = vmul.f32 1.442695, %v4500_v11 }
 0xc18   :  { %9424 = vpow2.f32 %v4518_v56  ;;  %v4475_v45 = vpop.xlane.xlu0 %4474 }
 0xc19   :  { %v4481_v59 = vpop.xlane.xlu1 %4480  ;;  %9426 = vpow2.f32 %v4516_v31  ;;  %v4503_v9 = vsub.f32 %v12676_v58, %v4475_v45 }
 0xc1a   :  { %v4506_v48 = vsub.f32 %v12672_v5, %v4481_v59  ;;  %9428 = vpow2.f32 %v4520_v28 }
 0xc1b   :  { %v4522_v46 = vmul.f32 1.442695, %v4503_v9 }
 0xc1c   :  { %v4479_v53 = vpop.xlane.xlu0 %4478  ;;  %v4528_v55 = vmul.f32 1.442695, %v4506_v48  ;;  %v14972_v48 = vld [vmem:[#allocation108_spill] sm:$0xff] }
 0xc1d   :  { %v4477_v12 = vpop.xlane.xlu1 %4476  ;;  %9430 = vpow2.f32 %v4522_v46  ;;  %v4505_v24 = vsub.f32 %v12683_v43, %v4479_v53 }
 0xc1e   :  { %v4504_v61 = vsub.f32 %v12687_v10, %v4477_v12  ;;  %v4878_v12 = vsel %vm14973_vm12, %v12382_v15, 0  ;;  %vm14977_vm12 = vcmask 1048320  }
 0xc1f   :  { %v4526_v52 = vmul.f32 1.442695, %v4505_v24 }
 0xc20   :  { %v4524_v13 = vmul.f32 1.442695, %v4504_v61 }
 0xc21   :  { %v4483_v40 = vpop.xlane.xlu1 %4482  ;;  %v4489_v58 = vpop.xlane.xlu0 %4488 }
 0xc22   :  { %9432 = vpow2.f32 %v4524_v13  ;;  %v4507_v14 = vsub.f32 %v12694_v29, %v4483_v40  ;;  %v12811_v33 = vpop.eup %9424  ;;  %v4510_v54 = vsub.f32 %v12698_v18, %v4489_v58 }
 0xc23   :  { %9434 = vpow2.f32 %v4526_v52  ;;  %v12813_v51 = vpop.eup %9426  ;;  %v14975_v52 = vld [vmem:[#allocation106_spill] sm:$0xff] }
 0xc24   :  { %v4530_v5 = vmul.f32 1.442695, %v4507_v14  ;;  %9436 = vpow2.f32 %v4528_v55  ;;  %v4580_v43 = vpack.c.bf16 %v12811_v33, %v12813_v51  ;;  %v12819_v11 = vpop.eup %9428  ;;  %v4536_v31 = vmul.f32 1.442695, %v4510_v54  ;;  %v14976_v54 = vld [vmem:[#allocation107_spill] sm:$0xff] }
 0xc25   :  { %v4485_v10 = vpop.xlane.xlu1 %4484 }
 0xc26   :  { %9438 = vpow2.f32 %v4530_v5  ;;  %v4508_v38 = vsub.f32 %v12704_v60, %v4485_v10  ;;  %8759 = vmatprep.mubr.bf16.mxu1 %v4580_v43 }
 0xc27   :  { %v12821_v29 = vpop.eup %9430  ;;  %9440 = vpow2.f32 %v4536_v31 }
 0xc28   :  { %v4581_v45 = vpack.c.bf16 %v12821_v29, %v12819_v11  ;;  %v4532_v9 = vmul.f32 1.442695, %v4508_v38  ;;  %v4881_v38 = vsel %vm14974_vm15, %v12389_v23, 0 }
 0xc29   :  { %v4491_v56 = vpop.xlane.xlu1 %4490 }
 0xc2a   :  { %v4511_v59 = vsub.f32 %v12709_v20, %v4491_v56  ;;  %v4493_v28 = vpop.xlane.xlu0 %4492  ;;  %8760 = vmatmul.mubr.bf16.vlgmr.msra.gmra.mrb[160].mxu1 %v4581_v45  ;;  %9442 = vpow2.f32 %v4532_v9 }
 0xc2b   :  { %v4512_v18 = vsub.f32 %v12713_v26, %v4493_v28  ;;  %1429 = vadd.xlane.f32.xlu0 %v14972_v48  ;;  %8776 = vmatpush3.bf16.xpose.msra.mxu1 %v4878_v12 }
 0xc2c   :  { %v12828_v46 = vpop.eup %9432  ;;  %v4538_v60 = vmul.f32 1.442695, %v4511_v59  ;;  %8960 = vmatprep.subr.msk.bf16.mxu1 %vm14974_vm15, %v12389_v23  ;;  %vm14980_vm15 = vmmov %vm14979_vm0 }
 0xc2d   :  { %v12832_v61 = vpop.eup %9434  ;;  %v4540_v53 = vmul.f32 1.442695, %v4512_v18  ;;  %v4487_v20 = vpop.xlane.xlu1 %4486 }
 0xc2e   :  { %v4509_v26 = vsub.f32 %v12719_v17, %v4487_v20  ;;  %v4495_v24 = vpop.xlane.xlu0 %4494  ;;  %v4582_v13 = vpack.c.bf16 %v12832_v61, %v12828_v46  ;;  %v12839_v55 = vpop.eup %9436  ;;  %9444 = vpow2.f32 %v4538_v60  ;;  %v14985_v20 = vld [vmem:[#allocation124_spill] sm:$0xff] }
 0xc2f   :  { %v4513_v15 = vsub.f32 %v12723_v42, %v4495_v24  ;;  %1433 = vadd.xlane.f32.xlu0 %v14975_v52  ;;  %9446 = vpow2.f32 %v4540_v53  ;;  %v14978_v42 = vld [vmem:[#allocation105_spill] sm:$0xff] }
 0xc30   :  { %v12843_v40 = vpop.eup %9438  ;;  %v4534_v14 = vmul.f32 1.442695, %v4509_v26  ;;  %8763 = vmatprep.mubr.bf16.mxu1 %v4582_v13 }
 0xc31   :  { %v4542_v58 = vmul.f32 1.442695, %v4513_v15  ;;  %v4497_v5 = vpop.xlane.xlu1 %4496  ;;  %v4583_v17 = vpack.c.bf16 %v12843_v40, %v12839_v55  ;;  %v12858_v59 = vpop.eup %9440  ;;  %v14988_v15 = vld [vmem:[#allocation23_spill] sm:$0xff] }
 0xc32   :  { %9448 = vpow2.f32 %v4534_v14  ;;  %v4514_v10 = vsub.f32 %v12729_v36, %v4497_v5  ;;  %1431 = vadd.xlane.f32.xlu1 %v14976_v54  ;;  %v3195_v43 = vpop.permute.xlu0 %3194  ;;  %v14993_v54 = vld [vmem:[#allocation32_spill] sm:$0xff] }
 0xc33   :  { %9450 = vpow2.f32 %v4542_v58  ;;  %3241 = vst.msk [vmem:[#allocation2 + $0x10] sm:$0xff] %vm14977_vm12, %v3195_v43  ;;  %1435 = vadd.xlane.f32.xlu0 %v14978_v42  ;;  %8764 = vmatmul.mubr.bf16.gmra.mrb[164].mxu1 %v4583_v17  ;;  %v14990_v58 = vld [vmem:[#allocation148_spill] sm:$0xff] }
 0xc34   :  { %v4544_v56 = vmul.f32 1.442695, %v4514_v10  ;;  %8778 = vmatpush3.bf16.xpose.msra.mxu1 %v4881_v38  ;;  %v12860_v45 = vpop.eup %9442  ;;  %v14995_v43 = vld [vmem:[#allocation140_spill] sm:$0xff] }
 0xc35   :  { %v4499_v31 = vpop.xlane.xlu1 %4498  ;;  %8961 = vmatprep.subr.msk.bf16.mxu1 %vm14979_vm0, %v12403_v49 }
 0xc36   :  { %v4515_v36 = vsub.f32 %v12734_v6, %v4499_v31  ;;  %4020 = vadd.xlane.f32.xlu1 %v12410_v16  ;;  %9452 = vpow2.f32 %v4544_v56  ;;  %v14996_v56 = vld [vmem:[#allocation142_spill] sm:$0xff] }
 0xc37   :  { %4018 = vadd.xlane.f32.xlu0 %v12423_v35  ;;  %v4884_v35 = vsel %vm14979_vm0, %v12403_v49, 0 }
 0xc38   :  { %v4546_v28 = vmul.f32 1.442695, %v4515_v36  ;;  %v12862_v23 = vpop.eup %9444 }
 0xc39   :  { %v3197_v9 = vpop.permute.xlu1 %3196  ;;  %v12866_v18 = vpop.eup %9446 }
 0xc3a   :  { %9454 = vpow2.f32 %v4546_v28  ;;  %3242 = vst.msk [vmem:[#allocation2 + $0x18] sm:$0xff] %vm14977_vm12, %v3197_v9  ;;  %4024 = vadd.xlane.f32.xlu1 %v12438_v47  ;;  %v4585_v47 = vpack.c.bf16 %v12862_v23, %v12858_v59  ;;  %vm14981_vm12 = vmmov %vm14979_vm0 }
 0xc3b   :  { %4022 = vadd.xlane.f32.xlu0 %v12436_v1  ;;  %9456 = vrcp.f32 %v12527_v32  ;;  %v4887_v60 = vsel %vm14981_vm12, %v12396_v25, 0  ;;  %vm14984_vm12 = vmmov %vm14979_vm0 }
 0xc3c   :  { %v12869_v16 = vpop.eup %9448  ;;  %8780 = vmatpush3.bf16.xpose.msra.mxu1 %v4884_v35  ;;  %9458 = vrcp.f32 %v12563_v3  ;;  %v4896_v35 = vsel %vm14979_vm0, %v14993_v54, 0 }
 0xc3d   :  { %v12874_v6 = vpop.eup %9450  ;;  %v4584_v48 = vpack.c.bf16 %v12869_v16, %v12860_v45  ;;  %8962 = vmatprep.subr.msk.bf16.mxu1 %vm14980_vm15, %v12396_v25  ;;  %9460 = vrcp.f32 %v12555_v27  ;;  %vm14982_vm15 = vmmov %vm14979_vm0 }
 0xc3e   :  { %v4586_v1 = vpack.c.bf16 %v12874_v6, %v12866_v18  ;;  %9462 = vrcp.f32 %v12535_v2  ;;  %v14983_v2 = vld [vmem:[#allocation127_spill] sm:$0xff] }
 0xc3f   :  { %8767 = vmatprep.mubr.bf16.mxu1 %v4584_v48  ;;  %9464 = vrcp.f32 %v12571_v0  ;;  %v4890_v0 = vsel %vm14984_vm12, %v12417_v19, 0  ;;  %vm14994_vm12 = vmmov %vm14979_vm0  ;;  %v14998_v48 = vld [vmem:[#allocation161_spill] sm:$0xff] }
 0xc40   :  { %8768 = vmatmul.mubr.bf16.gmra.mrb[168].mxu1 %v4585_v47  ;;  %v12886_v49 = vpop.eup %9452  ;;  %9466 = vrcp.f32 %v12541_v41 }
 0xc41   :  { %8771 = vmatprep.mubr.bf16.mxu1 %v4586_v1  ;;  %9468 = vrcp.f32 %v12579_v44 }
 0xc42   :  { %9470 = vrcp.f32 %v12545_v34  ;;  %v14987_v34 = vld [vmem:[#allocation126_spill] sm:$0xff] }
 0xc43   :  { %9472 = vrcp.f32 %v12588_v63  ;;  %v14989_v63 = vld [vmem:[#allocation141_spill] sm:$0xff] }
 0xc44   :  { %v12888_v32 = vpop.eup %9454  ;;  %8782 = vmatpush3.bf16.xpose.msra.mxu1 %v4887_v60  ;;  %9474 = vrcp.f32 %v12549_v7  ;;  %v14992_v7 = vld [vmem:[#allocation143_spill] sm:$0xff]  ;;  %v14999_v60 = vld [vmem:[#allocation44_spill] sm:$0xff] }
 0xc45   :  { %v4587_v12 = vpack.c.bf16 %v12888_v32, %v12886_v49  ;;  %v9457_v53 = vpop.eup %9456  ;;  %8963 = vmatprep.subr.msk.bf16.mxu1 %vm14979_vm0, %v12417_v19  ;;  %9476 = vrcp.f32 %v14988_v15 }
 0xc46   :  { %v2073_v27 = vmul.f32 %v9457_v53, %v14983_v2  ;;  %v9459_v3 = vpop.eup %9458  ;;  %9478 = vrcp.f32 %v14990_v58  ;;  %v15002_v2 = vld [vmem:[#allocation160_spill] sm:$0xff] }
 0xc47   :  { %v9461_v25 = vpop.eup %9460  ;;  %v2074_v41 = vmul.f32 %v9459_v3, %v14985_v20 }
 0xc48   :  { %8772 = vmatmul.mubr.bf16.gmra.mrb[172].mxu1 %v4587_v12  ;;  %v9463_v26 = vpop.eup %9462  ;;  %v15001_v12 = vld [vmem:[#allocation158_spill] sm:$0xff] }
 0xc49   :  { %8791 = vmatprep.mubr.msk.bf16.mxu1 %vm14982_vm15, %v12443_v57  ;;  %v14986_v57 = vld [vmem:[#allocation125_spill] sm:$0xff]  ;;  %v9465_v24 = vpop.eup %9464  ;;  %v2075_v19 = vmul.f32 %v9463_v26, %v14987_v34  ;;  %vm14991_vm15 = vmmov %vm14979_vm0  ;;  %v15004_v26 = vld [vmem:[#allocation36_spill] sm:$0xff] }
 0xc4a   :  { %v2072_v44 = vmul.f32 %v9461_v25, %v14986_v57  ;;  %v9467_v13 = vpop.eup %9466  ;;  %v2619_v52 = vmul.f32 %v9465_v24, %v14989_v63  ;;  %v4893_v5 = vsel %vm14991_vm15, %v12405_v22, 0  ;;  %vm15000_vm15 = vmmov %vm14979_vm0  ;;  %v15005_v57 = vld [vmem:[#allocation75_spill] sm:$0xff] }
 0xc4b   :  { %2114 = vrot.lane.b32.xlu1 %v2073_v27, %s9931_s2  ;;  %v9469_v14 = vpop.eup %9468  ;;  %v2620_v17 = vmul.f32 %v9467_v13, %v14992_v7 }
 0xc4c   :  { %8784 = vmatpush3.bf16.xpose.msra.mxu1 %v4890_v0  ;;  %v9471_v10 = vpop.eup %9470  ;;  %v2621_v42 = vmul.f32 %v9469_v14, %v14995_v43  ;;  %v15009_v14 = vld [vmem:[#allocation112_spill] sm:$0xff]  ;;  %v15014_v43 = vld [vmem:[#allocation115_spill] sm:$0xff] }
 0xc4d   :  { %8964 = vmatprep.subr.msk.bf16.mxu1 %vm14979_vm0, %v12405_v22  ;;  %v9473_v38 = vpop.eup %9472  ;;  %v2622_v31 = vmul.f32 %v9471_v10, %v14996_v56  ;;  %v14997_v22 = vld [vmem:[#allocation159_spill] sm:$0xff]  ;;  %v15016_v56 = vld [vmem:[#allocation114_spill] sm:$0xff] }
 0xc4e   :  { %v9475_v36 = vpop.eup %9474  ;;  %v3166_v28 = vmul.f32 %v9473_v38, %v14997_v22 }
 0xc4f   :  { %2116 = vrot.lane.b32.xlu1 %v2074_v41, %s9931_s2  ;;  %v9477_v9 = vpop.eup %9476  ;;  %v3167_v47 = vmul.f32 %v9475_v36, %v14998_v48 }
 0xc50   :  { %v9479_v1 = vpop.eup %9478  ;;  %v3168_v53 = vmul.f32 %v9477_v9, %v15001_v12  ;;  %v15023_v9 = vld [vmem:[#allocation48_spill] sm:$0xff]  ;;  %v15029_v12 = vld [vmem:[#allocation87_spill] sm:$0xff] }
 0xc51   :  { %2112 = vrot.lane.b32.xlu0 %v2072_v44, %s9931_s2  ;;  %v3169_v27 = vmul.f32 %v9479_v1, %v15002_v2  ;;  %v15033_v2 = vmov 0  }
 0xc53   :  { %2118 = vrot.lane.b32.xlu1 %v2075_v19, %s9931_s2  ;;  %v15007_v19 = vld [vmem:[#allocation113_spill] sm:$0xff] }
 0xc54   :  { %8786 = vmatpush3.bf16.xpose.msra.mxu1 %v4893_v5  ;;  %v15010_v5 = vld [vmem:[#allocation29_spill] sm:$0xff] }
 0xc55   :  { %2659 = vrot.lane.b32.xlu0 %v2619_v52, %s9926_s0  ;;  %8965 = vmatprep.subr.msk.bf16.mxu1 %vm14994_vm12, %v14993_v54  ;;  %vm15003_vm12 = vmmov %vm14979_vm0 }
 0xc56   :  { %v4899_v25 = vsel %vm15003_vm12, %v14999_v60, 0  ;;  %vm15008_vm12 = vmmov %vm14979_vm0 }
 0xc57   :  { %2661 = vrot.lane.b32.xlu1 %v2620_v17, %s9926_s0  ;;  %v15011_v17 = vld [vmem:[#allocation20_spill] sm:$0xff] }
 0xc59   :  { %2663 = vrot.lane.b32.xlu0 %v2621_v42, %s9926_s0 }
 0xc5b   :  { %2665 = vrot.lane.b32.xlu1 %v2622_v31, %s9926_s0 }
 0xc5c   :  { %8788 = vmatpush3.bf16.xpose.msra.mxu1 %v4896_v35 }
 0xc5d   :  { %3206 = vrot.lane.b32.xlu0 %v3166_v28, %s9930_s1  ;;  %8966 = vmatprep.subr.msk.bf16.mxu1 %vm15000_vm15, %v14999_v60  ;;  %vm15006_vm15 = vmmov %vm14979_vm0  ;;  %v15020_v28 = vld [vmem:[#allocation77_spill] sm:$0xff] }
 0xc5f   :  { %3208 = vrot.lane.b32.xlu1 %v3167_v47, %s9930_s1  ;;  %v15027_v47 = vld [vmem:[#allocation167_spill] sm:$0xff] }
 0xc61   :  { %3210 = vrot.lane.b32.xlu0 %v3168_v53, %s9930_s1  ;;  %v15032_v53 = vld [vmem:[#allocation169_spill] sm:$0xff] }
 0xc63   :  { %3212 = vrot.lane.b32.xlu1 %v3169_v27, %s9930_s1  ;;  %v1422_v3 = vpop.xlane.xlu0 %1421 }
 0xc64   :  { %9480 = vrcp.f32 %v1422_v3  ;;  %8790 = vmatpush3.bf16.xpose.msra.mxu1 %v4899_v25  ;;  %v15035_v3 = vld [vmem:[#allocation168_spill] sm:$0xff] }
 0xc67   :  { %v1426_v0 = vpop.xlane.xlu0 %1425 }
 0xc68   :  { %9482 = vrcp.f32 %v1426_v0  ;;  %v15037_v0 = vld [vmem:[#allocation166_spill] sm:$0xff] }
 0xc6a   :  { %v1424_v20 = vpop.xlane.xlu1 %1423 }
 0xc6b   :  { %9484 = vrcp.f32 %v1424_v20  ;;  %v1428_v41 = vpop.xlane.xlu0 %1427  ;;  %8792 = vmatmul.mubr.msk.bf16.vlgmr.msra.gmra.mrb[176].mxu1 %vm14979_vm0, %v15004_v26  ;;  %v15038_v20 = vld [vmem:[#allocation39_spill] sm:$0xff] }
 0xc6c   :  { %9486 = vrcp.f32 %v1428_v41  ;;  %8795 = vmatprep.mubr.msk.bf16.mxu1 %vm15006_vm15, %v15005_v57  ;;  %vm15012_vm15 = vmmov %vm14979_vm0  ;;  %v15040_v26 = vld [vmem:[#allocation91_spill] sm:$0xff] }
 0xc6d   :  { %9488 = vrcp.f32 %v15038_v20  ;;  %v15057_v20 = vld [vmem:[#allocation146_spill] sm:$0xff] }
 0xc6e   :  { %v9481_v44 = vpop.eup %9480  ;;  %v12949_v24 = vpop.xlane.xlu1 %4012  ;;  %9490 = vrcp.f32 %v15040_v26 }
 0xc6f   :  { %v12951_v34 = vpop.xlane.xlu0 %4010  ;;  %v1566_v13 = vmul.f32 %v9481_v44, %v15007_v19  ;;  %v15041_v44 = vld [vmem:[#allocation46_spill] sm:$0xff]  ;;  %v15043_v19 = vld [vmem:[#allocation41_spill] sm:$0xff] }
 0xc70   :  { %9492 = vrcp.f32 %v15041_v44 }
 0xc71   :  { %1582 = vst.msk [vmem:[#allocation2 + $0x40] sm:$0xff] %vm15008_vm12, %v1566_v13  ;;  %vm15015_vm12 = vcmask 523520   ;;  %9494 = vrcp.f32 %v15043_v19  ;;  %v15059_v19 = vld [vmem:[#allocation165_spill] sm:$0xff] }
 0xc72   :  { %v9483_v15 = vpop.eup %9482  ;;  %v12955_v63 = vpop.xlane.xlu1 %4016  ;;  %vm15017_vm14 = vmmov %vm15015_vm12 }
 0xc73   :  { %v12957_v52 = vpop.xlane.xlu0 %4014  ;;  %v1568_v58 = vmul.f32 %v9483_v15, %v15009_v14  ;;  %8796 = vmatmul.mubr.msk.bf16.gmra.mrb[180].mxu1 %vm14979_vm0, %v15010_v5  ;;  %vm15019_vm10 = vmmov %vm15015_vm12  ;;  %v15044_v15 = vld [vmem:[#allocation78_spill] sm:$0xff] }
 0xc74   :  { %8799 = vmatprep.mubr.msk.bf16.mxu1 %vm15012_vm15, %v15011_v17  ;;  %vm15022_vm15 = vcmask 785920   ;;  %vm15025_vm7 = vmmov %vm15019_vm10  ;;  %9496 = vrcp.f32 %v15044_v15  ;;  %v15045_v14 = vld [vmem:[#allocation90_spill] sm:$0xff]  ;;  %v15047_v17 = vld [vmem:[#allocation45_spill] sm:$0xff] }
 0xc75   :  { %v9485_v7 = vpop.eup %9484  ;;  %1584 = vst.msk [vmem:[#allocation2 + $0x50] sm:$0xff] %vm15013_vm11, %v1568_v58  ;;  %vm15021_vm11 = vmmov %vm14979_vm0  ;;  %9498 = vrcp.f32 %v15045_v14  ;;  %v15046_v58 = vld [vmem:[#allocation131_spill] sm:$0xff] }
 0xc76   :  { %v9487_v10 = vpop.eup %9486  ;;  %v2107_v54 = vpop.permute.xlu1 %2106  ;;  %v1567_v42 = vmul.f32 %v9485_v7, %v15014_v43  ;;  %9500 = vrcp.f32 %v15047_v17  ;;  %v15049_v43 = vld [vmem:[#allocation128_spill] sm:$0xff] }
 0xc77   :  { %2150 = vst.msk [vmem:[#allocation2 + $0x28] sm:$0xff] %vm15015_vm12, %v2107_v54  ;;  %v2105_v38 = vpop.permute.xlu0 %2104  ;;  %v1569_v31 = vmul.f32 %v9487_v10, %v15016_v56  ;;  %vm15024_vm12 = vmmov %vm14979_vm0  ;;  %v9489_v13 = vpop.eup %9488  ;;  %v15048_v54 = vld [vmem:[#allocation149_spill] sm:$0xff]  ;;  %v15050_v56 = vld [vmem:[#allocation83_spill] sm:$0xff] }
 0xc78   :  { %2149 = vst.msk [vmem:[#allocation2 + $0x20] sm:$0xff] %vm15017_vm14, %v2105_v38  ;;  %vm15026_vm14 = vmmov %vm15022_vm15  ;;  %v2077_v5 = vmul.f32 %v9489_v13, %v15046_v58  ;;  %v9491_v7 = vpop.eup %9490  ;;  %9502 = vrcp.f32 %v15048_v54  ;;  %v15061_v54 = vld [vmem:[#allocation117_spill] sm:$0xff] }
 0xc79   :  { %1583 = vst.msk [vmem:[#allocation2 + $0x48] sm:$0xff] %vm15018_vm9, %v1567_v42  ;;  %vm15028_vm9 = vmmov %vm15026_vm14  ;;  %v2078_v42 = vmul.f32 %v9491_v7, %v15049_v43  ;;  %9504 = vrcp.f32 %v15050_v56 }
 0xc7a   :  { %1585 = vst.msk [vmem:[#allocation2 + $0x58] sm:$0xff] %vm14979_vm0, %v1569_v31  ;;  %v2109_v36 = vpop.permute.xlu1 %2108  ;;  %v9493_v10 = vpop.eup %9492  ;;  %v15051_v31 = vld [vmem:[#allocation129_spill] sm:$0xff] }
 0xc7b   :  { %2151 = vst.msk [vmem:[#allocation2 + $0x30] sm:$0xff] %vm15019_vm10, %v2109_v36  ;;  %v2652_v22 = vpop.permute.xlu0 %2651  ;;  %8800 = vmatmul.mubr.msk.bf16.gmra.mrb[184].mxu1 %vm15021_vm11, %v15020_v28  ;;  %vm15030_vm10 = vmmov %vm14979_vm0  ;;  %vm15031_vm0 = vcmask 1048320   ;;  %v9495_v38 = vpop.eup %9494  ;;  %v2076_v36 = vmul.f32 %v9493_v10, %v15051_v31  ;;  %v15052_v28 = vld [vmem:[#allocation80_spill] sm:$0xff] }
 0xc7c   :  { %2696 = vst.msk [vmem:[#allocation2 + $0x20] sm:$0xff] %vm15022_vm15, %v2652_v22  ;;  %8803 = vmatprep.mubr.msk.bf16.mxu1 %vm15024_vm12, %v15023_v9  ;;  %vm15036_vm11 = vmmov %vm15031_vm0  ;;  %9506 = vrcp.f32 %v15052_v28  ;;  %v15053_v9 = vld [vmem:[#allocation130_spill] sm:$0xff]  ;;  %v15064_v31 = vld [vmem:[#allocation116_spill] sm:$0xff] }
 0xc7d   :  { %vm15039_vm15 = vmmov %vm15031_vm0 }
 0xc7e   :  { %v2111_v35 = vpop.permute.xlu1 %2110  ;;  %vm15042_vm12 = vmmov %vm15031_vm0  ;;  %v9497_v22 = vpop.eup %9496 }
 0xc7f   :  { %2152 = vst.msk [vmem:[#allocation2 + $0x38] sm:$0xff] %vm15025_vm7, %v2111_v35  ;;  %v2656_v48 = vpop.permute.xlu0 %2655  ;;  %vm15034_vm7 = vmmov %vm15028_vm9  ;;  %v2079_v35 = vmul.f32 %v9495_v38, %v15053_v9 }
 0xc80   :  { %2698 = vst.msk [vmem:[#allocation2 + $0x30] sm:$0xff] %vm15026_vm14, %v2656_v48  ;;  %3520 = vadd.xlane.f32.xlu0 %v15027_v47  ;;  %v9499_v48 = vpop.eup %9498  ;;  %v15054_v47 = vld [vmem:[#allocation145_spill] sm:$0xff]  ;;  %vm15062_vm14 = vmmov %vm15030_vm10 }
 0xc82   :  { %v2654_v1 = vpop.permute.xlu1 %2653 }
 0xc83   :  { %2697 = vst.msk [vmem:[#allocation2 + $0x28] sm:$0xff] %vm15028_vm9, %v2654_v1  ;;  %v3199_v60 = vpop.permute.xlu0 %3198  ;;  %8804 = vmatmul.mubr.msk.bf16.gmra.mrb[188].mxu1 %vm15030_vm10, %v15029_v12  ;;  %v2623_v1 = vmul.f32 %v9497_v22, %v15054_v47  ;;  %v15055_v12 = vld [vmem:[#allocation147_spill] sm:$0xff]  ;;  %vm15065_vm9 = vmmov %vm15030_vm10  ;;  %vm15067_vm10 = vcmask 523520  }
 0xc84   :  { %3243 = vst.msk [vmem:[#allocation2 + $0x20] sm:$0xff] %vm15031_vm0, %v3199_v60  ;;  %3524 = vadd.xlane.f32.xlu0 %v15032_v53  ;;  %6371 = vmatprep.mubr.bf16.mxu1 %v15033_v2  ;;  %v9501_v60 = vpop.eup %9500  ;;  %v2624_v53 = vmul.f32 %v9499_v48, %v15055_v12  ;;  %vm15069_vm0 = vmmov %vm15067_vm10 }
 0xc86   :  { %v2658_v27 = vpop.permute.xlu1 %2657 }
 0xc87   :  { %2699 = vst.msk [vmem:[#allocation2 + $0x38] sm:$0xff] %vm15034_vm7, %v2658_v27  ;;  %3522 = vadd.xlane.f32.xlu1 %v15035_v3  ;;  %v3203_v25 = vpop.permute.xlu0 %3202  ;;  %v9503_v27 = vpop.eup %9502  ;;  %v15056_v3 = vld [vmem:[#allocation144_spill] sm:$0xff]  ;;  %vm15070_vm7 = vmmov %vm15065_vm9 }
 0xc88   :  { %3245 = vst.msk [vmem:[#allocation2 + $0x30] sm:$0xff] %vm15036_vm11, %v3203_v25  ;;  %3526 = vadd.xlane.f32.xlu0 %v15037_v0  ;;  %v2625_v25 = vmul.f32 %v9501_v60, %v15056_v3  ;;  %v9505_v0 = vpop.eup %9504  ;;  %vm15071_vm11 = vmmov %vm15070_vm7 }
 0xc89   :  { %v9507_v26 = vpop.eup %9506 }
 0xc8a   :  { %v3201_v41 = vpop.permute.xlu1 %3200  ;;  %v3171_v13 = vmul.f32 %v9507_v26, %v15059_v19 }
 0xc8b   :  { %3244 = vst.msk [vmem:[#allocation2 + $0x28] sm:$0xff] %vm15039_vm15, %v3201_v41  ;;  %v2626_v41 = vmul.f32 %v9503_v27, %v15057_v20  ;;  %vm15072_vm15 = vmmov %vm15069_vm0 }
 0xc8e   :  { %v3205_v57 = vpop.permute.xlu1 %3204 }
 0xc8f   :  { %3246 = vst.msk [vmem:[#allocation2 + $0x38] sm:$0xff] %vm15042_vm12, %v3205_v57  ;;  %v15058_v57 = vld [vmem:[#allocation163_spill] sm:$0xff]  ;;  %vm15073_vm12 = vcmask 785920  }
 0xc90   :  { %v3170_v44 = vmul.f32 %v9505_v0, %v15058_v57 }
 0xc98   :  { %2122 = vrot.lane.b32.xlu1 %v2077_v5, %s9931_s2 }
 0xc9c   :  { %2124 = vrot.lane.b32.xlu1 %v2078_v42, %s9931_s2 }
 0xc9e   :  { %2120 = vrot.lane.b32.xlu0 %v2076_v36, %s9931_s2 }
 0xca0   :  { %2126 = vrot.lane.b32.xlu1 %v2079_v35, %s9931_s2  ;;  %v15066_v35 = vld [vmem:[#allocation120_spill] sm:$0xff] }
 0xca2   :  { %2667 = vrot.lane.b32.xlu0 %v2623_v1, %s9926_s0  ;;  %v15068_v1 = vld [vmem:[#allocation118_spill] sm:$0xff] }
 0xca4   :  { %2669 = vrot.lane.b32.xlu1 %v2624_v53, %s9926_s0 }
 0xca6   :  { %2671 = vrot.lane.b32.xlu0 %v2625_v25, %s9926_s0 }
 0xca8   :  { %2673 = vrot.lane.b32.xlu1 %v2626_v41, %s9926_s0 }
 0xcaa   :  { %3214 = vrot.lane.b32.xlu0 %v3170_v44, %s9930_s1 }
 0xcac   :  { %3216 = vrot.lane.b32.xlu1 %v3171_v13, %s9930_s1 }
 0xcb8   :  { %v1430_v15 = vpop.xlane.xlu0 %1429 }
 0xcb9   :  { %9508 = vrcp.f32 %v1430_v15  ;;  %v15083_v15 = vld [vmem:[#allocation183_spill] sm:$0xff] }
 0xcbc   :  { %v1434_v14 = vpop.xlane.xlu0 %1433 }
 0xcbd   :  { %9510 = vrcp.f32 %v1434_v14 }
 0xcbf   :  { %v1432_v58 = vpop.xlane.xlu1 %1431 }
 0xcc0   :  { %9512 = vrcp.f32 %v1432_v58  ;;  %v1436_v5 = vpop.xlane.xlu0 %1435 }
 0xcc1   :  { %9514 = vrcp.f32 %v1436_v5 }
 0xcc3   :  { %v9509_v7 = vpop.eup %9508  ;;  %v13022_v17 = vpop.xlane.xlu1 %4020 }
 0xcc4   :  { %15060 = vst [vmem:[#allocation122_spill] sm:$0xff] %v13022_v17  ;;  %v13024_v10 = vpop.xlane.xlu0 %4018  ;;  %v1570_v43 = vmul.f32 %v9509_v7, %v15061_v54 }
 0xcc6   :  { %1586 = vst.msk [vmem:[#allocation2 + $0x60] sm:$0xff] %vm15062_vm14, %v1570_v43  ;;  %vm15074_vm14 = vmmov %vm15069_vm0 }
 0xcc7   :  { %v9511_v42 = vpop.eup %9510  ;;  %v13028_v38 = vpop.xlane.xlu1 %4024 }
 0xcc8   :  { %15063 = vst [vmem:[#allocation86_spill] sm:$0xff] %v13028_v38  ;;  %v13030_v56 = vpop.xlane.xlu0 %4022  ;;  %v1572_v36 = vmul.f32 %v9511_v42, %v15064_v31  ;;  %v15088_v31 = vld [vmem:[#allocation182_spill] sm:$0xff] }
 0xcc9   :  { %4552 = vadd.xlane.f32.xlu0 %v12819_v11 }
 0xcca   :  { %v9513_v22 = vpop.eup %9512  ;;  %1588 = vst.msk [vmem:[#allocation2 + $0x70] sm:$0xff] %vm15065_vm9, %v1572_v36  ;;  %vm15075_vm9 = vmmov %vm15073_vm12 }
 0xccb   :  { %v9515_v28 = vpop.eup %9514  ;;  %v2115_v9 = vpop.permute.xlu1 %2114  ;;  %v1571_v48 = vmul.f32 %v9513_v22, %v15066_v35 }
 0xccc   :  { %2154 = vst.msk [vmem:[#allocation2 + $0x48] sm:$0xff] %vm15067_vm10, %v2115_v9  ;;  %v2113_v47 = vpop.permute.xlu0 %2112  ;;  %v1573_v60 = vmul.f32 %v9515_v28, %v15068_v1  ;;  %vm15076_vm10 = vmmov %vm15075_vm9 }
 0xccd   :  { %2153 = vst.msk [vmem:[#allocation2 + $0x40] sm:$0xff] %vm15069_vm0, %v2113_v47  ;;  %4548 = vadd.xlane.f32.xlu0 %v12813_v51  ;;  %vm15077_vm0 = vcmask 1048320  }
 0xcce   :  { %1587 = vst.msk [vmem:[#allocation2 + $0x68] sm:$0xff] %vm15070_vm7, %v1571_v48  ;;  %vm15078_vm7 = vmmov %vm15075_vm9  ;;  %v15091_v48 = vld [vmem:[#allocation185_spill] sm:$0xff] }
 0xccf   :  { %1589 = vst.msk [vmem:[#allocation2 + $0x78] sm:$0xff] %vm15071_vm11, %v1573_v60  ;;  %v2117_v11 = vpop.permute.xlu1 %2116  ;;  %vm15079_vm11 = vmmov %vm15077_vm0  ;;  %v15093_v60 = vld [vmem:[#allocation184_spill] sm:$0xff] }
 0xcd0   :  { %2155 = vst.msk [vmem:[#allocation2 + $0x50] sm:$0xff] %vm15072_vm15, %v2117_v11  ;;  %4554 = vadd.xlane.f32.xlu1 %v12821_v29  ;;  %v2660_v12 = vpop.permute.xlu0 %2659  ;;  %vm15080_vm15 = vmmov %vm15077_vm0 }
 0xcd1   :  { %2700 = vst.msk [vmem:[#allocation2 + $0x40] sm:$0xff] %vm15073_vm12, %v2660_v12  ;;  %4560 = vadd.xlane.f32.xlu0 %v12839_v55  ;;  %vm15081_vm12 = vmmov %vm15077_vm0 }
 0xcd3   :  { %v2119_v53 = vpop.permute.xlu1 %2118 }
 0xcd4   :  { %2156 = vst.msk [vmem:[#allocation2 + $0x58] sm:$0xff] %vm15074_vm14, %v2119_v53  ;;  %4550 = vadd.xlane.f32.xlu1 %v12811_v33  ;;  %v2664_v51 = vpop.permute.xlu0 %2663 }
 0xcd5   :  { %2702 = vst.msk [vmem:[#allocation2 + $0x50] sm:$0xff] %vm15075_vm9, %v2664_v51  ;;  %4556 = vadd.xlane.f32.xlu0 %v12828_v46  ;;  %vm15084_vm9 = vmmov %vm15074_vm14 }
 0xcd7   :  { %v2662_v27 = vpop.permute.xlu1 %2661 }
 0xcd8   :  { %2701 = vst.msk [vmem:[#allocation2 + $0x48] sm:$0xff] %vm15076_vm10, %v2662_v27  ;;  %4562 = vadd.xlane.f32.xlu1 %v12843_v40  ;;  %v3207_v29 = vpop.permute.xlu0 %3206  ;;  %vm15085_vm10 = vcmask 261120  }
 0xcd9   :  { %3247 = vst.msk [vmem:[#allocation2 + $0x40] sm:$0xff] %vm15077_vm0, %v3207_v29  ;;  %4568 = vadd.xlane.f32.xlu0 %v12858_v59  ;;  %vm15086_vm0 = vmmov %vm15084_vm9 }
 0xcdb   :  { %v2666_v55 = vpop.permute.xlu1 %2665 }
 0xcdc   :  { %2703 = vst.msk [vmem:[#allocation2 + $0x58] sm:$0xff] %vm15078_vm7, %v2666_v55  ;;  %4558 = vadd.xlane.f32.xlu1 %v12832_v61  ;;  %v3211_v33 = vpop.permute.xlu0 %3210  ;;  %v15112_v55 = vld [vmem:[#allocation43_spill] sm:$0xff] }
 0xcdd   :  { %3249 = vst.msk [vmem:[#allocation2 + $0x50] sm:$0xff] %vm15079_vm11, %v3211_v33  ;;  %4564 = vadd.xlane.f32.xlu0 %v12860_v45  ;;  %vm15090_vm11 = vmmov %vm15085_vm10 }
 0xcdf   :  { %v3209_v46 = vpop.permute.xlu1 %3208 }
 0xce0   :  { %3248 = vst.msk [vmem:[#allocation2 + $0x48] sm:$0xff] %vm15080_vm15, %v3209_v46  ;;  %4570 = vadd.xlane.f32.xlu1 %v12862_v23  ;;  %vm15092_vm15 = vmmov %vm15086_vm0 }
 0xce1   :  { %4576 = vadd.xlane.f32.xlu0 %v12886_v49 }
 0xce3   :  { %v3213_v40 = vpop.permute.xlu1 %3212 }
 0xce4   :  { %3250 = vst.msk [vmem:[#allocation2 + $0x58] sm:$0xff] %vm15081_vm12, %v3213_v40  ;;  %4566 = vadd.xlane.f32.xlu1 %v12869_v16  ;;  %vm15094_vm12 = vmmov %vm15078_vm7  ;;  %v15113_v40 = vld [vmem:[#allocation67_spill] sm:$0xff] }
 0xce5   :  { %4572 = vadd.xlane.f32.xlu0 %v12866_v18 }
 0xce8   :  { %4578 = vadd.xlane.f32.xlu1 %v12888_v32 }
 0xcec   :  { %4574 = vadd.xlane.f32.xlu1 %v12874_v6 }
 0xcfd   :  { %v13066_v61 = vpop.f32.mrb[160].mxu1 }
 0xcfe   :  { %v13068_v59 = vpop.f32.mrb[161].mxu1 }
 0xcff   :  { %v13070_v45 = vpop.f32.mrb[162].mxu1 }
 0xd00   :  { %v13072_v23 = vpop.f32.mrb[163].mxu1 }
 0xd06   :  { %v13074_v49 = vpop.f32.mrb[164].mxu1 }
 0xd07   :  { %v13076_v3 = vpop.f32.mrb[165].mxu1 }
 0xd08   :  { %v13078_v25 = vpop.f32.mrb[166].mxu1 }
 0xd09   :  { %v13080_v16 = vpop.f32.mrb[167].mxu1 }
 0xd0d   :  { %v3521_v18 = vpop.xlane.xlu0 %3520 }
 0xd0e   :  { %9516 = vrcp.f32 %v3521_v18 }
 0xd11   :  { %v3525_v32 = vpop.xlane.xlu0 %3524 }
 0xd12   :  { %9518 = vrcp.f32 %v3525_v32 }
 0xd13   :  { %v13082_v6 = vpop.f32.mrb[168].mxu1 }
 0xd14   :  { %v3523_v0 = vpop.xlane.xlu1 %3522  ;;  %v13084_v20 = vpop.f32.mrb[169].mxu1 }
 0xd15   :  { %9520 = vrcp.f32 %v3523_v0  ;;  %v13086_v41 = vpop.f32.mrb[170].mxu1  ;;  %v3527_v26 = vpop.xlane.xlu0 %3526 }
 0xd16   :  { %15082 = vst [vmem:[#allocation121_spill] sm:$0xff] %v13086_v41  ;;  %9522 = vrcp.f32 %v3527_v26  ;;  %v13088_v57 = vpop.f32.mrb[171].mxu1 }
 0xd17   :  { %9524 = vrcp.f32 %v15112_v55  ;;  %v15124_v55 = vld [vmem:[#allocation74_spill] sm:$0xff] }
 0xd18   :  { %v9517_v44 = vpop.eup %9516  ;;  %v2123_v19 = vpop.permute.xlu1 %2122 }
 0xd19   :  { %2158 = vst.msk [vmem:[#allocation2 + $0x68] sm:$0xff] %vm15074_vm14, %v2123_v19  ;;  %v2121_v13 = vpop.permute.xlu0 %2120  ;;  %v3673_v14 = vmul.f32 %v9517_v44, %v15083_v15  ;;  %vm15095_vm14 = vmmov %vm15085_vm10 }
 0xd1a   :  { %2157 = vst.msk [vmem:[#allocation2 + $0x60] sm:$0xff] %vm15084_vm9, %v2121_v13  ;;  %vm15096_vm9 = vmmov %vm15085_vm10  ;;  %v15115_v13 = vld [vmem:[#allocation33_spill] sm:$0xff] }
 0xd1b   :  { %v13093_v58 = vpop.f32.mrb[172].mxu1  ;;  %3689 = vst.msk [vmem:[#allocation2 + $0x80] sm:$0xff] %vm15085_vm10, %v3673_v14  ;;  %vm15097_vm10 = vmmov %vm15078_vm7  ;;  %9526 = vrcp.f32 %v15115_v13  ;;  %v15126_v13 = vld [vmem:[#allocation174_spill] sm:$0xff] }
 0xd1c   :  { %v9519_v5 = vpop.eup %9518  ;;  %v2125_v7 = vpop.permute.xlu1 %2124  ;;  %9528 = vrcp.f32 %v12784_v21 }
 0xd1d   :  { %v13096_v54 = vpop.f32.mrb[173].mxu1  ;;  %2159 = vst.msk [vmem:[#allocation2 + $0x70] sm:$0xff] %vm15086_vm0, %v2125_v7  ;;  %v2668_v42 = vpop.permute.xlu0 %2667  ;;  %v3675_v36 = vmul.f32 %v9519_v5, %v15088_v31  ;;  %vm15098_vm0 = vcmask 1048320   ;;  %v15116_v5 = vld [vmem:[#allocation164_spill] sm:$0xff]  ;;  %9530 = vrcp.f32 %v12778_v50 }
 0xd1e   :  { %v13099_v43 = vpop.f32.mrb[174].mxu1  ;;  %2704 = vst.msk [vmem:[#allocation2 + $0x60] sm:$0xff] %vm15078_vm7, %v2668_v42 }
 0xd1f   :  { %15087 = vst [vmem:[#allocation151_spill] sm:$0xff] %v13099_v43  ;;  %v13103_v22 = vpop.f32.mrb[175].mxu1  ;;  %v9521_v28 = vpop.eup %9520  ;;  %3691 = vst.msk [vmem:[#allocation2 + $0x90] sm:$0xff] %vm15090_vm11, %v3675_v36  ;;  %v15117_v36 = vld [vmem:[#allocation162_spill] sm:$0xff] }
 0xd20   :  { %15089 = vst [vmem:[#allocation154_spill] sm:$0xff] %v13103_v22  ;;  %v9523_v9 = vpop.eup %9522  ;;  %v2127_v35 = vpop.permute.xlu1 %2126  ;;  %v3674_v47 = vmul.f32 %v9521_v28, %v15091_v48  ;;  %vm15099_vm11 = vmmov %vm15098_vm0 }
 0xd21   :  { %2160 = vst.msk [vmem:[#allocation2 + $0x78] sm:$0xff] %vm15092_vm15, %v2127_v35  ;;  %v2672_v1 = vpop.permute.xlu0 %2671  ;;  %v3676_v11 = vmul.f32 %v9523_v9, %v15093_v60  ;;  %v15118_v35 = vld [vmem:[#allocation173_spill] sm:$0xff]  ;;  %vm15142_vm15 = vmmov %vm15098_vm0 }
 0xd22   :  { %2706 = vst.msk [vmem:[#allocation2 + $0x70] sm:$0xff] %vm15094_vm12, %v2672_v1  ;;  %vm15143_vm12 = vmmov %vm15098_vm0 }
 0xd23   :  { %3690 = vst.msk [vmem:[#allocation2 + $0x88] sm:$0xff] %vm15095_vm14, %v3674_v47  ;;  %v15119_v47 = vld [vmem:[#allocation69_spill] sm:$0xff]  ;;  %vm15149_vm14 = vcmask 523520  }
 0xd24   :  { %3692 = vst.msk [vmem:[#allocation2 + $0x98] sm:$0xff] %vm15096_vm9, %v3676_v11  ;;  %v2670_v12 = vpop.permute.xlu1 %2669 }
 0xd25   :  { %2705 = vst.msk [vmem:[#allocation2 + $0x68] sm:$0xff] %vm15097_vm10, %v2670_v12  ;;  %v3215_v53 = vpop.permute.xlu0 %3214  ;;  %vm15152_vm10 = vmmov %vm15096_vm9 }
 0xd26   :  { %3251 = vst.msk [vmem:[#allocation2 + $0x60] sm:$0xff] %vm15098_vm0, %v3215_v53  ;;  %v15108_v53 = vld [vmem:[#allocation65_spill] sm:$0xff]  ;;  %vm15153_vm0 = vmmov %vm15149_vm14 }
 0xd28   :  { %v2674_v51 = vpop.permute.xlu1 %2673 }
 0xd29   :  { %2707 = vst.msk [vmem:[#allocation2 + $0x78] sm:$0xff] %vm15078_vm7, %v2674_v51 }
 0xd2c   :  { %v3217_v27 = vpop.permute.xlu1 %3216 }
 0xd2d   :  { %3252 = vst.msk [vmem:[#allocation2 + $0x68] sm:$0xff] %vm15099_vm11, %v3217_v27  ;;  %v15110_v27 = vld [vmem:[#allocation70_spill] sm:$0xff]  ;;  %vm15155_vm11 = vmmov %vm15096_vm9 }
 0xd3e   :  { %v8793_v29 = vpop.f32.mrb[176].mxu1 }
 0xd3f   :  { %v13118_v33 = vsel %vm10814_vm1, %v8793_v29, -1e+30  ;;  %v4935_v46 = vpop.f32.mrb[177].mxu1  ;;  %vm15109_vm1 = vnez %v15108_v53  ;;  %v15122_v53 = vld [vmem:[#allocation72_spill] sm:$0xff] }
 0xd40   :  { %v13122_v18 = vsel %vm10826_vm2, %v4935_v46, -1e+30  ;;  %5018 = vmax.xlane.f32.xlu1 %v13118_v33  ;;  %v8794_v32 = vpop.f32.mrb[178].mxu1  ;;  %vm15111_vm2 = vnez %v15110_v27 }
 0xd41   :  { %5014 = vmax.xlane.f32.xlu0 %v13122_v18  ;;  %v4938_v0 = vpop.f32.mrb[179].mxu1  ;;  %v13128_v44 = vsel %vm10843_vm4, %v8794_v32, -1e+30  ;;  %vm15120_vm4 = vnez %v15119_v47 }
 0xd42   :  { %v13133_v15 = vsel %vm10836_vm3, %v4938_v0, -1e+30  ;;  %vm15114_vm3 = vnez %v15113_v40 }
 0xd44   :  { %5020 = vmax.xlane.f32.xlu1 %v13128_v44 }
 0xd46   :  { %v8797_v19 = vpop.f32.mrb[180].mxu1 }
 0xd47   :  { %v4951_v14 = vpop.f32.mrb[181].mxu1  ;;  %v13143_v28 = vsel %vm10865_vm6, %v8797_v19, -1e+30  ;;  %vm15125_vm6 = vnez %v15124_v55 }
 0xd48   :  { %v13137_v7 = vsel %vm10887_vm8, %v4951_v14, -1e+30  ;;  %5016 = vmax.xlane.f32.xlu1 %v13133_v15  ;;  %v8798_v42 = vpop.f32.mrb[182].mxu1  ;;  %v9525_v14 = vpop.eup %9524 }
 0xd49   :  { %5022 = vmax.xlane.f32.xlu0 %v13137_v7  ;;  %v4954_v31 = vpop.f32.mrb[183].mxu1  ;;  %v13148_v48 = vsel %vm10858_vm5, %v8798_v42, -1e+30  ;;  %v3173_v42 = vmul.f32 %v9525_v14, %v15116_v5  ;;  %vm15123_vm5 = vnez %v15122_v53  ;;  %v15127_v14 = vld [vmem:[#allocation85_spill] sm:$0xff] }
 0xd4a   :  { %v13158_v51 = vsel %vm15109_vm1, %v4954_v31, -1e+30  ;;  %v9527_v31 = vpop.eup %9526  ;;  %vm15157_vm1 = vmmov %vm15096_vm9 }
 0xd4c   :  { %5026 = vmax.xlane.f32.xlu1 %v13143_v28 }
 0xd4e   :  { %v8801_v9 = vpop.f32.mrb[184].mxu1 }
 0xd4f   :  { %v13152_v1 = vsel %vm14735_vm13, %v8801_v9, -1e+30  ;;  %v4967_v60 = vpop.f32.mrb[185].mxu1  ;;  %v3172_v9 = vmul.f32 %v9527_v31, %v15117_v36 }
 0xd50   :  { %5028 = vmax.xlane.f32.xlu1 %v13148_v48  ;;  %5034 = vmax.xlane.f32.xlu0 %v13152_v1  ;;  %v8802_v11 = vpop.f32.mrb[186].mxu1  ;;  %v13162_v29 = vsel %vm15111_vm2, %v4967_v60, -1e+30  ;;  %vm15158_vm2 = vmmov %vm15153_vm0 }
 0xd51   :  { %v4970_v12 = vpop.f32.mrb[187].mxu1  ;;  %v13169_v32 = vsel %vm15114_vm3, %v8802_v11, -1e+30  ;;  %v15121_v11 = vld [vmem:[#allocation170_spill] sm:$0xff]  ;;  %vm15159_vm3 = vmmov %vm15078_vm7 }
 0xd52   :  { %v13180_v60 = vsel %vm15120_vm4, %v4970_v12, -1e+30  ;;  %v9529_v12 = vpop.eup %9528  ;;  %vm15160_vm4 = vmmov %vm15153_vm0 }
 0xd53   :  { %v4180_v5 = vmul.f32 %v9529_v12, %v15127_v14 }
 0xd54   :  { %5024 = vmax.xlane.f32.xlu1 %v13158_v51  ;;  %5030 = vmax.xlane.f32.xlu0 %v13162_v29 }
 0xd56   :  { %v8805_v46 = vpop.f32.mrb[188].mxu1  ;;  %v4553_v21 = vpop.xlane.xlu0 %4552 }
 0xd57   :  { %v4983_v0 = vpop.f32.mrb[189].mxu1  ;;  %v13187_v27 = vsel %vm15123_vm5, %v8805_v46, -1e+30  ;;  %vm15162_vm5 = vmmov %vm15159_vm3 }
 0xd58   :  { %5036 = vmax.xlane.f32.xlu0 %v13169_v32  ;;  %v8806_v26 = vpop.f32.mrb[190].mxu1  ;;  %v13192_v40 = vsel %vm15125_vm6, %v4983_v0, -1e+30  ;;  %vm15163_vm6 = vmmov %vm15159_vm3 }
 0xd59   :  { %v4986_v19 = vpop.f32.mrb[191].mxu1 }
 0xd5a   :  { %v4549_v31 = vpop.xlane.xlu0 %4548 }
 0xd5b   :  { %9532 = vrcp.f32 %v4549_v31 }
 0xd5c   :  { %9534 = vrcp.f32 %v4553_v21 }
 0xd5d   :  { %v4555_v46 = vpop.xlane.xlu1 %4554  ;;  %9536 = vrcp.f32 %v12766_v4 }
 0xd5e   :  { %9538 = vrcp.f32 %v12774_v37  ;;  %v15137_v37 = vld [vmem:[#allocation19_spill] sm:$0xff] }
 0xd61   :  { %v4551_v36 = vpop.xlane.xlu1 %4550 }
 0xd62   :  { %9540 = vrcp.f32 %v4551_v36 }
 0xd63   :  { %9542 = vrcp.f32 %v4555_v46  ;;  %v15139_v46 = vld [vmem:[#allocation175_spill] sm:$0xff] }
 0xd65   :  { %3220 = vrot.lane.b32.xlu1 %v3173_v42, %s9930_s1  ;;  %v15128_v42 = vld [vmem:[#allocation171_spill] sm:$0xff]  ;;  %v13200_v0 = vpop.xlane.xlu1 %4562 }
 0xd69   :  { %v13204_v47 = vpop.xlane.xlu1 %4558 }
 0xd6d   :  { %v13211_v14 = vpop.xlane.xlu1 %4570 }
 0xd6e   :  { %3218 = vrot.lane.b32.xlu0 %v3172_v9, %s9930_s1  ;;  %v13202_v9 = vpop.xlane.xlu0 %4560  ;;  %15130 = vst [vmem:[#allocation153_spill] sm:$0xff] %v13211_v14 }
 0xd71   :  { %v13218_v21 = vpop.xlane.xlu1 %4566 }
 0xd72   :  { %v13207_v12 = vpop.xlane.xlu0 %4556 }
 0xd89   :  { %3530 = vadd.xlane.f32.xlu1 %v15118_v35  ;;  %v9531_v35 = vpop.eup %9530 }
 0xd8a   :  { %v9533_v55 = vpop.eup %9532 }
 0xd8b   :  { %v4725_v50 = vmul.f32 %v9533_v55, %v13068_v59  ;;  %v13227_v59 = vpop.xlane.xlu1 %4578  ;;  %v15134_v55 = vld [vmem:[#allocation73_spill] sm:$0xff] }
 0xd8c   :  { %15133 = vst [vmem:[#allocation156_spill] sm:$0xff] %v13227_v59  ;;  %vm15135_vm13 = vnez %v15134_v55 }
 0xd8d   :  { %3528 = vadd.xlane.f32.xlu0 %v15121_v11  ;;  %5032 = vmax.xlane.f32.xlu1 %v13180_v60  ;;  %v15129_v11 = vld [vmem:[#allocation21_spill] sm:$0xff] }
 0xd8e   :  { %v4179_v53 = vmul.f32 %v9531_v35, %v15129_v11  ;;  %v15131_v35 = vld [vmem:[#allocation71_spill] sm:$0xff] }
 0xd8f   :  { %vm15132_vm8 = vnez %v15131_v35 }
 0xd90   :  { %v13224_v11 = vsel %vm15132_vm8, %v8806_v26, -1e+30  ;;  %v13242_v26 = vld [vmem:[#allocation8] sm:$0xff]   ;;  %vm15167_vm8 = vmmov %vm15153_vm0 }
 0xd91   :  { %5042 = vmax.xlane.f32.xlu0 %v13187_v27  ;;  %8839 = vmatprep.subr.bf16.mxu0 %v13242_v26 }
 0xd95   :  { %5038 = vmax.xlane.f32.xlu0 %v13192_v40 }
 0xd99   :  { %3532 = vadd.xlane.f32.xlu0 %v15126_v13  ;;  %v9535_v13 = vpop.eup %9534 }
 0xd9a   :  { %v9537_v2 = vpop.eup %9536 }
 0xd9b   :  { %v4181_v38 = vmul.f32 %v9537_v2, %v15137_v37  ;;  %v9539_v41 = vpop.eup %9538  ;;  %v15141_v37 = vld [vmem:[#allocation177_spill] sm:$0xff] }
 0xd9d   :  { %3534 = vadd.xlane.f32.xlu0 %v15128_v42  ;;  %v4727_v42 = vmul.f32 %v9535_v13, %v13066_v61  ;;  %v13237_v61 = vpop.xlane.xlu1 %4574 }
 0xd9e   :  { %4213 = vrot.lane.b32.xlu1 %v4180_v5, %s9931_s2  ;;  %v13214_v5 = vpop.xlane.xlu0 %4568  ;;  %15136 = vst [vmem:[#allocation81_spill] sm:$0xff] %v13237_v61 }
 0xda2   :  { %v13220_v31 = vpop.xlane.xlu0 %4564 }
 0xdb3   :  { %4211 = vrot.lane.b32.xlu0 %v4179_v53, %s9931_s2  ;;  %v13229_v53 = vpop.xlane.xlu0 %4576 }
 0xdb7   :  { %4757 = vrot.lane.b32.xlu0 %v4725_v50, %s9926_s0  ;;  %v13233_v50 = vsel %vm15135_vm13, %v4986_v19, -1e+30  ;;  %v13239_v13 = vpop.xlane.xlu0 %4572  ;;  %vm15168_vm13 = vmmov %vm15157_vm1 }
 0xdbb   :  { %4761 = vrot.lane.b32.xlu0 %v4727_v42, %s9926_s0 }
 0xdc2   :  { %5044 = vmax.xlane.f32.xlu1 %v13224_v11 }
 0xdc6   :  { %5040 = vmax.xlane.f32.xlu1 %v13233_v50 }
 0xdcd   :  { %v5019_v42 = vpop.xlane.xlu1 %5018 }
 0xdce   :  { %v5015_v35 = vpop.xlane.xlu0 %5014  ;;  %v5048_v4 = vsub.f32 %v13118_v33, %v5019_v42  ;;  %v9541_v33 = vpop.eup %9540 }
 0xdcf   :  { %v5046_v19 = vsub.f32 %v13122_v18, %v5015_v35 }
 0xdd0   :  { %v5066_v14 = vmul.f32 1.442695, %v5048_v4 }
 0xdd1   :  { %v5021_v55 = vpop.xlane.xlu1 %5020  ;;  %v5062_v22 = vmul.f32 1.442695, %v5046_v19 }
 0xdd2   :  { %v5049_v43 = vsub.f32 %v13128_v44, %v5021_v55  ;;  %v15138_v44 = vld [vmem:[#allocation24_spill] sm:$0xff] }
 0xdd3   :  { %9544 = vpow2.f32 %v5062_v22  ;;  %v4182_v55 = vmul.f32 %v9539_v41, %v15138_v44 }
 0xdd4   :  { %v5068_v59 = vmul.f32 1.442695, %v5049_v43 }
 0xdd5   :  { %v5017_v61 = vpop.xlane.xlu1 %5016 }
 0xdd6   :  { %v5047_v17 = vsub.f32 %v13133_v15, %v5017_v61  ;;  %9546 = vpow2.f32 %v5068_v59  ;;  %v5023_v36 = vpop.xlane.xlu0 %5022  ;;  %v15140_v59 = vld [vmem:[#allocation176_spill] sm:$0xff] }
 0xdd7   :  { %4215 = vrot.lane.b32.xlu1 %v4181_v38, %s9931_s2  ;;  %v5050_v2 = vsub.f32 %v13137_v7, %v5023_v36  ;;  %v4726_v38 = vmul.f32 %v9541_v33, %v13072_v23  ;;  %v9017_v33 = vld [vmem:[#allocation8 + $0x8] sm:$0xff]  }
 0xdd8   :  { %v5064_v18 = vmul.f32 1.442695, %v5047_v17  ;;  %v9543_v17 = vpop.eup %9542 }
 0xdd9   :  { %v5027_v35 = vpop.xlane.xlu1 %5026  ;;  %v5070_v61 = vmul.f32 1.442695, %v5050_v2  ;;  %v4728_v7 = vmul.f32 %v9543_v17, %v13070_v45  ;;  %v9018_v2 = vld [vmem:[#allocation8 + $0x10] sm:$0xff]  }
 0xdda   :  { %9548 = vpow2.f32 %v5064_v18  ;;  %3536 = vadd.xlane.f32.xlu0 %v15139_v46  ;;  %v5052_v41 = vsub.f32 %v13143_v28, %v5027_v35 }
 0xddb   :  { %9550 = vpow2.f32 %v5066_v14  ;;  %4217 = vrot.lane.b32.xlu1 %v4182_v55, %s9931_s2 }
 0xddc   :  { %v5074_v18 = vmul.f32 1.442695, %v5052_v41  ;;  %9552 = vpow2.f32 %v5070_v61  ;;  %v15144_v61 = vld [vmem:[#allocation49_spill] sm:$0xff] }
 0xddd   :  { %v5029_v43 = vpop.xlane.xlu1 %5028  ;;  %v13255_v15 = vpop.xlane.xlu0 %5034 }
 0xdde   :  { %v5053_v22 = vsub.f32 %v13148_v48, %v5029_v43  ;;  %3540 = vadd.xlane.f32.xlu0 %v15140_v59  ;;  %v13265_v4 = vpop.eup %9544 }
 0xddf   :  { %4759 = vrot.lane.b32.xlu1 %v4726_v38, %s9926_s0  ;;  %v9019_v38 = vld [vmem:[#allocation8 + $0x18] sm:$0xff]  }
 0xde0   :  { %v5076_v14 = vmul.f32 1.442695, %v5053_v22  ;;  %v13269_v48 = vpop.eup %9546 }
 0xde1   :  { %v5025_v42 = vpop.xlane.xlu1 %5024  ;;  %v13262_v19 = vpop.xlane.xlu0 %5030 }
 0xde2   :  { %v5051_v23 = vsub.f32 %v13158_v51, %v5025_v42  ;;  %3542 = vadd.xlane.f32.xlu0 %v15141_v37  ;;  %9554 = vpow2.f32 %v5076_v14  ;;  %v9021_v42 = vld [vmem:[#allocation8 + $0x28] sm:$0xff]   ;;  %v9022_v37 = vld [vmem:[#allocation8 + $0x30] sm:$0xff]  }
 0xde3   :  { %4763 = vrot.lane.b32.xlu1 %v4728_v7, %s9926_s0 }
 0xde4   :  { %v13272_v28 = vpop.eup %9548  ;;  %v5072_v36 = vmul.f32 1.442695, %v5051_v23 }
 0xde5   :  { %v13274_v35 = vpop.eup %9550  ;;  %v3221_v44 = vpop.permute.xlu1 %3220  ;;  %v5126_v51 = vpack.c.bf16 %v13272_v28, %v13265_v4 }
 0xde6   :  { %v13276_v45 = vpop.xlane.xlu0 %5036  ;;  %9556 = vpow2.f32 %v5072_v36  ;;  %3254 = vst.msk [vmem:[#allocation2 + $0x78] sm:$0xff] %vm15142_vm15, %v3221_v44  ;;  %v5127_v55 = vpack.c.bf16 %v13269_v48, %v13274_v35  ;;  %v13287_v43 = vpop.eup %9552  ;;  %v15145_v36 = vld [vmem:[#allocation172_spill] sm:$0xff]  ;;  %vm15170_vm15 = vmmov %vm15159_vm3 }
 0xde7   :  { %9558 = vpow2.f32 %v5074_v18  ;;  %8823 = vmatprep.mubr.bf16.mxu0 %v5126_v51  ;;  %v9023_v18 = vld [vmem:[#allocation8 + $0x38] sm:$0xff]   ;;  %v5057_v51 = vsub.f32 %v13169_v32, %v13276_v45 }
 0xde8   :  { %8824 = vmatmul.mubr.bf16.vlgmr.msra.gmra.mrb[144].mxu0 %v5127_v55  ;;  %9560 = vrcp.f32 %v12798_v62 }
 0xde9   :  { %8840 = vmatpush3.bf16.msra.mxu0 %v13242_v26  ;;  %9562 = vrcp.f32 %v13207_v12  ;;  %v9020_v12 = vld [vmem:[#allocation8 + $0x20] sm:$0xff]  }
 0xdea   :  { %v3219_v46 = vpop.permute.xlu0 %3218  ;;  %8841 = vmatprep.subr.bf16.mxu0 %v9017_v33  ;;  %9564 = vrcp.f32 %v12801_v8  ;;  %v5056_v8 = vsub.f32 %v13152_v1, %v13255_v15 }
 0xdeb   :  { %3253 = vst.msk [vmem:[#allocation2 + $0x70] sm:$0xff] %vm15143_vm12, %v3219_v46  ;;  %9566 = vrcp.f32 %v12788_v30  ;;  %vm15171_vm12 = vmmov %vm15157_vm1 }
 0xdec   :  { %v13289_v17 = vpop.eup %9554  ;;  %9568 = vrcp.f32 %v12794_v39  ;;  %v5084_v39 = vmul.f32 1.442695, %v5057_v51  ;;  %v5082_v32 = vmul.f32 1.442695, %v5056_v8 }
 0xded   :  { %8842 = vmatpush3.bf16.msra.mxu0 %v9017_v33  ;;  %9570 = vrcp.f32 %v13204_v47  ;;  %v15146_v33 = vld [vmem:[#allocation40_spill] sm:$0xff] }
 0xdee   :  { %8843 = vmatprep.subr.bf16.mxu0 %v9018_v2 }
 0xdf0   :  { %v13291_v22 = vpop.eup %9556 }
 0xdf1   :  { %v13293_v59 = vpop.eup %9558  ;;  %v5128_v62 = vpack.c.bf16 %v13291_v22, %v13287_v43  ;;  %8844 = vmatpush3.bf16.msra.mxu0 %v9018_v2 }
 0xdf2   :  { %v5129_v26 = vpack.c.bf16 %v13289_v17, %v13293_v59  ;;  %8845 = vmatprep.subr.bf16.mxu0 %v9019_v38  ;;  %v9561_v41 = vpop.eup %9560 }
 0xdf3   :  { %8827 = vmatprep.mubr.bf16.mxu0 %v5128_v62  ;;  %v4183_v14 = vmul.f32 %v9561_v41, %v15144_v61  ;;  %v9563_v7 = vpop.eup %9562  ;;  %v15147_v62 = vld [vmem:[#allocation22_spill] sm:$0xff] }
 0xdf4   :  { %8828 = vmatmul.mubr.bf16.gmra.mrb[148].mxu0 %v5129_v26  ;;  %v4729_v23 = vmul.f32 %v9563_v7, %v13076_v3  ;;  %v9565_v44 = vpop.eup %9564  ;;  %v5054_v3 = vsub.f32 %v13162_v29, %v13262_v19 }
 0xdf5   :  { %8846 = vmatpush3.bf16.msra.mxu0 %v9019_v38  ;;  %v4184_v46 = vmul.f32 %v9565_v44, %v15146_v33  ;;  %v9567_v2 = vpop.eup %9566 }
 0xdf6   :  { %8847 = vmatprep.subr.bf16.mxu0 %v9020_v12  ;;  %v5078_v30 = vmul.f32 1.442695, %v5054_v3  ;;  %v4185_v26 = vmul.f32 %v9567_v2, %v15147_v62  ;;  %v9569_v29 = vpop.eup %9568  ;;  %v15154_v2 = vld [vmem:[#allocation186_spill] sm:$0xff] }
 0xdf7   :  { %v9571_v61 = vpop.eup %9570 }
 0xdf8   :  { %4219 = vrot.lane.b32.xlu0 %v4183_v14, %s9931_s2  ;;  %v4730_v14 = vmul.f32 %v9571_v61, %v13080_v16 }
 0xdf9   :  { %8848 = vmatpush3.bf16.msra.mxu0 %v9020_v12  ;;  %v15148_v12 = vld [vmem:[#allocation27_spill] sm:$0xff] }
 0xdfa   :  { %8849 = vmatprep.subr.bf16.mxu0 %v9021_v42  ;;  %v4186_v41 = vmul.f32 %v9569_v29, %v15148_v12 }
 0xdfc   :  { %4765 = vrot.lane.b32.xlu0 %v4729_v23, %s9926_s0 }
 0xdfd   :  { %8850 = vmatpush3.bf16.msra.mxu0 %v9021_v42  ;;  %v15150_v42 = vld [vmem:[#allocation189_spill] sm:$0xff] }
 0xdfe   :  { %8851 = vmatprep.subr.bf16.mxu0 %v9022_v37 }
 0xe01   :  { %8852 = vmatpush3.bf16.msra.mxu0 %v9022_v37 }
 0xe02   :  { %8853 = vmatprep.subr.bf16.mxu0 %v9023_v18 }
 0xe05   :  { %8854 = vmatpush3.bf16.msra.mxu0 %v9023_v18  ;;  %v15151_v18 = vld [vmem:[#allocation187_spill] sm:$0xff] }
 0xe07   :  { %3538 = vadd.xlane.f32.xlu1 %v15145_v36 }
 0xe16   :  { %v3531_v55 = vpop.xlane.xlu1 %3530 }
 0xe17   :  { %9572 = vrcp.f32 %v3531_v55 }
 0xe18   :  { %4221 = vrot.lane.b32.xlu1 %v4184_v46, %s9931_s2 }
 0xe1a   :  { %v5033_v38 = vpop.xlane.xlu1 %5032  ;;  %v3529_v47 = vpop.xlane.xlu0 %3528 }
 0xe1b   :  { %v5055_v19 = vsub.f32 %v13180_v60, %v5033_v38  ;;  %9574 = vrcp.f32 %v3529_v47  ;;  %5098 = vadd.xlane.f32.xlu0 %v13274_v35 }
 0xe1c   :  { %4223 = vrot.lane.b32.xlu1 %v4185_v26, %s9931_s2  ;;  %9576 = vpow2.f32 %v5078_v30 }
 0xe1d   :  { %v5080_v45 = vmul.f32 1.442695, %v5055_v19  ;;  %9578 = vpow2.f32 %v5084_v39  ;;  %v15156_v39 = vld [vmem:[#allocation188_spill] sm:$0xff] }
 0xe1e   :  { %v4214_v1 = vpop.permute.xlu1 %4213  ;;  %v5043_v15 = vpop.xlane.xlu0 %5042 }
 0xe1f   :  { %9580 = vpow2.f32 %v5080_v45  ;;  %4260 = vst.msk [vmem:[#allocation2 + $0x88] sm:$0xff] %vm15149_vm14, %v4214_v1  ;;  %5094 = vadd.xlane.f32.xlu0 %v13265_v4  ;;  %v5060_v19 = vsub.f32 %v13187_v27, %v5043_v15  ;;  %vm15173_vm14 = vmmov %vm15157_vm1 }
 0xe20   :  { %9582 = vpow2.f32 %v5082_v32  ;;  %4225 = vrot.lane.b32.xlu1 %v4186_v41, %s9931_s2 }
 0xe21   :  { %v9573_v60 = vpop.eup %9572  ;;  %v5090_v12 = vmul.f32 1.442695, %v5060_v19 }
 0xe22   :  { %v5039_v35 = vpop.xlane.xlu0 %5038  ;;  %v3678_v7 = vmul.f32 %v9573_v60, %v15150_v42 }
 0xe23   :  { %5106 = vadd.xlane.f32.xlu0 %v13293_v59 }
 0xe24   :  { %4767 = vrot.lane.b32.xlu1 %v4730_v14, %s9926_s0  ;;  %3694 = vst.msk [vmem:[#allocation2 + $0xa8] sm:$0xff] %vm15096_vm9, %v3678_v7  ;;  %vm15175_vm9 = vmmov %vm15153_vm0 }
 0xe25   :  { %v9575_v23 = vpop.eup %9574 }
 0xe26   :  { %v3533_v37 = vpop.xlane.xlu0 %3532  ;;  %v3677_v36 = vmul.f32 %v9575_v23, %v15151_v18  ;;  %v13330_v4 = vpop.eup %9576  ;;  %v5367_v23 = vld [vmem:[#allocation2] sm:$0xff] }
 0xe27   :  { %5102 = vadd.xlane.f32.xlu0 %v13287_v43  ;;  %v13333_v44 = vpop.eup %9578  ;;  %9584 = vrcp.f32 %v3533_v37 }
 0xe28   :  { %3693 = vst.msk [vmem:[#allocation2 + $0xa0] sm:$0xff] %vm15152_vm10, %v3677_v36  ;;  %v15164_v36 = vld [vmem:[#allocation181_spill] sm:$0xff]  ;;  %vm15176_vm10 = vmmov %vm15153_vm0 }
 0xe29   :  { %v13336_v16 = vpop.eup %9580 }
 0xe2a   :  { %v9583_v59 = vpop.eup %9582  ;;  %v3535_v3 = vpop.xlane.xlu0 %3534  ;;  %v5130_v51 = vpack.c.bf16 %v13336_v16, %v13330_v4 }
 0xe2b   :  { %9586 = vrcp.f32 %v3535_v3  ;;  %v5131_v55 = vpack.c.bf16 %v13333_v44, %v9583_v59  ;;  %v5372_v3 = vld [vmem:[#allocation2 + $0x28] sm:$0xff] }
 0xe2c   :  { %8831 = vmatprep.mubr.bf16.mxu0 %v5130_v51  ;;  %9588 = vrcp.f32 %v13202_v9  ;;  %v5058_v9 = vsub.f32 %v13192_v40, %v5039_v35  ;;  %v5368_v35 = vld [vmem:[#allocation2 + $0x8] sm:$0xff] }
 0xe2d   :  { %8832 = vmatmul.mubr.bf16.gmra.mrb[152].mxu0 %v5131_v55  ;;  %9590 = vrcp.f32 %v13200_v0  ;;  %v15161_v0 = vld [vmem:[#allocation178_spill] sm:$0xff]  ;;  %v5399_v37 = vpack.c.bf16 %v5368_v35, %v5367_v23  ;;  %v5369_v55 = vld [vmem:[#allocation2 + $0x10] sm:$0xff]  ;;  %v5382_v35 = vld [vmem:[#allocation2 + $0x78] sm:$0xff] }
 0xe2e   :  { %v4212_v43 = vpop.permute.xlu0 %4211  ;;  %v5086_v32 = vmul.f32 1.442695, %v5058_v9  ;;  %v15177_v23 = vld [vmem:[#allocation193_spill] sm:$0xff] }
 0xe2f   :  { %4259 = vst.msk [vmem:[#allocation2 + $0x80] sm:$0xff] %vm15153_vm0, %v4212_v43  ;;  %v15165_v43 = vld [vmem:[#allocation179_spill] sm:$0xff] }
 0xe30   :  { %9592 = vpow2.f32 %v5086_v32 }
 0xe31   :  { %v9585_v33 = vpop.eup %9584 }
 0xe32   :  { %v4758_v46 = vpop.permute.xlu0 %4757  ;;  %v3679_v8 = vmul.f32 %v9585_v33, %v15154_v2 }
 0xe33   :  { %4805 = vst.msk [vmem:[#allocation2 + $0x80] sm:$0xff] %vm15078_vm7, %v4758_v46  ;;  %vm15178_vm7 = vmmov %vm15157_vm1 }
 0xe34   :  { %3695 = vst.msk [vmem:[#allocation2 + $0xb0] sm:$0xff] %vm15155_vm11, %v3679_v8  ;;  %v5374_v8 = vld [vmem:[#allocation2 + $0x38] sm:$0xff]  ;;  %vm15179_vm11 = vmmov %vm15159_vm3 }
 0xe35   :  { %v9587_v30 = vpop.eup %9586 }
 0xe36   :  { %v3680_v38 = vmul.f32 %v9587_v30, %v15156_v39  ;;  %v9589_v47 = vpop.eup %9588  ;;  %v4762_v61 = vpop.permute.xlu0 %4761  ;;  %v5376_v39 = vld [vmem:[#allocation2 + $0x48] sm:$0xff] }
 0xe37   :  { %v4731_v62 = vmul.f32 %v9589_v47, %v13074_v49  ;;  %v5373_v47 = vld [vmem:[#allocation2 + $0x30] sm:$0xff] }
 0xe38   :  { %3696 = vst.msk [vmem:[#allocation2 + $0xb8] sm:$0xff] %vm15157_vm1, %v3680_v38  ;;  %vm15182_vm1 = vmmov %vm15159_vm3 }
 0xe3d   :  { %4769 = vrot.lane.b32.xlu0 %v4731_v62, %s9926_s0  ;;  %v15166_v62 = vld [vmem:[#allocation191_spill] sm:$0xff] }
 0xe48   :  { %5100 = vadd.xlane.f32.xlu1 %v13269_v48 }
 0xe4c   :  { %5096 = vadd.xlane.f32.xlu1 %v13272_v28  ;;  %v9591_v28 = vpop.eup %9590 }
 0xe4d   :  { %v4732_v27 = vmul.f32 %v9591_v28, %v13078_v25  ;;  %v5377_v28 = vld [vmem:[#allocation2 + $0x50] sm:$0xff] }
 0xe4f   :  { %v5045_v26 = vpop.xlane.xlu1 %5044 }
 0xe50   :  { %v5061_v29 = vsub.f32 %v13224_v11, %v5045_v26  ;;  %v5402_v26 = vpack.c.bf16 %v5374_v8, %v5373_v47 }
 0xe52   :  { %v5092_v45 = vmul.f32 1.442695, %v5061_v29  ;;  %v5375_v29 = vld [vmem:[#allocation2 + $0x40] sm:$0xff] }
 0xe53   :  { %v5041_v1 = vpop.xlane.xlu1 %5040  ;;  %v5403_v19 = vpack.c.bf16 %v5376_v39, %v5375_v29 }
 0xe54   :  { %v5059_v49 = vsub.f32 %v13233_v50, %v5041_v1  ;;  %9594 = vpow2.f32 %v5092_v45  ;;  %v9593_v50 = vpop.eup %9592  ;;  %v15169_v1 = vld [vmem:[#allocation190_spill] sm:$0xff] }
 0xe56   :  { %v5088_v41 = vmul.f32 1.442695, %v5059_v49 }
 0xe57   :  { %v4216_v48 = vpop.permute.xlu1 %4215 }
 0xe58   :  { %9596 = vpow2.f32 %v5088_v41  ;;  %4261 = vst.msk [vmem:[#allocation2 + $0x90] sm:$0xff] %vm15158_vm2, %v4216_v48  ;;  %v5380_v48 = vld [vmem:[#allocation2 + $0x68] sm:$0xff]  ;;  %vm15185_vm2 = vmmov %vm15182_vm1 }
 0xe59   :  { %9598 = vpow2.f32 %v5090_v12  ;;  %4807 = vst.msk [vmem:[#allocation2 + $0x90] sm:$0xff] %vm15159_vm3, %v4762_v61  ;;  %v5378_v12 = vld [vmem:[#allocation2 + $0x58] sm:$0xff]  ;;  %vm15188_vm3 = vmmov %vm15178_vm7 }
 0xe5a   :  { %v15172_v61 = vld [vmem:[#allocation192_spill] sm:$0xff] }
 0xe5b   :  { %v4218_v40 = vpop.permute.xlu1 %4217 }
 0xe5c   :  { %4262 = vst.msk [vmem:[#allocation2 + $0x98] sm:$0xff] %vm15160_vm4, %v4218_v40  ;;  %3544 = vadd.xlane.f32.xlu0 %v15161_v0  ;;  %v5379_v0 = vld [vmem:[#allocation2 + $0x60] sm:$0xff]  ;;  %vm15190_vm4 = vmmov %vm15188_vm3 }
 0xe5d   :  { %4771 = vrot.lane.b32.xlu1 %v4732_v27, %s9926_s0  ;;  %v5404_v27 = vpack.c.bf16 %v5378_v12, %v5377_v28  ;;  %v15184_v28 = vld [vmem:[#allocation25_spill] sm:$0xff] }
 0xe5e   :  { %v13364_v15 = vpop.eup %9594 }
 0xe5f   :  { %v4760_v11 = vpop.permute.xlu1 %4759 }
 0xe60   :  { %4806 = vst.msk [vmem:[#allocation2 + $0x88] sm:$0xff] %vm15162_vm5, %v4760_v11  ;;  %5114 = vadd.xlane.f32.xlu0 %v9583_v59  ;;  %v5370_v59 = vld [vmem:[#allocation2 + $0x18] sm:$0xff]  ;;  %v5405_v11 = vpack.c.bf16 %v5380_v48, %v5379_v0  ;;  %vm15192_vm5 = vmmov %vm15188_vm3 }
 0xe61   :  { %v5400_v33 = vpack.c.bf16 %v5370_v59, %v5369_v55 }
 0xe62   :  { %v13366_v60 = vpop.eup %9596 }
 0xe63   :  { %v9599_v14 = vpop.eup %9598  ;;  %v4764_v42 = vpop.permute.xlu1 %4763  ;;  %v5132_v25 = vpack.c.bf16 %v13366_v60, %v9593_v50 }
 0xe64   :  { %4808 = vst.msk [vmem:[#allocation2 + $0x98] sm:$0xff] %vm15163_vm6, %v4764_v42  ;;  %5110 = vadd.xlane.f32.xlu0 %v13330_v4  ;;  %v5133_v7 = vpack.c.bf16 %v13364_v15, %v9599_v14  ;;  %v5371_v4 = vld [vmem:[#allocation2 + $0x20] sm:$0xff]  ;;  %v15174_v42 = vld [vmem:[#allocation180_spill] sm:$0xff]  ;;  %vm15198_vm6 = vmmov %vm15188_vm3 }
 0xe65   :  { %8835 = vmatprep.mubr.bf16.mxu0 %v5132_v25  ;;  %v5401_v46 = vpack.c.bf16 %v5372_v3, %v5371_v4  ;;  %v15181_v3 = vld [vmem:[#allocation150_spill] sm:$0xff] }
 0xe66   :  { %8836 = vmatmul.mubr.bf16.gmra.mrb[156].mxu0 %v5133_v7 }
 0xe67   :  { %8855 = vmatprep.mubr.bf16.mxu0 %v5399_v37  ;;  %v3537_v18 = vpop.xlane.xlu0 %3536 }
 0xe68   :  { %9600 = vrcp.f32 %v3537_v18  ;;  %3548 = vadd.xlane.f32.xlu0 %v15164_v36  ;;  %v15180_v18 = vld [vmem:[#allocation47_spill] sm:$0xff] }
 0xe6b   :  { %v3541_v51 = vpop.xlane.xlu0 %3540 }
 0xe6c   :  { %9602 = vrcp.f32 %v3541_v51  ;;  %3550 = vadd.xlane.f32.xlu0 %v15165_v43 }
 0xe6e   :  { %8856 = vmatmul.mubr.bf16.vlgmr.msra.gmra.mrb[160].mxu0 %v5400_v33 }
 0xe6f   :  { %8859 = vmatprep.mubr.bf16.mxu0 %v5401_v46  ;;  %v3543_v2 = vpop.xlane.xlu0 %3542 }
 0xe70   :  { %9604 = vrcp.f32 %v3543_v2  ;;  %5122 = vadd.xlane.f32.xlu0 %v9599_v14 }
 0xe72   :  { %v9601_v30 = vpop.eup %9600 }
 0xe73   :  { %v4220_v38 = vpop.permute.xlu0 %4219  ;;  %v3681_v9 = vmul.f32 %v9601_v30, %v15166_v62 }
 0xe74   :  { %4263 = vst.msk [vmem:[#allocation2 + $0xa0] sm:$0xff] %vm15167_vm8, %v4220_v38  ;;  %5118 = vadd.xlane.f32.xlu0 %v9593_v50  ;;  %v5381_v50 = vld [vmem:[#allocation2 + $0x70] sm:$0xff]  ;;  %vm15202_vm8 = vmmov %vm15153_vm0 }
 0xe75   :  { %3697 = vst.msk [vmem:[#allocation2 + $0xc0] sm:$0xff] %vm15168_vm13, %v3681_v9  ;;  %v5406_v14 = vpack.c.bf16 %v5382_v35, %v5381_v50  ;;  %vm15204_vm13 = vmmov %vm15153_vm0 }
 0xe76   :  { %v9603_v32 = vpop.eup %9602  ;;  %8860 = vmatmul.mubr.bf16.gmra.mrb[164].mxu0 %v5402_v26 }
 0xe77   :  { %8863 = vmatprep.mubr.bf16.mxu0 %v5403_v19  ;;  %v4766_v45 = vpop.permute.xlu0 %4765  ;;  %v3683_v49 = vmul.f32 %v9603_v32, %v15169_v1 }
 0xe78   :  { %4809 = vst.msk [vmem:[#allocation2 + $0xa0] sm:$0xff] %vm15170_vm15, %v4766_v45  ;;  %vm15205_vm15 = vcmask 1048320  }
 0xe79   :  { %3699 = vst.msk [vmem:[#allocation2 + $0xd0] sm:$0xff] %vm15171_vm12, %v3683_v49  ;;  %vm15207_vm12 = vmmov %vm15205_vm15 }
 0xe7a   :  { %v9605_v41 = vpop.eup %9604 }
 0xe7b   :  { %v3684_v40 = vmul.f32 %v9605_v41, %v15172_v61 }
 0xe7d   :  { %3700 = vst.msk [vmem:[#allocation2 + $0xd8] sm:$0xff] %vm15173_vm14, %v3684_v40  ;;  %vm15209_vm14 = vmmov %vm15153_vm0 }
 0xe7e   :  { %8864 = vmatmul.mubr.bf16.gmra.mrb[168].mxu0 %v5404_v27 }
 0xe7f   :  { %8867 = vmatprep.mubr.bf16.mxu0 %v5405_v11 }
 0xe81   :  { %5108 = vadd.xlane.f32.xlu1 %v13289_v17 }
 0xe85   :  { %5104 = vadd.xlane.f32.xlu1 %v13291_v22 }
 0xe86   :  { %8868 = vmatmul.mubr.bf16.gmra.mrb[172].mxu0 %v5406_v14  ;;  %v15186_v14 = vld [vmem:[#allocation152_spill] sm:$0xff] }
 0xe89   :  { %3546 = vadd.xlane.f32.xlu1 %v15174_v42 }
 0xe8d   :  { %5116 = vadd.xlane.f32.xlu1 %v13333_v44 }
 0xe91   :  { %5112 = vadd.xlane.f32.xlu1 %v13336_v16 }
 0xe94   :  { %v3539_v25 = vpop.xlane.xlu1 %3538 }
 0xe95   :  { %9606 = vrcp.f32 %v3539_v25  ;;  %5124 = vadd.xlane.f32.xlu1 %v13364_v15 }
 0xe96   :  { %9608 = vrcp.f32 %v12949_v24 }
 0xe97   :  { %9610 = vrcp.f32 %v12957_v52 }
 0xe98   :  { %v4222_v7 = vpop.permute.xlu1 %4221 }
 0xe99   :  { %4264 = vst.msk [vmem:[#allocation2 + $0xa8] sm:$0xff] %vm15175_vm9, %v4222_v7  ;;  %5120 = vadd.xlane.f32.xlu1 %v13366_v60  ;;  %vm15211_vm9 = vmmov %vm15182_vm1 }
 0xe9c   :  { %v4224_v17 = vpop.permute.xlu1 %4223 }
 0xe9d   :  { %4265 = vst.msk [vmem:[#allocation2 + $0xb0] sm:$0xff] %vm15176_vm10, %v4224_v17  ;;  %vm15212_vm10 = vmmov %vm15207_vm12 }
 0xe9f   :  { %v9607_v22 = vpop.eup %9606 }
 0xea0   :  { %v4226_v44 = vpop.permute.xlu1 %4225  ;;  %v3682_v16 = vmul.f32 %v9607_v22, %v15177_v23  ;;  %v9609_v37 = vpop.eup %9608 }
 0xea1   :  { %4266 = vst.msk [vmem:[#allocation2 + $0xb8] sm:$0xff] %vm15153_vm0, %v4226_v44  ;;  %v4188_v24 = vmul.f32 %v9609_v37, %v15180_v18  ;;  %v9611_v36 = vpop.eup %9610  ;;  %v15187_v44 = vld [vmem:[#allocation195_spill] sm:$0xff]  ;;  %vm15213_vm0 = vmmov %vm15212_vm10 }
 0xea2   :  { %3698 = vst.msk [vmem:[#allocation2 + $0xc8] sm:$0xff] %vm15178_vm7, %v3682_v16  ;;  %v4189_v52 = vmul.f32 %v9611_v36, %v15181_v3  ;;  %vm15214_vm7 = vmmov %vm15182_vm1 }
 0xea4   :  { %v4768_v15 = vpop.permute.xlu1 %4767 }
 0xea5   :  { %4810 = vst.msk [vmem:[#allocation2 + $0xa8] sm:$0xff] %vm15179_vm11, %v4768_v15  ;;  %vm15215_vm11 = vmmov %vm15202_vm8 }
 0xea8   :  { %v5099_v60 = vpop.xlane.xlu0 %5098 }
 0xea9   :  { %9612 = vrcp.f32 %v5099_v60 }
 0xeaa   :  { %4229 = vrot.lane.b32.xlu1 %v4188_v24, %s9931_s2  ;;  %v15189_v24 = vld [vmem:[#allocation194_spill] sm:$0xff] }
 0xeac   :  { %v5095_v59 = vpop.xlane.xlu0 %5094 }
 0xead   :  { %9614 = vrcp.f32 %v5095_v59 }
 0xeae   :  { %4231 = vrot.lane.b32.xlu1 %v4189_v52, %s9931_s2  ;;  %9616 = vrcp.f32 %v12951_v34  ;;  %v15183_v34 = vld [vmem:[#allocation37_spill] sm:$0xff] }
 0xeaf   :  { %9618 = vrcp.f32 %v13220_v31 }
 0xeb0   :  { %v5107_v51 = vpop.xlane.xlu0 %5106 }
 0xeb1   :  { %9620 = vrcp.f32 %v5107_v51 }
 0xeb3   :  { %v9613_v33 = vpop.eup %9612 }
 0xeb4   :  { %v5103_v55 = vpop.xlane.xlu0 %5102 }
 0xeb5   :  { %9622 = vrcp.f32 %v5103_v55  ;;  %v15191_v55 = vld [vmem:[#allocation196_spill] sm:$0xff] }
 0xeb6   :  { %9624 = vrcp.f32 %v13214_v5 }
 0xeb7   :  { %v9615_v39 = vpop.eup %9614  ;;  %9626 = vrcp.f32 %v13024_v10 }
 0xeb8   :  { %v4770_v43 = vpop.permute.xlu0 %4769  ;;  %v9617_v47 = vpop.eup %9616 }
 0xeb9   :  { %4811 = vst.msk [vmem:[#allocation2 + $0xb0] sm:$0xff] %vm15182_vm1, %v4770_v43  ;;  %v4187_v62 = vmul.f32 %v9617_v47, %v15183_v34  ;;  %v9619_v9 = vpop.eup %9618  ;;  %vm15216_vm1 = vmmov %vm15213_vm0 }
 0xeba   :  { %v4733_v29 = vmul.f32 %v9619_v9, %v13084_v20 }
 0xebb   :  { %v8825_v4 = vpop.f32.mrb[144].mxu0  ;;  %v9621_v45 = vpop.eup %9620 }
 0xebc   :  { %v5273_v46 = vmul.f32 %v9613_v33, %v8825_v4  ;;  %v5192_v2 = vpop.f32.mrb[145].mxu0 }
 0xebd   :  { %v8826_v8 = vpop.f32.mrb[146].mxu0  ;;  %v5271_v38 = vmul.f32 %v9615_v39, %v5192_v2 }
 0xebe   :  { %v5195_v30 = vpop.f32.mrb[147].mxu0  ;;  %5307 = vrot.lane.b32.xlu0 %v5273_v46, %s9930_s1 }
 0xebf   :  { %v9623_v49 = vpop.eup %9622 }
 0xec0   :  { %v9625_v41 = vpop.eup %9624 }
 0xec1   :  { %v4735_v5 = vmul.f32 %v9625_v41, %v13082_v6  ;;  %v9627_v20 = vpop.eup %9626  ;;  %v15197_v41 = vld [vmem:[#allocation197_spill] sm:$0xff] }
 0xec2   :  { %5303 = vrot.lane.b32.xlu0 %v5271_v38, %s9930_s1  ;;  %v4191_v61 = vmul.f32 %v9627_v20, %v15184_v28  ;;  %v15194_v38 = vld [vmem:[#allocation153_spill] sm:$0xff] }
 0xec6   :  { %4227 = vrot.lane.b32.xlu0 %v4187_v62, %s9931_s2  ;;  %v15195_v62 = vld [vmem:[#allocation122_spill] sm:$0xff] }
 0xec7   :  { %v8829_v31 = vpop.f32.mrb[148].mxu0 }
 0xec8   :  { %v5208_v26 = vpop.f32.mrb[149].mxu0  ;;  %v5277_v1 = vmul.f32 %v9621_v45, %v8829_v31 }
 0xec9   :  { %v13410_v19 = vpop.f32.mrb[150].mxu0  ;;  %v5275_v12 = vmul.f32 %v9623_v49, %v5208_v26  ;;  %v15196_v49 = vld [vmem:[#allocation121_spill] sm:$0xff] }
 0xeca   :  { %v13412_v32 = vpop.f32.mrb[151].mxu0  ;;  %4773 = vrot.lane.b32.xlu0 %v4733_v29, %s9926_s0 }
 0xece   :  { %5315 = vrot.lane.b32.xlu0 %v5277_v1, %s9930_s1 }
 0xed2   :  { %5311 = vrot.lane.b32.xlu0 %v5275_v12, %s9930_s1 }
 0xed5   :  { %v5101_v48 = vpop.xlane.xlu1 %5100 }
 0xed6   :  { %9628 = vrcp.f32 %v5101_v48  ;;  %4777 = vrot.lane.b32.xlu0 %v4735_v5, %s9926_s0 }
 0xed9   :  { %v5097_v40 = vpop.xlane.xlu1 %5096 }
 0xeda   :  { %9630 = vrcp.f32 %v5097_v40  ;;  %4235 = vrot.lane.b32.xlu0 %v4191_v61, %s9931_s2 }
 0xedb   :  { %9632 = vrcp.f32 %v12955_v63 }
 0xedc   :  { %9634 = vrcp.f32 %v13218_v21 }
 0xedd   :  { %v4772_v10 = vpop.permute.xlu1 %4771 }
 0xede   :  { %4812 = vst.msk [vmem:[#allocation2 + $0xb8] sm:$0xff] %vm15185_vm2, %v4772_v10  ;;  %v15201_v10 = vld [vmem:[#allocation81_spill] sm:$0xff]  ;;  %vm15217_vm2 = vmmov %vm15213_vm0 }
 0xee0   :  { %v9629_v27 = vpop.eup %9628 }
 0xee1   :  { %v5274_v6 = vmul.f32 %v9629_v27, %v8826_v8 }
 0xee3   :  { %5309 = vrot.lane.b32.xlu1 %v5274_v6, %s9930_s1 }
 0xee4   :  { %v9631_v0 = vpop.eup %9630 }
 0xee5   :  { %v5272_v11 = vmul.f32 %v9631_v0, %v5195_v30  ;;  %v9633_v50 = vpop.eup %9632 }
 0xee6   :  { %v4190_v42 = vmul.f32 %v9633_v50, %v15186_v14  ;;  %v9635_v25 = vpop.eup %9634  ;;  %v15203_v50 = vld [vmem:[#allocation156_spill] sm:$0xff] }
 0xee7   :  { %5305 = vrot.lane.b32.xlu1 %v5272_v11, %s9930_s1  ;;  %v4734_v7 = vmul.f32 %v9635_v25, %v13088_v57 }
 0xee9   :  { %v3545_v35 = vpop.xlane.xlu0 %3544 }
 0xeea   :  { %9636 = vrcp.f32 %v3545_v35 }
 0xeeb   :  { %4233 = vrot.lane.b32.xlu1 %v4190_v42, %s9931_s2 }
 0xeed   :  { %v5115_v63 = vpop.xlane.xlu0 %5114 }
 0xeee   :  { %9638 = vrcp.f32 %v5115_v63  ;;  %v15206_v63 = vld [vmem:[#allocation76_spill] sm:$0xff] }
 0xeef   :  { %4775 = vrot.lane.b32.xlu1 %v4734_v7, %s9926_s0 }
 0xef1   :  { %v5111_v21 = vpop.xlane.xlu0 %5110 }
 0xef4   :  { %v9637_v17 = vpop.eup %9636 }
 0xef5   :  { %v3549_v22 = vpop.xlane.xlu0 %3548  ;;  %v3685_v23 = vmul.f32 %v9637_v17, %v15187_v44 }
 0xef6   :  { %9640 = vrcp.f32 %v3549_v22  ;;  %v15208_v22 = vld [vmem:[#allocation154_spill] sm:$0xff] }
 0xef7   :  { %3701 = vst.msk [vmem:[#allocation2 + $0xe0] sm:$0xff] %vm15188_vm3, %v3685_v23  ;;  %9642 = vrcp.f32 %v5111_v21  ;;  %vm15218_vm3 = vmmov %vm15202_vm8 }
 0xef8   :  { %v9639_v15 = vpop.eup %9638 }
 0xef9   :  { %v3551_v16 = vpop.xlane.xlu0 %3550 }
 0xefa   :  { %9644 = vrcp.f32 %v3551_v16 }
 0xefb   :  { %9646 = vrcp.f32 %v13030_v56 }
 0xefc   :  { %9648 = vrcp.f32 %v13239_v13  ;;  %v15193_v13 = vld [vmem:[#allocation17_spill] sm:$0xff] }
 0xefd   :  { %9650 = vrcp.f32 %v13229_v53  ;;  %v5123_v48 = vpop.xlane.xlu0 %5122 }
 0xf00   :  { %v9641_v37 = vpop.eup %9640  ;;  %v8833_v57 = vpop.f32.mrb[152].mxu0 }
 0xf01   :  { %v5281_v60 = vmul.f32 %v9639_v15, %v8833_v57  ;;  %v5224_v18 = vpop.f32.mrb[153].mxu0  ;;  %v3687_v36 = vmul.f32 %v9641_v37, %v15189_v24  ;;  %v9643_v3 = vpop.eup %9642 }
 0xf02   :  { %v8834_v59 = vpop.f32.mrb[154].mxu0  ;;  %v5279_v56 = vmul.f32 %v9643_v3, %v5224_v18  ;;  %v5119_v11 = vpop.xlane.xlu0 %5118 }
 0xf03   :  { %v5227_v52 = vpop.f32.mrb[155].mxu0  ;;  %5323 = vrot.lane.b32.xlu0 %v5281_v60, %s9930_s1  ;;  %3703 = vst.msk [vmem:[#allocation2 + $0xf0] sm:$0xff] %vm15190_vm4, %v3687_v36  ;;  %v15210_v60 = vld [vmem:[#allocation151_spill] sm:$0xff]  ;;  %vm15219_vm4 = vmmov %vm15214_vm7 }
 0xf04   :  { %v9645_v51 = vpop.eup %9644 }
 0xf05   :  { %v3688_v43 = vmul.f32 %v9645_v51, %v15191_v55  ;;  %v9647_v33 = vpop.eup %9646 }
 0xf06   :  { %v4193_v4 = vmul.f32 %v9647_v33, %v15193_v13  ;;  %v9649_v46 = vpop.eup %9648 }
 0xf07   :  { %5319 = vrot.lane.b32.xlu0 %v5279_v56, %s9930_s1  ;;  %3704 = vst.msk [vmem:[#allocation2 + $0xf8] sm:$0xff] %vm15192_vm5, %v3688_v43  ;;  %v4737_v2 = vmul.f32 %v9649_v46, %v13096_v54  ;;  %v9651_v8 = vpop.eup %9650  ;;  %vm15220_vm5 = vmmov %vm15213_vm0 }
 0xf08   :  { %v4739_v53 = vmul.f32 %v9651_v8, %v13093_v58 }
 0xf0b   :  { %4239 = vrot.lane.b32.xlu0 %v4193_v4, %s9931_s2 }
 0xf0e   :  { %v5109_v30 = vpop.xlane.xlu1 %5108 }
 0xf0f   :  { %9652 = vrcp.f32 %v5109_v30  ;;  %4781 = vrot.lane.b32.xlu0 %v4737_v2, %s9926_s0 }
 0xf12   :  { %v5105_v39 = vpop.xlane.xlu1 %5104 }
 0xf13   :  { %9654 = vrcp.f32 %v5105_v39  ;;  %4785 = vrot.lane.b32.xlu0 %v4739_v53, %s9926_s0 }
 0xf14   :  { %9656 = vrcp.f32 %v15194_v38 }
 0xf16   :  { %v3547_v47 = vpop.xlane.xlu1 %3546 }
 0xf17   :  { %9658 = vrcp.f32 %v3547_v47 }
 0xf18   :  { %9660 = vrcp.f32 %v15195_v62 }
 0xf19   :  { %v9653_v34 = vpop.eup %9652 }
 0xf1a   :  { %v5117_v9 = vpop.xlane.xlu1 %5116  ;;  %v5278_v54 = vmul.f32 %v9653_v34, %v13410_v19  ;;  %v15199_v19 = vld [vmem:[#allocation86_spill] sm:$0xff] }
 0xf1b   :  { %9662 = vrcp.f32 %v5117_v9 }
 0xf1c   :  { %5317 = vrot.lane.b32.xlu1 %v5278_v54, %s9930_s1 }
 0xf1d   :  { %v9655_v31 = vpop.eup %9654 }
 0xf1e   :  { %v5113_v26 = vpop.xlane.xlu1 %5112  ;;  %v5276_v58 = vmul.f32 %v9655_v31, %v13412_v32  ;;  %v9657_v29 = vpop.eup %9656  ;;  %v15200_v32 = vld [vmem:[#allocation82_spill] sm:$0xff] }
 0xf1f   :  { %9664 = vrcp.f32 %v5113_v26  ;;  %v4736_v12 = vmul.f32 %v9657_v29, %v15196_v49  ;;  %v13489_v29 = vld [vmem:[%s14175_s5] ss:$0 sm:$0xff] }
 0xf20   :  { %5313 = vrot.lane.b32.xlu1 %v5276_v58, %s9930_s1  ;;  %9666 = vrcp.f32 %v15199_v19 }
 0xf21   :  { %v9659_v45 = vpop.eup %9658  ;;  %9668 = vrcp.f32 %v15201_v10 }
 0xf22   :  { %v5125_v1 = vpop.xlane.xlu1 %5124  ;;  %v3686_v5 = vmul.f32 %v9659_v45, %v15197_v41  ;;  %v9661_v20 = vpop.eup %9660  ;;  %9670 = vrcp.f32 %v15203_v50 }
 0xf23   :  { %v4192_v61 = vmul.f32 %v9661_v20, %v15200_v32  ;;  %9672 = vrcp.f32 %v5119_v11 }
 0xf24   :  { %4779 = vrot.lane.b32.xlu1 %v4736_v12, %s9926_s0  ;;  %3702 = vst.msk [vmem:[#allocation2 + $0xe8] sm:$0xff] %vm15198_vm6, %v3686_v5  ;;  %vm15221_vm6 = vmmov %vm15213_vm0 }
 0xf25   :  { %v9663_v40 = vpop.eup %9662 }
 0xf26   :  { %v5121_v28 = vpop.xlane.xlu1 %5120  ;;  %v5282_v6 = vmul.f32 %v9663_v40, %v8834_v59 }
 0xf27   :  { %9674 = vrcp.f32 %v5121_v28 }
 0xf28   :  { %4237 = vrot.lane.b32.xlu1 %v4192_v61, %s9931_s2  ;;  %9676 = vrcp.f32 %v5123_v48  ;;  %v9744_v48 = vld [vmem:[#allocation3] sm:$0xff] }
 0xf29   :  { %v9665_v0 = vpop.eup %9664  ;;  %9678 = vrcp.f32 %v5125_v1 }
 0xf2a   :  { %v4230_v27 = vpop.permute.xlu1 %4229  ;;  %v5280_v14 = vmul.f32 %v9665_v0, %v5227_v52  ;;  %v9667_v42 = vpop.eup %9666 }
 0xf2b   :  { %4268 = vst.msk [vmem:[#allocation2 + $0xc8] sm:$0xff] %vm15202_vm8, %v4230_v27  ;;  %v4194_v7 = vmul.f32 %v9667_v42, %v15206_v63  ;;  %v9669_v21 = vpop.eup %9668  ;;  %v9745_v27 = vld [vmem:[#allocation3 + $0x10] sm:$0xff]  ;;  %v9746_v42 = vld [vmem:[#allocation3 + $0x18] sm:$0xff]  ;;  %v9747_v63 = vld [vmem:[#allocation3 + $0x8] sm:$0xff] }
 0xf2c   :  { %5325 = vrot.lane.b32.xlu1 %v5282_v6, %s9930_s1  ;;  %v4738_v44 = vmul.f32 %v9669_v21, %v15208_v22  ;;  %v9671_v23 = vpop.eup %9670  ;;  %vm15223_vm8 = vmmov %vm15218_vm3 }
 0xf2d   :  { %v9673_v37 = vpop.eup %9672  ;;  %v4740_v18 = vmul.f32 %v9671_v23, %v15210_v60 }
 0xf2e   :  { %v4232_v35 = vpop.permute.xlu1 %4231 }
 0xf2f   :  { %4269 = vst.msk [vmem:[#allocation2 + $0xd0] sm:$0xff] %vm15204_vm13, %v4232_v35  ;;  %vm15224_vm13 = vmmov %vm15219_vm4 }
 0xf30   :  { %5321 = vrot.lane.b32.xlu1 %v5280_v14, %s9930_s1  ;;  %v5308_v25 = vpop.permute.xlu0 %5307 }
 0xf31   :  { %5353 = vst.msk [vmem:[#allocation2 + $0x90] sm:$0xff] %vm15205_vm15, %v5308_v25  ;;  %v9675_v59 = vpop.eup %9674  ;;  %vm15225_vm15 = vmmov %vm15219_vm4 }
 0xf32   :  { %v9677_v56 = vpop.eup %9676 }
 0xf33   :  { %v9679_v33 = vpop.eup %9678 }
 0xf34   :  { %4241 = vrot.lane.b32.xlu1 %v4194_v7, %s9931_s2  ;;  %v5304_v17 = vpop.permute.xlu0 %5303 }
 0xf35   :  { %5351 = vst.msk [vmem:[#allocation2 + $0x80] sm:$0xff] %vm15207_vm12, %v5304_v17  ;;  %vm15226_vm12 = vmmov %vm15213_vm0 }
 0xf38   :  { %4783 = vrot.lane.b32.xlu1 %v4738_v44, %s9926_s0  ;;  %v4228_v16 = vpop.permute.xlu0 %4227  ;;  %v5385_v35 = vld [vmem:[#allocation2 + $0x90] sm:$0xff]  ;;  %v9748_v44 = vld [vmem:[#allocation3 + $0x20] sm:$0xff] }
 0xf39   :  { %4267 = vst.msk [vmem:[#allocation2 + $0xc0] sm:$0xff] %vm15209_vm14, %v4228_v16  ;;  %v8837_v15 = vpop.f32.mrb[156].mxu0  ;;  %vm15227_vm14 = vmmov %vm15213_vm0 }
 0xf3a   :  { %v5240_v57 = vpop.f32.mrb[157].mxu0  ;;  %v5285_v55 = vmul.f32 %v9677_v56, %v8837_v15  ;;  %v9749_v15 = vld [vmem:[#allocation3 + $0x28] sm:$0xff] }
 0xf3b   :  { %v5283_v24 = vmul.f32 %v9673_v37, %v5240_v57  ;;  %v8838_v36 = vpop.f32.mrb[158].mxu0  ;;  %v9750_v57 = vld [vmem:[#allocation3 + $0x30] sm:$0xff] }
 0xf3c   :  { %4787 = vrot.lane.b32.xlu1 %v4740_v18, %s9926_s0  ;;  %v5243_v3 = vpop.f32.mrb[159].mxu0  ;;  %v4774_v52 = vpop.permute.xlu0 %4773  ;;  %v5286_v4 = vmul.f32 %v9679_v33, %v8838_v36  ;;  %v5383_v40 = vld [vmem:[#allocation2 + $0x80] sm:$0xff]  ;;  %v9751_v18 = vld [vmem:[#allocation3 + $0x38] sm:$0xff] }
 0xf3d   :  { %v5284_v51 = vmul.f32 %v9675_v59, %v5243_v3  ;;  %4813 = vst.msk [vmem:[#allocation2 + $0xc0] sm:$0xff] %vm15211_vm9, %v4774_v52  ;;  %5327 = vrot.lane.b32.xlu0 %v5283_v24, %s9930_s1  ;;  %v9752_v52 = vld [vmem:[#allocation3 + $0x40] sm:$0xff]  ;;  %vm15228_vm9 = vmmov %vm15219_vm4 }
 0xf40   :  { %5329 = vrot.lane.b32.xlu1 %v5284_v51, %s9930_s1  ;;  %v5316_v43 = vpop.permute.xlu0 %5315 }
 0xf41   :  { %5357 = vst.msk [vmem:[#allocation2 + $0xb0] sm:$0xff] %vm15212_vm10, %v5316_v43  ;;  %v8857_v13 = vpop.f32.mrb[160].mxu0  ;;  %5331 = vrot.lane.b32.xlu0 %v5285_v55, %s9930_s1  ;;  %v9753_v55 = vld [vmem:[#allocation3 + $0x48] sm:$0xff]  ;;  %vm15229_vm10 = vmmov %vm15218_vm3 }
 0xf42   :  { %v5520_v46 = vpop.f32.mrb[161].mxu0  ;;  %v5529_v19 = vadd.f32 %v8857_v13, %v13489_v29  ;;  %v9754_v13 = vld [vmem:[#allocation3 + $0x50] sm:$0xff] }
 0xf43   :  { %v8858_v2 = vpop.f32.mrb[162].mxu0  ;;  %v5521_v49 = vadd.f32 %v13489_v29, %v5520_v46  ;;  %v9755_v46 = vld [vmem:[#allocation3 + $0x58] sm:$0xff] }
 0xf44   :  { %v5523_v8 = vpop.f32.mrb[163].mxu0  ;;  %5333 = vrot.lane.b32.xlu1 %v5286_v4, %s9930_s1  ;;  %v5312_v30 = vpop.permute.xlu0 %5311  ;;  %v13502_v6 = vadd.f32 %v9745_v27, %v5529_v19  ;;  %v5532_v0 = vadd.f32 %v8858_v2, %v13489_v29 }
 0xf45   :  { %5355 = vst.msk [vmem:[#allocation2 + $0xa0] sm:$0xff] %vm15213_vm0, %v5312_v30  ;;  %v13498_v28 = vadd.f32 %v9744_v48, %v5521_v49  ;;  %v5524_v11 = vadd.f32 %v13489_v29, %v5523_v8 }
 0xf46   :  { %v13508_v25 = vadd.f32 %v9746_v42, %v5532_v0 }
 0xf47   :  { %v13510_v7 = vadd.f32 %v9747_v63, %v5524_v11 }
 0xf48   :  { %v4778_v53 = vpop.permute.xlu0 %4777 }
 0xf49   :  { %4815 = vst.msk [vmem:[#allocation2 + $0xd0] sm:$0xff] %vm15214_vm7, %v4778_v53  ;;  %v8861_v39 = vpop.f32.mrb[164].mxu0  ;;  %vm15230_vm7 = vmmov %vm15213_vm0 }
 0xf4a   :  { %v5536_v38 = vpop.f32.mrb[165].mxu0  ;;  %v5545_v22 = vadd.f32 %v8861_v39, %v13489_v29 }
 0xf4b   :  { %v8862_v47 = vpop.f32.mrb[166].mxu0  ;;  %v5537_v21 = vadd.f32 %v13489_v29, %v5536_v38  ;;  %v9756_v38 = vld [vmem:[#allocation3 + $0x60] sm:$0xff] }
 0xf4c   :  { %v5539_v34 = vpop.f32.mrb[167].mxu0  ;;  %v4236_v62 = vpop.permute.xlu0 %4235  ;;  %v5548_v16 = vadd.f32 %v8862_v47, %v13489_v29  ;;  %v13524_v60 = vadd.f32 %v9750_v57, %v5545_v22  ;;  %v5387_v48 = vld [vmem:[#allocation2 + $0xa0] sm:$0xff] }
 0xf4d   :  { %4271 = vst.msk [vmem:[#allocation2 + $0xe0] sm:$0xff] %vm15215_vm11, %v4236_v62  ;;  %v5540_v17 = vadd.f32 %v13489_v29, %v5539_v34  ;;  %v13517_v23 = vadd.f32 %v9748_v44, %v5537_v21  ;;  %v9757_v62 = vld [vmem:[#allocation3 + $0x68] sm:$0xff]  ;;  %vm15231_vm11 = vmmov %vm15218_vm3 }
 0xf4e   :  { %v13526_v24 = vadd.f32 %v9751_v18, %v5548_v16 }
 0xf4f   :  { %v13520_v37 = vadd.f32 %v9749_v15, %v5540_v17 }
 0xf51   :  { %v8865_v9 = vpop.f32.mrb[168].mxu0 }
 0xf52   :  { %v5552_v54 = vpop.f32.mrb[169].mxu0  ;;  %v5561_v3 = vadd.f32 %v8865_v9, %v13489_v29 }
 0xf53   :  { %v8866_v31 = vpop.f32.mrb[170].mxu0  ;;  %v5553_v36 = vadd.f32 %v13489_v29, %v5552_v54 }
 0xf54   :  { %v5555_v26 = vpop.f32.mrb[171].mxu0  ;;  %v5564_v56 = vadd.f32 %v8866_v31, %v13489_v29  ;;  %v13540_v4 = vadd.f32 %v9754_v13, %v5561_v3  ;;  %v9758_v31 = vld [vmem:[#allocation3 + $0x70] sm:$0xff] }
 0xf55   :  { %v5310_v58 = vpop.permute.xlu1 %5309  ;;  %v5556_v59 = vadd.f32 %v13489_v29, %v5555_v26  ;;  %v13533_v51 = vadd.f32 %v9752_v52, %v5553_v36 }
 0xf56   :  { %5354 = vst.msk [vmem:[#allocation2 + $0x98] sm:$0xff] %vm15216_vm1, %v5310_v58  ;;  %v13542_v2 = vadd.f32 %v9755_v46, %v5564_v56  ;;  %v9759_v58 = vld [vmem:[#allocation3 + $0x78] sm:$0xff]  ;;  %vm15232_vm1 = vmmov %vm15219_vm4 }
 0xf57   :  { %v13536_v43 = vadd.f32 %v9753_v55, %v5556_v59  ;;  %v15238_v55 = vmov 0  }
 0xf59   :  { %v5306_v45 = vpop.permute.xlu1 %5305  ;;  %v13491_v1 = vpop.f32.mrb[172].mxu0 }
 0xf5a   :  { %5352 = vst.msk [vmem:[#allocation2 + $0x88] sm:$0xff] %vm15217_vm2, %v5306_v45  ;;  %v5568_v12 = vpop.f32.mrb[173].mxu0  ;;  %v5577_v39 = vadd.f32 %v13491_v1, %v13489_v29  ;;  %vm15233_vm2 = vmmov %vm15232_vm1 }
 0xf5b   :  { %v13495_v41 = vpop.f32.mrb[174].mxu0  ;;  %v5569_v8 = vadd.f32 %v13489_v29, %v5568_v12 }
 0xf5c   :  { %v5571_v5 = vpop.f32.mrb[175].mxu0  ;;  %v5580_v34 = vadd.f32 %v13495_v41, %v13489_v29  ;;  %v13560_v26 = vadd.f32 %v9758_v31, %v5577_v39 }
 0xf5d   :  { %v4234_v20 = vpop.permute.xlu1 %4233  ;;  %v5386_v32 = vld [vmem:[#allocation2 + $0x98] sm:$0xff]  ;;  %v5572_v30 = vadd.f32 %v13489_v29, %v5571_v5  ;;  %v13551_v47 = vadd.f32 %v9756_v38, %v5569_v8 }
 0xf5e   :  { %4270 = vst.msk [vmem:[#allocation2 + $0xd8] sm:$0xff] %vm15218_vm3, %v4234_v20  ;;  %v5408_v14 = vpack.c.bf16 %v5386_v32, %v5385_v35  ;;  %v13562_v45 = vadd.f32 %v9759_v58, %v5580_v34  ;;  %vm15234_vm3 = vmmov %vm15213_vm0 }
 0xf5f   :  { %v13555_v9 = vadd.f32 %v9757_v62, %v5572_v30  ;;  %v9760_v62 = vld [vmem:[#allocation3 + $0x80] sm:$0xff] }
 0xf60   :  { %5679 = vadd.xlane.f32.xlu0 %v13498_v28  ;;  %15222 = vst [vmem:[#allocation95_spill] sm:$0xff] %v13562_v45 }
 0xf61   :  { %v4776_v61 = vpop.permute.xlu1 %4775  ;;  %v5384_v10 = vld [vmem:[#allocation2 + $0x88] sm:$0xff] }
 0xf62   :  { %4814 = vst.msk [vmem:[#allocation2 + $0xc8] sm:$0xff] %vm15219_vm4, %v4776_v61  ;;  %v5407_v50 = vpack.c.bf16 %v5384_v10, %v5383_v40  ;;  %v5389_v40 = vld [vmem:[#allocation2 + $0xb0] sm:$0xff]  ;;  %vm15235_vm4 = vmmov %vm15213_vm0 }
 0xf64   :  { %5683 = vadd.xlane.f32.xlu0 %v13502_v6  ;;  %8871 = vmatprep.mubr.bf16.mxu0 %v5407_v50 }
 0xf65   :  { %8872 = vmatmul.mubr.bf16.gmra.mrb[176].mxu0 %v5408_v14 }
 0xf68   :  { %5681 = vadd.xlane.f32.xlu1 %v13510_v7  ;;  %5685 = vadd.xlane.f32.xlu0 %v13508_v25 }
 0xf6c   :  { %5689 = vadd.xlane.f32.xlu1 %v13520_v37  ;;  %5687 = vadd.xlane.f32.xlu0 %v13517_v23 }
 0xf70   :  { %5693 = vadd.xlane.f32.xlu1 %v13526_v24  ;;  %5691 = vadd.xlane.f32.xlu0 %v13524_v60 }
 0xf74   :  { %5697 = vadd.xlane.f32.xlu1 %v13536_v43  ;;  %5695 = vadd.xlane.f32.xlu0 %v13533_v51 }
 0xf75   :  { %v5324_v33 = vpop.permute.xlu0 %5323 }
 0xf76   :  { %5361 = vst.msk [vmem:[#allocation2 + $0xd0] sm:$0xff] %vm15220_vm5, %v5324_v33  ;;  %vm15236_vm5 = vmmov %vm15213_vm0 }
 0xf78   :  { %5701 = vadd.xlane.f32.xlu1 %v13542_v2  ;;  %5699 = vadd.xlane.f32.xlu0 %v13540_v4 }
 0xf79   :  { %v5320_v53 = vpop.permute.xlu0 %5319 }
 0xf7a   :  { %5359 = vst.msk [vmem:[#allocation2 + $0xc0] sm:$0xff] %vm15221_vm6, %v5320_v53  ;;  %vm15237_vm6 = vmmov %vm15213_vm0 }
 0xf7c   :  { %5705 = vadd.xlane.f32.xlu1 %v13555_v9  ;;  %5703 = vadd.xlane.f32.xlu0 %v13551_v47 }
 0xf7d   :  { %v4240_v54 = vpop.permute.xlu0 %4239  ;;  %v5393_v21 = vld [vmem:[#allocation2 + $0xd0] sm:$0xff] }
 0xf7e   :  { %4273 = vst.msk [vmem:[#allocation2 + $0xf0] sm:$0xff] %vm15223_vm8, %v4240_v54 }
 0xf80   :  { %5709 = vadd.xlane.f32.xlu1 %v13562_v45  ;;  %5707 = vadd.xlane.f32.xlu0 %v13560_v26 }
 0xf81   :  { %v4782_v1 = vpop.permute.xlu0 %4781  ;;  %v5391_v14 = vld [vmem:[#allocation2 + $0xc0] sm:$0xff] }
 0xf82   :  { %4817 = vst.msk [vmem:[#allocation2 + $0xe0] sm:$0xff] %vm15224_vm13, %v4782_v1 }
 0xf85   :  { %v4786_v49 = vpop.permute.xlu0 %4785 }
 0xf86   :  { %4819 = vst.msk [vmem:[#allocation2 + $0xf0] sm:$0xff] %vm15225_vm15, %v4786_v49  ;;  %v9761_v49 = vld [vmem:[#allocation3 + $0x88] sm:$0xff] }
 0xf8e   :  { %v5318_v12 = vpop.permute.xlu1 %5317 }
 0xf8f   :  { %5358 = vst.msk [vmem:[#allocation2 + $0xb8] sm:$0xff] %vm15226_vm12, %v5318_v12 }
 0xf92   :  { %v5314_v41 = vpop.permute.xlu1 %5313 }
 0xf93   :  { %5356 = vst.msk [vmem:[#allocation2 + $0xa8] sm:$0xff] %vm15227_vm14, %v5314_v41 }
 0xf96   :  { %v4780_v5 = vpop.permute.xlu1 %4779  ;;  %v5390_v20 = vld [vmem:[#allocation2 + $0xb8] sm:$0xff] }
 0xf97   :  { %4816 = vst.msk [vmem:[#allocation2 + $0xd8] sm:$0xff] %vm15228_vm9, %v4780_v5  ;;  %v5410_v10 = vpack.c.bf16 %v5390_v20, %v5389_v40  ;;  %v9762_v5 = vld [vmem:[#allocation3 + $0x90] sm:$0xff] }
 0xf9a   :  { %v4238_v19 = vpop.permute.xlu1 %4237  ;;  %v5388_v32 = vld [vmem:[#allocation2 + $0xa8] sm:$0xff] }
 0xf9b   :  { %4272 = vst.msk [vmem:[#allocation2 + $0xe8] sm:$0xff] %vm15229_vm10, %v4238_v19  ;;  %v5409_v61 = vpack.c.bf16 %v5388_v32, %v5387_v48  ;;  %v9763_v48 = vld [vmem:[#allocation3 + $0x98] sm:$0xff] }
 0xf9d   :  { %8875 = vmatprep.mubr.bf16.mxu0 %v5409_v61 }
 0xf9e   :  { %v5326_v27 = vpop.permute.xlu1 %5325  ;;  %8876 = vmatmul.mubr.bf16.gmra.mrb[180].mxu0 %v5410_v10  ;;  %v9026_v10 = vld [vmem:[#allocation9 + $0x4] ss:$16 sps:$4 sm:$0xff]  }
 0xf9f   :  { %5362 = vst.msk [vmem:[#allocation2 + $0xd8] sm:$0xff] %vm15213_vm0, %v5326_v27  ;;  %v9029_v27 = vld [vmem:[#allocation9 + $0xc] ss:$16 sps:$4 sm:$0xff]   ;;  %6339 = vmatprep.subr.bf16.mxu1 %v9026_v10 }
 0xfa0   :  { %6532 = vmatprep.subr.bf16.mxu0 %v9029_v27 }
 0xfa2   :  { %v5322_v0 = vpop.permute.xlu1 %5321 }
 0xfa3   :  { %5360 = vst.msk [vmem:[#allocation2 + $0xc8] sm:$0xff] %vm15230_vm7, %v5322_v0  ;;  %v9024_v0 = vld [vmem:[#allocation9] ss:$16 sps:$4 sm:$0xff]  }
 0xfa4   :  { %6340 = vmatpush1.bf16.msra.mxu1 %v9024_v0  ;;  %v9764_v0 = vld [vmem:[#allocation3 + $0xa0] sm:$0xff] }
 0xfa6   :  { %v4242_v11 = vpop.permute.xlu1 %4241  ;;  %v5394_v50 = vld [vmem:[#allocation2 + $0xd8] sm:$0xff] }
 0xfa7   :  { %4274 = vst.msk [vmem:[#allocation2 + $0xf8] sm:$0xff] %vm15231_vm11, %v4242_v11  ;;  %v5412_v17 = vpack.c.bf16 %v5394_v50, %v5393_v21  ;;  %v9027_v11 = vld [vmem:[#allocation9 + $0x8] ss:$16 sps:$4 sm:$0xff]   ;;  %v9032_v50 = vld [vmem:[#allocation9 + $0x24] ss:$16 sps:$4 sm:$0xff]  }
 0xfa8   :  { %6533 = vmatpush1.bf16.msra.mxu0 %v9027_v11  ;;  %6341 = vmatprep.subr.bf16.mxu1 %v9032_v50  ;;  %v9041_v21 = vld [vmem:[#allocation9 + $0x4c] ss:$16 sps:$4 sm:$0xff]  }
 0xfaa   :  { %v4784_v35 = vpop.permute.xlu1 %4783  ;;  %v5392_v42 = vld [vmem:[#allocation2 + $0xc8] sm:$0xff] }
 0xfab   :  { %4818 = vst.msk [vmem:[#allocation2 + $0xe8] sm:$0xff] %vm15232_vm1, %v4784_v35  ;;  %v5411_v63 = vpack.c.bf16 %v5392_v42, %v5391_v14  ;;  %v9035_v35 = vld [vmem:[#allocation9 + $0x2c] ss:$16 sps:$4 sm:$0xff]   ;;  %v9030_v14 = vld [vmem:[#allocation9 + $0x20] ss:$16 sps:$4 sm:$0xff]  }
 0xfac   :  { %v9033_v42 = vld [vmem:[#allocation9 + $0x28] ss:$16 sps:$4 sm:$0xff]   ;;  %6534 = vmatprep.subr.bf16.mxu0 %v9035_v35  ;;  %6342 = vmatpush1.bf16.msra.mxu1 %v9030_v14 }
 0xfad   :  { %8879 = vmatprep.mubr.bf16.mxu0 %v5411_v63  ;;  %6535 = vmatpush1.bf16.msra.mxu0 %v9033_v42  ;;  %v9038_v63 = vld [vmem:[#allocation9 + $0x44] ss:$16 sps:$4 sm:$0xff]   ;;  %v9765_v42 = vld [vmem:[#allocation3 + $0xa8] sm:$0xff] }
 0xfae   :  { %v4788_v22 = vpop.permute.xlu1 %4787  ;;  %8880 = vmatmul.mubr.bf16.gmra.mrb[184].mxu0 %v5412_v17  ;;  %v9036_v17 = vld [vmem:[#allocation9 + $0x40] ss:$16 sps:$4 sm:$0xff]   ;;  %6343 = vmatprep.subr.bf16.mxu1 %v9038_v63 }
 0xfaf   :  { %4820 = vst.msk [vmem:[#allocation2 + $0xf8] sm:$0xff] %vm15233_vm2, %v4788_v22  ;;  %v5328_v44 = vpop.permute.xlu0 %5327  ;;  %v9039_v22 = vld [vmem:[#allocation9 + $0x48] ss:$16 sps:$4 sm:$0xff]   ;;  %6536 = vmatprep.subr.bf16.mxu0 %v9041_v21 }
 0xfb0   :  { %5363 = vst.msk [vmem:[#allocation2 + $0xe0] sm:$0xff] %vm15234_vm3, %v5328_v44  ;;  %6344 = vmatpush1.bf16.msra.mxu1 %v9036_v17  ;;  %v9044_v44 = vld [vmem:[#allocation9 + $0x64] ss:$16 sps:$4 sm:$0xff]  }
 0xfb1   :  { %6537 = vmatpush1.bf16.msra.mxu0 %v9039_v22  ;;  %6345 = vmatprep.subr.bf16.mxu1 %v9044_v44 }
 0xfb2   :  { %v5330_v16 = vpop.permute.xlu1 %5329 }
 0xfb3   :  { %5364 = vst.msk [vmem:[#allocation2 + $0xe8] sm:$0xff] %vm15235_vm4, %v5330_v16  ;;  %v5332_v15 = vpop.permute.xlu0 %5331  ;;  %v9047_v16 = vld [vmem:[#allocation9 + $0x6c] ss:$16 sps:$4 sm:$0xff]  }
 0xfb4   :  { %5365 = vst.msk [vmem:[#allocation2 + $0xf0] sm:$0xff] %vm15236_vm5, %v5332_v15  ;;  %v9042_v15 = vld [vmem:[#allocation9 + $0x60] ss:$16 sps:$4 sm:$0xff]   ;;  %6538 = vmatprep.subr.bf16.mxu0 %v9047_v16 }
 0xfb5   :  { %6346 = vmatpush1.bf16.msra.mxu1 %v9042_v15 }
 0xfb6   :  { %v5334_v57 = vpop.permute.xlu1 %5333 }
 0xfb7   :  { %5366 = vst.msk [vmem:[#allocation2 + $0xf8] sm:$0xff] %vm15237_vm6, %v5334_v57  ;;  %v5395_v18 = vld [vmem:[#allocation2 + $0xe0] sm:$0xff]  ;;  %v9045_v57 = vld [vmem:[#allocation9 + $0x68] ss:$16 sps:$4 sm:$0xff]  }
 0xfb8   :  { %6539 = vmatpush1.bf16.msra.mxu0 %v9045_v57 }
 0xfba   :  { %v5396_v36 = vld [vmem:[#allocation2 + $0xe8] sm:$0xff] }
 0xfbb   :  { %v5413_v59 = vpack.c.bf16 %v5396_v36, %v5395_v18  ;;  %v5397_v3 = vld [vmem:[#allocation2 + $0xf0] sm:$0xff]  ;;  %v9053_v36 = vld [vmem:[#allocation9 + $0x8c] ss:$16 sps:$4 sm:$0xff]  }
 0xfbc   :  { %v9050_v18 = vld [vmem:[#allocation9 + $0x84] ss:$16 sps:$4 sm:$0xff]   ;;  %6540 = vmatprep.subr.bf16.mxu0 %v9053_v36 }
 0xfbd   :  { %8883 = vmatprep.mubr.bf16.mxu0 %v5413_v59  ;;  %v9048_v59 = vld [vmem:[#allocation9 + $0x80] ss:$16 sps:$4 sm:$0xff]   ;;  %6347 = vmatprep.subr.bf16.mxu1 %v9050_v18 }
 0xfbe   :  { %v5398_v52 = vld [vmem:[#allocation2 + $0xf8] sm:$0xff]  ;;  %6348 = vmatpush1.bf16.msra.mxu1 %v9048_v59  ;;  %v9766_v36 = vld [vmem:[#allocation3 + $0xb0] sm:$0xff] }
 0xfbf   :  { %v5414_v56 = vpack.c.bf16 %v5398_v52, %v5397_v3  ;;  %v9051_v3 = vld [vmem:[#allocation9 + $0x88] ss:$16 sps:$4 sm:$0xff]   ;;  %v9056_v52 = vld [vmem:[#allocation9 + $0xa4] ss:$16 sps:$4 sm:$0xff]  }
 0xfc0   :  { %6541 = vmatpush1.bf16.msra.mxu0 %v9051_v3  ;;  %6349 = vmatprep.subr.bf16.mxu1 %v9056_v52 }
 0xfc1   :  { %8884 = vmatmul.mubr.bf16.gmra.mrb[188].mxu0 %v5414_v56  ;;  %v9059_v56 = vld [vmem:[#allocation9 + $0xac] ss:$16 sps:$4 sm:$0xff]  }
 0xfc2   :  { %6564 = vmatprep.mubr.bf16.mxu0 %v15238_v55  ;;  %6542 = vmatprep.subr.bf16.mxu0 %v9059_v56  ;;  %v9767_v56 = vld [vmem:[#allocation3 + $0xb8] sm:$0xff] }
 0xfed   :  { %v5680_v13 = vpop.xlane.xlu0 %5679 }
 0xfee   :  { %v5743_v38 = vmul.f32 0.0078125, %v5680_v13  ;;  %v9057_v13 = vld [vmem:[#allocation9 + $0xa8] ss:$16 sps:$4 sm:$0xff]  }
 0xfef   :  { %6543 = vmatpush1.bf16.msra.mxu0 %v9057_v13 }
 0xff0   :  { %v13593_v41 = vsub.f32 %v13498_v28, %v5743_v38  ;;  %v9068_v38 = vld [vmem:[#allocation9 + $0xe4] ss:$16 sps:$4 sm:$0xff]  }
 0xff2   :  { %v5807_v61 = vmul.f32 %v13593_v41, %v13593_v41 }
 0xff5   :  { %v5682_v53 = vpop.xlane.xlu1 %5681 }
 0xff6   :  { %v5744_v58 = vmul.f32 0.0078125, %v5682_v53  ;;  %v9063_v53 = vld [vmem:[#allocation9 + $0xc8] ss:$16 sps:$4 sm:$0xff]  }
 0xff8   :  { %v13599_v19 = vsub.f32 %v13510_v7, %v5744_v58 }
 0xff9   :  { %v5690_v21 = vpop.xlane.xlu1 %5689 }
 0xffa   :  { %v5808_v40 = vmul.f32 %v13599_v19, %v13599_v19  ;;  %v5748_v16 = vmul.f32 0.0078125, %v5690_v21 }
 0xffc   :  { %v13635_v52 = vsub.f32 %v13520_v37, %v5748_v16  ;;  %v9770_v16 = vld [vmem:[#allocation3 + $0xd0] sm:$0xff] }
 0xffd   :  { %v5694_v13 = vpop.xlane.xlu1 %5693 }
0x1038   :  { %v8873_v33 = vpop.f32.mrb[176].mxu0 }
0x1039   :  { %v5584_v46 = vpop.f32.mrb[177].mxu0  ;;  %v5593_v34 = vadd.f32 %v8873_v33, %v13489_v29  ;;  %v9054_v33 = vld [vmem:[#allocation9 + $0xa0] ss:$16 sps:$4 sm:$0xff]  }
0x103a   :  { %v5585_v8 = vadd.f32 %v13489_v29, %v5584_v46  ;;  %v8874_v30 = vpop.f32.mrb[178].mxu0  ;;  %6350 = vmatpush1.bf16.msra.mxu1 %v9054_v33  ;;  %v9062_v46 = vld [vmem:[#allocation9 + $0xc4] ss:$16 sps:$4 sm:$0xff]  }
0x103b   :  { %v5587_v39 = vpop.f32.mrb[179].mxu0  ;;  %v5596_v1 = vadd.f32 %v8874_v30, %v13489_v29  ;;  %v13595_v20 = vadd.f32 %v9762_v5, %v5593_v34  ;;  %v9060_v30 = vld [vmem:[#allocation9 + $0xc0] ss:$16 sps:$4 sm:$0xff]   ;;  %6351 = vmatprep.subr.bf16.mxu1 %v9062_v46  ;;  %v9069_v34 = vld [vmem:[#allocation9 + $0xe8] ss:$16 sps:$4 sm:$0xff]  }
0x103c   :  { %v13585_v54 = vadd.f32 %v9760_v62, %v5585_v8  ;;  %v5588_v31 = vadd.f32 %v13489_v29, %v5587_v39  ;;  %v9065_v8 = vld [vmem:[#allocation9 + $0xcc] ss:$16 sps:$4 sm:$0xff]   ;;  %v9066_v39 = vld [vmem:[#allocation9 + $0xe0] ss:$16 sps:$4 sm:$0xff]  }
0x103d   :  { %15241 = vst [vmem:[#allocation119_spill] sm:$0xff] %v13595_v20  ;;  %v13601_v32 = vadd.f32 %v9763_v48, %v5596_v1  ;;  %6544 = vmatprep.subr.bf16.mxu0 %v9065_v8  ;;  %v9071_v62 = vld [vmem:[#allocation9 + $0xec] ss:$16 sps:$4 sm:$0xff]  }
0x103e   :  { %15239 = vst [vmem:[#allocation18_spill] sm:$0xff] %v13585_v54  ;;  %v13589_v12 = vadd.f32 %v9761_v49, %v5588_v31  ;;  %5711 = vadd.xlane.f32.xlu0 %v13585_v54  ;;  %6352 = vmatpush1.bf16.msra.mxu1 %v9060_v30  ;;  %v5684_v31 = vpop.xlane.xlu0 %5683 }
0x103f   :  { %15242 = vst [vmem:[#allocation99_spill] sm:$0xff] %v13601_v32  ;;  %6545 = vmatpush1.bf16.msra.mxu0 %v9063_v53  ;;  %6353 = vmatprep.subr.bf16.mxu1 %v9068_v38  ;;  %v5745_v1 = vmul.f32 0.0078125, %v5684_v31 }
0x1040   :  { %15240 = vst [vmem:[#allocation96_spill] sm:$0xff] %v13589_v12  ;;  %5713 = vadd.xlane.f32.xlu1 %v13589_v12  ;;  %6546 = vmatprep.subr.bf16.mxu0 %v9071_v62  ;;  %v5812_v62 = vmul.f32 %v13635_v52, %v13635_v52 }
0x1041   :  { %v13611_v27 = vsub.f32 %v13502_v6, %v5745_v1  ;;  %v9768_v1 = vld [vmem:[#allocation3 + $0xc0] sm:$0xff] }
0x1042   :  { %5715 = vadd.xlane.f32.xlu0 %v13595_v20  ;;  %6354 = vmatpush1.bf16.msra.mxu1 %v9066_v39  ;;  %v5686_v58 = vpop.xlane.xlu0 %5685  ;;  %v5750_v39 = vmul.f32 0.0078125, %v5694_v13 }
0x1043   :  { %6547 = vmatpush1.bf16.msra.mxu0 %v9069_v34  ;;  %v5746_v48 = vmul.f32 0.0078125, %v5686_v58  ;;  %v5809_v44 = vmul.f32 %v13611_v27, %v13611_v27 }
0x1044   :  { %5717 = vadd.xlane.f32.xlu1 %v13601_v32 }
0x1045   :  { %v13617_v14 = vsub.f32 %v13508_v25, %v5746_v48 }
0x1046   :  { %5839 = vadd.xlane.f32.xlu0 %v5807_v61  ;;  %v5688_v35 = vpop.xlane.xlu0 %5687 }
0x1047   :  { %v5747_v17 = vmul.f32 0.0078125, %v5688_v35  ;;  %v5810_v57 = vmul.f32 %v13617_v14, %v13617_v14 }
0x1048   :  { %5841 = vadd.xlane.f32.xlu1 %v5808_v40 }
0x1049   :  { %v13630_v18 = vsub.f32 %v13517_v23, %v5747_v17 }
0x104a   :  { %v5692_v3 = vpop.xlane.xlu0 %5691 }
0x104b   :  { %v5749_v46 = vmul.f32 0.0078125, %v5692_v3  ;;  %v5811_v30 = vmul.f32 %v13630_v18, %v13630_v18 }
0x104d   :  { %v13647_v58 = vsub.f32 %v13524_v60, %v5749_v46 }
0x104e   :  { %v5696_v48 = vpop.xlane.xlu0 %5695 }
0x1071   :  { %v8877_v49 = vpop.f32.mrb[180].mxu0 }
0x1072   :  { %v5600_v5 = vpop.f32.mrb[181].mxu0  ;;  %v5609_v22 = vadd.f32 %v8877_v49, %v13489_v29 }
0x1073   :  { %v5601_v61 = vadd.f32 %v13489_v29, %v5600_v5  ;;  %v8878_v40 = vpop.f32.mrb[182].mxu0 }
0x1074   :  { %v5603_v10 = vpop.f32.mrb[183].mxu0  ;;  %v5612_v15 = vadd.f32 %v8878_v40, %v13489_v29  ;;  %v13632_v59 = vadd.f32 %v9766_v36, %v5609_v22  ;;  %v9769_v40 = vld [vmem:[#allocation3 + $0xc8] sm:$0xff]  ;;  %v9771_v36 = vld [vmem:[#allocation3 + $0xd8] sm:$0xff] }
0x1075   :  { %v13613_v11 = vadd.f32 %v9764_v0, %v5601_v61  ;;  %v5604_v50 = vadd.f32 %v13489_v29, %v5603_v10  ;;  %v13653_v61 = vsub.f32 %v13526_v24, %v5750_v39  ;;  %v5698_v0 = vpop.xlane.xlu1 %5697 }
0x1076   :  { %15245 = vst [vmem:[#allocation155_spill] sm:$0xff] %v13632_v59  ;;  %v13637_v33 = vadd.f32 %v9767_v56, %v5612_v15  ;;  %v5752_v21 = vmul.f32 0.0078125, %v5698_v0  ;;  %v5700_v56 = vpop.xlane.xlu0 %5699 }
0x1077   :  { %15243 = vst [vmem:[#allocation123_spill] sm:$0xff] %v13613_v11  ;;  %v13619_v63 = vadd.f32 %v9765_v42, %v5604_v50  ;;  %5719 = vadd.xlane.f32.xlu0 %v13613_v11  ;;  %v5751_v50 = vmul.f32 0.0078125, %v5696_v48  ;;  %v5813_v42 = vmul.f32 %v13647_v58, %v13647_v58  ;;  %v5814_v22 = vmul.f32 %v13653_v61, %v13653_v61  ;;  %v9772_v48 = vld [vmem:[#allocation3 + $0xe0] sm:$0xff] }
0x1078   :  { %15246 = vst [vmem:[#allocation157_spill] sm:$0xff] %v13637_v33 }
0x1079   :  { %15244 = vst [vmem:[#allocation97_spill] sm:$0xff] %v13619_v63  ;;  %5721 = vadd.xlane.f32.xlu1 %v13619_v63  ;;  %v5702_v46 = vpop.xlane.xlu1 %5701 }
0x107b   :  { %5843 = vadd.xlane.f32.xlu0 %v5809_v44  ;;  %v13666_v44 = vsub.f32 %v13533_v51, %v5751_v50 }
0x107d   :  { %5845 = vadd.xlane.f32.xlu1 %v5810_v57  ;;  %v13671_v57 = vsub.f32 %v13536_v43, %v5752_v21  ;;  %v5815_v13 = vmul.f32 %v13666_v44, %v13666_v44  ;;  %v5706_v50 = vpop.xlane.xlu1 %5705 }
0x107f   :  { %5723 = vadd.xlane.f32.xlu0 %v13632_v59 }
0x1081   :  { %v8881_v8 = vpop.f32.mrb[184].mxu0  ;;  %5725 = vadd.xlane.f32.xlu1 %v13637_v33 }
0x1082   :  { %v5616_v53 = vpop.f32.mrb[185].mxu0  ;;  %v5625_v35 = vadd.f32 %v8881_v8, %v13489_v29  ;;  %v5816_v8 = vmul.f32 %v13671_v57, %v13671_v57 }
0x1083   :  { %v5617_v38 = vadd.f32 %v13489_v29, %v5616_v53  ;;  %v8882_v34 = vpop.f32.mrb[186].mxu0  ;;  %5847 = vadd.xlane.f32.xlu0 %v5811_v30  ;;  %v5753_v30 = vmul.f32 0.0078125, %v5700_v56  ;;  %v5756_v56 = vmul.f32 0.0078125, %v5706_v50 }
0x1084   :  { %v5619_v31 = vpop.f32.mrb[187].mxu0  ;;  %v5628_v17 = vadd.f32 %v8882_v34, %v13489_v29  ;;  %v13668_v15 = vadd.f32 %v9770_v16, %v5625_v35 }
0x1085   :  { %v13649_v49 = vadd.f32 %v9768_v1, %v5617_v38  ;;  %v5620_v5 = vadd.f32 %v13489_v29, %v5619_v31  ;;  %5849 = vadd.xlane.f32.xlu1 %v5812_v62  ;;  %v5754_v38 = vmul.f32 0.0078125, %v5702_v46  ;;  %v5704_v31 = vpop.xlane.xlu0 %5703 }
0x1086   :  { %v13673_v3 = vadd.f32 %v9771_v36, %v5628_v17  ;;  %v5755_v17 = vmul.f32 0.0078125, %v5704_v31 }
0x1087   :  { %15247 = vst [vmem:[#allocation94_spill] sm:$0xff] %v13649_v49  ;;  %v13655_v10 = vadd.f32 %v9769_v40, %v5620_v5  ;;  %5727 = vadd.xlane.f32.xlu0 %v13649_v49  ;;  %v13683_v5 = vsub.f32 %v13540_v4, %v5753_v30  ;;  %v13689_v35 = vsub.f32 %v13542_v2, %v5754_v38  ;;  %v9774_v38 = vld [vmem:[#allocation3 + $0xf0] sm:$0xff] }
0x1088   :  { %v13702_v30 = vsub.f32 %v13551_v47, %v5755_v17 }
0x1089   :  { %15248 = vst [vmem:[#allocation93_spill] sm:$0xff] %v13655_v10  ;;  %5729 = vadd.xlane.f32.xlu1 %v13655_v10  ;;  %v5817_v16 = vmul.f32 %v13683_v5, %v13683_v5  ;;  %v5708_v36 = vpop.xlane.xlu0 %5707  ;;  %v5818_v46 = vmul.f32 %v13689_v35, %v13689_v35 }
0x108b   :  { %5851 = vadd.xlane.f32.xlu0 %v5813_v42  ;;  %v9773_v42 = vld [vmem:[#allocation3 + $0xe8] sm:$0xff] }
0x108d   :  { %5853 = vadd.xlane.f32.xlu1 %v5814_v22 }
0x108f   :  { %5731 = vadd.xlane.f32.xlu0 %v13668_v15 }
0x1091   :  { %5733 = vadd.xlane.f32.xlu1 %v13673_v3 }
0x1093   :  { %5855 = vadd.xlane.f32.xlu0 %v5815_v13 }
0x1094   :  { %v8885_v53 = vpop.f32.mrb[188].mxu0 }
0x1095   :  { %v5632_v39 = vpop.f32.mrb[189].mxu0  ;;  %5857 = vadd.xlane.f32.xlu1 %v5816_v8  ;;  %v5641_v22 = vadd.f32 %v8885_v53, %v13489_v29  ;;  %v5710_v8 = vpop.xlane.xlu1 %5709 }
0x1096   :  { %v5633_v34 = vadd.f32 %v13489_v29, %v5632_v39  ;;  %v8886_v62 = vpop.f32.mrb[190].mxu0  ;;  %v5757_v39 = vmul.f32 0.0078125, %v5708_v36  ;;  %v5758_v31 = vmul.f32 0.0078125, %v5710_v8 }
0x1097   :  { %v5635_v1 = vpop.f32.mrb[191].mxu0  ;;  %v5644_v13 = vadd.f32 %v8886_v62, %v13489_v29  ;;  %v13704_v53 = vadd.f32 %v9774_v38, %v5641_v22  ;;  %v5819_v62 = vmul.f32 %v13702_v30, %v13702_v30 }
0x1098   :  { %v13685_v40 = vadd.f32 %v9772_v48, %v5633_v34  ;;  %v5636_v0 = vadd.f32 %v13489_v29, %v5635_v1  ;;  %v13707_v34 = vsub.f32 %v13555_v9, %v5756_v56  ;;  %v9775_v1 = vld [vmem:[#allocation3 + $0xf8] sm:$0xff]  ;;  %v13713_v29 = vsub.f32 %v13560_v26, %v5757_v39 }
0x1099   :  { %v13709_v48 = vadd.f32 %v9775_v1, %v5644_v13 }
0x109a   :  { %v13691_v21 = vadd.f32 %v9773_v42, %v5636_v0  ;;  %5735 = vadd.xlane.f32.xlu0 %v13685_v40  ;;  %v13719_v0 = vsub.f32 %v13562_v45, %v5758_v31  ;;  %v5820_v50 = vmul.f32 %v13707_v34, %v13707_v34  ;;  %v5821_v42 = vmul.f32 %v13713_v29, %v13713_v29 }
0x109c   :  { %5737 = vadd.xlane.f32.xlu1 %v13691_v21  ;;  %v5822_v17 = vmul.f32 %v13719_v0, %v13719_v0 }
0x109e   :  { %5859 = vadd.xlane.f32.xlu0 %v5817_v16 }
0x10a0   :  { %5861 = vadd.xlane.f32.xlu1 %v5818_v46 }
0x10a2   :  { %5739 = vadd.xlane.f32.xlu0 %v13704_v53 }
0x10a4   :  { %5741 = vadd.xlane.f32.xlu1 %v13709_v48 }
0x10a6   :  { %5863 = vadd.xlane.f32.xlu0 %v5819_v62 }
0x10a8   :  { %5865 = vadd.xlane.f32.xlu1 %v5820_v50 }
0x10aa   :  { %5867 = vadd.xlane.f32.xlu0 %v5821_v42 }
0x10ac   :  { %5869 = vadd.xlane.f32.xlu1 %v5822_v17 }
0x10cb   :  { %v5712_v22 = vpop.xlane.xlu0 %5711 }
0x10cc   :  { %v5759_v16 = vmul.f32 0.0078125, %v5712_v22 }
0x10cd   :  { %v5714_v36 = vpop.xlane.xlu1 %5713 }
0x10ce   :  { %v13728_v56 = vsub.f32 %v13585_v54, %v5759_v16  ;;  %v5760_v13 = vmul.f32 0.0078125, %v5714_v36 }
0x10cf   :  { %v5716_v46 = vpop.xlane.xlu0 %5715 }
0x10d0   :  { %v13731_v8 = vsub.f32 %v13589_v12, %v5760_v13  ;;  %v5761_v39 = vmul.f32 0.0078125, %v5716_v46  ;;  %v5823_v38 = vmul.f32 %v13728_v56, %v13728_v56 }
0x10d1   :  { %v5718_v31 = vpop.xlane.xlu1 %5717 }
0x10d2   :  { %v13736_v1 = vsub.f32 %v13595_v20, %v5761_v39  ;;  %v5762_v62 = vmul.f32 0.0078125, %v5718_v31  ;;  %5871 = vadd.xlane.f32.xlu0 %v5823_v38  ;;  %v5824_v50 = vmul.f32 %v13731_v8, %v13731_v8 }
0x10d3   :  { %v5840_v42 = vpop.xlane.xlu0 %5839 }
0x10d4   :  { %v13741_v17 = vsub.f32 %v13601_v32, %v5762_v62  ;;  %v5903_v22 = vmul.f32 0.0078125, %v5840_v42  ;;  %5873 = vadd.xlane.f32.xlu1 %v5824_v50  ;;  %v5825_v16 = vmul.f32 %v13736_v1, %v13736_v1  ;;  %v13750_v62 = vld [vmem:[%s14176_s6] ss:$0 sm:$0xff] }
0x10d5   :  { %v5842_v36 = vpop.xlane.xlu1 %5841 }
0x10d6   :  { %v5935_v13 = vadd.f32 1e-05, %v5903_v22  ;;  %v5904_v46 = vmul.f32 0.0078125, %v5842_v36  ;;  %5875 = vadd.xlane.f32.xlu0 %v5825_v16  ;;  %v5826_v39 = vmul.f32 %v13741_v17, %v13741_v17  ;;  %v13758_v36 = vld [vmem:[%s14177_s7] ss:$0 sm:$0xff] }
0x10d8   :  { %9680 = vrsqrt.f32 %v5935_v13  ;;  %v5936_v38 = vadd.f32 1e-05, %v5904_v46  ;;  %5877 = vadd.xlane.f32.xlu1 %v5826_v39 }
0x10da   :  { %9682 = vrsqrt.f32 %v5936_v38 }
0x10e2   :  { %v9681_v31 = vpop.eup %9680 }
0x10e3   :  { %v5999_v50 = vmul.f32 %v9681_v31, %v13593_v41 }
0x10e4   :  { %v9683_v42 = vpop.eup %9682 }
0x10e5   :  { %v6038_v22 = vmul.f32 %v13750_v62, %v5999_v50  ;;  %v6000_v16 = vmul.f32 %v9683_v42, %v13599_v19 }
0x10e7   :  { %v6039_v13 = vmul.f32 %v13750_v62, %v6000_v16  ;;  %v6077_v46 = vadd.f32 %v13758_v36, %v6038_v22 }
0x10e9   :  { %v6078_v39 = vadd.f32 %v13758_v36, %v6039_v13 }
0x10eb   :  { %v6109_v38 = vpack.c.bf16 %v6078_v39, %v6077_v46 }
0x10ed   :  { %6372 = vmatmul.mubr.bf16.vlgmr.msra.gmra.mrb[192].mxu1 %v6109_v38  ;;  %6565 = vmatmul.mubr.bf16.vlgmr.msra.gmra.mrb[192].mxu0 %v6109_v38 }
0x10ee   :  { %6381 = vmatprep.mubr.bf16.mxu1 %v15238_v55  ;;  %6574 = vmatprep.mubr.bf16.mxu0 %v15238_v55 }
0x1104   :  { %v5720_v41 = vpop.xlane.xlu0 %5719 }
0x1105   :  { %v5763_v19 = vmul.f32 0.0078125, %v5720_v41 }
0x1106   :  { %v5722_v31 = vpop.xlane.xlu1 %5721 }
0x1107   :  { %v13766_v50 = vsub.f32 %v13613_v11, %v5763_v19  ;;  %v5764_v42 = vmul.f32 0.0078125, %v5722_v31 }
0x1108   :  { %v5844_v32 = vpop.xlane.xlu0 %5843 }
0x1109   :  { %v13769_v16 = vsub.f32 %v13619_v63, %v5764_v42  ;;  %v5905_v22 = vmul.f32 0.0078125, %v5844_v32  ;;  %v5827_v13 = vmul.f32 %v13766_v50, %v13766_v50 }
0x110a   :  { %v5846_v46 = vpop.xlane.xlu1 %5845 }
0x110b   :  { %v5937_v39 = vadd.f32 1e-05, %v5905_v22  ;;  %v5906_v38 = vmul.f32 0.0078125, %v5846_v46  ;;  %5879 = vadd.xlane.f32.xlu0 %v5827_v13  ;;  %v5828_v41 = vmul.f32 %v13769_v16, %v13769_v16 }
0x110c   :  { %v5724_v20 = vpop.xlane.xlu0 %5723 }
0x110d   :  { %9684 = vrsqrt.f32 %v5937_v39  ;;  %v5938_v19 = vadd.f32 1e-05, %v5906_v38  ;;  %v5765_v11 = vmul.f32 0.0078125, %v5724_v20  ;;  %5881 = vadd.xlane.f32.xlu1 %v5828_v41 }
0x110e   :  { %v5726_v31 = vpop.xlane.xlu1 %5725 }
0x110f   :  { %9686 = vrsqrt.f32 %v5938_v19  ;;  %v13776_v42 = vsub.f32 %v13632_v59, %v5765_v11  ;;  %v5766_v32 = vmul.f32 0.0078125, %v5726_v31 }
0x1110   :  { %v5848_v63 = vpop.xlane.xlu0 %5847 }
0x1111   :  { %v13779_v12 = vsub.f32 %v13637_v33, %v5766_v32  ;;  %v5907_v22 = vmul.f32 0.0078125, %v5848_v63  ;;  %v5829_v13 = vmul.f32 %v13776_v42, %v13776_v42 }
0x1112   :  { %v5850_v46 = vpop.xlane.xlu1 %5849 }
0x1113   :  { %v5939_v54 = vadd.f32 1e-05, %v5907_v22  ;;  %v5908_v39 = vmul.f32 0.0078125, %v5850_v46  ;;  %5883 = vadd.xlane.f32.xlu0 %v5829_v13  ;;  %v5830_v20 = vmul.f32 %v13779_v12, %v13779_v12 }
0x1114   :  { %v5728_v38 = vpop.xlane.xlu0 %5727 }
0x1115   :  { %9688 = vrsqrt.f32 %v5939_v54  ;;  %v5940_v11 = vadd.f32 1e-05, %v5908_v39  ;;  %v5767_v41 = vmul.f32 0.0078125, %v5728_v38  ;;  %5885 = vadd.xlane.f32.xlu1 %v5830_v20 }
0x1116   :  { %v5730_v19 = vpop.xlane.xlu1 %5729 }
0x1117   :  { %v9685_v31 = vpop.eup %9684  ;;  %9690 = vrsqrt.f32 %v5940_v11  ;;  %v13786_v63 = vsub.f32 %v13649_v49, %v5767_v41  ;;  %v5768_v32 = vmul.f32 0.0078125, %v5730_v19 }
0x1118   :  { %v5852_v33 = vpop.xlane.xlu0 %5851  ;;  %v6001_v22 = vmul.f32 %v9685_v31, %v13611_v27 }
0x1119   :  { %v9687_v46 = vpop.eup %9686  ;;  %v13790_v13 = vsub.f32 %v13655_v10, %v5768_v32  ;;  %v5909_v59 = vmul.f32 0.0078125, %v5852_v33  ;;  %v5831_v54 = vmul.f32 %v13786_v63, %v13786_v63 }
0x111a   :  { %v5854_v39 = vpop.xlane.xlu1 %5853  ;;  %v6002_v20 = vmul.f32 %v9687_v46, %v13617_v14  ;;  %v6040_v38 = vmul.f32 %v13750_v62, %v6001_v22 }
0x111b   :  { %v5941_v11 = vadd.f32 1e-05, %v5909_v59  ;;  %v5910_v41 = vmul.f32 0.0078125, %v5854_v39  ;;  %5887 = vadd.xlane.f32.xlu0 %v5831_v54  ;;  %v5832_v19 = vmul.f32 %v13790_v13, %v13790_v13 }
0x111c   :  { %v5732_v27 = vpop.xlane.xlu0 %5731  ;;  %v6041_v31 = vmul.f32 %v13750_v62, %v6002_v20  ;;  %v6079_v49 = vadd.f32 %v13758_v36, %v6040_v38 }
0x111d   :  { %9692 = vrsqrt.f32 %v5941_v11  ;;  %v5942_v32 = vadd.f32 1e-05, %v5910_v41  ;;  %v5769_v33 = vmul.f32 0.0078125, %v5732_v27  ;;  %5889 = vadd.xlane.f32.xlu1 %v5832_v19 }
0x111e   :  { %v5734_v10 = vpop.xlane.xlu1 %5733  ;;  %v6080_v14 = vadd.f32 %v13758_v36, %v6041_v31 }
0x111f   :  { %v9689_v46 = vpop.eup %9688  ;;  %9694 = vrsqrt.f32 %v5942_v32  ;;  %v13802_v59 = vsub.f32 %v13668_v15, %v5769_v33  ;;  %v5770_v22 = vmul.f32 0.0078125, %v5734_v10 }
0x1120   :  { %v5856_v54 = vpop.xlane.xlu0 %5855  ;;  %v6110_v39 = vpack.c.bf16 %v6080_v14, %v6079_v49  ;;  %v6003_v45 = vmul.f32 %v9689_v46, %v13630_v18 }
0x1121   :  { %v9691_v20 = vpop.eup %9690  ;;  %v13806_v11 = vsub.f32 %v13673_v3, %v5770_v22  ;;  %v5911_v41 = vmul.f32 0.0078125, %v5856_v54  ;;  %v5833_v38 = vmul.f32 %v13802_v59, %v13802_v59 }
0x1122   :  { %v5858_v19 = vpop.xlane.xlu1 %5857  ;;  %6382 = vmatmul.mubr.bf16.gmra.mrb[196].mxu1 %v6110_v39  ;;  %6575 = vmatmul.mubr.bf16.gmra.mrb[196].mxu0 %v6110_v39  ;;  %v6004_v27 = vmul.f32 %v9691_v20, %v13635_v52  ;;  %v6042_v31 = vmul.f32 %v13750_v62, %v6003_v45 }
0x1123   :  { %v5943_v10 = vadd.f32 1e-05, %v5911_v41  ;;  %v5912_v32 = vmul.f32 0.0078125, %v5858_v19  ;;  %5891 = vadd.xlane.f32.xlu0 %v5833_v38  ;;  %v5834_v18 = vmul.f32 %v13806_v11, %v13806_v11  ;;  %6391 = vmatprep.mubr.bf16.mxu1 %v15238_v55 }
0x1124   :  { %6584 = vmatprep.mubr.bf16.mxu0 %v15238_v55  ;;  %v6043_v49 = vmul.f32 %v13750_v62, %v6004_v27  ;;  %v6081_v14 = vadd.f32 %v13758_v36, %v6042_v31 }
0x1125   :  { %9696 = vrsqrt.f32 %v5943_v10  ;;  %v5944_v33 = vadd.f32 1e-05, %v5912_v32  ;;  %5893 = vadd.xlane.f32.xlu1 %v5834_v18 }
0x1126   :  { %v6082_v52 = vadd.f32 %v13758_v36, %v6043_v49 }
0x1127   :  { %v9693_v45 = vpop.eup %9692  ;;  %9698 = vrsqrt.f32 %v5944_v33  ;;  %v5736_v46 = vpop.xlane.xlu0 %5735 }
0x1128   :  { %v5771_v22 = vmul.f32 0.0078125, %v5736_v46  ;;  %v6111_v54 = vpack.c.bf16 %v6082_v52, %v6081_v14  ;;  %v6005_v39 = vmul.f32 %v9693_v45, %v13647_v58 }
0x1129   :  { %v9695_v20 = vpop.eup %9694  ;;  %v5738_v41 = vpop.xlane.xlu1 %5737 }
0x112a   :  { %v13821_v38 = vsub.f32 %v13685_v40, %v5771_v22  ;;  %v5772_v19 = vmul.f32 0.0078125, %v5738_v41  ;;  %6392 = vmatmul.mubr.bf16.gmra.mrb[200].mxu1 %v6111_v54  ;;  %6585 = vmatmul.mubr.bf16.gmra.mrb[200].mxu0 %v6111_v54  ;;  %v6006_v27 = vmul.f32 %v9695_v20, %v13653_v61  ;;  %v6044_v31 = vmul.f32 %v13750_v62, %v6005_v39 }
0x112b   :  { %v5860_v10 = vpop.xlane.xlu0 %5859  ;;  %6401 = vmatprep.mubr.bf16.mxu1 %v15238_v55  ;;  %6594 = vmatprep.mubr.bf16.mxu0 %v15238_v55 }
0x112c   :  { %v13828_v32 = vsub.f32 %v13691_v21, %v5772_v19  ;;  %v5913_v58 = vmul.f32 0.0078125, %v5860_v10  ;;  %v5835_v18 = vmul.f32 %v13821_v38, %v13821_v38  ;;  %v6045_v49 = vmul.f32 %v13750_v62, %v6006_v27 }
0x112d   :  { %v5862_v33 = vpop.xlane.xlu1 %5861  ;;  %v6083_v14 = vadd.f32 %v13758_v36, %v6044_v31 }
0x112e   :  { %v5945_v61 = vadd.f32 1e-05, %v5913_v58  ;;  %v5914_v52 = vmul.f32 0.0078125, %v5862_v33  ;;  %5895 = vadd.xlane.f32.xlu0 %v5835_v18  ;;  %v5836_v45 = vmul.f32 %v13828_v32, %v13828_v32  ;;  %v6084_v46 = vadd.f32 %v13758_v36, %v6045_v49 }
0x112f   :  { %v9697_v22 = vpop.eup %9696  ;;  %v5740_v54 = vpop.xlane.xlu0 %5739 }
0x1130   :  { %9700 = vrsqrt.f32 %v5945_v61  ;;  %v5946_v39 = vadd.f32 1e-05, %v5914_v52  ;;  %v5773_v20 = vmul.f32 0.0078125, %v5740_v54  ;;  %5897 = vadd.xlane.f32.xlu1 %v5836_v45  ;;  %v6112_v41 = vpack.c.bf16 %v6084_v46, %v6083_v14 }
0x1131   :  { %v9699_v19 = vpop.eup %9698  ;;  %v5742_v27 = vpop.xlane.xlu1 %5741  ;;  %v6007_v10 = vmul.f32 %v9697_v22, %v13666_v44 }
0x1132   :  { %9702 = vrsqrt.f32 %v5946_v39  ;;  %v13839_v31 = vsub.f32 %v13704_v53, %v5773_v20  ;;  %v5774_v58 = vmul.f32 0.0078125, %v5742_v27  ;;  %6402 = vmatmul.mubr.bf16.gmra.mrb[204].mxu1 %v6112_v41  ;;  %6595 = vmatmul.mubr.bf16.gmra.mrb[204].mxu0 %v6112_v41  ;;  %v6008_v18 = vmul.f32 %v9699_v19, %v13671_v57 }
0x1133   :  { %v5864_v49 = vpop.xlane.xlu0 %5863  ;;  %6411 = vmatprep.mubr.bf16.mxu1 %v15238_v55  ;;  %6604 = vmatprep.mubr.bf16.mxu0 %v15238_v55  ;;  %v6046_v33 = vmul.f32 %v13750_v62, %v6007_v10 }
0x1134   :  { %v13846_v14 = vsub.f32 %v13709_v48, %v5774_v58  ;;  %v5915_v44 = vmul.f32 0.0078125, %v5864_v49  ;;  %v5837_v61 = vmul.f32 %v13839_v31, %v13839_v31  ;;  %v6047_v52 = vmul.f32 %v13750_v62, %v6008_v18 }
0x1135   :  { %v5866_v45 = vpop.xlane.xlu1 %5865  ;;  %v6085_v46 = vadd.f32 %v13758_v36, %v6046_v33 }
0x1136   :  { %v5947_v57 = vadd.f32 1e-05, %v5915_v44  ;;  %v5916_v22 = vmul.f32 0.0078125, %v5866_v45  ;;  %5899 = vadd.xlane.f32.xlu0 %v5837_v61  ;;  %v5838_v54 = vmul.f32 %v13846_v14, %v13846_v14  ;;  %v6086_v39 = vadd.f32 %v13758_v36, %v6047_v52 }
0x1137   :  { %v5868_v20 = vpop.xlane.xlu0 %5867 }
0x1138   :  { %9704 = vrsqrt.f32 %v5947_v57  ;;  %v5948_v41 = vadd.f32 1e-05, %v5916_v22  ;;  %v5917_v19 = vmul.f32 0.0078125, %v5868_v20  ;;  %5901 = vadd.xlane.f32.xlu1 %v5838_v54  ;;  %v6113_v27 = vpack.c.bf16 %v6086_v39, %v6085_v46 }
0x1139   :  { %v5870_v10 = vpop.xlane.xlu1 %5869 }
0x113a   :  { %v9701_v58 = vpop.eup %9700  ;;  %9706 = vrsqrt.f32 %v5948_v41  ;;  %v5949_v18 = vadd.f32 1e-05, %v5917_v19  ;;  %v5918_v49 = vmul.f32 0.0078125, %v5870_v10  ;;  %6412 = vmatmul.mubr.bf16.gmra.mrb[208].mxu1 %v6113_v27  ;;  %6605 = vmatmul.mubr.bf16.gmra.mrb[208].mxu0 %v6113_v27  ;;  %v9073_v19 = vld [vmem:[#allocation11 + $0xc0] sm:$0xff]  }
0x113b   :  { %6421 = vmatprep.mubr.bf16.mxu1 %v15238_v55  ;;  %6614 = vmatprep.mubr.bf16.mxu0 %v15238_v55  ;;  %v6009_v33 = vmul.f32 %v9701_v58, %v13683_v5  ;;  %v9072_v5 = vld [vmem:[#allocation11 + $0x40] sm:$0xff]  }
0x113c   :  { %v9703_v44 = vpop.eup %9702  ;;  %9708 = vrsqrt.f32 %v5949_v18  ;;  %v5950_v61 = vadd.f32 1e-05, %v5918_v49  ;;  %v9074_v10 = vld [vmem:[#allocation11] sm:$0xff]   ;;  %8055 = vmatprep.subr.bf16.mxu1 %v9072_v5  ;;  %8167 = vmatprep.subr.bf16.mxu0 %v9073_v19  ;;  %v9083_v5 = vld [vmem:[#allocation11 + $0x90] sm:$0xff]   ;;  %v9084_v19 = vld [vmem:[#allocation11 + $0x58] sm:$0xff]  }
0x113d   :  { %v6010_v52 = vmul.f32 %v9703_v44, %v13689_v35  ;;  %v6048_v45 = vmul.f32 %v13750_v62, %v6009_v33  ;;  %v9075_v58 = vld [vmem:[#allocation11 + $0x80] sm:$0xff]   ;;  %8056 = vmatpush3.bf16.msra.mxu1 %v9074_v10  ;;  %v9076_v33 = vld [vmem:[#allocation11 + $0x48] sm:$0xff]  }
0x113e   :  { %9710 = vrsqrt.f32 %v5950_v61  ;;  %8168 = vmatpush3.bf16.msra.mxu0 %v9075_v58  ;;  %v9077_v44 = vld [vmem:[#allocation11 + $0xc8] sm:$0xff]   ;;  %8057 = vmatprep.subr.bf16.mxu1 %v9076_v33  ;;  %v9086_v58 = vld [vmem:[#allocation11 + $0x18] sm:$0xff]   ;;  %v9090_v33 = vld [vmem:[#allocation11 + $0x20] sm:$0xff]  }
0x113f   :  { %v6049_v46 = vmul.f32 %v13750_v62, %v6010_v52  ;;  %v6087_v57 = vadd.f32 %v13758_v36, %v6048_v45  ;;  %8169 = vmatprep.subr.bf16.mxu0 %v9077_v44  ;;  %v9091_v44 = vld [vmem:[#allocation11 + $0xa0] sm:$0xff]  }
0x1141   :  { %v6088_v22 = vadd.f32 %v13758_v36, %v6049_v46 }
0x1142   :  { %v9705_v54 = vpop.eup %9704 }
0x1143   :  { %v6114_v39 = vpack.c.bf16 %v6088_v22, %v6087_v57  ;;  %v6011_v20 = vmul.f32 %v9705_v54, %v13702_v30  ;;  %v9078_v22 = vld [vmem:[#allocation11 + $0x8] sm:$0xff]  }
0x1144   :  { %v9707_v41 = vpop.eup %9706  ;;  %v9079_v54 = vld [vmem:[#allocation11 + $0x88] sm:$0xff]   ;;  %8058 = vmatpush3.bf16.msra.mxu1 %v9078_v22 }
0x1145   :  { %6422 = vmatmul.mubr.bf16.gmra.mrb[212].mxu1 %v6114_v39  ;;  %6615 = vmatmul.mubr.bf16.gmra.mrb[212].mxu0 %v6114_v39  ;;  %v6012_v35 = vmul.f32 %v9707_v41, %v13707_v34  ;;  %v6050_v27 = vmul.f32 %v13750_v62, %v6011_v20  ;;  %v9080_v39 = vld [vmem:[#allocation11 + $0x50] sm:$0xff]  }
0x1146   :  { %v9709_v18 = vpop.eup %9708  ;;  %6431 = vmatprep.mubr.bf16.mxu1 %v15238_v55  ;;  %6624 = vmatprep.mubr.bf16.mxu0 %v15238_v55  ;;  %v9081_v20 = vld [vmem:[#allocation11 + $0xd0] sm:$0xff]  }
0x1147   :  { %v6051_v49 = vmul.f32 %v13750_v62, %v6012_v35  ;;  %v6089_v34 = vadd.f32 %v13758_v36, %v6050_v27  ;;  %v6013_v52 = vmul.f32 %v9709_v18, %v13713_v29  ;;  %8170 = vmatpush3.bf16.msra.mxu0 %v9079_v54  ;;  %8059 = vmatprep.subr.bf16.mxu1 %v9080_v39  ;;  %v9085_v35 = vld [vmem:[#allocation11 + $0xd8] sm:$0xff]   ;;  %v9098_v54 = vld [vmem:[#allocation11 + $0x30] sm:$0xff]  }
0x1148   :  { %v9711_v30 = vpop.eup %9710  ;;  %8171 = vmatprep.subr.bf16.mxu0 %v9081_v20  ;;  %v9087_v18 = vld [vmem:[#allocation11 + $0x98] sm:$0xff]   ;;  %v9099_v39 = vld [vmem:[#allocation11 + $0xb0] sm:$0xff]  }
0x1149   :  { %v6090_v61 = vadd.f32 %v13758_v36, %v6051_v49  ;;  %v6014_v45 = vmul.f32 %v9711_v30, %v13719_v0  ;;  %v6052_v41 = vmul.f32 %v13750_v62, %v6013_v52  ;;  %v9082_v0 = vld [vmem:[#allocation11 + $0x10] sm:$0xff]   ;;  %v9088_v49 = vld [vmem:[#allocation11 + $0x60] sm:$0xff]   ;;  %v9094_v52 = vld [vmem:[#allocation11 + $0x28] sm:$0xff]  }
0x114a   :  { %8060 = vmatpush3.bf16.msra.mxu1 %v9082_v0  ;;  %v9089_v30 = vld [vmem:[#allocation11 + $0xe0] sm:$0xff]  }
0x114b   :  { %v6115_v46 = vpack.c.bf16 %v6090_v61, %v6089_v34  ;;  %v6053_v57 = vmul.f32 %v13750_v62, %v6014_v45  ;;  %v6091_v27 = vadd.f32 %v13758_v36, %v6052_v41  ;;  %8172 = vmatpush3.bf16.msra.mxu0 %v9083_v5  ;;  %8061 = vmatprep.subr.bf16.mxu1 %v9084_v19  ;;  %v9092_v34 = vld [vmem:[#allocation11 + $0x68] sm:$0xff]   ;;  %v9100_v41 = vld [vmem:[#allocation11 + $0x78] sm:$0xff]  }
0x114c   :  { %8173 = vmatprep.subr.bf16.mxu0 %v9085_v35  ;;  %v9093_v61 = vld [vmem:[#allocation11 + $0xe8] sm:$0xff]  }
0x114d   :  { %6432 = vmatmul.mubr.bf16.gmra.mrb[216].mxu1 %v6115_v46  ;;  %6625 = vmatmul.mubr.bf16.gmra.mrb[216].mxu0 %v6115_v46  ;;  %v6092_v29 = vadd.f32 %v13758_v36, %v6053_v57  ;;  %v9095_v45 = vld [vmem:[#allocation11 + $0xa8] sm:$0xff]   ;;  %v9096_v46 = vld [vmem:[#allocation11 + $0x70] sm:$0xff]  }
0x114e   :  { %6441 = vmatprep.mubr.bf16.mxu1 %v15238_v55  ;;  %6634 = vmatprep.mubr.bf16.mxu0 %v15238_v55  ;;  %v9097_v57 = vld [vmem:[#allocation11 + $0xf0] sm:$0xff]  }
0x114f   :  { %v6116_v10 = vpack.c.bf16 %v6092_v29, %v6091_v27  ;;  %8062 = vmatpush3.bf16.msra.mxu1 %v9086_v58  ;;  %8174 = vmatpush3.bf16.msra.mxu0 %v9087_v18  ;;  %v9101_v29 = vld [vmem:[#allocation11 + $0xf8] sm:$0xff]  }
0x1150   :  { %8063 = vmatprep.subr.bf16.mxu1 %v9088_v49  ;;  %8175 = vmatprep.subr.bf16.mxu0 %v9089_v30  ;;  %v9102_v27 = vld [vmem:[#allocation11 + $0x38] sm:$0xff]  }
0x1153   :  { %8064 = vmatpush3.bf16.msra.mxu1 %v9090_v33  ;;  %8176 = vmatpush3.bf16.msra.mxu0 %v9091_v44 }
0x1154   :  { %8065 = vmatprep.subr.bf16.mxu1 %v9092_v34  ;;  %8177 = vmatprep.subr.bf16.mxu0 %v9093_v61 }
0x1155   :  { %6442 = vmatmul.mubr.bf16.gmra.mrb[220].mxu1 %v6116_v10  ;;  %6635 = vmatmul.mubr.bf16.gmra.mrb[220].mxu0 %v6116_v10  ;;  %v9103_v10 = vld [vmem:[#allocation11 + $0xb8] sm:$0xff]  }
0x1156   :  { %6451 = vmatprep.mubr.bf16.mxu1 %v15238_v55  ;;  %6644 = vmatprep.mubr.bf16.mxu0 %v15238_v55 }
0x1157   :  { %8066 = vmatpush3.bf16.msra.mxu1 %v9094_v52  ;;  %8178 = vmatpush3.bf16.msra.mxu0 %v9095_v45 }
0x1158   :  { %8067 = vmatprep.subr.bf16.mxu1 %v9096_v46  ;;  %8179 = vmatprep.subr.bf16.mxu0 %v9097_v57 }
0x115b   :  { %8068 = vmatpush3.bf16.msra.mxu1 %v9098_v54  ;;  %8180 = vmatpush3.bf16.msra.mxu0 %v9099_v39 }
0x115c   :  { %8069 = vmatprep.subr.bf16.mxu1 %v9100_v41  ;;  %8181 = vmatprep.subr.bf16.mxu0 %v9101_v29 }
0x115f   :  { %v5872_v22 = vpop.xlane.xlu0 %5871  ;;  %8070 = vmatpush3.bf16.msra.mxu1 %v9102_v27  ;;  %8182 = vmatpush3.bf16.msra.mxu0 %v9103_v10 }
0x1160   :  { %v5919_v20 = vmul.f32 0.0078125, %v5872_v22 }
0x1161   :  { %v5874_v0 = vpop.xlane.xlu1 %5873 }
0x1162   :  { %v5951_v5 = vadd.f32 1e-05, %v5919_v20  ;;  %v5920_v19 = vmul.f32 0.0078125, %v5874_v0 }
0x1163   :  { %v5876_v35 = vpop.xlane.xlu0 %5875 }
0x1164   :  { %9712 = vrsqrt.f32 %v5951_v5  ;;  %v5952_v58 = vadd.f32 1e-05, %v5920_v19  ;;  %v5921_v18 = vmul.f32 0.0078125, %v5876_v35 }
0x1165   :  { %v5878_v49 = vpop.xlane.xlu1 %5877 }
0x1166   :  { %9714 = vrsqrt.f32 %v5952_v58  ;;  %v5953_v30 = vadd.f32 1e-05, %v5921_v18  ;;  %v5922_v33 = vmul.f32 0.0078125, %v5878_v49 }
0x1168   :  { %9716 = vrsqrt.f32 %v5953_v30  ;;  %v5954_v44 = vadd.f32 1e-05, %v5922_v33 }
0x116a   :  { %9718 = vrsqrt.f32 %v5954_v44 }
0x116e   :  { %v9713_v34 = vpop.eup %9712 }
0x116f   :  { %v6015_v61 = vmul.f32 %v9713_v34, %v13728_v56 }
0x1170   :  { %v9715_v52 = vpop.eup %9714 }
0x1171   :  { %v6016_v45 = vmul.f32 %v9715_v52, %v13731_v8  ;;  %v6054_v46 = vmul.f32 %v13750_v62, %v6015_v61 }
0x1172   :  { %v9717_v57 = vpop.eup %9716 }
0x1173   :  { %v6055_v22 = vmul.f32 %v13750_v62, %v6016_v45  ;;  %v6093_v39 = vadd.f32 %v13758_v36, %v6054_v46  ;;  %v6017_v41 = vmul.f32 %v9717_v57, %v13736_v1 }
0x1174   :  { %v9719_v54 = vpop.eup %9718 }
0x1175   :  { %v6094_v20 = vadd.f32 %v13758_v36, %v6055_v22  ;;  %v6018_v29 = vmul.f32 %v9719_v54, %v13741_v17  ;;  %v6056_v8 = vmul.f32 %v13750_v62, %v6017_v41 }
0x1177   :  { %v6117_v0 = vpack.c.bf16 %v6094_v20, %v6093_v39  ;;  %v6057_v56 = vmul.f32 %v13750_v62, %v6018_v29  ;;  %v6095_v19 = vadd.f32 %v13758_v36, %v6056_v8 }
0x1179   :  { %6452 = vmatmul.mubr.bf16.gmra.mrb[224].mxu1 %v6117_v0  ;;  %6645 = vmatmul.mubr.bf16.gmra.mrb[224].mxu0 %v6117_v0  ;;  %v6096_v5 = vadd.f32 %v13758_v36, %v6057_v56 }
0x117a   :  { %6461 = vmatprep.mubr.bf16.mxu1 %v15238_v55  ;;  %6654 = vmatprep.mubr.bf16.mxu0 %v15238_v55 }
0x117b   :  { %v6118_v35 = vpack.c.bf16 %v6096_v5, %v6095_v19 }
0x1181   :  { %6462 = vmatmul.mubr.bf16.gmra.mrb[228].mxu1 %v6118_v35  ;;  %6655 = vmatmul.mubr.bf16.gmra.mrb[228].mxu0 %v6118_v35 }
0x1182   :  { %6471 = vmatprep.mubr.bf16.mxu1 %v15238_v55  ;;  %6664 = vmatprep.mubr.bf16.mxu0 %v15238_v55 }
0x1198   :  { %v5880_v1 = vpop.xlane.xlu0 %5879 }
0x1199   :  { %v5923_v17 = vmul.f32 0.0078125, %v5880_v1 }
0x119a   :  { %v5882_v27 = vpop.xlane.xlu1 %5881 }
0x119b   :  { %v5955_v10 = vadd.f32 1e-05, %v5923_v17  ;;  %v5924_v58 = vmul.f32 0.0078125, %v5882_v27 }
0x119d   :  { %9720 = vrsqrt.f32 %v5955_v10  ;;  %v5956_v18 = vadd.f32 1e-05, %v5924_v58 }
0x119f   :  { %9722 = vrsqrt.f32 %v5956_v18 }
0x11a0   :  { %v5884_v49 = vpop.xlane.xlu0 %5883 }
0x11a1   :  { %v5925_v30 = vmul.f32 0.0078125, %v5884_v49 }
0x11a2   :  { %v5886_v33 = vpop.xlane.xlu1 %5885 }
0x11a3   :  { %v5957_v44 = vadd.f32 1e-05, %v5925_v30  ;;  %v5926_v34 = vmul.f32 0.0078125, %v5886_v33 }
0x11a5   :  { %9724 = vrsqrt.f32 %v5957_v44  ;;  %v5958_v61 = vadd.f32 1e-05, %v5926_v34 }
0x11a7   :  { %v9721_v52 = vpop.eup %9720  ;;  %9726 = vrsqrt.f32 %v5958_v61 }
0x11a8   :  { %v5888_v45 = vpop.xlane.xlu0 %5887  ;;  %v6019_v46 = vmul.f32 %v9721_v52, %v13766_v50 }
0x11a9   :  { %v9723_v57 = vpop.eup %9722  ;;  %v5927_v22 = vmul.f32 0.0078125, %v5888_v45  ;;  %v15249_v45 = vld [vmem:[#allocation58_spill] sm:$0xff] }
0x11aa   :  { %v5890_v54 = vpop.xlane.xlu1 %5889  ;;  %v6020_v39 = vmul.f32 %v9723_v57, %v13769_v16  ;;  %v6058_v20 = vmul.f32 %v13750_v62, %v6019_v46  ;;  %v6161_v46 = vsub.s32 0, %v15249_v45  ;;  %v6165_v57 = vsub.s32 1, %v15249_v45 }
0x11ab   :  { %v5959_v41 = vadd.f32 1e-05, %v5927_v22  ;;  %v5928_v29 = vmul.f32 0.0078125, %v5890_v54  ;;  %v6169_v22 = vsub.s32 2, %v15249_v45  ;;  %v6173_v54 = vsub.s32 3, %v15249_v45 }
0x11ac   :  { %v6059_v0 = vmul.f32 %v13750_v62, %v6020_v39  ;;  %v6097_v8 = vadd.f32 %v13758_v36, %v6058_v20  ;;  %v6157_v39 = vld [vmem:[%s14179_s9] sm:$0xf] }
0x11ad   :  { %9728 = vrsqrt.f32 %v5959_v41  ;;  %v5960_v56 = vadd.f32 1e-05, %v5928_v29 }
0x11ae   :  { %v6098_v5 = vadd.f32 %v13758_v36, %v6059_v0 }
0x11af   :  { %v9725_v19 = vpop.eup %9724  ;;  %9730 = vrsqrt.f32 %v5960_v56  ;;  %v13924_v56 = vrot.slane %v6157_v39, %v6161_v46 }
0x11b0   :  { %v5892_v50 = vpop.xlane.xlu0 %5891  ;;  %v6119_v35 = vpack.c.bf16 %v6098_v5, %v6097_v8  ;;  %v6021_v1 = vmul.f32 %v9725_v19, %v13776_v42  ;;  %v13926_v8 = vrot.slane %v6157_v39, %v6165_v57  ;;  %v13928_v5 = vrot.slane %v6157_v39, %v6169_v22 }
0x11b1   :  { %v9727_v17 = vpop.eup %9726  ;;  %v5929_v16 = vmul.f32 0.0078125, %v5892_v50  ;;  %v13930_v19 = vrot.slane %v6157_v39, %v6173_v54 }
0x11b2   :  { %v5894_v27 = vpop.xlane.xlu1 %5893  ;;  %6472 = vmatmul.mubr.bf16.gmra.mrb[232].mxu1 %v6119_v35  ;;  %6665 = vmatmul.mubr.bf16.gmra.mrb[232].mxu0 %v6119_v35  ;;  %v6022_v10 = vmul.f32 %v9727_v17, %v13779_v12  ;;  %v6060_v58 = vmul.f32 %v13750_v62, %v6021_v1 }
0x11b3   :  { %v5961_v18 = vadd.f32 1e-05, %v5929_v16  ;;  %v5930_v49 = vmul.f32 0.0078125, %v5894_v27  ;;  %6481 = vmatprep.mubr.bf16.mxu1 %v15238_v55  ;;  %6674 = vmatprep.mubr.bf16.mxu0 %v15238_v55 }
0x11b4   :  { %v6061_v30 = vmul.f32 %v13750_v62, %v6022_v10  ;;  %v6099_v42 = vadd.f32 %v13758_v36, %v6060_v58 }
0x11b5   :  { %9732 = vrsqrt.f32 %v5961_v18  ;;  %v5962_v33 = vadd.f32 1e-05, %v5930_v49 }
0x11b6   :  { %v6100_v44 = vadd.f32 %v13758_v36, %v6061_v30 }
0x11b7   :  { %v9729_v34 = vpop.eup %9728  ;;  %9734 = vrsqrt.f32 %v5962_v33 }
0x11b8   :  { %v6120_v61 = vpack.c.bf16 %v6100_v44, %v6099_v42  ;;  %v6023_v12 = vmul.f32 %v9729_v34, %v13786_v63 }
0x11b9   :  { %v9731_v52 = vpop.eup %9730 }
0x11ba   :  { %6482 = vmatmul.mubr.bf16.gmra.mrb[236].mxu1 %v6120_v61  ;;  %6675 = vmatmul.mubr.bf16.gmra.mrb[236].mxu0 %v6120_v61  ;;  %v6024_v20 = vmul.f32 %v9731_v52, %v13790_v13  ;;  %v6062_v41 = vmul.f32 %v13750_v62, %v6023_v12 }
0x11bb   :  { %v5896_v63 = vpop.xlane.xlu0 %5895  ;;  %6491 = vmatprep.mubr.bf16.mxu1 %v15238_v55  ;;  %6684 = vmatprep.mubr.bf16.mxu0 %v15238_v55 }
0x11bc   :  { %v5931_v29 = vmul.f32 0.0078125, %v5896_v63  ;;  %v6063_v0 = vmul.f32 %v13750_v62, %v6024_v20  ;;  %v6101_v1 = vadd.f32 %v13758_v36, %v6062_v41 }
0x11bd   :  { %v5898_v50 = vpop.xlane.xlu1 %5897 }
0x11be   :  { %v5963_v13 = vadd.f32 1e-05, %v5931_v29  ;;  %v5932_v35 = vmul.f32 0.0078125, %v5898_v50  ;;  %v6102_v17 = vadd.f32 %v13758_v36, %v6063_v0 }
0x11bf   :  { %v9733_v16 = vpop.eup %9732 }
0x11c0   :  { %9736 = vrsqrt.f32 %v5963_v13  ;;  %v5964_v27 = vadd.f32 1e-05, %v5932_v35  ;;  %v6373_v10 = vpop.f32.mrb[192].mxu1  ;;  %v6566_v58 = vpop.f32.mrb[192].mxu0  ;;  %v6121_v18 = vpack.c.bf16 %v6102_v17, %v6101_v1  ;;  %v6025_v34 = vmul.f32 %v9733_v16, %v13802_v59 }
0x11c1   :  { %v9735_v49 = vpop.eup %9734  ;;  %v6374_v30 = vadd.f32 %v6373_v10, %v13924_v56  ;;  %v6567_v33 = vadd.f32 %v6566_v58, %v13928_v5  ;;  %v6375_v42 = vpop.f32.mrb[193].mxu1 }
0x11c2   :  { %v6568_v44 = vpop.f32.mrb[193].mxu0  ;;  %9738 = vrsqrt.f32 %v5964_v27  ;;  %v6376_v61 = vadd.f32 %v6375_v42, %v13926_v8  ;;  %v6377_v52 = vpop.f32.mrb[194].mxu1  ;;  %6492 = vmatmul.mubr.bf16.gmra.mrb[240].mxu1 %v6121_v18  ;;  %6685 = vmatmul.mubr.bf16.gmra.mrb[240].mxu0 %v6121_v18  ;;  %v6026_v46 = vmul.f32 %v9735_v49, %v13806_v11  ;;  %v6064_v17 = vmul.f32 %v13750_v62, %v6025_v34 }
0x11c3   :  { %v6569_v12 = vadd.f32 %v6568_v44, %v13930_v19  ;;  %v6570_v45 = vpop.f32.mrb[194].mxu0  ;;  %v6725_v57 = vmax.f32 %v6374_v30, 0.0  ;;  %v6727_v22 = vmax.f32 %v6567_v33, 0.0  ;;  %v6378_v54 = vadd.f32 %v6377_v52, %v13924_v56  ;;  %v6379_v20 = vpop.f32.mrb[195].mxu1  ;;  %6501 = vmatprep.mubr.bf16.mxu1 %v15238_v55  ;;  %6694 = vmatprep.mubr.bf16.mxu0 %v15238_v55 }
0x11c4   :  { %v6571_v39 = vadd.f32 %v6570_v45, %v13928_v5  ;;  %v6572_v41 = vpop.f32.mrb[195].mxu0  ;;  %v6726_v59 = vmax.f32 %v6376_v61, 0.0  ;;  %v6380_v29 = vadd.f32 %v6379_v20, %v13926_v8  ;;  %v5900_v50 = vpop.xlane.xlu0 %5899  ;;  %v6065_v58 = vmul.f32 %v13750_v62, %v6026_v46 }
0x11c5   :  { %v6728_v63 = vmax.f32 %v6569_v12, 0.0  ;;  %v6573_v0 = vadd.f32 %v6572_v41, %v13930_v19  ;;  %v6729_v11 = vmax.f32 %v6378_v54, 0.0  ;;  %v5933_v35 = vmul.f32 0.0078125, %v5900_v50  ;;  %v5902_v1 = vpop.xlane.xlu1 %5901 }
0x11c6   :  { %v6731_v13 = vmax.f32 %v6571_v39, 0.0  ;;  %v6730_v16 = vmax.f32 %v6380_v29, 0.0  ;;  %v5934_v10 = vmul.f32 0.0078125, %v5902_v1  ;;  %v6103_v33 = vadd.f32 %v13758_v36, %v6064_v17 }
0x11c7   :  { %v6732_v27 = vmax.f32 %v6573_v0, 0.0  ;;  %v6853_v18 = vpack.c.bf16 %v6729_v11, %v6725_v57  ;;  %v5965_v30 = vadd.f32 1e-05, %v5933_v35  ;;  %v6104_v12 = vadd.f32 %v13758_v36, %v6065_v58 }
0x11c8   :  { %v6855_v49 = vpack.c.bf16 %v6731_v13, %v6727_v22  ;;  %v6854_v42 = vpack.c.bf16 %v6730_v16, %v6726_v59  ;;  %v5966_v61 = vadd.f32 1e-05, %v5934_v10 }
0x11c9   :  { %v6856_v44 = vpack.c.bf16 %v6732_v27, %v6728_v63  ;;  %9740 = vrsqrt.f32 %v5965_v30  ;;  %v6122_v45 = vpack.c.bf16 %v6104_v12, %v6103_v33 }
0x11ca   :  { %v9737_v52 = vpop.eup %9736  ;;  %9742 = vrsqrt.f32 %v5966_v61 }
0x11cb   :  { %v6027_v34 = vmul.f32 %v9737_v52, %v13821_v38  ;;  %6502 = vmatmul.mubr.bf16.gmra.mrb[244].mxu1 %v6122_v45  ;;  %6695 = vmatmul.mubr.bf16.gmra.mrb[244].mxu0 %v6122_v45 }
0x11cc   :  { %v9739_v54 = vpop.eup %9738  ;;  %6511 = vmatprep.mubr.bf16.mxu1 %v15238_v55  ;;  %6704 = vmatprep.mubr.bf16.mxu0 %v15238_v55 }
0x11cd   :  { %v6028_v46 = vmul.f32 %v9739_v54, %v13828_v32  ;;  %v6066_v57 = vmul.f32 %v13750_v62, %v6027_v34 }
0x11cf   :  { %v6067_v22 = vmul.f32 %v13750_v62, %v6028_v46  ;;  %v6105_v39 = vadd.f32 %v13758_v36, %v6066_v57 }
0x11d1   :  { %v6106_v20 = vadd.f32 %v13758_v36, %v6067_v22 }
0x11d3   :  { %v9741_v41 = vpop.eup %9740  ;;  %v6123_v59 = vpack.c.bf16 %v6106_v20, %v6105_v39 }
0x11d4   :  { %v9743_v38 = vpop.eup %9742  ;;  %v6029_v63 = vmul.f32 %v9741_v41, %v13839_v31 }
0x11d5   :  { %6512 = vmatmul.mubr.bf16.gmra.mrb[248].mxu1 %v6123_v59  ;;  %6705 = vmatmul.mubr.bf16.gmra.mrb[248].mxu0 %v6123_v59  ;;  %v6030_v29 = vmul.f32 %v9743_v38, %v13846_v14 }
0x11d6   :  { %6521 = vmatprep.mubr.bf16.mxu1 %v15238_v55  ;;  %6714 = vmatprep.mubr.bf16.mxu0 %v15238_v55  ;;  %v6068_v32 = vmul.f32 %v13750_v62, %v6029_v63 }
0x11d7   :  { %v6069_v0 = vmul.f32 %v13750_v62, %v6030_v29 }
0x11d8   :  { %v6107_v50 = vadd.f32 %v13758_v36, %v6068_v32 }
0x11d9   :  { %v6108_v11 = vadd.f32 %v13758_v36, %v6069_v0 }
0x11db   :  { %v6124_v13 = vpack.c.bf16 %v6108_v11, %v6107_v50 }
0x11dd   :  { %6522 = vmatmul.mubr.bf16.gmra.mrb[252].mxu1 %v6124_v13  ;;  %6715 = vmatmul.mubr.bf16.gmra.mrb[252].mxu0 %v6124_v13 }
0x11de   :  { %7212 = vmatprep.mubr.bf16.mxu1 %v6854_v42  ;;  %7373 = vmatprep.mubr.bf16.mxu0 %v6856_v44 }
0x11e5   :  { %7213 = vmatmul.mubr.bf16.vlgmr.msra.gmra.mrb[0].mxu1 %v6853_v18  ;;  %7374 = vmatmul.mubr.bf16.vlgmr.msra.gmra.mrb[0].mxu0 %v6855_v49 }
0x11f5   :  { %v6383_v31 = vpop.f32.mrb[196].mxu1  ;;  %v6576_v14 = vpop.f32.mrb[196].mxu0 }
0x11f6   :  { %v6384_v35 = vadd.f32 %v6383_v31, %v13924_v56  ;;  %v6577_v55 = vadd.f32 %v6576_v14, %v13928_v5  ;;  %v6385_v1 = vpop.f32.mrb[197].mxu1  ;;  %v6578_v17 = vpop.f32.mrb[197].mxu0 }
0x11f7   :  { %v6386_v62 = vadd.f32 %v6385_v1, %v13926_v8  ;;  %v6579_v16 = vadd.f32 %v6578_v17, %v13930_v19  ;;  %v6387_v36 = vpop.f32.mrb[198].mxu1  ;;  %v6580_v27 = vpop.f32.mrb[198].mxu0 }
0x11f8   :  { %v6388_v10 = vadd.f32 %v6387_v36, %v13924_v56  ;;  %v6581_v58 = vadd.f32 %v6580_v27, %v13928_v5  ;;  %v6389_v18 = vpop.f32.mrb[199].mxu1  ;;  %v6582_v49 = vpop.f32.mrb[199].mxu0  ;;  %v6733_v42 = vmax.f32 %v6384_v35, 0.0  ;;  %v6735_v44 = vmax.f32 %v6577_v55, 0.0 }
0x11f9   :  { %v6390_v30 = vadd.f32 %v6389_v18, %v13926_v8  ;;  %v6583_v33 = vadd.f32 %v6582_v49, %v13930_v19  ;;  %v6734_v52 = vmax.f32 %v6386_v62, 0.0  ;;  %v6736_v45 = vmax.f32 %v6579_v16, 0.0 }
0x11fa   :  { %v6737_v61 = vmax.f32 %v6388_v10, 0.0  ;;  %v6739_v12 = vmax.f32 %v6581_v58, 0.0 }
0x11fb   :  { %v6738_v34 = vmax.f32 %v6390_v30, 0.0  ;;  %v6740_v54 = vmax.f32 %v6583_v33, 0.0 }
0x11fc   :  { %v6857_v46 = vpack.c.bf16 %v6737_v61, %v6733_v42  ;;  %v6859_v57 = vpack.c.bf16 %v6739_v12, %v6735_v44 }
0x11fd   :  { %v6858_v22 = vpack.c.bf16 %v6738_v34, %v6734_v52  ;;  %v6860_v39 = vpack.c.bf16 %v6740_v54, %v6736_v45  ;;  %v6393_v20 = vpop.f32.mrb[200].mxu1  ;;  %v6586_v41 = vpop.f32.mrb[200].mxu0 }
0x11fe   :  { %v6394_v59 = vadd.f32 %v6393_v20, %v13924_v56  ;;  %v6587_v38 = vadd.f32 %v6586_v41, %v13928_v5  ;;  %v6395_v63 = vpop.f32.mrb[201].mxu1  ;;  %v6588_v29 = vpop.f32.mrb[201].mxu0 }
0x11ff   :  { %v6396_v32 = vadd.f32 %v6395_v63, %v13926_v8  ;;  %v6589_v0 = vadd.f32 %v6588_v29, %v13930_v19  ;;  %v6397_v50 = vpop.f32.mrb[202].mxu1  ;;  %v6590_v11 = vpop.f32.mrb[202].mxu0  ;;  %7220 = vmatprep.mubr.bf16.mxu1 %v6858_v22  ;;  %7381 = vmatprep.mubr.bf16.mxu0 %v6860_v39 }
0x1200   :  { %v6398_v13 = vadd.f32 %v6397_v50, %v13924_v56  ;;  %v6591_v31 = vadd.f32 %v6590_v11, %v13928_v5  ;;  %v6399_v14 = vpop.f32.mrb[203].mxu1  ;;  %v6592_v35 = vpop.f32.mrb[203].mxu0  ;;  %7221 = vmatmul.mubr.bf16.gmra.mrb[4].mxu1 %v6857_v46  ;;  %7382 = vmatmul.mubr.bf16.gmra.mrb[4].mxu0 %v6859_v57  ;;  %v6741_v17 = vmax.f32 %v6394_v59, 0.0  ;;  %v6743_v62 = vmax.f32 %v6587_v38, 0.0 }
0x1201   :  { %v6400_v55 = vadd.f32 %v6399_v14, %v13926_v8  ;;  %v6593_v1 = vadd.f32 %v6592_v35, %v13930_v19  ;;  %v6742_v27 = vmax.f32 %v6396_v32, 0.0  ;;  %v6744_v10 = vmax.f32 %v6589_v0, 0.0 }
0x1202   :  { %v6745_v16 = vmax.f32 %v6398_v13, 0.0  ;;  %v6747_v36 = vmax.f32 %v6591_v31, 0.0 }
0x1203   :  { %v6746_v58 = vmax.f32 %v6400_v55, 0.0  ;;  %v6748_v18 = vmax.f32 %v6593_v1, 0.0 }
0x1204   :  { %v6861_v49 = vpack.c.bf16 %v6745_v16, %v6741_v17  ;;  %v6863_v30 = vpack.c.bf16 %v6747_v36, %v6743_v62 }
0x1205   :  { %v6862_v33 = vpack.c.bf16 %v6746_v58, %v6742_v27  ;;  %v6864_v42 = vpack.c.bf16 %v6748_v18, %v6744_v10  ;;  %v6403_v44 = vpop.f32.mrb[204].mxu1  ;;  %v6596_v61 = vpop.f32.mrb[204].mxu0 }
0x1206   :  { %v6404_v12 = vadd.f32 %v6403_v44, %v13924_v56  ;;  %v6597_v52 = vadd.f32 %v6596_v61, %v13928_v5  ;;  %v6405_v45 = vpop.f32.mrb[205].mxu1  ;;  %v6598_v34 = vpop.f32.mrb[205].mxu0 }
0x1207   :  { %v6406_v54 = vadd.f32 %v6405_v45, %v13926_v8  ;;  %v6599_v46 = vadd.f32 %v6598_v34, %v13930_v19  ;;  %v6407_v57 = vpop.f32.mrb[206].mxu1  ;;  %v6600_v22 = vpop.f32.mrb[206].mxu0  ;;  %7228 = vmatprep.mubr.bf16.mxu1 %v6862_v33  ;;  %7389 = vmatprep.mubr.bf16.mxu0 %v6864_v42 }
0x1208   :  { %v6408_v39 = vadd.f32 %v6407_v57, %v13924_v56  ;;  %v6601_v20 = vadd.f32 %v6600_v22, %v13928_v5  ;;  %v6409_v41 = vpop.f32.mrb[207].mxu1  ;;  %v6602_v59 = vpop.f32.mrb[207].mxu0  ;;  %7229 = vmatmul.mubr.bf16.gmra.mrb[8].mxu1 %v6861_v49  ;;  %7390 = vmatmul.mubr.bf16.gmra.mrb[8].mxu0 %v6863_v30  ;;  %v6749_v29 = vmax.f32 %v6404_v12, 0.0  ;;  %v6751_v32 = vmax.f32 %v6597_v52, 0.0 }
0x1209   :  { %v6410_v38 = vadd.f32 %v6409_v41, %v13926_v8  ;;  %v6603_v63 = vadd.f32 %v6602_v59, %v13930_v19  ;;  %v6750_v11 = vmax.f32 %v6406_v54, 0.0  ;;  %v6752_v13 = vmax.f32 %v6599_v46, 0.0 }
0x120a   :  { %v6753_v0 = vmax.f32 %v6408_v39, 0.0  ;;  %v6755_v50 = vmax.f32 %v6601_v20, 0.0 }
0x120b   :  { %v6754_v31 = vmax.f32 %v6410_v38, 0.0  ;;  %v6756_v14 = vmax.f32 %v6603_v63, 0.0 }
0x120c   :  { %v6865_v35 = vpack.c.bf16 %v6753_v0, %v6749_v29  ;;  %v6867_v55 = vpack.c.bf16 %v6755_v50, %v6751_v32 }
0x120d   :  { %v6866_v1 = vpack.c.bf16 %v6754_v31, %v6750_v11  ;;  %v6868_v17 = vpack.c.bf16 %v6756_v14, %v6752_v13  ;;  %v6413_v62 = vpop.f32.mrb[208].mxu1  ;;  %v6606_v16 = vpop.f32.mrb[208].mxu0 }
0x120e   :  { %v6414_v36 = vadd.f32 %v6413_v62, %v13924_v56  ;;  %v6607_v27 = vadd.f32 %v6606_v16, %v13928_v5  ;;  %v6415_v10 = vpop.f32.mrb[209].mxu1  ;;  %v6608_v58 = vpop.f32.mrb[209].mxu0 }
0x120f   :  { %v6416_v18 = vadd.f32 %v6415_v10, %v13926_v8  ;;  %v6609_v49 = vadd.f32 %v6608_v58, %v13930_v19  ;;  %v6417_v30 = vpop.f32.mrb[210].mxu1  ;;  %v6610_v33 = vpop.f32.mrb[210].mxu0  ;;  %7236 = vmatprep.mubr.bf16.mxu1 %v6866_v1  ;;  %7397 = vmatprep.mubr.bf16.mxu0 %v6868_v17 }
0x1210   :  { %v6418_v42 = vadd.f32 %v6417_v30, %v13924_v56  ;;  %v6611_v44 = vadd.f32 %v6610_v33, %v13928_v5  ;;  %v6419_v61 = vpop.f32.mrb[211].mxu1  ;;  %v6612_v12 = vpop.f32.mrb[211].mxu0  ;;  %7237 = vmatmul.mubr.bf16.gmra.mrb[12].mxu1 %v6865_v35  ;;  %7398 = vmatmul.mubr.bf16.gmra.mrb[12].mxu0 %v6867_v55  ;;  %v6757_v34 = vmax.f32 %v6414_v36, 0.0  ;;  %v6759_v54 = vmax.f32 %v6607_v27, 0.0 }
0x1211   :  { %v6420_v52 = vadd.f32 %v6419_v61, %v13926_v8  ;;  %v6613_v45 = vadd.f32 %v6612_v12, %v13930_v19  ;;  %v6758_v22 = vmax.f32 %v6416_v18, 0.0  ;;  %v6760_v39 = vmax.f32 %v6609_v49, 0.0 }
0x1212   :  { %v6761_v46 = vmax.f32 %v6418_v42, 0.0  ;;  %v6763_v57 = vmax.f32 %v6611_v44, 0.0 }
0x1213   :  { %v6762_v20 = vmax.f32 %v6420_v52, 0.0  ;;  %v6764_v41 = vmax.f32 %v6613_v45, 0.0 }
0x1214   :  { %v6869_v59 = vpack.c.bf16 %v6761_v46, %v6757_v34  ;;  %v6871_v38 = vpack.c.bf16 %v6763_v57, %v6759_v54 }
0x1215   :  { %v6870_v63 = vpack.c.bf16 %v6762_v20, %v6758_v22  ;;  %v6872_v29 = vpack.c.bf16 %v6764_v41, %v6760_v39 }
0x1217   :  { %7244 = vmatprep.mubr.bf16.mxu1 %v6870_v63  ;;  %7405 = vmatprep.mubr.bf16.mxu0 %v6872_v29 }
0x1218   :  { %v6423_v32 = vpop.f32.mrb[212].mxu1  ;;  %v6616_v0 = vpop.f32.mrb[212].mxu0  ;;  %7245 = vmatmul.mubr.bf16.gmra.mrb[16].mxu1 %v6869_v59  ;;  %7406 = vmatmul.mubr.bf16.gmra.mrb[16].mxu0 %v6871_v38 }
0x1219   :  { %v6424_v50 = vadd.f32 %v6423_v32, %v13924_v56  ;;  %v6617_v11 = vadd.f32 %v6616_v0, %v13928_v5  ;;  %v6425_v13 = vpop.f32.mrb[213].mxu1  ;;  %v6618_v31 = vpop.f32.mrb[213].mxu0 }
0x121a   :  { %v6426_v14 = vadd.f32 %v6425_v13, %v13926_v8  ;;  %v6619_v35 = vadd.f32 %v6618_v31, %v13930_v19  ;;  %v6427_v55 = vpop.f32.mrb[214].mxu1  ;;  %v6620_v1 = vpop.f32.mrb[214].mxu0 }
0x121b   :  { %v6428_v17 = vadd.f32 %v6427_v55, %v13924_v56  ;;  %v6621_v62 = vadd.f32 %v6620_v1, %v13928_v5  ;;  %v6429_v16 = vpop.f32.mrb[215].mxu1  ;;  %v6622_v36 = vpop.f32.mrb[215].mxu0  ;;  %v6765_v58 = vmax.f32 %v6424_v50, 0.0  ;;  %v6767_v18 = vmax.f32 %v6617_v11, 0.0 }
0x121c   :  { %v6430_v27 = vadd.f32 %v6429_v16, %v13926_v8  ;;  %v6623_v10 = vadd.f32 %v6622_v36, %v13930_v19  ;;  %v6766_v33 = vmax.f32 %v6426_v14, 0.0  ;;  %v6768_v42 = vmax.f32 %v6619_v35, 0.0 }
0x121d   :  { %v6769_v49 = vmax.f32 %v6428_v17, 0.0  ;;  %v6771_v30 = vmax.f32 %v6621_v62, 0.0 }
0x121e   :  { %v6770_v44 = vmax.f32 %v6430_v27, 0.0  ;;  %v6772_v61 = vmax.f32 %v6623_v10, 0.0 }
0x121f   :  { %v6873_v12 = vpack.c.bf16 %v6769_v49, %v6765_v58  ;;  %v6875_v52 = vpack.c.bf16 %v6771_v30, %v6767_v18 }
0x1220   :  { %v6874_v45 = vpack.c.bf16 %v6770_v44, %v6766_v33  ;;  %v6876_v34 = vpack.c.bf16 %v6772_v61, %v6768_v42  ;;  %v6433_v54 = vpop.f32.mrb[216].mxu1  ;;  %v6626_v46 = vpop.f32.mrb[216].mxu0 }
0x1221   :  { %v6434_v57 = vadd.f32 %v6433_v54, %v13924_v56  ;;  %v6627_v22 = vadd.f32 %v6626_v46, %v13928_v5  ;;  %v6435_v39 = vpop.f32.mrb[217].mxu1  ;;  %v6628_v20 = vpop.f32.mrb[217].mxu0 }
0x1222   :  { %v6436_v41 = vadd.f32 %v6435_v39, %v13926_v8  ;;  %v6629_v59 = vadd.f32 %v6628_v20, %v13930_v19  ;;  %v6437_v38 = vpop.f32.mrb[218].mxu1  ;;  %v6630_v63 = vpop.f32.mrb[218].mxu0  ;;  %7252 = vmatprep.mubr.bf16.mxu1 %v6874_v45  ;;  %7413 = vmatprep.mubr.bf16.mxu0 %v6876_v34 }
0x1223   :  { %v6438_v29 = vadd.f32 %v6437_v38, %v13924_v56  ;;  %v6631_v32 = vadd.f32 %v6630_v63, %v13928_v5  ;;  %v6439_v0 = vpop.f32.mrb[219].mxu1  ;;  %v6632_v50 = vpop.f32.mrb[219].mxu0  ;;  %7253 = vmatmul.mubr.bf16.gmra.mrb[20].mxu1 %v6873_v12  ;;  %7414 = vmatmul.mubr.bf16.gmra.mrb[20].mxu0 %v6875_v52  ;;  %v6773_v31 = vmax.f32 %v6434_v57, 0.0  ;;  %v6775_v14 = vmax.f32 %v6627_v22, 0.0 }
0x1224   :  { %v6440_v11 = vadd.f32 %v6439_v0, %v13926_v8  ;;  %v6633_v13 = vadd.f32 %v6632_v50, %v13930_v19  ;;  %v6774_v1 = vmax.f32 %v6436_v41, 0.0  ;;  %v6776_v17 = vmax.f32 %v6629_v59, 0.0 }
0x1225   :  { %v6777_v35 = vmax.f32 %v6438_v29, 0.0  ;;  %v6779_v55 = vmax.f32 %v6631_v32, 0.0 }
0x1226   :  { %v6778_v62 = vmax.f32 %v6440_v11, 0.0  ;;  %v6780_v16 = vmax.f32 %v6633_v13, 0.0 }
0x1227   :  { %v6877_v36 = vpack.c.bf16 %v6777_v35, %v6773_v31  ;;  %v6879_v27 = vpack.c.bf16 %v6779_v55, %v6775_v14 }
0x1228   :  { %v6878_v10 = vpack.c.bf16 %v6778_v62, %v6774_v1  ;;  %v6880_v58 = vpack.c.bf16 %v6780_v16, %v6776_v17  ;;  %v6443_v18 = vpop.f32.mrb[220].mxu1  ;;  %v6636_v49 = vpop.f32.mrb[220].mxu0 }
0x1229   :  { %v6444_v30 = vadd.f32 %v6443_v18, %v13924_v56  ;;  %v6637_v33 = vadd.f32 %v6636_v49, %v13928_v5  ;;  %v6445_v42 = vpop.f32.mrb[221].mxu1  ;;  %v6638_v44 = vpop.f32.mrb[221].mxu0 }
0x122a   :  { %v6446_v61 = vadd.f32 %v6445_v42, %v13926_v8  ;;  %v6639_v12 = vadd.f32 %v6638_v44, %v13930_v19  ;;  %v6447_v52 = vpop.f32.mrb[222].mxu1  ;;  %v6640_v45 = vpop.f32.mrb[222].mxu0  ;;  %7260 = vmatprep.mubr.bf16.mxu1 %v6878_v10  ;;  %7421 = vmatprep.mubr.bf16.mxu0 %v6880_v58 }
0x122b   :  { %v6448_v34 = vadd.f32 %v6447_v52, %v13924_v56  ;;  %v6641_v54 = vadd.f32 %v6640_v45, %v13928_v5  ;;  %v6449_v46 = vpop.f32.mrb[223].mxu1  ;;  %v6642_v57 = vpop.f32.mrb[223].mxu0  ;;  %7261 = vmatmul.mubr.bf16.gmra.mrb[24].mxu1 %v6877_v36  ;;  %7422 = vmatmul.mubr.bf16.gmra.mrb[24].mxu0 %v6879_v27  ;;  %v6781_v20 = vmax.f32 %v6444_v30, 0.0  ;;  %v6783_v41 = vmax.f32 %v6637_v33, 0.0 }
0x122c   :  { %v6450_v22 = vadd.f32 %v6449_v46, %v13926_v8  ;;  %v6643_v39 = vadd.f32 %v6642_v57, %v13930_v19  ;;  %v6782_v63 = vmax.f32 %v6446_v61, 0.0  ;;  %v6784_v29 = vmax.f32 %v6639_v12, 0.0 }
0x122d   :  { %v6785_v59 = vmax.f32 %v6448_v34, 0.0  ;;  %v6787_v38 = vmax.f32 %v6641_v54, 0.0 }
0x122e   :  { %v6786_v32 = vmax.f32 %v6450_v22, 0.0  ;;  %v6788_v0 = vmax.f32 %v6643_v39, 0.0 }
0x122f   :  { %v6881_v50 = vpack.c.bf16 %v6785_v59, %v6781_v20  ;;  %v6883_v11 = vpack.c.bf16 %v6787_v38, %v6783_v41 }
0x1230   :  { %v6882_v13 = vpack.c.bf16 %v6786_v32, %v6782_v63  ;;  %v6884_v31 = vpack.c.bf16 %v6788_v0, %v6784_v29 }
0x1232   :  { %7268 = vmatprep.mubr.bf16.mxu1 %v6882_v13  ;;  %7429 = vmatprep.mubr.bf16.mxu0 %v6884_v31 }
0x1233   :  { %7269 = vmatmul.mubr.bf16.gmra.mrb[28].mxu1 %v6881_v50  ;;  %7430 = vmatmul.mubr.bf16.gmra.mrb[28].mxu0 %v6883_v11 }
0x124c   :  { %v6453_v14 = vpop.f32.mrb[224].mxu1  ;;  %v6646_v35 = vpop.f32.mrb[224].mxu0 }
0x124d   :  { %v6454_v55 = vadd.f32 %v6453_v14, %v13924_v56  ;;  %v6647_v1 = vadd.f32 %v6646_v35, %v13928_v5  ;;  %v6455_v17 = vpop.f32.mrb[225].mxu1  ;;  %v6648_v62 = vpop.f32.mrb[225].mxu0 }
0x124e   :  { %v6456_v16 = vadd.f32 %v6455_v17, %v13926_v8  ;;  %v6649_v36 = vadd.f32 %v6648_v62, %v13930_v19  ;;  %v6457_v27 = vpop.f32.mrb[226].mxu1  ;;  %v6650_v10 = vpop.f32.mrb[226].mxu0 }
0x124f   :  { %v6458_v58 = vadd.f32 %v6457_v27, %v13924_v56  ;;  %v6651_v18 = vadd.f32 %v6650_v10, %v13928_v5  ;;  %v6459_v49 = vpop.f32.mrb[227].mxu1  ;;  %v6652_v30 = vpop.f32.mrb[227].mxu0  ;;  %v6789_v44 = vmax.f32 %v6454_v55, 0.0  ;;  %v6791_v61 = vmax.f32 %v6647_v1, 0.0 }
0x1250   :  { %v6460_v33 = vadd.f32 %v6459_v49, %v13926_v8  ;;  %v6653_v42 = vadd.f32 %v6652_v30, %v13930_v19  ;;  %v6790_v45 = vmax.f32 %v6456_v16, 0.0  ;;  %v6792_v34 = vmax.f32 %v6649_v36, 0.0 }
0x1251   :  { %v6793_v12 = vmax.f32 %v6458_v58, 0.0  ;;  %v6795_v52 = vmax.f32 %v6651_v18, 0.0 }
0x1252   :  { %v6794_v54 = vmax.f32 %v6460_v33, 0.0  ;;  %v6796_v46 = vmax.f32 %v6653_v42, 0.0 }
0x1253   :  { %v6885_v57 = vpack.c.bf16 %v6793_v12, %v6789_v44  ;;  %v6887_v22 = vpack.c.bf16 %v6795_v52, %v6791_v61 }
0x1254   :  { %v6886_v39 = vpack.c.bf16 %v6794_v54, %v6790_v45  ;;  %v6888_v20 = vpack.c.bf16 %v6796_v46, %v6792_v34  ;;  %v6463_v41 = vpop.f32.mrb[228].mxu1  ;;  %v6656_v59 = vpop.f32.mrb[228].mxu0 }
0x1255   :  { %v6464_v38 = vadd.f32 %v6463_v41, %v13924_v56  ;;  %v6657_v63 = vadd.f32 %v6656_v59, %v13928_v5  ;;  %v6465_v29 = vpop.f32.mrb[229].mxu1  ;;  %v6658_v32 = vpop.f32.mrb[229].mxu0 }
0x1256   :  { %v6466_v0 = vadd.f32 %v6465_v29, %v13926_v8  ;;  %v6659_v50 = vadd.f32 %v6658_v32, %v13930_v19  ;;  %v6467_v11 = vpop.f32.mrb[230].mxu1  ;;  %v6660_v13 = vpop.f32.mrb[230].mxu0  ;;  %7276 = vmatprep.mubr.bf16.mxu1 %v6886_v39  ;;  %7437 = vmatprep.mubr.bf16.mxu0 %v6888_v20 }
0x1257   :  { %v6468_v31 = vadd.f32 %v6467_v11, %v13924_v56  ;;  %v6661_v14 = vadd.f32 %v6660_v13, %v13928_v5  ;;  %v6469_v35 = vpop.f32.mrb[231].mxu1  ;;  %v6662_v55 = vpop.f32.mrb[231].mxu0  ;;  %7277 = vmatmul.mubr.bf16.gmra.mrb[32].mxu1 %v6885_v57  ;;  %7438 = vmatmul.mubr.bf16.gmra.mrb[32].mxu0 %v6887_v22  ;;  %v6797_v62 = vmax.f32 %v6464_v38, 0.0  ;;  %v6799_v16 = vmax.f32 %v6657_v63, 0.0 }
0x1258   :  { %v6470_v1 = vadd.f32 %v6469_v35, %v13926_v8  ;;  %v6663_v17 = vadd.f32 %v6662_v55, %v13930_v19  ;;  %v6798_v10 = vmax.f32 %v6466_v0, 0.0  ;;  %v6800_v58 = vmax.f32 %v6659_v50, 0.0 }
0x1259   :  { %v6801_v36 = vmax.f32 %v6468_v31, 0.0  ;;  %v6803_v27 = vmax.f32 %v6661_v14, 0.0 }
0x125a   :  { %v6802_v18 = vmax.f32 %v6470_v1, 0.0  ;;  %v6804_v49 = vmax.f32 %v6663_v17, 0.0 }
0x125b   :  { %v6889_v30 = vpack.c.bf16 %v6801_v36, %v6797_v62  ;;  %v6891_v33 = vpack.c.bf16 %v6803_v27, %v6799_v16 }
0x125c   :  { %v6890_v42 = vpack.c.bf16 %v6802_v18, %v6798_v10  ;;  %v6892_v44 = vpack.c.bf16 %v6804_v49, %v6800_v58 }
0x125e   :  { %7284 = vmatprep.mubr.bf16.mxu1 %v6890_v42  ;;  %7445 = vmatprep.mubr.bf16.mxu0 %v6892_v44 }
0x125f   :  { %7285 = vmatmul.mubr.bf16.gmra.mrb[36].mxu1 %v6889_v30  ;;  %7446 = vmatmul.mubr.bf16.gmra.mrb[36].mxu0 %v6891_v33 }
0x1285   :  { %v6473_v61 = vpop.f32.mrb[232].mxu1  ;;  %v6666_v12 = vpop.f32.mrb[232].mxu0 }
0x1286   :  { %v6474_v52 = vadd.f32 %v6473_v61, %v13924_v56  ;;  %v6667_v45 = vadd.f32 %v6666_v12, %v13928_v5  ;;  %v6475_v34 = vpop.f32.mrb[233].mxu1  ;;  %v6668_v54 = vpop.f32.mrb[233].mxu0 }
0x1287   :  { %v6476_v46 = vadd.f32 %v6475_v34, %v13926_v8  ;;  %v6669_v57 = vadd.f32 %v6668_v54, %v13930_v19  ;;  %v6477_v22 = vpop.f32.mrb[234].mxu1  ;;  %v6670_v39 = vpop.f32.mrb[234].mxu0 }
0x1288   :  { %v6478_v20 = vadd.f32 %v6477_v22, %v13924_v56  ;;  %v6671_v41 = vadd.f32 %v6670_v39, %v13928_v5  ;;  %v6479_v59 = vpop.f32.mrb[235].mxu1  ;;  %v6672_v38 = vpop.f32.mrb[235].mxu0  ;;  %v6805_v32 = vmax.f32 %v6474_v52, 0.0  ;;  %v6807_v0 = vmax.f32 %v6667_v45, 0.0 }
0x1289   :  { %v6480_v63 = vadd.f32 %v6479_v59, %v13926_v8  ;;  %v6673_v29 = vadd.f32 %v6672_v38, %v13930_v19  ;;  %v6806_v13 = vmax.f32 %v6476_v46, 0.0  ;;  %v6808_v31 = vmax.f32 %v6669_v57, 0.0 }
0x128a   :  { %v6809_v50 = vmax.f32 %v6478_v20, 0.0  ;;  %v6811_v11 = vmax.f32 %v6671_v41, 0.0 }
0x128b   :  { %v6810_v14 = vmax.f32 %v6480_v63, 0.0  ;;  %v6812_v35 = vmax.f32 %v6673_v29, 0.0 }
0x128c   :  { %v6893_v55 = vpack.c.bf16 %v6809_v50, %v6805_v32  ;;  %v6895_v1 = vpack.c.bf16 %v6811_v11, %v6807_v0 }
0x128d   :  { %v6894_v17 = vpack.c.bf16 %v6810_v14, %v6806_v13  ;;  %v6896_v62 = vpack.c.bf16 %v6812_v35, %v6808_v31  ;;  %v6483_v16 = vpop.f32.mrb[236].mxu1  ;;  %v6676_v36 = vpop.f32.mrb[236].mxu0 }
0x128e   :  { %v6484_v27 = vadd.f32 %v6483_v16, %v13924_v56  ;;  %v6677_v10 = vadd.f32 %v6676_v36, %v13928_v5  ;;  %v6485_v58 = vpop.f32.mrb[237].mxu1  ;;  %v6678_v18 = vpop.f32.mrb[237].mxu0 }
0x128f   :  { %v6486_v49 = vadd.f32 %v6485_v58, %v13926_v8  ;;  %v6679_v30 = vadd.f32 %v6678_v18, %v13930_v19  ;;  %v6487_v33 = vpop.f32.mrb[238].mxu1  ;;  %v6680_v42 = vpop.f32.mrb[238].mxu0  ;;  %7292 = vmatprep.mubr.bf16.mxu1 %v6894_v17  ;;  %7453 = vmatprep.mubr.bf16.mxu0 %v6896_v62 }
0x1290   :  { %v6488_v44 = vadd.f32 %v6487_v33, %v13924_v56  ;;  %v6681_v61 = vadd.f32 %v6680_v42, %v13928_v5  ;;  %v6489_v12 = vpop.f32.mrb[239].mxu1  ;;  %v6682_v52 = vpop.f32.mrb[239].mxu0  ;;  %7293 = vmatmul.mubr.bf16.gmra.mrb[40].mxu1 %v6893_v55  ;;  %7454 = vmatmul.mubr.bf16.gmra.mrb[40].mxu0 %v6895_v1  ;;  %v6813_v54 = vmax.f32 %v6484_v27, 0.0  ;;  %v6815_v46 = vmax.f32 %v6677_v10, 0.0 }
0x1291   :  { %v6490_v45 = vadd.f32 %v6489_v12, %v13926_v8  ;;  %v6683_v34 = vadd.f32 %v6682_v52, %v13930_v19  ;;  %v6814_v39 = vmax.f32 %v6486_v49, 0.0  ;;  %v6816_v20 = vmax.f32 %v6679_v30, 0.0 }
0x1292   :  { %v6817_v57 = vmax.f32 %v6488_v44, 0.0  ;;  %v6819_v22 = vmax.f32 %v6681_v61, 0.0 }
0x1293   :  { %v6818_v41 = vmax.f32 %v6490_v45, 0.0  ;;  %v6820_v59 = vmax.f32 %v6683_v34, 0.0 }
0x1294   :  { %v6897_v38 = vpack.c.bf16 %v6817_v57, %v6813_v54  ;;  %v6899_v63 = vpack.c.bf16 %v6819_v22, %v6815_v46 }
0x1295   :  { %v6898_v29 = vpack.c.bf16 %v6818_v41, %v6814_v39  ;;  %v6900_v32 = vpack.c.bf16 %v6820_v59, %v6816_v20  ;;  %v6493_v0 = vpop.f32.mrb[240].mxu1  ;;  %v6686_v50 = vpop.f32.mrb[240].mxu0 }
0x1296   :  { %v6494_v11 = vadd.f32 %v6493_v0, %v13924_v56  ;;  %v6687_v13 = vadd.f32 %v6686_v50, %v13928_v5  ;;  %v6495_v31 = vpop.f32.mrb[241].mxu1  ;;  %v6688_v14 = vpop.f32.mrb[241].mxu0 }
0x1297   :  { %v6496_v35 = vadd.f32 %v6495_v31, %v13926_v8  ;;  %v6689_v55 = vadd.f32 %v6688_v14, %v13930_v19  ;;  %v6497_v1 = vpop.f32.mrb[242].mxu1  ;;  %v6690_v17 = vpop.f32.mrb[242].mxu0  ;;  %7300 = vmatprep.mubr.bf16.mxu1 %v6898_v29  ;;  %7461 = vmatprep.mubr.bf16.mxu0 %v6900_v32 }
0x1298   :  { %v6498_v62 = vadd.f32 %v6497_v1, %v13924_v56  ;;  %v6691_v16 = vadd.f32 %v6690_v17, %v13928_v5  ;;  %v6499_v36 = vpop.f32.mrb[243].mxu1  ;;  %v6692_v27 = vpop.f32.mrb[243].mxu0  ;;  %7301 = vmatmul.mubr.bf16.gmra.mrb[44].mxu1 %v6897_v38  ;;  %7462 = vmatmul.mubr.bf16.gmra.mrb[44].mxu0 %v6899_v63  ;;  %v6821_v18 = vmax.f32 %v6494_v11, 0.0  ;;  %v6823_v49 = vmax.f32 %v6687_v13, 0.0 }
0x1299   :  { %v6500_v10 = vadd.f32 %v6499_v36, %v13926_v8  ;;  %v6693_v58 = vadd.f32 %v6692_v27, %v13930_v19  ;;  %v6822_v42 = vmax.f32 %v6496_v35, 0.0  ;;  %v6824_v44 = vmax.f32 %v6689_v55, 0.0 }
0x129a   :  { %v6825_v30 = vmax.f32 %v6498_v62, 0.0  ;;  %v6827_v33 = vmax.f32 %v6691_v16, 0.0 }
0x129b   :  { %v6826_v61 = vmax.f32 %v6500_v10, 0.0  ;;  %v6828_v12 = vmax.f32 %v6693_v58, 0.0 }
0x129c   :  { %v6901_v52 = vpack.c.bf16 %v6825_v30, %v6821_v18  ;;  %v6903_v45 = vpack.c.bf16 %v6827_v33, %v6823_v49 }
0x129d   :  { %v6902_v34 = vpack.c.bf16 %v6826_v61, %v6822_v42  ;;  %v6904_v54 = vpack.c.bf16 %v6828_v12, %v6824_v44 }
0x129e   :  { %v6503_v46 = vpop.f32.mrb[244].mxu1  ;;  %v6696_v57 = vpop.f32.mrb[244].mxu0 }
0x129f   :  { %7308 = vmatprep.mubr.bf16.mxu1 %v6902_v34  ;;  %7469 = vmatprep.mubr.bf16.mxu0 %v6904_v54  ;;  %v6504_v22 = vadd.f32 %v6503_v46, %v13924_v56  ;;  %v6697_v39 = vadd.f32 %v6696_v57, %v13928_v5  ;;  %v6505_v20 = vpop.f32.mrb[245].mxu1  ;;  %v6698_v41 = vpop.f32.mrb[245].mxu0 }
0x12a0   :  { %7309 = vmatmul.mubr.bf16.gmra.mrb[48].mxu1 %v6901_v52  ;;  %7470 = vmatmul.mubr.bf16.gmra.mrb[48].mxu0 %v6903_v45  ;;  %v6506_v59 = vadd.f32 %v6505_v20, %v13926_v8  ;;  %v6699_v38 = vadd.f32 %v6698_v41, %v13930_v19  ;;  %v6507_v63 = vpop.f32.mrb[246].mxu1  ;;  %v6700_v29 = vpop.f32.mrb[246].mxu0 }
0x12a1   :  { %v6508_v32 = vadd.f32 %v6507_v63, %v13924_v56  ;;  %v6701_v0 = vadd.f32 %v6700_v29, %v13928_v5  ;;  %v6509_v50 = vpop.f32.mrb[247].mxu1  ;;  %v6702_v11 = vpop.f32.mrb[247].mxu0  ;;  %v6829_v14 = vmax.f32 %v6504_v22, 0.0  ;;  %v6831_v35 = vmax.f32 %v6697_v39, 0.0 }
0x12a2   :  { %v6510_v13 = vadd.f32 %v6509_v50, %v13926_v8  ;;  %v6703_v31 = vadd.f32 %v6702_v11, %v13930_v19  ;;  %v6830_v17 = vmax.f32 %v6506_v59, 0.0  ;;  %v6832_v62 = vmax.f32 %v6699_v38, 0.0 }
0x12a3   :  { %v6833_v55 = vmax.f32 %v6508_v32, 0.0  ;;  %v6835_v1 = vmax.f32 %v6701_v0, 0.0 }
0x12a4   :  { %v6834_v16 = vmax.f32 %v6510_v13, 0.0  ;;  %v6836_v36 = vmax.f32 %v6703_v31, 0.0 }
0x12a5   :  { %v6905_v27 = vpack.c.bf16 %v6833_v55, %v6829_v14  ;;  %v6907_v10 = vpack.c.bf16 %v6835_v1, %v6831_v35 }
0x12a6   :  { %v6906_v58 = vpack.c.bf16 %v6834_v16, %v6830_v17  ;;  %v6908_v18 = vpack.c.bf16 %v6836_v36, %v6832_v62 }
0x12a8   :  { %v6513_v49 = vpop.f32.mrb[248].mxu1  ;;  %v6706_v30 = vpop.f32.mrb[248].mxu0  ;;  %7316 = vmatprep.mubr.bf16.mxu1 %v6906_v58  ;;  %7477 = vmatprep.mubr.bf16.mxu0 %v6908_v18 }
0x12a9   :  { %v6514_v33 = vadd.f32 %v6513_v49, %v13924_v56  ;;  %v6707_v42 = vadd.f32 %v6706_v30, %v13928_v5  ;;  %v6515_v44 = vpop.f32.mrb[249].mxu1  ;;  %v6708_v61 = vpop.f32.mrb[249].mxu0  ;;  %7317 = vmatmul.mubr.bf16.gmra.mrb[52].mxu1 %v6905_v27  ;;  %7478 = vmatmul.mubr.bf16.gmra.mrb[52].mxu0 %v6907_v10 }
0x12aa   :  { %v6516_v12 = vadd.f32 %v6515_v44, %v13926_v8  ;;  %v6709_v52 = vadd.f32 %v6708_v61, %v13930_v19  ;;  %v6517_v45 = vpop.f32.mrb[250].mxu1  ;;  %v6710_v34 = vpop.f32.mrb[250].mxu0 }
0x12ab   :  { %v6518_v54 = vadd.f32 %v6517_v45, %v13924_v56  ;;  %v6711_v46 = vadd.f32 %v6710_v34, %v13928_v5  ;;  %v6519_v57 = vpop.f32.mrb[251].mxu1  ;;  %v6712_v22 = vpop.f32.mrb[251].mxu0  ;;  %v6837_v41 = vmax.f32 %v6514_v33, 0.0  ;;  %v6839_v59 = vmax.f32 %v6707_v42, 0.0 }
0x12ac   :  { %v6520_v39 = vadd.f32 %v6519_v57, %v13926_v8  ;;  %v6713_v20 = vadd.f32 %v6712_v22, %v13930_v19  ;;  %v6838_v29 = vmax.f32 %v6516_v12, 0.0  ;;  %v6840_v32 = vmax.f32 %v6709_v52, 0.0 }
0x12ad   :  { %v6841_v38 = vmax.f32 %v6518_v54, 0.0  ;;  %v6843_v63 = vmax.f32 %v6711_v46, 0.0 }
0x12ae   :  { %v6842_v0 = vmax.f32 %v6520_v39, 0.0  ;;  %v6844_v50 = vmax.f32 %v6713_v20, 0.0 }
0x12af   :  { %v6909_v11 = vpack.c.bf16 %v6841_v38, %v6837_v41  ;;  %v6911_v13 = vpack.c.bf16 %v6843_v63, %v6839_v59 }
0x12b0   :  { %v6910_v31 = vpack.c.bf16 %v6842_v0, %v6838_v29  ;;  %v6912_v14 = vpack.c.bf16 %v6844_v50, %v6840_v32  ;;  %v6523_v35 = vpop.f32.mrb[252].mxu1  ;;  %v6716_v55 = vpop.f32.mrb[252].mxu0 }
0x12b1   :  { %v6524_v1 = vadd.f32 %v6523_v35, %v13924_v56  ;;  %v6717_v17 = vadd.f32 %v6716_v55, %v13928_v5  ;;  %v6525_v62 = vpop.f32.mrb[253].mxu1  ;;  %v6718_v16 = vpop.f32.mrb[253].mxu0 }
0x12b2   :  { %v6526_v36 = vadd.f32 %v6525_v62, %v13926_v8  ;;  %v6719_v27 = vadd.f32 %v6718_v16, %v13930_v19  ;;  %v6527_v10 = vpop.f32.mrb[254].mxu1  ;;  %v6720_v58 = vpop.f32.mrb[254].mxu0  ;;  %7324 = vmatprep.mubr.bf16.mxu1 %v6910_v31  ;;  %7485 = vmatprep.mubr.bf16.mxu0 %v6912_v14 }
0x12b3   :  { %v6528_v18 = vadd.f32 %v6527_v10, %v13924_v56  ;;  %v6721_v49 = vadd.f32 %v6720_v58, %v13928_v5  ;;  %v6529_v30 = vpop.f32.mrb[255].mxu1  ;;  %v6722_v33 = vpop.f32.mrb[255].mxu0  ;;  %7325 = vmatmul.mubr.bf16.gmra.mrb[56].mxu1 %v6909_v11  ;;  %7486 = vmatmul.mubr.bf16.gmra.mrb[56].mxu0 %v6911_v13  ;;  %v6845_v61 = vmax.f32 %v6524_v1, 0.0  ;;  %v6847_v12 = vmax.f32 %v6717_v17, 0.0 }
0x12b4   :  { %v6530_v42 = vadd.f32 %v6529_v30, %v13926_v8  ;;  %v6723_v44 = vadd.f32 %v6722_v33, %v13930_v19  ;;  %v6846_v34 = vmax.f32 %v6526_v36, 0.0  ;;  %v6848_v54 = vmax.f32 %v6719_v27, 0.0  ;;  %v14089_v8 = vld [vmem:[%s14181_s11] ss:$0 sm:$0xff]  ;;  %s9932_s11 = smov [#allocation12]  }
0x12b5   :  { %v6849_v52 = vmax.f32 %v6528_v18, 0.0  ;;  %v6851_v45 = vmax.f32 %v6721_v49, 0.0  ;;  %s7571_s21 = sshll.u32 %s9932_s11, 4  ;;  %s7572_s21 = int_to_ptr.vmem [resolvable:$true] %s7571_s21 }
0x12b6   :  { %v6850_v46 = vmax.f32 %v6530_v42, 0.0  ;;  %v6852_v57 = vmax.f32 %v6723_v44, 0.0  ;;  %s9886_s23 = scalar_lea.vmem %s7572_s21, 4096  ;;  %p9891_p13 = scmp.lt.s32.totalorder %s7572_s21, %s7572_s21 }
0x12b7   :  { %v6913_v22 = vpack.c.bf16 %v6849_v52, %v6845_v61  ;;  %v6915_v56 = vpack.c.bf16 %v6851_v45, %v6847_v12  ;;  %p9887_p12 = scmp.ne.s32.totalorder %s7572_s21, %s9886_s23  ;;  %p9892_p0 = scmp.lt.s32.totalorder %s9886_s23, %s9886_s23 }
0x12b8   :  { %v6914_v39 = vpack.c.bf16 %v6850_v46, %v6846_v34  ;;  %v6916_v5 = vpack.c.bf16 %v6852_v57, %v6848_v54  ;;  %v8071_v20 = vpop.f32.mrb[0].mxu1  ;;  %v8183_v41 = vpop.f32.mrb[0].mxu0 }
0x12b9   :  { %v8072_v19 = vpop.f32.mrb[1].mxu1  ;;  %v8184_v59 = vpop.f32.mrb[1].mxu0  ;;  %p9893_p1 = por %p9892_p0, %p9891_p13 }
0x12ba   :  { %v8073_v38 = vadd.f32 %v8072_v19, %v8071_v20  ;;  %v8185_v63 = vadd.f32 %v8184_v59, %v8183_v41  ;;  %v8074_v29 = vpop.f32.mrb[2].mxu1  ;;  %7332 = vmatprep.mubr.bf16.mxu1 %v6914_v39  ;;  %v8186_v32 = vpop.f32.mrb[2].mxu0  ;;  %7493 = vmatprep.mubr.bf16.mxu0 %v6916_v5 }
0x12bb   :  { %v8075_v0 = vpop.f32.mrb[3].mxu1  ;;  %7333 = vmatmul.mubr.bf16.gmra.mrb[60].mxu1 %v6913_v22  ;;  %v8187_v50 = vpop.f32.mrb[3].mxu0  ;;  %7494 = vmatmul.mubr.bf16.gmra.mrb[60].mxu0 %v6915_v56  ;;  %p9894_p2 = pnand %p9893_p1, %p9887_p12 }
0x12bc   :  { %v7215_v11 = vadd.f32 %v8073_v38, %v14089_v8  ;;  %v8076_v13 = vadd.f32 %v8075_v0, %v8074_v29  ;;  %v8188_v31 = vadd.f32 %v8187_v50, %v8186_v32 }
0x12be   :  { %v7376_v14 = vadd.f32 %v8185_v63, %v7215_v11  ;;  %v7218_v35 = vadd.f32 %v8076_v13, %v14089_v8 }
0x12c0   :  { %v7502_v55 = vadd.f32 %v7376_v14, %v13498_v28  ;;  %v7379_v1 = vadd.f32 %v8188_v31, %v7218_v35 }
0x12c2   :  { %7534 = vst [vmem:[#allocation12] sm:$0xff] %v7502_v55  ;;  %v7503_v17 = vadd.f32 %v7379_v1, %v13510_v7 }
0x12c4   :  { %7535 = vst [vmem:[#allocation12 + $0x8] sm:$0xff] %v7503_v17 }
0x12d3   :  { %v8077_v62 = vpop.f32.mrb[4].mxu1  ;;  %v8189_v16 = vpop.f32.mrb[4].mxu0 }
0x12d4   :  { %v8078_v36 = vpop.f32.mrb[5].mxu1  ;;  %v8190_v27 = vpop.f32.mrb[5].mxu0 }
0x12d5   :  { %v8079_v10 = vadd.f32 %v8078_v36, %v8077_v62  ;;  %v8191_v58 = vadd.f32 %v8190_v27, %v8189_v16  ;;  %v8080_v18 = vpop.f32.mrb[6].mxu1  ;;  %v8192_v49 = vpop.f32.mrb[6].mxu0 }
0x12d6   :  { %v8081_v30 = vpop.f32.mrb[7].mxu1  ;;  %v8193_v33 = vpop.f32.mrb[7].mxu0 }
0x12d7   :  { %v7223_v42 = vadd.f32 %v8079_v10, %v14089_v8  ;;  %v8082_v44 = vadd.f32 %v8081_v30, %v8080_v18  ;;  %v8194_v61 = vadd.f32 %v8193_v33, %v8192_v49 }
0x12d9   :  { %v7384_v28 = vadd.f32 %v8191_v58, %v7223_v42  ;;  %v7226_v12 = vadd.f32 %v8082_v44, %v14089_v8 }
0x12db   :  { %v7504_v7 = vadd.f32 %v7384_v28, %v13502_v6  ;;  %v7387_v52 = vadd.f32 %v8194_v61, %v7226_v12  ;;  %v8083_v45 = vpop.f32.mrb[8].mxu1  ;;  %v8195_v34 = vpop.f32.mrb[8].mxu0 }
0x12dc   :  { %v8084_v54 = vpop.f32.mrb[9].mxu1  ;;  %v8196_v46 = vpop.f32.mrb[9].mxu0 }
0x12dd   :  { %7536 = vst [vmem:[#allocation12 + $0x10] sm:$0xff] %v7504_v7  ;;  %v7505_v57 = vadd.f32 %v7387_v52, %v13508_v25  ;;  %v8085_v22 = vadd.f32 %v8084_v54, %v8083_v45  ;;  %v8197_v56 = vadd.f32 %v8196_v46, %v8195_v34  ;;  %v8086_v39 = vpop.f32.mrb[10].mxu1  ;;  %v8198_v5 = vpop.f32.mrb[10].mxu0 }
0x12de   :  { %v8087_v20 = vpop.f32.mrb[11].mxu1  ;;  %v8199_v41 = vpop.f32.mrb[11].mxu0 }
0x12df   :  { %7537 = vst [vmem:[#allocation12 + $0x18] sm:$0xff] %v7505_v57  ;;  %v7231_v19 = vadd.f32 %v8085_v22, %v14089_v8  ;;  %v8088_v59 = vadd.f32 %v8087_v20, %v8086_v39  ;;  %v8200_v38 = vadd.f32 %v8199_v41, %v8198_v5 }
0x12e1   :  { %v7392_v6 = vadd.f32 %v8197_v56, %v7231_v19  ;;  %v7234_v63 = vadd.f32 %v8088_v59, %v14089_v8 }
0x12e3   :  { %v7506_v29 = vadd.f32 %v7392_v6, %v13517_v23  ;;  %v7395_v32 = vadd.f32 %v8200_v38, %v7234_v63  ;;  %v8089_v0 = vpop.f32.mrb[12].mxu1  ;;  %v8201_v50 = vpop.f32.mrb[12].mxu0 }
0x12e4   :  { %v8090_v25 = vpop.f32.mrb[13].mxu1  ;;  %v8202_v11 = vpop.f32.mrb[13].mxu0 }
0x12e5   :  { %7538 = vst [vmem:[#allocation12 + $0x20] sm:$0xff] %v7506_v29  ;;  %v7507_v13 = vadd.f32 %v7395_v32, %v13520_v37  ;;  %v8091_v31 = vadd.f32 %v8090_v25, %v8089_v0  ;;  %v8203_v14 = vadd.f32 %v8202_v11, %v8201_v50  ;;  %v8092_v35 = vpop.f32.mrb[14].mxu1  ;;  %v8204_v55 = vpop.f32.mrb[14].mxu0 }
0x12e6   :  { %v8093_v1 = vpop.f32.mrb[15].mxu1  ;;  %v8205_v17 = vpop.f32.mrb[15].mxu0 }
0x12e7   :  { %7539 = vst [vmem:[#allocation12 + $0x28] sm:$0xff] %v7507_v13  ;;  %v7239_v62 = vadd.f32 %v8091_v31, %v14089_v8  ;;  %v8094_v16 = vadd.f32 %v8093_v1, %v8092_v35  ;;  %v8206_v36 = vadd.f32 %v8205_v17, %v8204_v55 }
0x12e9   :  { %v7400_v23 = vadd.f32 %v8203_v14, %v7239_v62  ;;  %v7242_v27 = vadd.f32 %v8094_v16, %v14089_v8 }
0x12eb   :  { %v7508_v10 = vadd.f32 %v7400_v23, %v13524_v60  ;;  %v7403_v58 = vadd.f32 %v8206_v36, %v7242_v27  ;;  %v8095_v18 = vpop.f32.mrb[16].mxu1  ;;  %v8207_v49 = vpop.f32.mrb[16].mxu0 }
0x12ec   :  { %v8096_v37 = vpop.f32.mrb[17].mxu1  ;;  %v8208_v30 = vpop.f32.mrb[17].mxu0 }
0x12ed   :  { %7540 = vst [vmem:[#allocation12 + $0x30] sm:$0xff] %v7508_v10  ;;  %v7509_v33 = vadd.f32 %v7403_v58, %v13526_v24  ;;  %v8097_v42 = vadd.f32 %v8096_v37, %v8095_v18  ;;  %v8209_v44 = vadd.f32 %v8208_v30, %v8207_v49  ;;  %v8098_v61 = vpop.f32.mrb[18].mxu1  ;;  %v8210_v28 = vpop.f32.mrb[18].mxu0 }
0x12ee   :  { %v8099_v12 = vpop.f32.mrb[19].mxu1  ;;  %v8211_v7 = vpop.f32.mrb[19].mxu0 }
0x12ef   :  { %7541 = vst [vmem:[#allocation12 + $0x38] sm:$0xff] %v7509_v33  ;;  %v7247_v52 = vadd.f32 %v8097_v42, %v14089_v8  ;;  %v8100_v45 = vadd.f32 %v8099_v12, %v8098_v61  ;;  %v8212_v34 = vadd.f32 %v8211_v7, %v8210_v28 }
0x12f1   :  { %v7408_v60 = vadd.f32 %v8209_v44, %v7247_v52  ;;  %v7250_v54 = vadd.f32 %v8100_v45, %v14089_v8 }
0x12f3   :  { %v7510_v46 = vadd.f32 %v7408_v60, %v13533_v51  ;;  %v7411_v57 = vadd.f32 %v8212_v34, %v7250_v54 }
0x12f5   :  { %7542 = vst [vmem:[#allocation12 + $0x40] sm:$0xff] %v7510_v46  ;;  %v7511_v24 = vadd.f32 %v7411_v57, %v13536_v43  ;;  %v15250_v57 = vld [vmem:[#allocation95_spill] sm:$0xff] }
0x12f6   :  { %v8101_v22 = vpop.f32.mrb[20].mxu1  ;;  %v8213_v56 = vpop.f32.mrb[20].mxu0 }
0x12f7   :  { %7543 = vst [vmem:[#allocation12 + $0x48] sm:$0xff] %v7511_v24  ;;  %v8102_v39 = vpop.f32.mrb[21].mxu1  ;;  %v8214_v5 = vpop.f32.mrb[21].mxu0 }
0x12f8   :  { %v8103_v20 = vadd.f32 %v8102_v39, %v8101_v22  ;;  %v8215_v41 = vadd.f32 %v8214_v5, %v8213_v56  ;;  %v8104_v19 = vpop.f32.mrb[22].mxu1  ;;  %v8216_v59 = vpop.f32.mrb[22].mxu0 }
0x12f9   :  { %v8105_v38 = vpop.f32.mrb[23].mxu1  ;;  %v8217_v6 = vpop.f32.mrb[23].mxu0 }
0x12fa   :  { %v7255_v63 = vadd.f32 %v8103_v20, %v14089_v8  ;;  %v8106_v29 = vadd.f32 %v8105_v38, %v8104_v19  ;;  %v8218_v32 = vadd.f32 %v8217_v6, %v8216_v59 }
0x12fc   :  { %v7416_v51 = vadd.f32 %v8215_v41, %v7255_v63  ;;  %v7258_v0 = vadd.f32 %v8106_v29, %v14089_v8 }
0x12fe   :  { %v7512_v43 = vadd.f32 %v7416_v51, %v13540_v4  ;;  %v7419_v50 = vadd.f32 %v8218_v32, %v7258_v0  ;;  %v8107_v25 = vpop.f32.mrb[24].mxu1  ;;  %v8219_v11 = vpop.f32.mrb[24].mxu0  ;;  %v15251_v51 = vld [vmem:[#allocation18_spill] sm:$0xff] }
0x12ff   :  { %v8108_v13 = vpop.f32.mrb[25].mxu1  ;;  %v8220_v31 = vpop.f32.mrb[25].mxu0 }
0x1300   :  { %7544 = vst [vmem:[#allocation12 + $0x50] sm:$0xff] %v7512_v43  ;;  %v7513_v14 = vadd.f32 %v7419_v50, %v13542_v2  ;;  %v8109_v35 = vadd.f32 %v8108_v13, %v8107_v25  ;;  %v8221_v55 = vadd.f32 %v8220_v31, %v8219_v11  ;;  %v8110_v1 = vpop.f32.mrb[26].mxu1  ;;  %v8222_v17 = vpop.f32.mrb[26].mxu0  ;;  %v15252_v31 = vld [vmem:[#allocation96_spill] sm:$0xff] }
0x1301   :  { %v8111_v62 = vpop.f32.mrb[27].mxu1  ;;  %v8223_v16 = vpop.f32.mrb[27].mxu0 }
0x1302   :  { %7545 = vst [vmem:[#allocation12 + $0x58] sm:$0xff] %v7513_v14  ;;  %v7263_v36 = vadd.f32 %v8109_v35, %v14089_v8  ;;  %v8112_v23 = vadd.f32 %v8111_v62, %v8110_v1  ;;  %v8224_v27 = vadd.f32 %v8223_v16, %v8222_v17 }
0x1304   :  { %v7424_v4 = vadd.f32 %v8221_v55, %v7263_v36  ;;  %v7266_v10 = vadd.f32 %v8112_v23, %v14089_v8 }
0x1306   :  { %v7514_v58 = vadd.f32 %v7424_v4, %v13551_v47  ;;  %v7427_v18 = vadd.f32 %v8224_v27, %v7266_v10  ;;  %v8113_v49 = vpop.f32.mrb[28].mxu1  ;;  %v8225_v37 = vpop.f32.mrb[28].mxu0 }
0x1307   :  { %v8114_v2 = vpop.f32.mrb[29].mxu1  ;;  %v8226_v30 = vpop.f32.mrb[29].mxu0 }
0x1308   :  { %7546 = vst [vmem:[#allocation12 + $0x60] sm:$0xff] %v7514_v58  ;;  %v7515_v33 = vadd.f32 %v7427_v18, %v13555_v9  ;;  %v8115_v42 = vadd.f32 %v8114_v2, %v8113_v49  ;;  %v8227_v44 = vadd.f32 %v8226_v30, %v8225_v37  ;;  %v8116_v61 = vpop.f32.mrb[30].mxu1  ;;  %v8228_v28 = vpop.f32.mrb[30].mxu0  ;;  %v15253_v58 = vld [vmem:[#allocation119_spill] sm:$0xff] }
0x1309   :  { %v8117_v12 = vpop.f32.mrb[31].mxu1  ;;  %v8229_v7 = vpop.f32.mrb[31].mxu0  ;;  %v15254_v37 = vld [vmem:[#allocation99_spill] sm:$0xff] }
0x130a   :  { %7547 = vst [vmem:[#allocation12 + $0x68] sm:$0xff] %v7515_v33  ;;  %v7271_v52 = vadd.f32 %v8115_v42, %v14089_v8  ;;  %v8118_v45 = vadd.f32 %v8117_v12, %v8116_v61  ;;  %v8230_v34 = vadd.f32 %v8229_v7, %v8228_v28 }
0x130c   :  { %v7432_v47 = vadd.f32 %v8227_v44, %v7271_v52  ;;  %v7274_v60 = vadd.f32 %v8118_v45, %v14089_v8 }
0x130e   :  { %v7516_v54 = vadd.f32 %v7432_v47, %v13560_v26  ;;  %v7435_v46 = vadd.f32 %v8230_v34, %v7274_v60 }
0x1310   :  { %7548 = vst [vmem:[#allocation12 + $0x70] sm:$0xff] %v7516_v54  ;;  %v7517_v9 = vadd.f32 %v7435_v46, %v15250_v57  ;;  %v15255_v57 = vld [vmem:[#allocation123_spill] sm:$0xff] }
0x1312   :  { %7549 = vst [vmem:[#allocation12 + $0x78] sm:$0xff] %v7517_v9 }
0x132a   :  { %v8119_v24 = vpop.f32.mrb[32].mxu1  ;;  %v8231_v22 = vpop.f32.mrb[32].mxu0 }
0x132b   :  { %v8120_v56 = vpop.f32.mrb[33].mxu1  ;;  %v8232_v39 = vpop.f32.mrb[33].mxu0 }
0x132c   :  { %v8121_v5 = vadd.f32 %v8120_v56, %v8119_v24  ;;  %v8233_v20 = vadd.f32 %v8232_v39, %v8231_v22  ;;  %v8122_v41 = vpop.f32.mrb[34].mxu1  ;;  %v8234_v19 = vpop.f32.mrb[34].mxu0 }
0x132d   :  { %v8123_v59 = vpop.f32.mrb[35].mxu1  ;;  %v8235_v38 = vpop.f32.mrb[35].mxu0 }
0x132e   :  { %v7279_v6 = vadd.f32 %v8121_v5, %v14089_v8  ;;  %v8124_v63 = vadd.f32 %v8123_v59, %v8122_v41  ;;  %v8236_v29 = vadd.f32 %v8235_v38, %v8234_v19 }
0x1330   :  { %v7440_v26 = vadd.f32 %v8233_v20, %v7279_v6  ;;  %v7282_v32 = vadd.f32 %v8124_v63, %v14089_v8  ;;  %v15256_v20 = vld [vmem:[#allocation97_spill] sm:$0xff] }
0x1332   :  { %v7518_v0 = vadd.f32 %v7440_v26, %v15251_v51  ;;  %v7443_v43 = vadd.f32 %v8236_v29, %v7282_v32  ;;  %v8125_v50 = vpop.f32.mrb[36].mxu1  ;;  %v8237_v25 = vpop.f32.mrb[36].mxu0 }
0x1333   :  { %v8126_v11 = vpop.f32.mrb[37].mxu1  ;;  %v8238_v13 = vpop.f32.mrb[37].mxu0 }
0x1334   :  { %7550 = vst [vmem:[#allocation12 + $0x80] sm:$0xff] %v7518_v0  ;;  %v7519_v14 = vadd.f32 %v7443_v43, %v15252_v31  ;;  %v8127_v35 = vadd.f32 %v8126_v11, %v8125_v50  ;;  %v8239_v55 = vadd.f32 %v8238_v13, %v8237_v25  ;;  %v8128_v1 = vpop.f32.mrb[38].mxu1  ;;  %v8240_v17 = vpop.f32.mrb[38].mxu0  ;;  %v15257_v50 = vld [vmem:[#allocation155_spill] sm:$0xff] }
0x1335   :  { %v8129_v62 = vpop.f32.mrb[39].mxu1  ;;  %v8241_v16 = vpop.f32.mrb[39].mxu0 }
0x1336   :  { %7551 = vst [vmem:[#allocation12 + $0x88] sm:$0xff] %v7519_v14  ;;  %v7287_v36 = vadd.f32 %v8127_v35, %v14089_v8  ;;  %v8130_v23 = vadd.f32 %v8129_v62, %v8128_v1  ;;  %v8242_v27 = vadd.f32 %v8241_v16, %v8240_v17 }
0x1338   :  { %v7448_v4 = vadd.f32 %v8239_v55, %v7287_v36  ;;  %v7290_v10 = vadd.f32 %v8130_v23, %v14089_v8  ;;  %v15258_v55 = vld [vmem:[#allocation157_spill] sm:$0xff] }
0x133a   :  { %v7520_v18 = vadd.f32 %v7448_v4, %v15253_v58  ;;  %v7451_v49 = vadd.f32 %v8242_v27, %v7290_v10 }
0x133c   :  { %7552 = vst [vmem:[#allocation12 + $0x90] sm:$0xff] %v7520_v18  ;;  %v7521_v2 = vadd.f32 %v7451_v49, %v15254_v37  ;;  %v15259_v37 = vld [vmem:[#allocation94_spill] sm:$0xff] }
0x133e   :  { %7553 = vst [vmem:[#allocation12 + $0x98] sm:$0xff] %v7521_v2 }
0x1363   :  { %v8131_v30 = vpop.f32.mrb[40].mxu1  ;;  %v8243_v33 = vpop.f32.mrb[40].mxu0 }
0x1364   :  { %v8132_v42 = vpop.f32.mrb[41].mxu1  ;;  %v8244_v44 = vpop.f32.mrb[41].mxu0 }
0x1365   :  { %v8133_v61 = vadd.f32 %v8132_v42, %v8131_v30  ;;  %v8245_v28 = vadd.f32 %v8244_v44, %v8243_v33  ;;  %v8134_v12 = vpop.f32.mrb[42].mxu1  ;;  %v8246_v7 = vpop.f32.mrb[42].mxu0  ;;  %v15260_v33 = vld [vmem:[#allocation93_spill] sm:$0xff] }
0x1366   :  { %v8135_v52 = vpop.f32.mrb[43].mxu1  ;;  %v8247_v45 = vpop.f32.mrb[43].mxu0 }
0x1367   :  { %v7295_v34 = vadd.f32 %v8133_v61, %v14089_v8  ;;  %v8136_v47 = vadd.f32 %v8135_v52, %v8134_v12  ;;  %v8248_v60 = vadd.f32 %v8247_v45, %v8246_v7 }
0x1369   :  { %v7456_v54 = vadd.f32 %v8245_v28, %v7295_v34  ;;  %v7298_v46 = vadd.f32 %v8136_v47, %v14089_v8 }
0x136b   :  { %v7522_v9 = vadd.f32 %v7456_v54, %v15255_v57  ;;  %v7459_v24 = vadd.f32 %v8248_v60, %v7298_v46  ;;  %v8137_v22 = vpop.f32.mrb[44].mxu1  ;;  %v8249_v56 = vpop.f32.mrb[44].mxu0 }
0x136c   :  { %v8138_v39 = vpop.f32.mrb[45].mxu1  ;;  %v8250_v5 = vpop.f32.mrb[45].mxu0 }
0x136d   :  { %7554 = vst [vmem:[#allocation12 + $0xa0] sm:$0xff] %v7522_v9  ;;  %v7523_v41 = vadd.f32 %v7459_v24, %v15256_v20  ;;  %v8139_v19 = vadd.f32 %v8138_v39, %v8137_v22  ;;  %v8251_v59 = vadd.f32 %v8250_v5, %v8249_v56  ;;  %v8140_v38 = vpop.f32.mrb[46].mxu1  ;;  %v8252_v6 = vpop.f32.mrb[46].mxu0 }
0x136e   :  { %v8141_v63 = vpop.f32.mrb[47].mxu1  ;;  %v8253_v29 = vpop.f32.mrb[47].mxu0 }
0x136f   :  { %7555 = vst [vmem:[#allocation12 + $0xa8] sm:$0xff] %v7523_v41  ;;  %v7303_v26 = vadd.f32 %v8139_v19, %v14089_v8  ;;  %v8142_v32 = vadd.f32 %v8141_v63, %v8140_v38  ;;  %v8254_v51 = vadd.f32 %v8253_v29, %v8252_v6 }
0x1371   :  { %v7464_v0 = vadd.f32 %v8251_v59, %v7303_v26  ;;  %v7306_v43 = vadd.f32 %v8142_v32, %v14089_v8 }
0x1373   :  { %v7524_v25 = vadd.f32 %v7464_v0, %v15257_v50  ;;  %v7467_v11 = vadd.f32 %v8254_v51, %v7306_v43  ;;  %v8143_v13 = vpop.f32.mrb[48].mxu1  ;;  %v8255_v31 = vpop.f32.mrb[48].mxu0 }
0x1374   :  { %v8144_v14 = vpop.f32.mrb[49].mxu1  ;;  %v8256_v35 = vpop.f32.mrb[49].mxu0 }
0x1375   :  { %7556 = vst [vmem:[#allocation12 + $0xb0] sm:$0xff] %v7524_v25  ;;  %v7525_v1 = vadd.f32 %v7467_v11, %v15258_v55  ;;  %v8145_v17 = vadd.f32 %v8144_v14, %v8143_v13  ;;  %v8257_v62 = vadd.f32 %v8256_v35, %v8255_v31  ;;  %v8146_v16 = vpop.f32.mrb[50].mxu1  ;;  %v8258_v36 = vpop.f32.mrb[50].mxu0 }
0x1376   :  { %v8147_v23 = vpop.f32.mrb[51].mxu1  ;;  %v8259_v27 = vpop.f32.mrb[51].mxu0 }
0x1377   :  { %7557 = vst [vmem:[#allocation12 + $0xb8] sm:$0xff] %v7525_v1  ;;  %v7311_v4 = vadd.f32 %v8145_v17, %v14089_v8  ;;  %v8148_v10 = vadd.f32 %v8147_v23, %v8146_v16  ;;  %v8260_v58 = vadd.f32 %v8259_v27, %v8258_v36 }
0x1379   :  { %v7472_v18 = vadd.f32 %v8257_v62, %v7311_v4  ;;  %v7314_v49 = vadd.f32 %v8148_v10, %v14089_v8 }
0x137b   :  { %v7526_v2 = vadd.f32 %v7472_v18, %v15259_v37  ;;  %v7475_v30 = vadd.f32 %v8260_v58, %v7314_v49 }
0x137c   :  { %v8149_v44 = vpop.f32.mrb[52].mxu1  ;;  %v8261_v61 = vpop.f32.mrb[52].mxu0 }
0x137d   :  { %7558 = vst [vmem:[#allocation12 + $0xc0] sm:$0xff] %v7526_v2  ;;  %v7527_v42 = vadd.f32 %v7475_v30, %v15260_v33  ;;  %v8150_v28 = vpop.f32.mrb[53].mxu1  ;;  %v8262_v12 = vpop.f32.mrb[53].mxu0 }
0x137e   :  { %v8151_v7 = vadd.f32 %v8150_v28, %v8149_v44  ;;  %v8263_v52 = vadd.f32 %v8262_v12, %v8261_v61  ;;  %v8152_v45 = vpop.f32.mrb[54].mxu1  ;;  %v8264_v34 = vpop.f32.mrb[54].mxu0 }
0x137f   :  { %7559 = vst [vmem:[#allocation12 + $0xc8] sm:$0xff] %v7527_v42  ;;  %v8153_v47 = vpop.f32.mrb[55].mxu1  ;;  %v8265_v60 = vpop.f32.mrb[55].mxu0 }
0x1380   :  { %v7319_v54 = vadd.f32 %v8151_v7, %v14089_v8  ;;  %v8154_v46 = vadd.f32 %v8153_v47, %v8152_v45  ;;  %v8266_v57 = vadd.f32 %v8265_v60, %v8264_v34 }
0x1382   :  { %v7480_v9 = vadd.f32 %v8263_v52, %v7319_v54  ;;  %v7322_v24 = vadd.f32 %v8154_v46, %v14089_v8 }
0x1384   :  { %v7528_v22 = vadd.f32 %v7480_v9, %v13668_v15  ;;  %v7483_v56 = vadd.f32 %v8266_v57, %v7322_v24 }
0x1386   :  { %v8155_v39 = vpop.f32.mrb[56].mxu1  ;;  %v8267_v5 = vpop.f32.mrb[56].mxu0  ;;  %7560 = vst [vmem:[#allocation12 + $0xd0] sm:$0xff] %v7528_v22  ;;  %v7529_v20 = vadd.f32 %v7483_v56, %v13673_v3 }
0x1387   :  { %v8156_v41 = vpop.f32.mrb[57].mxu1  ;;  %v8268_v19 = vpop.f32.mrb[57].mxu0 }
0x1388   :  { %v8157_v59 = vadd.f32 %v8156_v41, %v8155_v39  ;;  %v8269_v38 = vadd.f32 %v8268_v19, %v8267_v5  ;;  %v8158_v6 = vpop.f32.mrb[58].mxu1  ;;  %v8270_v63 = vpop.f32.mrb[58].mxu0  ;;  %7561 = vst [vmem:[#allocation12 + $0xd8] sm:$0xff] %v7529_v20 }
0x1389   :  { %v8159_v29 = vpop.f32.mrb[59].mxu1  ;;  %v8271_v26 = vpop.f32.mrb[59].mxu0 }
0x138a   :  { %v7327_v32 = vadd.f32 %v8157_v59, %v14089_v8  ;;  %v8160_v51 = vadd.f32 %v8159_v29, %v8158_v6  ;;  %v8272_v0 = vadd.f32 %v8271_v26, %v8270_v63 }
0x138c   :  { %v7488_v15 = vadd.f32 %v8269_v38, %v7327_v32  ;;  %v7330_v43 = vadd.f32 %v8160_v51, %v14089_v8 }
0x138e   :  { %v7530_v50 = vadd.f32 %v7488_v15, %v13685_v40  ;;  %v7491_v25 = vadd.f32 %v8272_v0, %v7330_v43  ;;  %v8161_v3 = vpop.f32.mrb[60].mxu1  ;;  %v8273_v11 = vpop.f32.mrb[60].mxu0 }
0x138f   :  { %v8162_v13 = vpop.f32.mrb[61].mxu1  ;;  %v8274_v31 = vpop.f32.mrb[61].mxu0 }
0x1390   :  { %7562 = vst [vmem:[#allocation12 + $0xe0] sm:$0xff] %v7530_v50  ;;  %v7531_v14 = vadd.f32 %v7491_v25, %v13691_v21  ;;  %v8163_v35 = vadd.f32 %v8162_v13, %v8161_v3  ;;  %v8275_v55 = vadd.f32 %v8274_v31, %v8273_v11  ;;  %v8164_v1 = vpop.f32.mrb[62].mxu1  ;;  %v8276_v17 = vpop.f32.mrb[62].mxu0 }
0x1391   :  { %v8165_v62 = vpop.f32.mrb[63].mxu1  ;;  %v8277_v16 = vpop.f32.mrb[63].mxu0 }
0x1392   :  { %7563 = vst [vmem:[#allocation12 + $0xe8] sm:$0xff] %v7531_v14  ;;  %v7335_v36 = vadd.f32 %v8163_v35, %v14089_v8  ;;  %v8166_v23 = vadd.f32 %v8165_v62, %v8164_v1  ;;  %v8278_v27 = vadd.f32 %v8277_v16, %v8276_v17 }
0x1394   :  { %v7496_v40 = vadd.f32 %v8275_v55, %v7335_v36  ;;  %v7338_v4 = vadd.f32 %v8166_v23, %v14089_v8 }
0x1396   :  { %v7532_v10 = vadd.f32 %v7496_v40, %v13704_v53  ;;  %v7499_v58 = vadd.f32 %v8278_v27, %v7338_v4 }
0x1398   :  { %7564 = vst [vmem:[#allocation12 + $0xf0] sm:$0xff] %v7532_v10  ;;  %v7533_v21 = vadd.f32 %v7499_v58, %v13709_v48 }
0x139a   :  { %7565 = vst [vmem:[#allocation12 + $0xf8] sm:$0xff] %v7533_v21 }
0x139b   :  { %9897 = shalt.err (!%p9894_p2)
}
0x139c   :  { %s9898_s26 = scalar_lea.hbm %s14182_s12, 4096 }
0x139d   :  { %p9899_p3 = scmp.ne.s32.totalorder %s14182_s12, %s9898_s26  ;;  %p9902_p4 = scmp.lt.u32.totalorder %s9898_s26, %s14182_s12 }
0x139f   :  { %p9904_p5 = pnand %p9902_p4, %p9899_p3 }
0x13a1   :  { %9907 = shalt.err (!%p9904_p5)
}
0x13a2   :  { %7577 = dma.vmem_to_hbm [thread:$0]  %s7572_s21, 4096, %s14182_s12, [#allocation5], %s9923_s8, %s9923_s8, %s9924_s18  }
0x13a3   :  { %9914 = dma.done.wait [#allocation5], 4096  }
0x13a4   :  { %9915 = vsyncadd [#allocation5], 4294963200 }
0x13a5   :  { %7581 = vsyncpa [#allocation4], 1 }
0x13a6   :  { %7582 = vsyncpa [#allocation7], 1 }
0x13a7   :  { %7583 = vsyncpa [#allocation10], 1 }
0x13a8   :  { %7584 = vsyncpa [#allocation5], 1 }

</bundles_post_ra>
